<compile_context>
chip_gen: v7x
topology: tpu7x:2x2x1
jax: 0.10.0
libtpu: 0.0.40
codegen_flags: <defaults>
</compile_context>

<pallas_src>
import math
import numpy as np

import jax
import jax.numpy as jnp
from jax.experimental import pallas as pl
from jax.experimental.pallas import tpu as pltpu

LATENT = 40          # latent_dim
SE_IN = 9            # set encoder in_features (coords 6 + amps 3)
SE_HIDDEN = 128      # set encoder hidden_features
HYPER_HIDDEN = 128   # hypernetwork hidden_features
HYPO_IN = 6          # hypo net in_features
HYPO_IN_PAD = 8      # coords zero-padded to 8 so K is 8-aligned everywhere
HYPO_HIDDEN = 60     # hypo net hidden_features (padded to 64 lanes in the slab)
LANE = 64            # lane width of the predicted-parameter slab tiles


def _round_up(x, m):
    return (x + m - 1) // m * m


# ----------------------------- slab layout -----------------------------------

def slab_layout(out_features):
    """Row/column layout of the predicted-parameter slab (per batch element).

    Hypo weight W_l (out, in) is stored pre-transposed + zero-padded as an
    (nrows_l, LANE) tile (rows = in, lanes = out).  The 5 biases share one
    8-row block (row bias_row + l).  Row offsets are 8-aligned; flat column
    offsets are LANE-aligned, so both kernels slice with static offsets only.
    """
    assert out_features <= LANE
    assert HYPO_HIDDEN <= LANE
    dims = [HYPO_IN] + [HYPO_HIDDEN] * 4 + [out_features]
    names, layout, w_rows = [], {}, []
    row = 0
    nr0 = _round_up(HYPO_IN, 8)                  # first weight: 6 -> 8 rows
    w_rows.append((row, nr0)); row += nr0
    bias_row = row; row += 8                     # 5 bias rows (+3 spare, zeroed)
    for _ in range(1, 5):
        w_rows.append((row, LANE)); row += LANE  # hidden/out weights: 64 rows
    slab_rows = row                              # = 8 + 8 + 4*64 = 272
    for j in range(5):
        fin, fout = dims[j], dims[j + 1]
        r0, nr = w_rows[j]
        wname, bname = f"net.net.{j}.0.weight", f"net.net.{j}.0.bias"
        names += [wname, bname]
        layout[wname] = dict(kind="w", row=r0, nrows=nr, fin=fin, fout=fout,
                             col=r0 * LANE, width=nr * LANE, shape=(fout, fin))
        layout[bname] = dict(kind="b", row=bias_row + j, nrows=1, fin=1, fout=fout,
                             col=(bias_row + j) * LANE, width=LANE, shape=(fout,))
    return names, layout, slab_rows, bias_row, w_rows


# ------------------------- parameter initialization --------------------------

def _kaiming(key, fan_in, fan_out, scale=1.0):
    # kaiming_normal (relu, fan_in) for a linear stored as (in, out)
    return jax.random.normal(key, (fan_in, fan_out), jnp.float32) * (
        math.sqrt(2.0 / fan_in) * scale)


def _uniform_bias(key, fan_out, bound):
    return jax.random.uniform(key, (fan_out,), jnp.float32, -bound, bound)


def init_params(key, out_features):
    names, layout, slab_rows, bias_row, w_rows = slab_layout(out_features)
    slab_cols = slab_rows * LANE
    keys = iter(jax.random.split(key, 8 + 6 * len(names)))

    # SetEncoder: 9->128, 128->128, 128->128, 128->40, ReLU after every layer.
    se_layers = []
    for fin, fout in [(SE_IN, SE_HIDDEN), (SE_HIDDEN, SE_HIDDEN),
                      (SE_HIDDEN, SE_HIDDEN), (SE_HIDDEN, LATENT)]:
        w = _kaiming(next(keys), fin, fout)
        b = _uniform_bias(next(keys), fout, 1.0 / math.sqrt(fin))
        se_layers.append((w, b.reshape(1, fout)))

    # First SE layer split so the kernel consumes coords/amps separately
    # (no wrapper concatenate); the coords half is padded to 8 rows.
    w0, b0 = se_layers[0]
    se_w0c = jnp.zeros((HYPO_IN_PAD, SE_HIDDEN), jnp.float32).at[:HYPO_IN].set(w0[:HYPO_IN])
    se_w0a = w0[HYPO_IN:SE_IN]                               # (3, 128)

    # HyperNetwork: one FCBlock (40 -> 128 -> 128 -> prod(shape)) per hypo param.
    hw1, hb1, hw2, hb2, w3_orig, b3_orig = [], [], [], [], [], []
    for name in names:
        info = layout[name]
        size = int(np.prod(info["shape"]))
        hw1.append(_kaiming(next(keys), LATENT, HYPER_HIDDEN))
        hb1.append(_uniform_bias(next(keys), HYPER_HIDDEN, 1.0 / math.sqrt(LATENT)))
        hw2.append(_kaiming(next(keys), HYPER_HIDDEN, HYPER_HIDDEN))
        hb2.append(_uniform_bias(next(keys), HYPER_HIDDEN, 1.0 / math.sqrt(HYPER_HIDDEN)))
        # hyper_weight_init / hyper_bias_init: kaiming / 100, special bias bound.
        w3_orig.append(_kaiming(next(keys), HYPER_HIDDEN, size, scale=0.01))
        bound = (1.0 / info["shape"][-1]) if name.endswith("weight") else (1.0 / HYPER_HIDDEN)
        b3_orig.append(_uniform_bias(next(keys), size, bound))

    # Pack the 10 final hyper layers into one lane-padded slab whose columns are
    # permuted so every weight segment comes out already transposed as (in, out)
    # inside an (nrows, 64) tile (free at init); stored in bf16 (largest DMA).
    hw3 = np.zeros((HYPER_HIDDEN, slab_cols), np.float32)
    hb3 = np.zeros((slab_cols,), np.float32)
    for name, w3, b3 in zip(names, w3_orig, b3_orig):
        info = layout[name]
        w3 = np.asarray(w3); b3 = np.asarray(b3)
        col, width, fout = info["col"], info["width"], info["fout"]
        if info["kind"] == "w":
            fin, nr = info["fin"], info["nrows"]
            blk_w = np.zeros((HYPER_HIDDEN, nr, LANE), np.float32)
            blk_w[:, :fin, :fout] = w3.reshape(HYPER_HIDDEN, fout, fin).transpose(0, 2, 1)
            blk_b = np.zeros((nr, LANE), np.float32)
            blk_b[:fin, :fout] = b3.reshape(fout, fin).T
            hw3[:, col:col + width] = blk_w.reshape(HYPER_HIDDEN, width)
            hb3[col:col + width] = blk_b.reshape(width)
        else:
            hw3[:, col:col + fout] = w3
            hb3[col:col + fout] = b3

    return dict(
        se=se_layers,
        se_w0c=se_w0c, se_w0a=se_w0a, se_b0=b0,
        se_w1=se_layers[1][0], se_b1=se_layers[1][1],
        se_w2=se_layers[2][0], se_b2=se_layers[2][1],
        se_w3=se_layers[3][0], se_b3=se_layers[3][1],
        hw1=jnp.stack(hw1), hb1=jnp.stack(hb1),
        hw2=jnp.stack(hw2), hb2=jnp.stack(hb2),
        hw3=jnp.asarray(hw3, dtype=jnp.bfloat16),
        hb3=jnp.asarray(hb3, dtype=jnp.bfloat16).reshape(1, slab_cols),
        w3_orig=w3_orig, b3_orig=b3_orig,
        names=names, layout=layout, slab_rows=slab_rows,
        bias_row=bias_row, w_rows=w_rows, out_features=out_features)


# -------------------------------- kernels -------------------------------------

def make_se_hyper_kernel(bt, n, segments, spare_col, spare_width):
    """Fused SetEncoder + HyperNetwork for one batch block of `bt` elements."""
    inv_n = 1.0 / n

    def kernel(coords_ref, amps_ref,
               w0c, w0a, b0, w1, b1, w2, b2, w3, b3,
               hw1_ref, hb1_ref, hw2_ref, hb2_ref, hw3_ref, hb3_ref,
               z_ref, flat_ref):
        # --- SetEncoder: 4x (linear + ReLU); mean over the set dim as an MXU
        #     matmul with a constant (1, n) averaging row.
        avg = jnp.full((1, n), inv_n, dtype=jnp.float32)
        zs = []
        for b in range(bt):
            h = (jnp.dot(coords_ref[b], w0c[...], preferred_element_type=jnp.float32)
                 + jnp.dot(amps_ref[b], w0a[...], preferred_element_type=jnp.float32)
                 + b0[...])
            h = jnp.maximum(h, 0.0)
            h = jnp.maximum(jnp.dot(h, w1[...], preferred_element_type=jnp.float32) + b1[...], 0.0)
            h = jnp.maximum(jnp.dot(h, w2[...], preferred_element_type=jnp.float32) + b2[...], 0.0)
            h = jnp.maximum(jnp.dot(h, w3[...], preferred_element_type=jnp.float32) + b3[...], 0.0)
            zb = jnp.dot(avg, h, preferred_element_type=jnp.float32)      # (1, LATENT)
            z_ref[b] = zb
            zs.append(zb)
        z = zs[0] if bt == 1 else jnp.concatenate(zs, axis=0)              # (bt, LATENT)

        # --- HyperNetwork: 10 small MLPs; the final (bf16) layer writes straight
        #     into the pre-transposed, lane-padded parameter slab (f32 accum).
        for k, (col, width) in enumerate(segments):
            h1 = jnp.maximum(
                jnp.dot(z, hw1_ref[k], preferred_element_type=jnp.float32)
                + hb1_ref[k:k + 1, :], 0.0)
            h2 = jnp.maximum(
                jnp.dot(h1, hw2_ref[k], preferred_element_type=jnp.float32)
                + hb2_ref[k:k + 1, :], 0.0)
            pred = (jnp.dot(h2.astype(jnp.bfloat16), hw3_ref[:, col:col + width],
                            preferred_element_type=jnp.float32)
                    + hb3_ref[:, col:col + width].astype(jnp.float32))
            flat_ref[:, 0, col:col + width] = pred
        # Only the 3 spare bias rows are never predicted; zero just those
        # (instead of the whole slab) so the output stays deterministic.
        flat_ref[:, 0, spare_col:spare_col + spare_width] = jnp.zeros(
            (bt, spare_width), jnp.float32)

    return kernel


def make_hypo_kernel(bt, w_rows, bias_row):
    """SingleBVPNet MLP with per-batch predicted weights read straight off the slab."""
    def kernel(coords_ref, slab_ref, out_ref):
        for b in range(bt):
            h = coords_ref[b]                                   # (N, 8); cols 6..7 are zero
            for j in range(5):
                r0, nr = w_rows[j]
                w = slab_ref[b, r0:r0 + nr, :]                  # (nr, 64): already (in, out)
                bias = slab_ref[b, bias_row + j:bias_row + j + 1, :]   # (1, 64)
                h = jnp.dot(h, w, preferred_element_type=jnp.float32) + bias
                if j < 4:                                       # outermost_linear=True
                    h = jnp.maximum(h, 0.0)
            out_ref[b] = h                                      # (N, 64), lanes >= out are 0
    return kernel


# -------------------------------- wrapper -------------------------------------

def _const_spec(shape):
    nd = len(shape)
    return pl.BlockSpec(shape, lambda i, _nd=nd: (0,) * _nd)


def _pick_bt(batch, n, target_rows=512):
    """Largest divisor of `batch` with bt*n <= target_rows that keeps >= 2 grid
    steps (so both v7x TensorCores get work)."""
    best = 1
    for d in range(1, batch + 1):
        if batch % d == 0 and d * n <= target_rows and (batch // d >= 2 or batch == 1):
            best = d
    return best


def _padded_bytes(shape, dtype):
    """VMEM footprint of one buffer of `shape` ((8|16) sublane x 128 lane tiles)."""
    itemsize = int(jnp.dtype(dtype).itemsize)
    shape = (1,) * max(0, 2 - len(shape)) + tuple(shape)
    lead = int(np.prod(shape[:-2])) if len(shape) > 2 else 1
    sub = 32 // itemsize
    return lead * _round_up(shape[-2], sub) * _round_up(shape[-1], 128) * itemsize


def _vmem_limit(block_shapes_dtypes):
    # Every BlockSpec input/output is double-buffered by default; add headroom
    # and cap below v7x's 64 MiB physical VMEM.
    need = 2 * sum(_padded_bytes(s, d) for s, d in block_shapes_dtypes) + (8 << 20)
    return int(min(max(need, 32 << 20), 56 << 20))


def hyper_brdf_forward(params, coords, amps, return_hypo_params=True):
    B, N, _ = coords.shape
    out_features = params["out_features"]
    names, layout = params["names"], params["layout"]
    slab_rows, bias_row, w_rows = params["slab_rows"], params["bias_row"], params["w_rows"]
    slab_cols = slab_rows * LANE

    coords = coords.astype(jnp.float32)
    amps = amps.astype(jnp.float32)
    coords_p = jnp.pad(coords, ((0, 0), (0, 0), (0, HYPO_IN_PAD - HYPO_IN)))

    bt = _pick_bt(B, N)
    grid = (B // bt,)

    se_args = [params[k] for k in ("se_w0c", "se_w0a", "se_b0", "se_w1", "se_b1",
                                   "se_w2", "se_b2", "se_w3", "se_b3")]
    hyper_args = [params[k] for k in ("hw1", "hb1", "hw2", "hb2", "hw3", "hb3")]
    const_args = se_args + hyper_args
    segments = tuple((layout[nm]["col"], layout[nm]["width"]) for nm in names)
    spare_col = (bias_row + 5) * LANE
    spare_width = 3 * LANE

    # --- Kernel A: fused SetEncoder + HyperNetwork (one launch, grid over batch,
    #     hyper constants resident in VMEM across all grid steps) ----------------
    blocks_a = ([((bt, N, HYPO_IN_PAD), jnp.float32),
                 ((bt, N, SE_IN - HYPO_IN), jnp.float32)]
                + [(tuple(a.shape), a.dtype) for a in const_args]
                + [((bt, 1, LATENT), jnp.float32), ((bt, 1, slab_cols), jnp.float32)])
    z3, flat3 = pl.pallas_call(
        make_se_hyper_kernel(bt, N, segments, spare_col, spare_width),
        grid=grid,
        in_specs=[pl.BlockSpec((bt, N, HYPO_IN_PAD), lambda i: (i, 0, 0)),
                  pl.BlockSpec((bt, N, SE_IN - HYPO_IN), lambda i: (i, 0, 0))]
                 + [_const_spec(tuple(a.shape)) for a in const_args],
        out_specs=(pl.BlockSpec((bt, 1, LATENT), lambda i: (i, 0, 0)),
                   pl.BlockSpec((bt, 1, slab_cols), lambda i: (i, 0, 0))),
        out_shape=(jax.ShapeDtypeStruct((B, 1, LATENT), jnp.float32),
                   jax.ShapeDtypeStruct((B, 1, slab_cols), jnp.float32)),
        compiler_params=pltpu.CompilerParams(
            dimension_semantics=("parallel",),
            vmem_limit_bytes=_vmem_limit(blocks_a)),
    )(coords_p, amps, *const_args)

    z = z3[:, 0, :]                                    # (B, 40) latent_vec
    slab = flat3.reshape(B, slab_rows, LANE)           # contiguous (metadata) reshape

    # --- Kernel B: hypo net, 2 DMAs per grid step (coords block + slab block) ---
    blocks_b = [((bt, N, HYPO_IN_PAD), jnp.float32),
                ((bt, slab_rows, LANE), jnp.float32),
                ((bt, N, LANE), jnp.float32)]
    out_pad = pl.pallas_call(
        make_hypo_kernel(bt, w_rows, bias_row),
        grid=grid,
        in_specs=[pl.BlockSpec((bt, N, HYPO_IN_PAD), lambda i: (i, 0, 0)),
                  pl.BlockSpec((bt, slab_rows, LANE), lambda i: (i, 0, 0))],
        out_specs=pl.BlockSpec((bt, N, LANE), lambda i: (i, 0, 0)),
        out_shape=jax.ShapeDtypeStruct((B, N, LANE), jnp.float32),
        compiler_params=pltpu.CompilerParams(
            dimension_semantics=("parallel",),
            vmem_limit_bytes=_vmem_limit(blocks_b)),
    )(coords_p, slab)
    model_out = out_pad[:, :, :out_features]           # padded lanes are exactly 0

    result = {"model_in": coords, "model_out": model_out, "latent_vec": z}
    if return_hypo_params:
        # PyTorch-shaped (out, in)/(out,) views; built only on request so callers
        # that just need model_out skip these HBM transposes.
        hypo_params = {}
        for nm in names:
            info = layout[nm]
            if info["kind"] == "w":
                seg = slab[:, info["row"]:info["row"] + info["fin"], :info["fout"]]
                hypo_params[nm] = jnp.swapaxes(seg, 1, 2)            # (B, out, in)
            else:
                hypo_params[nm] = slab[:, info["row"], :info["fout"]]  # (B, out)
        result["hypo_params"] = hypo_params

    # TODO(synk): clone/detach/requires_grad bookkeeping on coords is autograd-only
    # and has no Pallas equivalent; model_in is simply the input coords.
    return result


# ---------------------------- pure-JAX reference ------------------------------

def reference_forward(params, coords, amps):
    HI = jax.lax.Precision.HIGHEST
    B = coords.shape[0]
    h = jnp.concatenate([coords, amps], axis=-1)
    for w, b in params["se"]:
        h = jnp.maximum(jnp.dot(h, w, precision=HI) + b, 0.0)
    z = h.mean(axis=-2)
    hypo = {}
    for k, name in enumerate(params["names"]):
        shape = params["layout"][name]["shape"]
        h1 = jnp.maximum(jnp.dot(z, params["hw1"][k], precision=HI) + params["hb1"][k], 0.0)
        h2 = jnp.maximum(jnp.dot(h1, params["hw2"][k], precision=HI) + params["hb2"][k], 0.0)
        p = jnp.dot(h2, params["w3_orig"][k], precision=HI) + params["b3_orig"][k]
        hypo[name] = p.reshape((B,) + shape)
    x = coords
    for i in range(5):
        w = hypo[f"net.net.{i}.0.weight"]
        b = hypo[f"net.net.{i}.0.bias"]
        x = jnp.einsum("bnd,bod->bno", x, w, precision=HI) + b[:, None, :]
        if i < 4:
            x = jnp.maximum(x, 0.0)
    return z, hypo, x


if __name__ == "__main__":
    key = jax.random.PRNGKey(0)
    kp, kc, ka = jax.random.split(key, 3)
    B, N, out_features = 2, 64, 3

    params = init_params(kp, out_features)
    coords = jax.random.normal(kc, (B, N, HYPO_IN), jnp.float32)          # model_input['coords']
    amps = jax.random.normal(ka, (B, N, SE_IN - HYPO_IN), jnp.float32)    # model_input['amps']

    out = hyper_brdf_forward(params, coords, amps)
    jax.block_until_ready(out)

    z_ref, hypo_ref, x_ref = reference_forward(params, coords, amps)
    np.testing.assert_allclose(np.asarray(out["latent_vec"]), np.asarray(z_ref),
                               rtol=5e-2, atol=5e-3)
    np.testing.assert_allclose(np.asarray(out["model_out"]), np.asarray(x_ref),
                               rtol=5e-2, atol=5e-3)
    for nm in params["names"]:
        np.testing.assert_allclose(np.asarray(out["hypo_params"][nm]),
                                   np.asarray(hypo_ref[nm]),
                                   rtol=5e-2, atol=5e-3)
    print("KERNEL_OK")
</pallas_src>

<mosaic_0001>
module attributes {stable_mosaic.version = 11 : i64} {
  func.func @kernel(%arg0: i32, %arg1: memref<1x64x8xf32, #tpu.memory_space<vmem>>, %arg2: memref<1x64x3xf32, #tpu.memory_space<vmem>>, %arg3: memref<8x128xf32, #tpu.memory_space<vmem>>, %arg4: memref<3x128xf32, #tpu.memory_space<vmem>>, %arg5: memref<1x128xf32, #tpu.memory_space<vmem>>, %arg6: memref<128x128xf32, #tpu.memory_space<vmem>>, %arg7: memref<1x128xf32, #tpu.memory_space<vmem>>, %arg8: memref<128x128xf32, #tpu.memory_space<vmem>>, %arg9: memref<1x128xf32, #tpu.memory_space<vmem>>, %arg10: memref<128x40xf32, #tpu.memory_space<vmem>>, %arg11: memref<1x40xf32, #tpu.memory_space<vmem>>, %arg12: memref<10x40x128xf32, #tpu.memory_space<vmem>>, %arg13: memref<10x128xf32, #tpu.memory_space<vmem>>, %arg14: memref<10x128x128xf32, #tpu.memory_space<vmem>>, %arg15: memref<10x128xf32, #tpu.memory_space<vmem>>, %arg16: memref<128x17408xbf16, #tpu.memory_space<vmem>>, %arg17: memref<1x17408xbf16, #tpu.memory_space<vmem>>, %arg18: memref<1x1x40xf32, #tpu.memory_space<vmem>>, %arg19: memref<1x1x17408xf32, #tpu.memory_space<vmem>>) attributes {dimension_semantics = [#tpu.dimension_semantics<parallel>], iteration_bounds = array<i64: 2>, scalar_prefetch = 0 : i64, scratch_operands = 0 : i64, tpu.core_type = #tpu.core_type<tc>, window_params = [{transform_indices = @transform_0, window_bounds = array<i64: 1, 64, 8>}, {transform_indices = @transform_1, window_bounds = array<i64: 1, 64, 3>}, {pipeline_mode = #tpu.pipeline_mode<synchronous>, transform_indices = @transform_2, window_bounds = array<i64: 8, 128>}, {pipeline_mode = #tpu.pipeline_mode<synchronous>, transform_indices = @transform_3, window_bounds = array<i64: 3, 128>}, {pipeline_mode = #tpu.pipeline_mode<synchronous>, transform_indices = @transform_4, window_bounds = array<i64: 1, 128>}, {pipeline_mode = #tpu.pipeline_mode<synchronous>, transform_indices = @transform_5, window_bounds = array<i64: 128, 128>}, {pipeline_mode = #tpu.pipeline_mode<synchronous>, transform_indices = @transform_6, window_bounds = array<i64: 1, 128>}, {pipeline_mode = #tpu.pipeline_mode<synchronous>, transform_indices = @transform_7, window_bounds = array<i64: 128, 128>}, {pipeline_mode = #tpu.pipeline_mode<synchronous>, transform_indices = @transform_8, window_bounds = array<i64: 1, 128>}, {pipeline_mode = #tpu.pipeline_mode<synchronous>, transform_indices = @transform_9, window_bounds = array<i64: 128, 40>}, {pipeline_mode = #tpu.pipeline_mode<synchronous>, transform_indices = @transform_10, window_bounds = array<i64: 1, 40>}, {pipeline_mode = #tpu.pipeline_mode<synchronous>, transform_indices = @transform_11, window_bounds = array<i64: 10, 40, 128>}, {pipeline_mode = #tpu.pipeline_mode<synchronous>, transform_indices = @transform_12, window_bounds = array<i64: 10, 128>}, {pipeline_mode = #tpu.pipeline_mode<synchronous>, transform_indices = @transform_13, window_bounds = array<i64: 10, 128, 128>}, {pipeline_mode = #tpu.pipeline_mode<synchronous>, transform_indices = @transform_14, window_bounds = array<i64: 10, 128>}, {pipeline_mode = #tpu.pipeline_mode<synchronous>, transform_indices = @transform_15, window_bounds = array<i64: 128, 17408>}, {pipeline_mode = #tpu.pipeline_mode<synchronous>, transform_indices = @transform_16, window_bounds = array<i64: 1, 17408>}, {transform_indices = @transform_17, window_bounds = array<i64: 1, 1, 40>}, {transform_indices = @transform_18, window_bounds = array<i64: 1, 1, 17408>}]} {
    %cst = arith.constant 1.562500e-02 : f32
    %0 = vector.broadcast %cst : f32 to vector<1x64xf32>
    %c0 = arith.constant 0 : index
    %c0_0 = arith.constant 0 : index
    %c0_1 = arith.constant 0 : index
    %1 = vector.load %arg1[%c0, %c0_0, %c0_1] : memref<1x64x8xf32, #tpu.memory_space<vmem>>, vector<1x64x8xf32>
    %2 = vector.shape_cast %1 : vector<1x64x8xf32> to vector<64x8xf32>
    %c0_2 = arith.constant 0 : index
    %c0_3 = arith.constant 0 : index
    %3 = vector.load %arg3[%c0_2, %c0_3] : memref<8x128xf32, #tpu.memory_space<vmem>>, vector<8x128xf32>
    %cst_4 = arith.constant dense<0.000000e+00> : vector<64x128xf32>
    %4 = tpu.matmul %2, %3, %cst_4 {dimension_numbers = #tpu.dot_dimension_numbers<[1], [0], [0], [1], [0, 0, 1, 1], [], []>} : vector<64x8xf32>, vector<8x128xf32>, vector<64x128xf32> -> vector<64x128xf32>
    %c0_5 = arith.constant 0 : index
    %c0_6 = arith.constant 0 : index
    %c0_7 = arith.constant 0 : index
    %5 = vector.load %arg2[%c0_5, %c0_6, %c0_7] : memref<1x64x3xf32, #tpu.memory_space<vmem>>, vector<1x64x3xf32>
    %6 = vector.shape_cast %5 : vector<1x64x3xf32> to vector<64x3xf32>
    %c0_8 = arith.constant 0 : index
    %c0_9 = arith.constant 0 : index
    %7 = vector.load %arg4[%c0_8, %c0_9] : memref<3x128xf32, #tpu.memory_space<vmem>>, vector<3x128xf32>
    %cst_10 = arith.constant dense<0.000000e+00> : vector<64x128xf32>
    %8 = tpu.matmul %6, %7, %cst_10 {dimension_numbers = #tpu.dot_dimension_numbers<[1], [0], [0], [1], [0, 0, 1, 1], [], []>} : vector<64x3xf32>, vector<3x128xf32>, vector<64x128xf32> -> vector<64x128xf32>
    %9 = arith.addf %4, %8 : vector<64x128xf32>
    %c0_11 = arith.constant 0 : index
    %c0_12 = arith.constant 0 : index
    %10 = vector.load %arg5[%c0_11, %c0_12] : memref<1x128xf32, #tpu.memory_space<vmem>>, vector<1x128xf32>
    %11 = vector.broadcast %10 : vector<1x128xf32> to vector<64x128xf32>
    %12 = arith.addf %9, %11 : vector<64x128xf32>
    %cst_13 = arith.constant 0.000000e+00 : f32
    %13 = vector.broadcast %cst_13 : f32 to vector<64x128xf32>
    %14 = arith.maximumf %12, %13 : vector<64x128xf32>
    %c0_14 = arith.constant 0 : index
    %c0_15 = arith.constant 0 : index
    %15 = vector.load %arg6[%c0_14, %c0_15] : memref<128x128xf32, #tpu.memory_space<vmem>>, vector<128x128xf32>
    %cst_16 = arith.constant dense<0.000000e+00> : vector<64x128xf32>
    %16 = tpu.matmul %14, %15, %cst_16 {dimension_numbers = #tpu.dot_dimension_numbers<[1], [0], [0], [1], [0, 0, 1, 1], [], []>} : vector<64x128xf32>, vector<128x128xf32>, vector<64x128xf32> -> vector<64x128xf32>
    %c0_17 = arith.constant 0 : index
    %c0_18 = arith.constant 0 : index
    %17 = vector.load %arg7[%c0_17, %c0_18] : memref<1x128xf32, #tpu.memory_space<vmem>>, vector<1x128xf32>
    %18 = vector.broadcast %17 : vector<1x128xf32> to vector<64x128xf32>
    %19 = arith.addf %16, %18 : vector<64x128xf32>
    %cst_19 = arith.constant 0.000000e+00 : f32
    %20 = vector.broadcast %cst_19 : f32 to vector<64x128xf32>
    %21 = arith.maximumf %19, %20 : vector<64x128xf32>
    %c0_20 = arith.constant 0 : index
    %c0_21 = arith.constant 0 : index
    %22 = vector.load %arg8[%c0_20, %c0_21] : memref<128x128xf32, #tpu.memory_space<vmem>>, vector<128x128xf32>
    %cst_22 = arith.constant dense<0.000000e+00> : vector<64x128xf32>
    %23 = tpu.matmul %21, %22, %cst_22 {dimension_numbers = #tpu.dot_dimension_numbers<[1], [0], [0], [1], [0, 0, 1, 1], [], []>} : vector<64x128xf32>, vector<128x128xf32>, vector<64x128xf32> -> vector<64x128xf32>
    %c0_23 = arith.constant 0 : index
    %c0_24 = arith.constant 0 : index
    %24 = vector.load %arg9[%c0_23, %c0_24] : memref<1x128xf32, #tpu.memory_space<vmem>>, vector<1x128xf32>
    %25 = vector.broadcast %24 : vector<1x128xf32> to vector<64x128xf32>
    %26 = arith.addf %23, %25 : vector<64x128xf32>
    %cst_25 = arith.constant 0.000000e+00 : f32
    %27 = vector.broadcast %cst_25 : f32 to vector<64x128xf32>
    %28 = arith.maximumf %26, %27 : vector<64x128xf32>
    %c0_26 = arith.constant 0 : index
    %c0_27 = arith.constant 0 : index
    %29 = vector.load %arg10[%c0_26, %c0_27] : memref<128x40xf32, #tpu.memory_space<vmem>>, vector<128x40xf32>
    %cst_28 = arith.constant dense<0.000000e+00> : vector<64x40xf32>
    %30 = tpu.matmul %28, %29, %cst_28 {dimension_numbers = #tpu.dot_dimension_numbers<[1], [0], [0], [1], [0, 0, 1, 1], [], []>} : vector<64x128xf32>, vector<128x40xf32>, vector<64x40xf32> -> vector<64x40xf32>
    %c0_29 = arith.constant 0 : index
    %c0_30 = arith.constant 0 : index
    %31 = vector.load %arg11[%c0_29, %c0_30] : memref<1x40xf32, #tpu.memory_space<vmem>>, vector<1x40xf32>
    %32 = vector.broadcast %31 : vector<1x40xf32> to vector<64x40xf32>
    %33 = arith.addf %30, %32 : vector<64x40xf32>
    %cst_31 = arith.constant 0.000000e+00 : f32
    %34 = vector.broadcast %cst_31 : f32 to vector<64x40xf32>
    %35 = arith.maximumf %33, %34 : vector<64x40xf32>
    %cst_32 = arith.constant dense<0.000000e+00> : vector<1x40xf32>
    %36 = tpu.matmul %0, %35, %cst_32 {dimension_numbers = #tpu.dot_dimension_numbers<[1], [0], [0], [1], [0, 0, 1, 1], [], []>} : vector<1x64xf32>, vector<64x40xf32>, vector<1x40xf32> -> vector<1x40xf32>
    %c0_33 = arith.constant 0 : index
    %c0_34 = arith.constant 0 : index
    %c0_35 = arith.constant 0 : index
    %37 = vector.load %arg18[%c0_33, %c0_34, %c0_35] : memref<1x1x40xf32, #tpu.memory_space<vmem>>, vector<1x1x40xf32>
    %38 = vector.shape_cast %37 : vector<1x1x40xf32> to vector<1x40xf32>
    %39 = vector.shape_cast %36 : vector<1x40xf32> to vector<1x1x40xf32>
    tpu.vector_store %arg18[%c0_33, %c0_34, %c0_35], %39 {strides = array<i32>} : memref<1x1x40xf32, #tpu.memory_space<vmem>>, vector<1x1x40xf32>,
    %c0_36 = arith.constant 0 : index
    %c0_37 = arith.constant 0 : index
    %c0_38 = arith.constant 0 : index
    %40 = vector.load %arg12[%c0_36, %c0_37, %c0_38] : memref<10x40x128xf32, #tpu.memory_space<vmem>>, vector<1x40x128xf32>
    %41 = vector.shape_cast %40 : vector<1x40x128xf32> to vector<40x128xf32>
    %cst_39 = arith.constant dense<0.000000e+00> : vector<1x128xf32>
    %42 = tpu.matmul %36, %41, %cst_39 {dimension_numbers = #tpu.dot_dimension_numbers<[1], [0], [0], [1], [0, 0, 1, 1], [], []>} : vector<1x40xf32>, vector<40x128xf32>, vector<1x128xf32> -> vector<1x128xf32>
    %c0_40 = arith.constant 0 : index
    %c0_41 = arith.constant 0 : index
    %43 = vector.load %arg13[%c0_40, %c0_41] : memref<10x128xf32, #tpu.memory_space<vmem>>, vector<1x128xf32>
    %44 = arith.addf %42, %43 : vector<1x128xf32>
    %cst_42 = arith.constant 0.000000e+00 : f32
    %45 = vector.broadcast %cst_42 : f32 to vector<1x128xf32>
    %46 = arith.maximumf %44, %45 : vector<1x128xf32>
    %c0_43 = arith.constant 0 : index
    %c0_44 = arith.constant 0 : index
    %c0_45 = arith.constant 0 : index
    %47 = vector.load %arg14[%c0_43, %c0_44, %c0_45] : memref<10x128x128xf32, #tpu.memory_space<vmem>>, vector<1x128x128xf32>
    %48 = vector.shape_cast %47 : vector<1x128x128xf32> to vector<128x128xf32>
    %cst_46 = arith.constant dense<0.000000e+00> : vector<1x128xf32>
    %49 = tpu.matmul %46, %48, %cst_46 {dimension_numbers = #tpu.dot_dimension_numbers<[1], [0], [0], [1], [0, 0, 1, 1], [], []>} : vector<1x128xf32>, vector<128x128xf32>, vector<1x128xf32> -> vector<1x128xf32>
    %c0_47 = arith.constant 0 : index
    %c0_48 = arith.constant 0 : index
    %50 = vector.load %arg15[%c0_47, %c0_48] : memref<10x128xf32, #tpu.memory_space<vmem>>, vector<1x128xf32>
    %51 = arith.addf %49, %50 : vector<1x128xf32>
    %cst_49 = arith.constant 0.000000e+00 : f32
    %52 = vector.broadcast %cst_49 : f32 to vector<1x128xf32>
    %53 = arith.maximumf %51, %52 : vector<1x128xf32>
    %54 = arith.truncf %53 : vector<1x128xf32> to vector<1x128xbf16>
    %c0_50 = arith.constant 0 : index
    %c0_51 = arith.constant 0 : index
    %55 = vector.load %arg16[%c0_50, %c0_51] : memref<128x17408xbf16, #tpu.memory_space<vmem>>, vector<128x512xbf16>
    %cst_52 = arith.constant dense<0.000000e+00> : vector<1x512xf32>
    %56 = tpu.matmul %54, %55, %cst_52 {dimension_numbers = #tpu.dot_dimension_numbers<[1], [0], [0], [1], [0, 0, 1, 1], [], []>} : vector<1x128xbf16>, vector<128x512xbf16>, vector<1x512xf32> -> vector<1x512xf32>
    %c0_53 = arith.constant 0 : index
    %c0_54 = arith.constant 0 : index
    %57 = vector.load %arg17[%c0_53, %c0_54] : memref<1x17408xbf16, #tpu.memory_space<vmem>>, vector<1x512xbf16>
    %58 = arith.extf %57 : vector<1x512xbf16> to vector<1x512xf32>
    %59 = arith.addf %56, %58 : vector<1x512xf32>
    %c0_55 = arith.constant 0 : index
    %c0_56 = arith.constant 0 : index
    %c0_57 = arith.constant 0 : index
    %60 = vector.load %arg19[%c0_55, %c0_56, %c0_57] : memref<1x1x17408xf32, #tpu.memory_space<vmem>>, vector<1x1x512xf32>
    %61 = vector.shape_cast %60 : vector<1x1x512xf32> to vector<1x512xf32>
    %62 = vector.shape_cast %59 : vector<1x512xf32> to vector<1x1x512xf32>
    tpu.vector_store %arg19[%c0_55, %c0_56, %c0_57], %62 {strides = array<i32>} : memref<1x1x17408xf32, #tpu.memory_space<vmem>>, vector<1x1x512xf32>,
    %c1 = arith.constant 1 : index
    %c0_58 = arith.constant 0 : index
    %c0_59 = arith.constant 0 : index
    %63 = vector.load %arg12[%c1, %c0_58, %c0_59] : memref<10x40x128xf32, #tpu.memory_space<vmem>>, vector<1x40x128xf32>
    %64 = vector.shape_cast %63 : vector<1x40x128xf32> to vector<40x128xf32>
    %cst_60 = arith.constant dense<0.000000e+00> : vector<1x128xf32>
    %65 = tpu.matmul %36, %64, %cst_60 {dimension_numbers = #tpu.dot_dimension_numbers<[1], [0], [0], [1], [0, 0, 1, 1], [], []>} : vector<1x40xf32>, vector<40x128xf32>, vector<1x128xf32> -> vector<1x128xf32>
    %c1_61 = arith.constant 1 : index
    %c0_62 = arith.constant 0 : index
    %66 = vector.load %arg13[%c1_61, %c0_62] : memref<10x128xf32, #tpu.memory_space<vmem>>, vector<1x128xf32>
    %67 = arith.addf %65, %66 : vector<1x128xf32>
    %cst_63 = arith.constant 0.000000e+00 : f32
    %68 = vector.broadcast %cst_63 : f32 to vector<1x128xf32>
    %69 = arith.maximumf %67, %68 : vector<1x128xf32>
    %c1_64 = arith.constant 1 : index
    %c0_65 = arith.constant 0 : index
    %c0_66 = arith.constant 0 : index
    %70 = vector.load %arg14[%c1_64, %c0_65, %c0_66] : memref<10x128x128xf32, #tpu.memory_space<vmem>>, vector<1x128x128xf32>
    %71 = vector.shape_cast %70 : vector<1x128x128xf32> to vector<128x128xf32>
    %cst_67 = arith.constant dense<0.000000e+00> : vector<1x128xf32>
    %72 = tpu.matmul %69, %71, %cst_67 {dimension_numbers = #tpu.dot_dimension_numbers<[1], [0], [0], [1], [0, 0, 1, 1], [], []>} : vector<1x128xf32>, vector<128x128xf32>, vector<1x128xf32> -> vector<1x128xf32>
    %c1_68 = arith.constant 1 : index
    %c0_69 = arith.constant 0 : index
    %73 = vector.load %arg15[%c1_68, %c0_69] : memref<10x128xf32, #tpu.memory_space<vmem>>, vector<1x128xf32>
    %74 = arith.addf %72, %73 : vector<1x128xf32>
    %cst_70 = arith.constant 0.000000e+00 : f32
    %75 = vector.broadcast %cst_70 : f32 to vector<1x128xf32>
    %76 = arith.maximumf %74, %75 : vector<1x128xf32>
    %77 = arith.truncf %76 : vector<1x128xf32> to vector<1x128xbf16>
    %c0_71 = arith.constant 0 : index
    %c512 = arith.constant 512 : index
    %78 = vector.load %arg16[%c0_71, %c512] : memref<128x17408xbf16, #tpu.memory_space<vmem>>, vector<128x64xbf16>
    %cst_72 = arith.constant dense<0.000000e+00> : vector<1x64xf32>
    %79 = tpu.matmul %77, %78, %cst_72 {dimension_numbers = #tpu.dot_dimension_numbers<[1], [0], [0], [1], [0, 0, 1, 1], [], []>} : vector<1x128xbf16>, vector<128x64xbf16>, vector<1x64xf32> -> vector<1x64xf32>
    %c0_73 = arith.constant 0 : index
    %c512_74 = arith.constant 512 : index
    %80 = vector.load %arg17[%c0_73, %c512_74] : memref<1x17408xbf16, #tpu.memory_space<vmem>>, vector<1x64xbf16>
    %81 = arith.extf %80 : vector<1x64xbf16> to vector<1x64xf32>
    %82 = arith.addf %79, %81 : vector<1x64xf32>
    %c0_75 = arith.constant 0 : index
    %c0_76 = arith.constant 0 : index
    %c512_77 = arith.constant 512 : index
    %83 = vector.load %arg19[%c0_75, %c0_76, %c512_77] : memref<1x1x17408xf32, #tpu.memory_space<vmem>>, vector<1x1x64xf32>
    %84 = vector.shape_cast %83 : vector<1x1x64xf32> to vector<1x64xf32>
    %85 = vector.shape_cast %82 : vector<1x64xf32> to vector<1x1x64xf32>
    tpu.vector_store %arg19[%c0_75, %c0_76, %c512_77], %85 {strides = array<i32>} : memref<1x1x17408xf32, #tpu.memory_space<vmem>>, vector<1x1x64xf32>,
    %c2 = arith.constant 2 : index
    %c0_78 = arith.constant 0 : index
    %c0_79 = arith.constant 0 : index
    %86 = vector.load %arg12[%c2, %c0_78, %c0_79] : memref<10x40x128xf32, #tpu.memory_space<vmem>>, vector<1x40x128xf32>
    %87 = vector.shape_cast %86 : vector<1x40x128xf32> to vector<40x128xf32>
    %cst_80 = arith.constant dense<0.000000e+00> : vector<1x128xf32>
    %88 = tpu.matmul %36, %87, %cst_80 {dimension_numbers = #tpu.dot_dimension_numbers<[1], [0], [0], [1], [0, 0, 1, 1], [], []>} : vector<1x40xf32>, vector<40x128xf32>, vector<1x128xf32> -> vector<1x128xf32>
    %c2_81 = arith.constant 2 : index
    %c0_82 = arith.constant 0 : index
    %89 = vector.load %arg13[%c2_81, %c0_82] : memref<10x128xf32, #tpu.memory_space<vmem>>, vector<1x128xf32>
    %90 = arith.addf %88, %89 : vector<1x128xf32>
    %cst_83 = arith.constant 0.000000e+00 : f32
    %91 = vector.broadcast %cst_83 : f32 to vector<1x128xf32>
    %92 = arith.maximumf %90, %91 : vector<1x128xf32>
    %c2_84 = arith.constant 2 : index
    %c0_85 = arith.constant 0 : index
    %c0_86 = arith.constant 0 : index
    %93 = vector.load %arg14[%c2_84, %c0_85, %c0_86] : memref<10x128x128xf32, #tpu.memory_space<vmem>>, vector<1x128x128xf32>
    %94 = vector.shape_cast %93 : vector<1x128x128xf32> to vector<128x128xf32>
    %cst_87 = arith.constant dense<0.000000e+00> : vector<1x128xf32>
    %95 = tpu.matmul %92, %94, %cst_87 {dimension_numbers = #tpu.dot_dimension_numbers<[1], [0], [0], [1], [0, 0, 1, 1], [], []>} : vector<1x128xf32>, vector<128x128xf32>, vector<1x128xf32> -> vector<1x128xf32>
    %c2_88 = arith.constant 2 : index
    %c0_89 = arith.constant 0 : index
    %96 = vector.load %arg15[%c2_88, %c0_89] : memref<10x128xf32, #tpu.memory_space<vmem>>, vector<1x128xf32>
    %97 = arith.addf %95, %96 : vector<1x128xf32>
    %cst_90 = arith.constant 0.000000e+00 : f32
    %98 = vector.broadcast %cst_90 : f32 to vector<1x128xf32>
    %99 = arith.maximumf %97, %98 : vector<1x128xf32>
    %100 = arith.truncf %99 : vector<1x128xf32> to vector<1x128xbf16>
    %c0_91 = arith.constant 0 : index
    %c1024 = arith.constant 1024 : index
    %101 = vector.load %arg16[%c0_91, %c1024] : memref<128x17408xbf16, #tpu.memory_space<vmem>>, vector<128x4096xbf16>
    %cst_92 = arith.constant dense<0.000000e+00> : vector<1x4096xf32>
    %102 = tpu.matmul %100, %101, %cst_92 {dimension_numbers = #tpu.dot_dimension_numbers<[1], [0], [0], [1], [0, 0, 1, 1], [], []>} : vector<1x128xbf16>, vector<128x4096xbf16>, vector<1x4096xf32> -> vector<1x4096xf32>
    %c0_93 = arith.constant 0 : index
    %c1024_94 = arith.constant 1024 : index
    %103 = vector.load %arg17[%c0_93, %c1024_94] : memref<1x17408xbf16, #tpu.memory_space<vmem>>, vector<1x4096xbf16>
    %104 = arith.extf %103 : vector<1x4096xbf16> to vector<1x4096xf32>
    %105 = arith.addf %102, %104 : vector<1x4096xf32>
    %c0_95 = arith.constant 0 : index
    %c0_96 = arith.constant 0 : index
    %c1024_97 = arith.constant 1024 : index
    %106 = vector.load %arg19[%c0_95, %c0_96, %c1024_97] : memref<1x1x17408xf32, #tpu.memory_space<vmem>>, vector<1x1x4096xf32>
    %107 = vector.shape_cast %106 : vector<1x1x4096xf32> to vector<1x4096xf32>
    %108 = vector.shape_cast %105 : vector<1x4096xf32> to vector<1x1x4096xf32>
    tpu.vector_store %arg19[%c0_95, %c0_96, %c1024_97], %108 {strides = array<i32>} : memref<1x1x17408xf32, #tpu.memory_space<vmem>>, vector<1x1x4096xf32>,
    %c3 = arith.constant 3 : index
    %c0_98 = arith.constant 0 : index
    %c0_99 = arith.constant 0 : index
    %109 = vector.load %arg12[%c3, %c0_98, %c0_99] : memref<10x40x128xf32, #tpu.memory_space<vmem>>, vector<1x40x128xf32>
    %110 = vector.shape_cast %109 : vector<1x40x128xf32> to vector<40x128xf32>
    %cst_100 = arith.constant dense<0.000000e+00> : vector<1x128xf32>
    %111 = tpu.matmul %36, %110, %cst_100 {dimension_numbers = #tpu.dot_dimension_numbers<[1], [0], [0], [1], [0, 0, 1, 1], [], []>} : vector<1x40xf32>, vector<40x128xf32>, vector<1x128xf32> -> vector<1x128xf32>
    %c3_101 = arith.constant 3 : index
    %c0_102 = arith.constant 0 : index
    %112 = vector.load %arg13[%c3_101, %c0_102] : memref<10x128xf32, #tpu.memory_space<vmem>>, vector<1x128xf32>
    %113 = arith.addf %111, %112 : vector<1x128xf32>
    %cst_103 = arith.constant 0.000000e+00 : f32
    %114 = vector.broadcast %cst_103 : f32 to vector<1x128xf32>
    %115 = arith.maximumf %113, %114 : vector<1x128xf32>
    %c3_104 = arith.constant 3 : index
    %c0_105 = arith.constant 0 : index
    %c0_106 = arith.constant 0 : index
    %116 = vector.load %arg14[%c3_104, %c0_105, %c0_106] : memref<10x128x128xf32, #tpu.memory_space<vmem>>, vector<1x128x128xf32>
    %117 = vector.shape_cast %116 : vector<1x128x128xf32> to vector<128x128xf32>
    %cst_107 = arith.constant dense<0.000000e+00> : vector<1x128xf32>
    %118 = tpu.matmul %115, %117, %cst_107 {dimension_numbers = #tpu.dot_dimension_numbers<[1], [0], [0], [1], [0, 0, 1, 1], [], []>} : vector<1x128xf32>, vector<128x128xf32>, vector<1x128xf32> -> vector<1x128xf32>
    %c3_108 = arith.constant 3 : index
    %c0_109 = arith.constant 0 : index
    %119 = vector.load %arg15[%c3_108, %c0_109] : memref<10x128xf32, #tpu.memory_space<vmem>>, vector<1x128xf32>
    %120 = arith.addf %118, %119 : vector<1x128xf32>
    %cst_110 = arith.constant 0.000000e+00 : f32
    %121 = vector.broadcast %cst_110 : f32 to vector<1x128xf32>
    %122 = arith.maximumf %120, %121 : vector<1x128xf32>
    %123 = arith.truncf %122 : vector<1x128xf32> to vector<1x128xbf16>
    %c0_111 = arith.constant 0 : index
    %c576 = arith.constant 576 : index
    %124 = vector.load %arg16[%c0_111, %c576] : memref<128x17408xbf16, #tpu.memory_space<vmem>>, vector<128x64xbf16>
    %cst_112 = arith.constant dense<0.000000e+00> : vector<1x64xf32>
    %125 = tpu.matmul %123, %124, %cst_112 {dimension_numbers = #tpu.dot_dimension_numbers<[1], [0], [0], [1], [0, 0, 1, 1], [], []>} : vector<1x128xbf16>, vector<128x64xbf16>, vector<1x64xf32> -> vector<1x64xf32>
    %c0_113 = arith.constant 0 : index
    %c576_114 = arith.constant 576 : index
    %126 = vector.load %arg17[%c0_113, %c576_114] : memref<1x17408xbf16, #tpu.memory_space<vmem>>, vector<1x64xbf16>
    %127 = arith.extf %126 : vector<1x64xbf16> to vector<1x64xf32>
    %128 = arith.addf %125, %127 : vector<1x64xf32>
    %c0_115 = arith.constant 0 : index
    %c0_116 = arith.constant 0 : index
    %c576_117 = arith.constant 576 : index
    %129 = vector.load %arg19[%c0_115, %c0_116, %c576_117] : memref<1x1x17408xf32, #tpu.memory_space<vmem>>, vector<1x1x64xf32>
    %130 = vector.shape_cast %129 : vector<1x1x64xf32> to vector<1x64xf32>
    %131 = vector.shape_cast %128 : vector<1x64xf32> to vector<1x1x64xf32>
    tpu.vector_store %arg19[%c0_115, %c0_116, %c576_117], %131 {strides = array<i32>} : memref<1x1x17408xf32, #tpu.memory_space<vmem>>, vector<1x1x64xf32>,
    %c4 = arith.constant 4 : index
    %c0_118 = arith.constant 0 : index
    %c0_119 = arith.constant 0 : index
    %132 = vector.load %arg12[%c4, %c0_118, %c0_119] : memref<10x40x128xf32, #tpu.memory_space<vmem>>, vector<1x40x128xf32>
    %133 = vector.shape_cast %132 : vector<1x40x128xf32> to vector<40x128xf32>
    %cst_120 = arith.constant dense<0.000000e+00> : vector<1x128xf32>
    %134 = tpu.matmul %36, %133, %cst_120 {dimension_numbers = #tpu.dot_dimension_numbers<[1], [0], [0], [1], [0, 0, 1, 1], [], []>} : vector<1x40xf32>, vector<40x128xf32>, vector<1x128xf32> -> vector<1x128xf32>
    %c4_121 = arith.constant 4 : index
    %c0_122 = arith.constant 0 : index
    %135 = vector.load %arg13[%c4_121, %c0_122] : memref<10x128xf32, #tpu.memory_space<vmem>>, vector<1x128xf32>
    %136 = arith.addf %134, %135 : vector<1x128xf32>
    %cst_123 = arith.constant 0.000000e+00 : f32
    %137 = vector.broadcast %cst_123 : f32 to vector<1x128xf32>
    %138 = arith.maximumf %136, %137 : vector<1x128xf32>
    %c4_124 = arith.constant 4 : index
    %c0_125 = arith.constant 0 : index
    %c0_126 = arith.constant 0 : index
    %139 = vector.load %arg14[%c4_124, %c0_125, %c0_126] : memref<10x128x128xf32, #tpu.memory_space<vmem>>, vector<1x128x128xf32>
    %140 = vector.shape_cast %139 : vector<1x128x128xf32> to vector<128x128xf32>
    %cst_127 = arith.constant dense<0.000000e+00> : vector<1x128xf32>
    %141 = tpu.matmul %138, %140, %cst_127 {dimension_numbers = #tpu.dot_dimension_numbers<[1], [0], [0], [1], [0, 0, 1, 1], [], []>} : vector<1x128xf32>, vector<128x128xf32>, vector<1x128xf32> -> vector<1x128xf32>
    %c4_128 = arith.constant 4 : index
    %c0_129 = arith.constant 0 : index
    %142 = vector.load %arg15[%c4_128, %c0_129] : memref<10x128xf32, #tpu.memory_space<vmem>>, vector<1x128xf32>
    %143 = arith.addf %141, %142 : vector<1x128xf32>
    %cst_130 = arith.constant 0.000000e+00 : f32
    %144 = vector.broadcast %cst_130 : f32 to vector<1x128xf32>
    %145 = arith.maximumf %143, %144 : vector<1x128xf32>
    %146 = arith.truncf %145 : vector<1x128xf32> to vector<1x128xbf16>
    %c0_131 = arith.constant 0 : index
    %c5120 = arith.constant 5120 : index
    %147 = vector.load %arg16[%c0_131, %c5120] : memref<128x17408xbf16, #tpu.memory_space<vmem>>, vector<128x4096xbf16>
    %cst_132 = arith.constant dense<0.000000e+00> : vector<1x4096xf32>
    %148 = tpu.matmul %146, %147, %cst_132 {dimension_numbers = #tpu.dot_dimension_numbers<[1], [0], [0], [1], [0, 0, 1, 1], [], []>} : vector<1x128xbf16>, vector<128x4096xbf16>, vector<1x4096xf32> -> vector<1x4096xf32>
    %c0_133 = arith.constant 0 : index
    %c5120_134 = arith.constant 5120 : index
    %149 = vector.load %arg17[%c0_133, %c5120_134] : memref<1x17408xbf16, #tpu.memory_space<vmem>>, vector<1x4096xbf16>
    %150 = arith.extf %149 : vector<1x4096xbf16> to vector<1x4096xf32>
    %151 = arith.addf %148, %150 : vector<1x4096xf32>
    %c0_135 = arith.constant 0 : index
    %c0_136 = arith.constant 0 : index
    %c5120_137 = arith.constant 5120 : index
    %152 = vector.load %arg19[%c0_135, %c0_136, %c5120_137] : memref<1x1x17408xf32, #tpu.memory_space<vmem>>, vector<1x1x4096xf32>
    %153 = vector.shape_cast %152 : vector<1x1x4096xf32> to vector<1x4096xf32>
    %154 = vector.shape_cast %151 : vector<1x4096xf32> to vector<1x1x4096xf32>
    tpu.vector_store %arg19[%c0_135, %c0_136, %c5120_137], %154 {strides = array<i32>} : memref<1x1x17408xf32, #tpu.memory_space<vmem>>, vector<1x1x4096xf32>,
    %c5 = arith.constant 5 : index
    %c0_138 = arith.constant 0 : index
    %c0_139 = arith.constant 0 : index
    %155 = vector.load %arg12[%c5, %c0_138, %c0_139] : memref<10x40x128xf32, #tpu.memory_space<vmem>>, vector<1x40x128xf32>
    %156 = vector.shape_cast %155 : vector<1x40x128xf32> to vector<40x128xf32>
    %cst_140 = arith.constant dense<0.000000e+00> : vector<1x128xf32>
    %157 = tpu.matmul %36, %156, %cst_140 {dimension_numbers = #tpu.dot_dimension_numbers<[1], [0], [0], [1], [0, 0, 1, 1], [], []>} : vector<1x40xf32>, vector<40x128xf32>, vector<1x128xf32> -> vector<1x128xf32>
    %c5_141 = arith.constant 5 : index
    %c0_142 = arith.constant 0 : index
    %158 = vector.load %arg13[%c5_141, %c0_142] : memref<10x128xf32, #tpu.memory_space<vmem>>, vector<1x128xf32>
    %159 = arith.addf %157, %158 : vector<1x128xf32>
    %cst_143 = arith.constant 0.000000e+00 : f32
    %160 = vector.broadcast %cst_143 : f32 to vector<1x128xf32>
    %161 = arith.maximumf %159, %160 : vector<1x128xf32>
    %c5_144 = arith.constant 5 : index
    %c0_145 = arith.constant 0 : index
    %c0_146 = arith.constant 0 : index
    %162 = vector.load %arg14[%c5_144, %c0_145, %c0_146] : memref<10x128x128xf32, #tpu.memory_space<vmem>>, vector<1x128x128xf32>
    %163 = vector.shape_cast %162 : vector<1x128x128xf32> to vector<128x128xf32>
    %cst_147 = arith.constant dense<0.000000e+00> : vector<1x128xf32>
    %164 = tpu.matmul %161, %163, %cst_147 {dimension_numbers = #tpu.dot_dimension_numbers<[1], [0], [0], [1], [0, 0, 1, 1], [], []>} : vector<1x128xf32>, vector<128x128xf32>, vector<1x128xf32> -> vector<1x128xf32>
    %c5_148 = arith.constant 5 : index
    %c0_149 = arith.constant 0 : index
    %165 = vector.load %arg15[%c5_148, %c0_149] : memref<10x128xf32, #tpu.memory_space<vmem>>, vector<1x128xf32>
    %166 = arith.addf %164, %165 : vector<1x128xf32>
    %cst_150 = arith.constant 0.000000e+00 : f32
    %167 = vector.broadcast %cst_150 : f32 to vector<1x128xf32>
    %168 = arith.maximumf %166, %167 : vector<1x128xf32>
    %169 = arith.truncf %168 : vector<1x128xf32> to vector<1x128xbf16>
    %c0_151 = arith.constant 0 : index
    %c640 = arith.constant 640 : index
    %170 = vector.load %arg16[%c0_151, %c640] : memref<128x17408xbf16, #tpu.memory_space<vmem>>, vector<128x64xbf16>
    %cst_152 = arith.constant dense<0.000000e+00> : vector<1x64xf32>
    %171 = tpu.matmul %169, %170, %cst_152 {dimension_numbers = #tpu.dot_dimension_numbers<[1], [0], [0], [1], [0, 0, 1, 1], [], []>} : vector<1x128xbf16>, vector<128x64xbf16>, vector<1x64xf32> -> vector<1x64xf32>
    %c0_153 = arith.constant 0 : index
    %c640_154 = arith.constant 640 : index
    %172 = vector.load %arg17[%c0_153, %c640_154] : memref<1x17408xbf16, #tpu.memory_space<vmem>>, vector<1x64xbf16>
    %173 = arith.extf %172 : vector<1x64xbf16> to vector<1x64xf32>
    %174 = arith.addf %171, %173 : vector<1x64xf32>
    %c0_155 = arith.constant 0 : index
    %c0_156 = arith.constant 0 : index
    %c640_157 = arith.constant 640 : index
    %175 = vector.load %arg19[%c0_155, %c0_156, %c640_157] : memref<1x1x17408xf32, #tpu.memory_space<vmem>>, vector<1x1x64xf32>
    %176 = vector.shape_cast %175 : vector<1x1x64xf32> to vector<1x64xf32>
    %177 = vector.shape_cast %174 : vector<1x64xf32> to vector<1x1x64xf32>
    tpu.vector_store %arg19[%c0_155, %c0_156, %c640_157], %177 {strides = array<i32>} : memref<1x1x17408xf32, #tpu.memory_space<vmem>>, vector<1x1x64xf32>,
    %c6 = arith.constant 6 : index
    %c0_158 = arith.constant 0 : index
    %c0_159 = arith.constant 0 : index
    %178 = vector.load %arg12[%c6, %c0_158, %c0_159] : memref<10x40x128xf32, #tpu.memory_space<vmem>>, vector<1x40x128xf32>
    %179 = vector.shape_cast %178 : vector<1x40x128xf32> to vector<40x128xf32>
    %cst_160 = arith.constant dense<0.000000e+00> : vector<1x128xf32>
    %180 = tpu.matmul %36, %179, %cst_160 {dimension_numbers = #tpu.dot_dimension_numbers<[1], [0], [0], [1], [0, 0, 1, 1], [], []>} : vector<1x40xf32>, vector<40x128xf32>, vector<1x128xf32> -> vector<1x128xf32>
    %c6_161 = arith.constant 6 : index
    %c0_162 = arith.constant 0 : index
    %181 = vector.load %arg13[%c6_161, %c0_162] : memref<10x128xf32, #tpu.memory_space<vmem>>, vector<1x128xf32>
    %182 = arith.addf %180, %181 : vector<1x128xf32>
    %cst_163 = arith.constant 0.000000e+00 : f32
    %183 = vector.broadcast %cst_163 : f32 to vector<1x128xf32>
    %184 = arith.maximumf %182, %183 : vector<1x128xf32>
    %c6_164 = arith.constant 6 : index
    %c0_165 = arith.constant 0 : index
    %c0_166 = arith.constant 0 : index
    %185 = vector.load %arg14[%c6_164, %c0_165, %c0_166] : memref<10x128x128xf32, #tpu.memory_space<vmem>>, vector<1x128x128xf32>
    %186 = vector.shape_cast %185 : vector<1x128x128xf32> to vector<128x128xf32>
    %cst_167 = arith.constant dense<0.000000e+00> : vector<1x128xf32>
    %187 = tpu.matmul %184, %186, %cst_167 {dimension_numbers = #tpu.dot_dimension_numbers<[1], [0], [0], [1], [0, 0, 1, 1], [], []>} : vector<1x128xf32>, vector<128x128xf32>, vector<1x128xf32> -> vector<1x128xf32>
    %c6_168 = arith.constant 6 : index
    %c0_169 = arith.constant 0 : index
    %188 = vector.load %arg15[%c6_168, %c0_169] : memref<10x128xf32, #tpu.memory_space<vmem>>, vector<1x128xf32>
    %189 = arith.addf %187, %188 : vector<1x128xf32>
    %cst_170 = arith.constant 0.000000e+00 : f32
    %190 = vector.broadcast %cst_170 : f32 to vector<1x128xf32>
    %191 = arith.maximumf %189, %190 : vector<1x128xf32>
    %192 = arith.truncf %191 : vector<1x128xf32> to vector<1x128xbf16>
    %c0_171 = arith.constant 0 : index
    %c9216 = arith.constant 9216 : index
    %193 = vector.load %arg16[%c0_171, %c9216] : memref<128x17408xbf16, #tpu.memory_space<vmem>>, vector<128x4096xbf16>
    %cst_172 = arith.constant dense<0.000000e+00> : vector<1x4096xf32>
    %194 = tpu.matmul %192, %193, %cst_172 {dimension_numbers = #tpu.dot_dimension_numbers<[1], [0], [0], [1], [0, 0, 1, 1], [], []>} : vector<1x128xbf16>, vector<128x4096xbf16>, vector<1x4096xf32> -> vector<1x4096xf32>
    %c0_173 = arith.constant 0 : index
    %c9216_174 = arith.constant 9216 : index
    %195 = vector.load %arg17[%c0_173, %c9216_174] : memref<1x17408xbf16, #tpu.memory_space<vmem>>, vector<1x4096xbf16>
    %196 = arith.extf %195 : vector<1x4096xbf16> to vector<1x4096xf32>
    %197 = arith.addf %194, %196 : vector<1x4096xf32>
    %c0_175 = arith.constant 0 : index
    %c0_176 = arith.constant 0 : index
    %c9216_177 = arith.constant 9216 : index
    %198 = vector.load %arg19[%c0_175, %c0_176, %c9216_177] : memref<1x1x17408xf32, #tpu.memory_space<vmem>>, vector<1x1x4096xf32>
    %199 = vector.shape_cast %198 : vector<1x1x4096xf32> to vector<1x4096xf32>
    %200 = vector.shape_cast %197 : vector<1x4096xf32> to vector<1x1x4096xf32>
    tpu.vector_store %arg19[%c0_175, %c0_176, %c9216_177], %200 {strides = array<i32>} : memref<1x1x17408xf32, #tpu.memory_space<vmem>>, vector<1x1x4096xf32>,
    %c7 = arith.constant 7 : index
    %c0_178 = arith.constant 0 : index
    %c0_179 = arith.constant 0 : index
    %201 = vector.load %arg12[%c7, %c0_178, %c0_179] : memref<10x40x128xf32, #tpu.memory_space<vmem>>, vector<1x40x128xf32>
    %202 = vector.shape_cast %201 : vector<1x40x128xf32> to vector<40x128xf32>
    %cst_180 = arith.constant dense<0.000000e+00> : vector<1x128xf32>
    %203 = tpu.matmul %36, %202, %cst_180 {dimension_numbers = #tpu.dot_dimension_numbers<[1], [0], [0], [1], [0, 0, 1, 1], [], []>} : vector<1x40xf32>, vector<40x128xf32>, vector<1x128xf32> -> vector<1x128xf32>
    %c7_181 = arith.constant 7 : index
    %c0_182 = arith.constant 0 : index
    %204 = vector.load %arg13[%c7_181, %c0_182] : memref<10x128xf32, #tpu.memory_space<vmem>>, vector<1x128xf32>
    %205 = arith.addf %203, %204 : vector<1x128xf32>
    %cst_183 = arith.constant 0.000000e+00 : f32
    %206 = vector.broadcast %cst_183 : f32 to vector<1x128xf32>
    %207 = arith.maximumf %205, %206 : vector<1x128xf32>
    %c7_184 = arith.constant 7 : index
    %c0_185 = arith.constant 0 : index
    %c0_186 = arith.constant 0 : index
    %208 = vector.load %arg14[%c7_184, %c0_185, %c0_186] : memref<10x128x128xf32, #tpu.memory_space<vmem>>, vector<1x128x128xf32>
    %209 = vector.shape_cast %208 : vector<1x128x128xf32> to vector<128x128xf32>
    %cst_187 = arith.constant dense<0.000000e+00> : vector<1x128xf32>
    %210 = tpu.matmul %207, %209, %cst_187 {dimension_numbers = #tpu.dot_dimension_numbers<[1], [0], [0], [1], [0, 0, 1, 1], [], []>} : vector<1x128xf32>, vector<128x128xf32>, vector<1x128xf32> -> vector<1x128xf32>
    %c7_188 = arith.constant 7 : index
    %c0_189 = arith.constant 0 : index
    %211 = vector.load %arg15[%c7_188, %c0_189] : memref<10x128xf32, #tpu.memory_space<vmem>>, vector<1x128xf32>
    %212 = arith.addf %210, %211 : vector<1x128xf32>
    %cst_190 = arith.constant 0.000000e+00 : f32
    %213 = vector.broadcast %cst_190 : f32 to vector<1x128xf32>
    %214 = arith.maximumf %212, %213 : vector<1x128xf32>
    %215 = arith.truncf %214 : vector<1x128xf32> to vector<1x128xbf16>
    %c0_191 = arith.constant 0 : index
    %c704 = arith.constant 704 : index
    %216 = vector.load %arg16[%c0_191, %c704] : memref<128x17408xbf16, #tpu.memory_space<vmem>>, vector<128x64xbf16>
    %cst_192 = arith.constant dense<0.000000e+00> : vector<1x64xf32>
    %217 = tpu.matmul %215, %216, %cst_192 {dimension_numbers = #tpu.dot_dimension_numbers<[1], [0], [0], [1], [0, 0, 1, 1], [], []>} : vector<1x128xbf16>, vector<128x64xbf16>, vector<1x64xf32> -> vector<1x64xf32>
    %c0_193 = arith.constant 0 : index
    %c704_194 = arith.constant 704 : index
    %218 = vector.load %arg17[%c0_193, %c704_194] : memref<1x17408xbf16, #tpu.memory_space<vmem>>, vector<1x64xbf16>
    %219 = arith.extf %218 : vector<1x64xbf16> to vector<1x64xf32>
    %220 = arith.addf %217, %219 : vector<1x64xf32>
    %c0_195 = arith.constant 0 : index
    %c0_196 = arith.constant 0 : index
    %c704_197 = arith.constant 704 : index
    %221 = vector.load %arg19[%c0_195, %c0_196, %c704_197] : memref<1x1x17408xf32, #tpu.memory_space<vmem>>, vector<1x1x64xf32>
    %222 = vector.shape_cast %221 : vector<1x1x64xf32> to vector<1x64xf32>
    %223 = vector.shape_cast %220 : vector<1x64xf32> to vector<1x1x64xf32>
    tpu.vector_store %arg19[%c0_195, %c0_196, %c704_197], %223 {strides = array<i32>} : memref<1x1x17408xf32, #tpu.memory_space<vmem>>, vector<1x1x64xf32>,
    %c8 = arith.constant 8 : index
    %c0_198 = arith.constant 0 : index
    %c0_199 = arith.constant 0 : index
    %224 = vector.load %arg12[%c8, %c0_198, %c0_199] : memref<10x40x128xf32, #tpu.memory_space<vmem>>, vector<1x40x128xf32>
    %225 = vector.shape_cast %224 : vector<1x40x128xf32> to vector<40x128xf32>
    %cst_200 = arith.constant dense<0.000000e+00> : vector<1x128xf32>
    %226 = tpu.matmul %36, %225, %cst_200 {dimension_numbers = #tpu.dot_dimension_numbers<[1], [0], [0], [1], [0, 0, 1, 1], [], []>} : vector<1x40xf32>, vector<40x128xf32>, vector<1x128xf32> -> vector<1x128xf32>
    %c8_201 = arith.constant 8 : index
    %c0_202 = arith.constant 0 : index
    %227 = vector.load %arg13[%c8_201, %c0_202] : memref<10x128xf32, #tpu.memory_space<vmem>>, vector<1x128xf32>
    %228 = arith.addf %226, %227 : vector<1x128xf32>
    %cst_203 = arith.constant 0.000000e+00 : f32
    %229 = vector.broadcast %cst_203 : f32 to vector<1x128xf32>
    %230 = arith.maximumf %228, %229 : vector<1x128xf32>
    %c8_204 = arith.constant 8 : index
    %c0_205 = arith.constant 0 : index
    %c0_206 = arith.constant 0 : index
    %231 = vector.load %arg14[%c8_204, %c0_205, %c0_206] : memref<10x128x128xf32, #tpu.memory_space<vmem>>, vector<1x128x128xf32>
    %232 = vector.shape_cast %231 : vector<1x128x128xf32> to vector<128x128xf32>
    %cst_207 = arith.constant dense<0.000000e+00> : vector<1x128xf32>
    %233 = tpu.matmul %230, %232, %cst_207 {dimension_numbers = #tpu.dot_dimension_numbers<[1], [0], [0], [1], [0, 0, 1, 1], [], []>} : vector<1x128xf32>, vector<128x128xf32>, vector<1x128xf32> -> vector<1x128xf32>
    %c8_208 = arith.constant 8 : index
    %c0_209 = arith.constant 0 : index
    %234 = vector.load %arg15[%c8_208, %c0_209] : memref<10x128xf32, #tpu.memory_space<vmem>>, vector<1x128xf32>
    %235 = arith.addf %233, %234 : vector<1x128xf32>
    %cst_210 = arith.constant 0.000000e+00 : f32
    %236 = vector.broadcast %cst_210 : f32 to vector<1x128xf32>
    %237 = arith.maximumf %235, %236 : vector<1x128xf32>
    %238 = arith.truncf %237 : vector<1x128xf32> to vector<1x128xbf16>
    %c0_211 = arith.constant 0 : index
    %c13312 = arith.constant 13312 : index
    %239 = vector.load %arg16[%c0_211, %c13312] : memref<128x17408xbf16, #tpu.memory_space<vmem>>, vector<128x4096xbf16>
    %cst_212 = arith.constant dense<0.000000e+00> : vector<1x4096xf32>
    %240 = tpu.matmul %238, %239, %cst_212 {dimension_numbers = #tpu.dot_dimension_numbers<[1], [0], [0], [1], [0, 0, 1, 1], [], []>} : vector<1x128xbf16>, vector<128x4096xbf16>, vector<1x4096xf32> -> vector<1x4096xf32>
    %c0_213 = arith.constant 0 : index
    %c13312_214 = arith.constant 13312 : index
    %241 = vector.load %arg17[%c0_213, %c13312_214] : memref<1x17408xbf16, #tpu.memory_space<vmem>>, vector<1x4096xbf16>
    %242 = arith.extf %241 : vector<1x4096xbf16> to vector<1x4096xf32>
    %243 = arith.addf %240, %242 : vector<1x4096xf32>
    %c0_215 = arith.constant 0 : index
    %c0_216 = arith.constant 0 : index
    %c13312_217 = arith.constant 13312 : index
    %244 = vector.load %arg19[%c0_215, %c0_216, %c13312_217] : memref<1x1x17408xf32, #tpu.memory_space<vmem>>, vector<1x1x4096xf32>
    %245 = vector.shape_cast %244 : vector<1x1x4096xf32> to vector<1x4096xf32>
    %246 = vector.shape_cast %243 : vector<1x4096xf32> to vector<1x1x4096xf32>
    tpu.vector_store %arg19[%c0_215, %c0_216, %c13312_217], %246 {strides = array<i32>} : memref<1x1x17408xf32, #tpu.memory_space<vmem>>, vector<1x1x4096xf32>,
    %c9 = arith.constant 9 : index
    %c0_218 = arith.constant 0 : index
    %c0_219 = arith.constant 0 : index
    %247 = vector.load %arg12[%c9, %c0_218, %c0_219] : memref<10x40x128xf32, #tpu.memory_space<vmem>>, vector<1x40x128xf32>
    %248 = vector.shape_cast %247 : vector<1x40x128xf32> to vector<40x128xf32>
    %cst_220 = arith.constant dense<0.000000e+00> : vector<1x128xf32>
    %249 = tpu.matmul %36, %248, %cst_220 {dimension_numbers = #tpu.dot_dimension_numbers<[1], [0], [0], [1], [0, 0, 1, 1], [], []>} : vector<1x40xf32>, vector<40x128xf32>, vector<1x128xf32> -> vector<1x128xf32>
    %c9_221 = arith.constant 9 : index
    %c0_222 = arith.constant 0 : index
    %250 = vector.load %arg13[%c9_221, %c0_222] : memref<10x128xf32, #tpu.memory_space<vmem>>, vector<1x128xf32>
    %251 = arith.addf %249, %250 : vector<1x128xf32>
    %cst_223 = arith.constant 0.000000e+00 : f32
    %252 = vector.broadcast %cst_223 : f32 to vector<1x128xf32>
    %253 = arith.maximumf %251, %252 : vector<1x128xf32>
    %c9_224 = arith.constant 9 : index
    %c0_225 = arith.constant 0 : index
    %c0_226 = arith.constant 0 : index
    %254 = vector.load %arg14[%c9_224, %c0_225, %c0_226] : memref<10x128x128xf32, #tpu.memory_space<vmem>>, vector<1x128x128xf32>
    %255 = vector.shape_cast %254 : vector<1x128x128xf32> to vector<128x128xf32>
    %cst_227 = arith.constant dense<0.000000e+00> : vector<1x128xf32>
    %256 = tpu.matmul %253, %255, %cst_227 {dimension_numbers = #tpu.dot_dimension_numbers<[1], [0], [0], [1], [0, 0, 1, 1], [], []>} : vector<1x128xf32>, vector<128x128xf32>, vector<1x128xf32> -> vector<1x128xf32>
    %c9_228 = arith.constant 9 : index
    %c0_229 = arith.constant 0 : index
    %257 = vector.load %arg15[%c9_228, %c0_229] : memref<10x128xf32, #tpu.memory_space<vmem>>, vector<1x128xf32>
    %258 = arith.addf %256, %257 : vector<1x128xf32>
    %cst_230 = arith.constant 0.000000e+00 : f32
    %259 = vector.broadcast %cst_230 : f32 to vector<1x128xf32>
    %260 = arith.maximumf %258, %259 : vector<1x128xf32>
    %261 = arith.truncf %260 : vector<1x128xf32> to vector<1x128xbf16>
    %c0_231 = arith.constant 0 : index
    %c768 = arith.constant 768 : index
    %262 = vector.load %arg16[%c0_231, %c768] : memref<128x17408xbf16, #tpu.memory_space<vmem>>, vector<128x64xbf16>
    %cst_232 = arith.constant dense<0.000000e+00> : vector<1x64xf32>
    %263 = tpu.matmul %261, %262, %cst_232 {dimension_numbers = #tpu.dot_dimension_numbers<[1], [0], [0], [1], [0, 0, 1, 1], [], []>} : vector<1x128xbf16>, vector<128x64xbf16>, vector<1x64xf32> -> vector<1x64xf32>
    %c0_233 = arith.constant 0 : index
    %c768_234 = arith.constant 768 : index
    %264 = vector.load %arg17[%c0_233, %c768_234] : memref<1x17408xbf16, #tpu.memory_space<vmem>>, vector<1x64xbf16>
    %265 = arith.extf %264 : vector<1x64xbf16> to vector<1x64xf32>
    %266 = arith.addf %263, %265 : vector<1x64xf32>
    %c0_235 = arith.constant 0 : index
    %c0_236 = arith.constant 0 : index
    %c768_237 = arith.constant 768 : index
    %267 = vector.load %arg19[%c0_235, %c0_236, %c768_237] : memref<1x1x17408xf32, #tpu.memory_space<vmem>>, vector<1x1x64xf32>
    %268 = vector.shape_cast %267 : vector<1x1x64xf32> to vector<1x64xf32>
    %269 = vector.shape_cast %266 : vector<1x64xf32> to vector<1x1x64xf32>
    tpu.vector_store %arg19[%c0_235, %c0_236, %c768_237], %269 {strides = array<i32>} : memref<1x1x17408xf32, #tpu.memory_space<vmem>>, vector<1x1x64xf32>,
    %cst_238 = arith.constant 0.000000e+00 : f32
    %270 = vector.broadcast %cst_238 : f32 to vector<1x192xf32>
    %c0_239 = arith.constant 0 : index
    %c0_240 = arith.constant 0 : index
    %c832 = arith.constant 832 : index
    %271 = vector.load %arg19[%c0_239, %c0_240, %c832] : memref<1x1x17408xf32, #tpu.memory_space<vmem>>, vector<1x1x192xf32>
    %272 = vector.shape_cast %271 : vector<1x1x192xf32> to vector<1x192xf32>
    %273 = vector.shape_cast %270 : vector<1x192xf32> to vector<1x1x192xf32>
    tpu.vector_store %arg19[%c0_239, %c0_240, %c832], %273 {strides = array<i32>} : memref<1x1x17408xf32, #tpu.memory_space<vmem>>, vector<1x1x192xf32>,
    return
  }
  func.func @transform_0(%arg0: i32) -> (i32, i32, i32) {
    %c0_i32 = arith.constant 0 : i32
    %c0_i32_0 = arith.constant 0 : i32
    %c0_i32_1 = arith.constant 0 : i32
    return %arg0, %c0_i32, %c0_i32_0 : i32, i32, i32
  }
  func.func @transform_1(%arg0: i32) -> (i32, i32, i32) {
    %c0_i32 = arith.constant 0 : i32
    %c0_i32_0 = arith.constant 0 : i32
    %c0_i32_1 = arith.constant 0 : i32
    return %arg0, %c0_i32, %c0_i32_0 : i32, i32, i32
  }
  func.func @transform_2(%arg0: i32) -> (i32, i32) {
    %c0_i32 = arith.constant 0 : i32
    %c0_i32_0 = arith.constant 0 : i32
    %c0_i32_1 = arith.constant 0 : i32
    return %c0_i32, %c0_i32_0 : i32, i32
  }
  func.func @transform_3(%arg0: i32) -> (i32, i32) {
    %c0_i32 = arith.constant 0 : i32
    %c0_i32_0 = arith.constant 0 : i32
    %c0_i32_1 = arith.constant 0 : i32
    return %c0_i32, %c0_i32_0 : i32, i32
  }
  func.func @transform_4(%arg0: i32) -> (i32, i32) {
    %c0_i32 = arith.constant 0 : i32
    %c0_i32_0 = arith.constant 0 : i32
    %c0_i32_1 = arith.constant 0 : i32
    return %c0_i32, %c0_i32_0 : i32, i32
  }
  func.func @transform_5(%arg0: i32) -> (i32, i32) {
    %c0_i32 = arith.constant 0 : i32
    %c0_i32_0 = arith.constant 0 : i32
    %c0_i32_1 = arith.constant 0 : i32
    return %c0_i32, %c0_i32_0 : i32, i32
  }
  func.func @transform_6(%arg0: i32) -> (i32, i32) {
    %c0_i32 = arith.constant 0 : i32
    %c0_i32_0 = arith.constant 0 : i32
    %c0_i32_1 = arith.constant 0 : i32
    return %c0_i32, %c0_i32_0 : i32, i32
  }
  func.func @transform_7(%arg0: i32) -> (i32, i32) {
    %c0_i32 = arith.constant 0 : i32
    %c0_i32_0 = arith.constant 0 : i32
    %c0_i32_1 = arith.constant 0 : i32
    return %c0_i32, %c0_i32_0 : i32, i32
  }
  func.func @transform_8(%arg0: i32) -> (i32, i32) {
    %c0_i32 = arith.constant 0 : i32
    %c0_i32_0 = arith.constant 0 : i32
    %c0_i32_1 = arith.constant 0 : i32
    return %c0_i32, %c0_i32_0 : i32, i32
  }
  func.func @transform_9(%arg0: i32) -> (i32, i32) {
    %c0_i32 = arith.constant 0 : i32
    %c0_i32_0 = arith.constant 0 : i32
    %c0_i32_1 = arith.constant 0 : i32
    return %c0_i32, %c0_i32_0 : i32, i32
  }
  func.func @transform_10(%arg0: i32) -> (i32, i32) {
    %c0_i32 = arith.constant 0 : i32
    %c0_i32_0 = arith.constant 0 : i32
    %c0_i32_1 = arith.constant 0 : i32
    return %c0_i32, %c0_i32_0 : i32, i32
  }
  func.func @transform_11(%arg0: i32) -> (i32, i32, i32) {
    %c0_i32 = arith.constant 0 : i32
    %c0_i32_0 = arith.constant 0 : i32
    %c0_i32_1 = arith.constant 0 : i32
    %c0_i32_2 = arith.constant 0 : i32
    return %c0_i32, %c0_i32_0, %c0_i32_1 : i32, i32, i32
  }
  func.func @transform_12(%arg0: i32) -> (i32, i32) {
    %c0_i32 = arith.constant 0 : i32
    %c0_i32_0 = arith.constant 0 : i32
    %c0_i32_1 = arith.constant 0 : i32
    return %c0_i32, %c0_i32_0 : i32, i32
  }
  func.func @transform_13(%arg0: i32) -> (i32, i32, i32) {
    %c0_i32 = arith.constant 0 : i32
    %c0_i32_0 = arith.constant 0 : i32
    %c0_i32_1 = arith.constant 0 : i32
    %c0_i32_2 = arith.constant 0 : i32
    return %c0_i32, %c0_i32_0, %c0_i32_1 : i32, i32, i32
  }
  func.func @transform_14(%arg0: i32) -> (i32, i32) {
    %c0_i32 = arith.constant 0 : i32
    %c0_i32_0 = arith.constant 0 : i32
    %c0_i32_1 = arith.constant 0 : i32
    return %c0_i32, %c0_i32_0 : i32, i32
  }
  func.func @transform_15(%arg0: i32) -> (i32, i32) {
    %c0_i32 = arith.constant 0 : i32
    %c0_i32_0 = arith.constant 0 : i32
    %c0_i32_1 = arith.constant 0 : i32
    return %c0_i32, %c0_i32_0 : i32, i32
  }
  func.func @transform_16(%arg0: i32) -> (i32, i32) {
    %c0_i32 = arith.constant 0 : i32
    %c0_i32_0 = arith.constant 0 : i32
    %c0_i32_1 = arith.constant 0 : i32
    return %c0_i32, %c0_i32_0 : i32, i32
  }
  func.func @transform_17(%arg0: i32) -> (i32, i32, i32) {
    %c0_i32 = arith.constant 0 : i32
    %c0_i32_0 = arith.constant 0 : i32
    %c0_i32_1 = arith.constant 0 : i32
    return %arg0, %c0_i32, %c0_i32_0 : i32, i32, i32
  }
  func.func @transform_18(%arg0: i32) -> (i32, i32, i32) {
    %c0_i32 = arith.constant 0 : i32
    %c0_i32_0 = arith.constant 0 : i32
    %c0_i32_1 = arith.constant 0 : i32
    return %arg0, %c0_i32, %c0_i32_0 : i32, i32, i32
  }
}

</mosaic_0001>

<bundles_post_ra>
// kernel: tpu_custom_call.1
= control target key start
LH: loop header
LB: loop body
LE: loop exit
PB: predicated region body
PF: predicated region fallthrough
CT: control target
= control target key end

     0   :  { %s19810_s0 = inlined_call_operand.vmem [shape: f32[2,64,8], index: 0, kind: input, shape index: {}]   ;;  %s19811_s1 = inlined_call_operand.vmem [shape: f32[2,64,3], index: 1, kind: input, shape index: {}]   ;;  %s19812_s2 = inlined_call_operand.hbm [shape: f32[8,128], index: 2, kind: input, shape index: {}]   ;;  %s19813_s3 = inlined_call_operand.hbm [shape: f32[3,128], index: 3, kind: input, shape index: {}]   ;;  %s19814_s4 = inlined_call_operand.hbm [shape: f32[1,128], index: 4, kind: input, shape index: {}]   ;;  %s19815_s5 = inlined_call_operand.hbm [shape: f32[128,128], index: 5, kind: input, shape index: {}]   ;;  %s19816_s6 = inlined_call_operand.hbm [shape: f32[1,128], index: 6, kind: input, shape index: {}]   ;;  %s19817_s7 = inlined_call_operand.hbm [shape: f32[128,128], index: 7, kind: input, shape index: {}]   ;;  %s19818_s8 = inlined_call_operand.hbm [shape: f32[1,128], index: 8, kind: input, shape index: {}]   ;;  %s19819_s9 = inlined_call_operand.vmem [shape: f32[128,40], index: 9, kind: input, shape index: {}]   ;;  %s19820_s10 = inlined_call_operand.hbm [shape: f32[1,40], index: 10, kind: input, shape index: {}]   ;;  %s19821_s11 = inlined_call_operand.hbm [shape: f32[10,40,128], index: 11, kind: input, shape index: {}]   ;;  %s19822_s12 = inlined_call_operand.hbm [shape: f32[10,128], index: 12, kind: input, shape index: {}]   ;;  %s19823_s13 = inlined_call_operand.hbm [shape: f32[10,128,128], index: 13, kind: input, shape index: {}]   ;;  %s19824_s14 = inlined_call_operand.hbm [shape: f32[10,128], index: 14, kind: input, shape index: {}]   ;;  %s19825_s15 = inlined_call_operand.hbm [shape: bf16[128,17408], index: 15, kind: input, shape index: {}]   ;;  %s19826_s16 = inlined_call_operand.hbm [shape: bf16[1,17408], index: 16, kind: input, shape index: {}]   ;;  %s19827_s17 = inlined_call_operand.hbm [shape: f32[2,1,40], index: 17, kind: output, shape index: {0}]   ;;  %s19828_s18 = inlined_call_operand.hbm [shape: f32[2,1,17408], index: 18, kind: output, shape index: {1}]  }
   0x1   :  { %19847 = sst [smem:[#allocation46_spill]] %s19810_s0 }
   0x2   :  { %19848 = sst [smem:[#allocation47_spill]] %s19811_s1 }
   0x3   :  { %19849 = sst [smem:[#allocation48_spill]] %s19812_s2 }
   0x4   :  { %19850 = sst [smem:[#allocation49_spill]] %s19813_s3 }
   0x5   :  { %19851 = sst [smem:[#allocation50_spill]] %s19815_s5 }
   0x6   :  { %19852 = sst [smem:[#allocation51_spill]] %s19827_s17 }
   0x7   :  { %19853 = sst [smem:[#allocation52_spill]] %s19828_s18 }
   0x8   :  { %24 = vsyncpa [#allocation3], 0 }
   0x9   :  { %25 = vsyncpa [#allocation6], 0 }
   0xa   :  { %26 = vsyncpa [#allocation9], 0 }
   0xb   :  { %27 = vsyncpa [#allocation12], 0 }
   0xc   :  { %28 = vsyncpa [#allocation15], 0 }
   0xd   :  { %29 = vsyncpa [#allocation18], 0 }
   0xe   :  { %30 = vsyncpa [#allocation21], 0 }
   0xf   :  { %31 = vsyncpa [#allocation24], 0 }
  0x10   :  { %32 = vsyncpa [#allocation4], 0 }
  0x11   :  { %34 = vsyncpa [#allocation4 + $0x1], 0 }
  0x12   :  { %35 = vsyncpa [#allocation27], 0 }
  0x13   :  { %37 = vsyncpa [#allocation27 + $0x1], 0  ;;  %s18489_s27 = smov 0   ;;  %s18491_s28 = smov 0  }
  0x14   :  { %s18493_s29 = smov 0   ;;  %s18495_s30 = smov 0  }
  0x15 LB: > { %19854 = sst [smem:[#allocation38_spill]] %s18353_s27  ;;  %s18510_s0 = sadd.s32 4294967295, %s18365_s30   ;;  %s18365_s30 = sphi %s18495_s30, %s19904_s30   ;;  %s18361_s29 = sphi %s18493_s29, %s19907_s29   ;;  %s18357_s28 = sphi %s18491_s28, %s19906_s28   ;;  %s18353_s27 = sphi %s18489_s27, %s19905_s27  }
  0x16   : > { %19855 = sst [smem:[#allocation39_spill]] %s18357_s28  ;;  %s14923_s19 = sadd.s32 4294967294, %s18365_s30  }
  0x17   : > { %19856 = sst [smem:[#allocation40_spill]] %s18361_s29  ;;  %s18514_s1 = sadd.s32 1, %s18365_s30  }
  0x18   : > { %19857 = sst [smem:[#allocation41_spill]] %s18365_s30  ;;  %s417_s20 = sadd.s32 1, %s18361_s29 }
  0x19   : > { %19858 = sst [smem:[#allocation42_spill]] %s18514_s1  ;;  %s414_s21 = ssub.s32 %s18365_s30, %s18514_s1 }
  0x1a   : > { %p427_p0 = scmp.ne.s32.totalorder %s18361_s29, %s18357_s28  ;;  %p415_p1 = scmp.eq.s32.totalorder %s414_s21, 0 }
  0x1b   : > { %p428_p2 = scmp.eq.s32.totalorder %s18510_s0, 1  ;;  %p433_p3 = scmp.ne.s32.totalorder %s18357_s28, %s18353_s27 }
  0x1c   : > { %p434_p4 = scmp.eq.s32.totalorder %s14923_s19, 1  ;;  %p14924_p7 = scmp.ge.s32.totalorder %s18365_s30, 1 }
  0x1d   : > { %s18525_s22 = scalar_select %p415_p1, %s18361_s29, %s417_s20  }
  0x1e   : > { %p18527_p5 = por %p428_p2, %p427_p0  ;;  %p18531_p6 = por %p434_p4, %p433_p3 }
  0x1f   : > { %19859 = sst [smem:[#allocation43_spill]] %s18525_s22  ;;  %p467_p8 = scmp.lt.s32.totalorder %s18365_s30, 3 }
  0x20   : > { %s19860_s2 = scalar_select %p18527_p5, 1, 0 }
  0x21   : > { %s19862_s23 = scalar_select %p18531_p6, 1, 0 }
  0x22   : > { %19861 = sst [smem:[#allocation44_spill]] %s19860_s2  ;;  %p19837_p9 = scmp.eq.s32.totalorder %s18510_s0, 0 }
  0x23   : > { %19863 = sst [smem:[#allocation45_spill]] %s19862_s23  ;;  %p18538_p10 = pnand %p14924_p7, %p467_p8 }
  0x24   : > { %s18367_s25 = smov [#allocation5]   ;;  %s18368_s19 = smov [#allocation8]  }
  0x25   : > { %s19864_s24 = scalar_select %p18538_p10, 1, 0 }
  0x26   : > { %s491_s26 = sshll.u32 %s18367_s25, 4  ;;  %p17704_p11 = pneg %p18538_p10  ;;  %s492_s26 = int_to_ptr.vmem [resolvable:$true] %s491_s26 }
  0x27   : > { %s512_s20 = sshll.u32 %s18368_s19, 4  ;;  %s18369_s22 = smov [#allocation11]   ;;  %s18550_s20 = int_to_ptr.vmem [resolvable:$true] %s512_s20 }
  0x28   : > { %p18546_p12 = pnand %p19837_p9, %p17704_p11  ;;  %s18552_s29 = sshll.u32 %s18369_s22, 4  ;;  %s537_s29 = int_to_ptr.vmem [resolvable:$true] %s18552_s29 }
  0x29   : > { %s19866_s3 = sld [smem:[#allocation49_spill]] }
  0x2a   : > { %p18562_p0 = pneg %p18546_p12 }
  0x2f   : > { %s17847_s25 = scalar_lea.hbm %s19866_s3, 64 }
  0x30   : > { %p17848_p13 = scmp.ne.s32.totalorder %s19866_s3, %s17847_s25  ;;  %p17854_p3 = scmp.lt.u32.totalorder %s17847_s25, %s19866_s3 }
  0x32   : > { %p17850_p1 = pnand %p18562_p0, %p17848_p13 }
  0x34   : > { %p17851_p2 = pneg %p17850_p1 }
  0x36   : > { %p17856_p4 = pnand %p17854_p3, %p17851_p2 }
  0x38   : > { %17859 = shalt.err (!%p17856_p4)
}
  0x39   : > { %s17860_s1 = scalar_lea.vmem %s492_s26, 64  ;;  %p17868_p9 = scmp.lt.s32.totalorder %s492_s26, %s492_s26 }
  0x3a   : > { %p17861_p7 = scmp.ne.s32.totalorder %s492_s26, %s17860_s1  ;;  %p17869_p6 = scmp.lt.s32.totalorder %s17860_s1, %s17860_s1 }
  0x3c   : > { %p17863_p8 = pnand %p17861_p7, %p18562_p0  ;;  %p17870_p5 = por %p17869_p6, %p17868_p9 }
  0x3e   : > { %p17864_p11 = pneg %p17863_p8 }
  0x40   : > { %p17871_p10 = pnand %p17870_p5, %p17864_p11 }
  0x42   : > { %17874 = shalt.err (!%p17871_p10)
}
  0x43   : > { %17710 = dma.hbm_to_vmem [thread:$0]  (!%p18546_p12), %s19866_s3, 64, %s492_s26, [#allocation6]  }
  0x44   : > { %s19868_s5 = sld [smem:[#allocation50_spill]] }
  0x4a   : > { %s17875_s25 = scalar_lea.hbm %s19868_s5, 2048 }
  0x4b   : > { %p17876_p13 = scmp.ne.s32.totalorder %s19868_s5, %s17875_s25  ;;  %p17882_p5 = scmp.lt.u32.totalorder %s17875_s25, %s19868_s5 }
  0x4d   : > { %p17878_p1 = pnand %p17876_p13, %p18562_p0 }
  0x4f   : > { %p17879_p6 = pneg %p17878_p1 }
  0x51   : > { %p17884_p9 = pnand %p17882_p5, %p17879_p6 }
  0x53   : > { %17887 = shalt.err (!%p17884_p9)
}
  0x54   : > { %s17888_s26 = scalar_lea.vmem %s18550_s20, 2048  ;;  %p17896_p4 = scmp.lt.s32.totalorder %s18550_s20, %s18550_s20 }
  0x55   : > { %p17889_p10 = scmp.ne.s32.totalorder %s18550_s20, %s17888_s26  ;;  %p17897_p7 = scmp.lt.s32.totalorder %s17888_s26, %s17888_s26 }
  0x57   : > { %p17891_p2 = pnand %p17889_p10, %p18562_p0  ;;  %p17898_p8 = por %p17897_p7, %p17896_p4 }
  0x59   : > { %p17892_p3 = pneg %p17891_p2 }
  0x5b   : > { %p17899_p11 = pnand %p17898_p8, %p17892_p3 }
  0x5d   : > { %17902 = shalt.err (!%p17899_p11)
}
  0x5e   : > { %s19844_s17 = smov 128   ;;  %s18371_s2 = smov 8  }
  0x5f   : > { %17716 = dma.hbm_to_vmem [thread:$0]  (!%p18546_p12), %s19868_s5, 2048, %s18550_s20, [#allocation9], %s19844_s17, %s19844_s17, %s18371_s2  }
  0x60   : > { %s17903_s25 = scalar_lea.hbm %s19817_s7, 2048 }
  0x61   : > { %p17904_p13 = scmp.ne.s32.totalorder %s19817_s7, %s17903_s25  ;;  %p17910_p5 = scmp.lt.u32.totalorder %s17903_s25, %s19817_s7 }
  0x63   : > { %p17906_p1 = pnand %p17904_p13, %p18562_p0 }
  0x65   : > { %p17907_p6 = pneg %p17906_p1 }
  0x67   : > { %p17912_p9 = pnand %p17910_p5, %p17907_p6 }
  0x69   : > { %17915 = shalt.err (!%p17912_p9)
}
  0x6a   : > { %s17916_s27 = scalar_lea.vmem %s537_s29, 2048  ;;  %p17924_p4 = scmp.lt.s32.totalorder %s537_s29, %s537_s29 }
  0x6b   : > { %p17917_p10 = scmp.ne.s32.totalorder %s537_s29, %s17916_s27  ;;  %p17925_p7 = scmp.lt.s32.totalorder %s17916_s27, %s17916_s27 }
  0x6d   : > { %p17919_p2 = pnand %p17917_p10, %p18562_p0  ;;  %p17926_p8 = por %p17925_p7, %p17924_p4 }
  0x6f   : > { %p17920_p3 = pneg %p17919_p2 }
  0x71   : > { %p17927_p11 = pnand %p17926_p8, %p17920_p3 }
  0x73   : > { %17930 = shalt.err (!%p17927_p11)
}
  0x74   : > { %17722 = dma.hbm_to_vmem [thread:$0]  (!%p18546_p12), %s19817_s7, 2048, %s537_s29, [#allocation12], %s19844_s17, %s19844_s17, %s18371_s2  }
  0x75   : > { %s18372_s30 = smov [#allocation14]   ;;  %s18373_s23 = smov [#allocation17]  }
  0x76   : > { %s564_s18 = sshll.u32 %s18372_s30, 4  ;;  %s587_s25 = sshll.u32 %s18373_s23, 4  ;;  %s565_s18 = int_to_ptr.vmem [resolvable:$true] %s564_s18  ;;  %s588_s25 = int_to_ptr.vmem [resolvable:$true] %s587_s25 }
  0x77   : > { %s17931_s26 = scalar_lea.hbm %s19820_s10, 16 }
  0x78   : > { %p17932_p13 = scmp.ne.s32.totalorder %s19820_s10, %s17931_s26  ;;  %p17938_p5 = scmp.lt.u32.totalorder %s17931_s26, %s19820_s10 }
  0x7a   : > { %p17934_p1 = pnand %p17932_p13, %p18562_p0 }
  0x7c   : > { %p17935_p6 = pneg %p17934_p1 }
  0x7e   : > { %p17940_p9 = pnand %p17938_p5, %p17935_p6 }
  0x80   : > { %17943 = shalt.err (!%p17940_p9)
}
  0x81   : > { %s17944_s29 = scalar_lea.vmem %s565_s18, 16  ;;  %s17951_s20 = scalar_lea.vmem %s565_s18, 32 }
  0x82   : > { %p17945_p10 = scmp.ne.s32.totalorder %s565_s18, %s17944_s29  ;;  %p17952_p4 = scmp.lt.s32.totalorder %s565_s18, %s565_s18 }
  0x83   : > { %p17953_p7 = scmp.lt.s32.totalorder %s17951_s20, %s17944_s29 }
  0x84   : > { %p17947_p2 = pnand %p17945_p10, %p18562_p0 }
  0x85   : > { %p17954_p8 = por %p17953_p7, %p17952_p4 }
  0x86   : > { %p17948_p3 = pneg %p17947_p2 }
  0x88   : > { %p17955_p11 = pnand %p17954_p8, %p17948_p3 }
  0x8a   : > { %17958 = shalt.err (!%p17955_p11)
}
  0x8b   : > { %17728 = dma.hbm_to_vmem [thread:$0]  (!%p18546_p12), %s19820_s10, 16, %s565_s18, [#allocation15]  }
  0x8c   : > { %s17959_s22 = scalar_lea.hbm %s19822_s12, 256 }
  0x8d   : > { %p17960_p13 = scmp.ne.s32.totalorder %s19822_s12, %s17959_s22  ;;  %p17966_p5 = scmp.lt.u32.totalorder %s17959_s22, %s19822_s12 }
  0x8f   : > { %p17962_p1 = pnand %p17960_p13, %p18562_p0 }
  0x91   : > { %p17963_p6 = pneg %p17962_p1 }
  0x93   : > { %p17968_p9 = pnand %p17966_p5, %p17963_p6 }
  0x95   : > { %17971 = shalt.err (!%p17968_p9)
}
  0x96   : > { %s17972_s29 = scalar_lea.vmem %s588_s25, 256  ;;  %p17980_p4 = scmp.lt.s32.totalorder %s588_s25, %s588_s25 }
  0x97   : > { %p17973_p10 = scmp.ne.s32.totalorder %s588_s25, %s17972_s29  ;;  %p17981_p7 = scmp.lt.s32.totalorder %s17972_s29, %s17972_s29 }
  0x99   : > { %p17975_p2 = pnand %p17973_p10, %p18562_p0  ;;  %p17982_p8 = por %p17981_p7, %p17980_p4 }
  0x9b   : > { %p17976_p3 = pneg %p17975_p2 }
  0x9d   : > { %p17983_p11 = pnand %p17982_p8, %p17976_p3 }
  0x9f   : > { %17986 = shalt.err (!%p17983_p11)
}
  0xa0   : > { %17734 = dma.hbm_to_vmem [thread:$0]  (!%p18546_p12), %s19822_s12, 256, %s588_s25, [#allocation18], %s19844_s17, %s19844_s17, %s18371_s2  }
  0xa1   : > { %s18374_s5 = smov [#allocation20]   ;;  %s18375_s28 = smov [#allocation2]  }
  0xa2   : > { %s613_s30 = sshll.u32 %s18374_s5, 4  ;;  %s480_s23 = sshll.u32 %s18375_s28, 4  ;;  %s614_s30 = int_to_ptr.vmem [resolvable:$true] %s613_s30  ;;  %s481_s23 = int_to_ptr.vmem [resolvable:$true] %s480_s23 }
  0xa3   : > { %s17987_s26 = scalar_lea.hbm %s19824_s14, 256 }
  0xa4   : > { %p17988_p13 = scmp.ne.s32.totalorder %s19824_s14, %s17987_s26  ;;  %p17994_p5 = scmp.lt.u32.totalorder %s17987_s26, %s19824_s14 }
  0xa6   : > { %p17990_p1 = pnand %p17988_p13, %p18562_p0 }
  0xa8   : > { %p17991_p6 = pneg %p17990_p1 }
  0xaa   : > { %p17996_p9 = pnand %p17994_p5, %p17991_p6 }
  0xac   : > { %17999 = shalt.err (!%p17996_p9)
}
  0xad   : > { %s18000_s25 = scalar_lea.vmem %s614_s30, 256  ;;  %p18008_p4 = scmp.lt.s32.totalorder %s614_s30, %s614_s30 }
  0xae   : > { %p18001_p10 = scmp.ne.s32.totalorder %s614_s30, %s18000_s25  ;;  %p18009_p7 = scmp.lt.s32.totalorder %s18000_s25, %s18000_s25 }
  0xb0   : > { %p18003_p2 = pnand %p18001_p10, %p18562_p0  ;;  %p18010_p8 = por %p18009_p7, %p18008_p4 }
  0xb2   : > { %p18004_p3 = pneg %p18003_p2 }
  0xb4   : > { %p18011_p11 = pnand %p18010_p8, %p18004_p3 }
  0xb6   : > { %18014 = shalt.err (!%p18011_p11)
}
  0xb7   : > { %17740 = dma.hbm_to_vmem [thread:$0]  (!%p18546_p12), %s19824_s14, 256, %s614_s30, [#allocation21], %s19844_s17, %s19844_s17, %s18371_s2  }
  0xb8   : > { %s19869_s1 = sld [smem:[#allocation48_spill]] }
  0xbe   : > { %s18015_s26 = scalar_lea.hbm %s19869_s1, 128 }
  0xbf   : > { %p18016_p13 = scmp.ne.s32.totalorder %s19869_s1, %s18015_s26  ;;  %p18022_p5 = scmp.lt.u32.totalorder %s18015_s26, %s19869_s1 }
  0xc1   : > { %p18018_p1 = pnand %p18016_p13, %p18562_p0 }
  0xc3   : > { %p18019_p6 = pneg %p18018_p1 }
  0xc5   : > { %p18024_p9 = pnand %p18022_p5, %p18019_p6 }
  0xc7   : > { %18027 = shalt.err (!%p18024_p9)
}
  0xc8   : > { %s18028_s25 = scalar_lea.vmem %s481_s23, 128  ;;  %p18036_p4 = scmp.lt.s32.totalorder %s481_s23, %s481_s23 }
  0xc9   : > { %p18029_p10 = scmp.ne.s32.totalorder %s481_s23, %s18028_s25  ;;  %p18037_p7 = scmp.lt.s32.totalorder %s18028_s25, %s18028_s25 }
  0xcb   : > { %p18031_p2 = pnand %p18029_p10, %p18562_p0  ;;  %p18038_p8 = por %p18037_p7, %p18036_p4 }
  0xcd   : > { %p18032_p3 = pneg %p18031_p2 }
  0xcf   : > { %p18039_p11 = pnand %p18038_p8, %p18032_p3 }
  0xd1   : > { %18042 = shalt.err (!%p18039_p11)
}
  0xd2   : > { %17707 = dma.hbm_to_vmem [thread:$0]  (!%p18546_p12), %s19869_s1, 128, %s481_s23, [#allocation3]  }
  0xd3   : > { %s18376_s5 = smov [#allocation7]   ;;  %s18377_s22 = smov [#allocation10]  }
  0xd4   : > { %s502_s28 = sshll.u32 %s18376_s5, 4  ;;  %s526_s26 = sshll.u32 %s18377_s22, 4  ;;  %s503_s28 = int_to_ptr.vmem [resolvable:$true] %s502_s28  ;;  %s527_s26 = int_to_ptr.vmem [resolvable:$true] %s526_s26 }
  0xd5   : > { %s18043_s29 = scalar_lea.hbm %s19814_s4, 16 }
  0xd6   : > { %p18044_p13 = scmp.ne.s32.totalorder %s19814_s4, %s18043_s29  ;;  %p18050_p5 = scmp.lt.u32.totalorder %s18043_s29, %s19814_s4 }
  0xd8   : > { %p18046_p1 = pnand %p18044_p13, %p18562_p0 }
  0xda   : > { %p18047_p6 = pneg %p18046_p1 }
  0xdc   : > { %p18052_p9 = pnand %p18050_p5, %p18047_p6 }
  0xde   : > { %18055 = shalt.err (!%p18052_p9)
}
  0xdf   : > { %s18056_s23 = scalar_lea.vmem %s503_s28, 16  ;;  %s18063_s20 = scalar_lea.vmem %s503_s28, 32 }
  0xe0   : > { %p18057_p10 = scmp.ne.s32.totalorder %s503_s28, %s18056_s23  ;;  %p18064_p4 = scmp.lt.s32.totalorder %s503_s28, %s503_s28 }
  0xe1   : > { %p18065_p7 = scmp.lt.s32.totalorder %s18063_s20, %s18056_s23 }
  0xe2   : > { %p18059_p2 = pnand %p18057_p10, %p18562_p0 }
  0xe3   : > { %p18066_p8 = por %p18065_p7, %p18064_p4 }
  0xe4   : > { %p18060_p3 = pneg %p18059_p2 }
  0xe6   : > { %p18067_p11 = pnand %p18066_p8, %p18060_p3 }
  0xe8   : > { %18070 = shalt.err (!%p18067_p11)
}
  0xe9   : > { %17713 = dma.hbm_to_vmem [thread:$0]  (!%p18546_p12), %s19814_s4, 16, %s503_s28, [#allocation6]  }
  0xea   : > { %s18071_s3 = scalar_lea.hbm %s19816_s6, 16 }
  0xeb   : > { %p18072_p13 = scmp.ne.s32.totalorder %s19816_s6, %s18071_s3  ;;  %p18078_p5 = scmp.lt.u32.totalorder %s18071_s3, %s19816_s6 }
  0xed   : > { %p18074_p1 = pnand %p18072_p13, %p18562_p0 }
  0xef   : > { %p18075_p6 = pneg %p18074_p1 }
  0xf1   : > { %p18080_p9 = pnand %p18078_p5, %p18075_p6 }
  0xf3   : > { %18083 = shalt.err (!%p18080_p9)
}
  0xf4   : > { %s18084_s23 = scalar_lea.vmem %s527_s26, 16  ;;  %s18091_s28 = scalar_lea.vmem %s527_s26, 32 }
  0xf5   : > { %p18085_p10 = scmp.ne.s32.totalorder %s527_s26, %s18084_s23  ;;  %p18092_p4 = scmp.lt.s32.totalorder %s527_s26, %s527_s26 }
  0xf6   : > { %p18093_p7 = scmp.lt.s32.totalorder %s18091_s28, %s18084_s23 }
  0xf7   : > { %p18087_p2 = pnand %p18085_p10, %p18562_p0 }
  0xf8   : > { %p18094_p8 = por %p18093_p7, %p18092_p4 }
  0xf9   : > { %p18088_p3 = pneg %p18087_p2 }
  0xfb   : > { %p18095_p11 = pnand %p18094_p8, %p18088_p3 }
  0xfd   : > { %18098 = shalt.err (!%p18095_p11)
}
  0xfe   : > { %17719 = dma.hbm_to_vmem [thread:$0]  (!%p18546_p12), %s19816_s6, 16, %s527_s26, [#allocation9]  }
  0xff   : > { %s18378_s22 = smov [#allocation13]   ;;  %s18379_s27 = smov [#allocation16]  }
 0x100   : > { %s550_s17 = sshll.u32 %s18378_s22, 4  ;;  %s574_s3 = sshll.u32 %s18379_s27, 4  ;;  %s551_s17 = int_to_ptr.vmem [resolvable:$true] %s550_s17  ;;  %s575_s3 = int_to_ptr.vmem [resolvable:$true] %s574_s3 }
 0x101   : > { %s18099_s25 = scalar_lea.hbm %s19818_s8, 16 }
 0x102   : > { %p18100_p13 = scmp.ne.s32.totalorder %s19818_s8, %s18099_s25  ;;  %p18106_p5 = scmp.lt.u32.totalorder %s18099_s25, %s19818_s8 }
 0x104   : > { %p18102_p1 = pnand %p18100_p13, %p18562_p0 }
 0x106   : > { %p18103_p6 = pneg %p18102_p1 }
 0x108   : > { %p18108_p9 = pnand %p18106_p5, %p18103_p6 }
 0x10a   : > { %18111 = shalt.err (!%p18108_p9)
}
 0x10b   : > { %s18112_s26 = scalar_lea.vmem %s551_s17, 16  ;;  %s18119_s5 = scalar_lea.vmem %s551_s17, 32 }
 0x10c   : > { %p18113_p10 = scmp.ne.s32.totalorder %s551_s17, %s18112_s26  ;;  %p18120_p4 = scmp.lt.s32.totalorder %s551_s17, %s551_s17 }
 0x10d   : > { %p18121_p7 = scmp.lt.s32.totalorder %s18119_s5, %s18112_s26 }
 0x10e   : > { %p18115_p2 = pnand %p18113_p10, %p18562_p0 }
 0x10f   : > { %p18122_p8 = por %p18121_p7, %p18120_p4 }
 0x110   : > { %p18116_p3 = pneg %p18115_p2 }
 0x112   : > { %p18123_p11 = pnand %p18122_p8, %p18116_p3 }
 0x114   : > { %18126 = shalt.err (!%p18123_p11)
}
 0x115   : > { %17725 = dma.hbm_to_vmem [thread:$0]  (!%p18546_p12), %s19818_s8, 16, %s551_s17, [#allocation12]  }
 0x116   : > { %s18127_s25 = scalar_lea.hbm %s19821_s11, 6400 }
 0x117   : > { %p18128_p13 = scmp.ne.s32.totalorder %s19821_s11, %s18127_s25  ;;  %p18134_p5 = scmp.lt.u32.totalorder %s18127_s25, %s19821_s11 }
 0x119   : > { %p18130_p1 = pnand %p18128_p13, %p18562_p0 }
 0x11b   : > { %p18131_p6 = pneg %p18130_p1 }
 0x11d   : > { %p18136_p9 = pnand %p18134_p5, %p18131_p6 }
 0x11f   : > { %18139 = shalt.err (!%p18136_p9)
}
 0x120   : > { %s18140_s26 = scalar_lea.vmem %s575_s3, 6400  ;;  %p18148_p4 = scmp.lt.s32.totalorder %s575_s3, %s575_s3 }
 0x121   : > { %p18141_p10 = scmp.ne.s32.totalorder %s575_s3, %s18140_s26  ;;  %p18149_p7 = scmp.lt.s32.totalorder %s18140_s26, %s18140_s26 }
 0x123   : > { %p18143_p2 = pnand %p18141_p10, %p18562_p0  ;;  %p18150_p8 = por %p18149_p7, %p18148_p4 }
 0x125   : > { %p18144_p3 = pneg %p18143_p2 }
 0x127   : > { %p18151_p11 = pnand %p18150_p8, %p18144_p3 }
 0x129   : > { %18154 = shalt.err (!%p18151_p11)
}
 0x12a   : > { %s19870_s17 = smov 128   ;;  %s18380_s27 = smov [#allocation19]  }
 0x12b   : > { %17731 = dma.hbm_to_vmem [thread:$0]  (!%p18546_p12), %s19821_s11, 6400, %s575_s3, [#allocation15], %s19870_s17, %s19870_s17, %s18371_s2  }
 0x12c   : > { %s600_s29 = sshll.u32 %s18380_s27, 4  ;;  %s18381_s18 = smov [#allocation22]   ;;  %s601_s29 = int_to_ptr.vmem [resolvable:$true] %s600_s29 }
 0x12d   : > { %s626_s25 = sshll.u32 %s18381_s18, 4  ;;  %s18155_s28 = scalar_lea.hbm %s19823_s13, 20480  ;;  %s627_s25 = int_to_ptr.vmem [resolvable:$true] %s626_s25 }
 0x12e   : > { %p18156_p13 = scmp.ne.s32.totalorder %s19823_s13, %s18155_s28  ;;  %p18162_p5 = scmp.lt.u32.totalorder %s18155_s28, %s19823_s13 }
 0x130   : > { %p18158_p1 = pnand %p18156_p13, %p18562_p0 }
 0x132   : > { %p18159_p6 = pneg %p18158_p1 }
 0x134   : > { %p18164_p9 = pnand %p18162_p5, %p18159_p6 }
 0x136   : > { %18167 = shalt.err (!%p18164_p9)
}
 0x137   : > { %s18168_s3 = scalar_lea.vmem %s601_s29, 20480  ;;  %p18176_p4 = scmp.lt.s32.totalorder %s601_s29, %s601_s29 }
 0x138   : > { %p18169_p10 = scmp.ne.s32.totalorder %s601_s29, %s18168_s3  ;;  %p18177_p7 = scmp.lt.s32.totalorder %s18168_s3, %s18168_s3 }
 0x13a   : > { %p18171_p2 = pnand %p18169_p10, %p18562_p0  ;;  %p18178_p8 = por %p18177_p7, %p18176_p4 }
 0x13c   : > { %p18172_p3 = pneg %p18171_p2 }
 0x13e   : > { %p18179_p11 = pnand %p18178_p8, %p18172_p3 }
 0x140   : > { %18182 = shalt.err (!%p18179_p11)
}
 0x141   : > { %17737 = dma.hbm_to_vmem [thread:$0]  (!%p18546_p12), %s19823_s13, 20480, %s601_s29, [#allocation18], %s19870_s17, %s19870_s17, %s18371_s2  }
 0x142   : > { %s18183_s30 = scalar_lea.hbm %s19825_s15, 139264 }
 0x143   : > { %p18184_p13 = scmp.ne.s32.totalorder %s19825_s15, %s18183_s30  ;;  %p18190_p5 = scmp.lt.u32.totalorder %s18183_s30, %s19825_s15 }
 0x145   : > { %p18186_p1 = pnand %p18184_p13, %p18562_p0 }
 0x147   : > { %p18187_p6 = pneg %p18186_p1 }
 0x149   : > { %p18192_p9 = pnand %p18190_p5, %p18187_p6 }
 0x14b   : > { %18195 = shalt.err (!%p18192_p9)
}
 0x14c   : > { %s18196_s5 = scalar_lea.vmem %s627_s25, 139264  ;;  %p18204_p4 = scmp.lt.s32.totalorder %s627_s25, %s627_s25 }
 0x14d   : > { %p18197_p10 = scmp.ne.s32.totalorder %s627_s25, %s18196_s5  ;;  %p18205_p7 = scmp.lt.s32.totalorder %s18196_s5, %s18196_s5 }
 0x14f   : > { %p18199_p2 = pnand %p18197_p10, %p18562_p0  ;;  %p18206_p8 = por %p18205_p7, %p18204_p4 }
 0x151   : > { %p18200_p3 = pneg %p18199_p2 }
 0x153   : > { %p18207_p11 = pnand %p18206_p8, %p18200_p3 }
 0x155   : > { %18210 = shalt.err (!%p18207_p11)
}
 0x156   : > { %s18382_s2 = smov 8704   ;;  %s18383_s17 = smov 544  }
 0x157   : > { %17743 = dma.hbm_to_vmem [thread:$0]  (!%p18546_p12), %s19825_s15, 139264, %s627_s25, [#allocation21], %s18382_s2, %s18382_s2, %s18383_s17  }
 0x158   : > { %s18384_s1 = smov [#allocation23]   ;;  %s18211_s30 = scalar_lea.hbm %s19826_s16, 2176 }
 0x159   : > { %s640_s22 = sshll.u32 %s18384_s1, 4  ;;  %p18212_p13 = scmp.ne.s32.totalorder %s19826_s16, %s18211_s30  ;;  %s641_s22 = int_to_ptr.vmem [resolvable:$true] %s640_s22 }
 0x15a   : > { %p18218_p5 = scmp.lt.u32.totalorder %s18211_s30, %s19826_s16 }
 0x15b   : > { %p18214_p1 = pnand %p18212_p13, %p18562_p0 }
 0x15d   : > { %p18215_p6 = pneg %p18214_p1 }
 0x15f   : > { %p18220_p9 = pnand %p18218_p5, %p18215_p6 }
 0x161   : > { %18223 = shalt.err (!%p18220_p9)
}
 0x162   : > { %s18224_s25 = scalar_lea.vmem %s641_s22, 2176  ;;  %p18232_p4 = scmp.lt.s32.totalorder %s641_s22, %s641_s22 }
 0x163   : > { %p18225_p10 = scmp.ne.s32.totalorder %s641_s22, %s18224_s25  ;;  %p18233_p7 = scmp.lt.s32.totalorder %s18224_s25, %s18224_s25 }
 0x165   : > { %p18227_p2 = pnand %p18225_p10, %p18562_p0  ;;  %p18234_p8 = por %p18233_p7, %p18232_p4 }
 0x167   : > { %p18228_p3 = pneg %p18227_p2 }
 0x169   : > { %p18235_p11 = pnand %p18234_p8, %p18228_p3 }
 0x16b   : > { %18238 = shalt.err (!%p18235_p11)
}
 0x16c   : > { %17746 = dma.hbm_to_vmem [thread:$0]  (!%p18546_p12), %s19826_s16, 2176, %s641_s22, [#allocation24]  }
 0x16d   : > { %p19871_p13 = scmp.ne.s32.totalorder %s19864_s24, 0 }
 0x16e   : > { %p19872_p1 = scmp.eq.s32.totalorder (!%p19871_p13), %s18510_s0, 0 }
 0x16f   : > { %669 = sbr.rel (%p19871_p13) target bundleno = 6410 (0x190a), region = 88 }
 0x176   : > { %18312 = dma.done.wait (%p19872_p1), [#allocation3], 128   ;;  %p19873_p0 = pmov %p19872_p1 }
 0x178   : > { %18314 = vsyncadd (%p19873_p0), [#allocation3], 4294967168  ;;  %p19874_p6 = pmov %p19873_p0 }
 0x179   : > { %p19875_p5 = pmov %p19873_p0 }
 0x17a   : > { %18316 = dma.done.wait (%p19874_p6), [#allocation6], 80  }
 0x17b   : > { %18318 = vsyncadd (%p19875_p5), [#allocation6], 4294967216  ;;  %p19876_p9 = pmov %p19873_p0 }
 0x17c   : > { %p19877_p12 = pmov %p19873_p0 }
 0x17d   : > { %18320 = dma.done.wait (%p19876_p9), [#allocation9], 2064  }
 0x17e   : > { %18322 = vsyncadd (%p19877_p12), [#allocation9], 4294965232  ;;  %p19878_p10 = pmov %p19873_p0 }
 0x17f   : > { %p19879_p2 = pmov %p19873_p0 }
 0x180   : > { %18324 = dma.done.wait (%p19878_p10), [#allocation12], 2064  }
 0x181   : > { %18326 = vsyncadd (%p19879_p2), [#allocation12], 4294965232  ;;  %p19880_p3 = pmov %p19873_p0 }
 0x182   : > { %p19881_p4 = pmov %p19873_p0 }
 0x183   : > { %18328 = dma.done.wait (%p19880_p3), [#allocation15], 6416  }
 0x184   : > { %18330 = vsyncadd (%p19881_p4), [#allocation15], 4294960880  ;;  %p19882_p7 = pmov %p19873_p0 }
 0x185   : > { %p19883_p8 = pmov %p19873_p0 }
 0x186   : > { %18332 = dma.done.wait (%p19882_p7), [#allocation18], 20736  }
 0x187   : > { %18334 = vsyncadd (%p19883_p8), [#allocation18], 4294946560  ;;  %p19884_p11 = pmov %p19873_p0 }
 0x188   : > { %p19885_p13 = pmov %p19873_p0 }
 0x189   : > { %18336 = dma.done.wait (%p19884_p11), [#allocation21], 139520  }
 0x18a   : > { %18338 = vsyncadd (%p19885_p13), [#allocation21], 4294827776  ;;  %p19886_p1 = pmov %p19873_p0 }
 0x18c   : > { %18340 = dma.done.wait (%p19886_p1), [#allocation24], 2176  }
 0x18d   : > { %18342 = vsyncadd (%p19873_p0), [#allocation24], 4294965120  ;;  %p784_p6 = scmp.lt.s32.totalorder %s18510_s0, 1  ;;  %vm838_vm0 = vcmask 1042432   ;;  %s19887_s29 = sld [smem:[#allocation47_spill]]  ;;  %vm813_vm1 = vcmask 23552  }
 0x18e   : > { %s19888_s27 = sld [smem:[#allocation46_spill]]  ;;  %v812_v0 = vld [vmem:[#allocation5] sm:$0x7]  ;;  %v803_v1 = vld [vmem:[#allocation2] sm:$0xff]  ;;  %vm947_vm2 = vcmask 64512   ;;  %v1100_v12 = vld [vmem:[#allocation8] sm:$0xff] }
 0x18f   : > { %s785_s24 = scalar_select %p784_p6, %s18510_s0, 1  ;;  %16467 = vmatprep.subr.msk.mxu1 %vm838_vm0, %v812_v0  ;;  %16481 = vmatprep.subr.mxu0 %v803_v1  ;;  %v1101_v13 = vld [vmem:[#allocation8 + $0x8] sm:$0xff]  ;;  %v1102_v15 = vld [vmem:[#allocation8 + $0x10] sm:$0xff]  ;;  %v1103_v16 = vld [vmem:[#allocation8 + $0x18] sm:$0xff]  ;;  %vm18386_vm3 = vmmov 0   ;;  %vm1508_vm4 = vcmask 523264  }
 0x190   : > { %16468 = vmatpush3.msk.msra.mxu1 %vm838_vm0, %v812_v0  ;;  %16482 = vmatpush3.msra.mxu0 %v803_v1  ;;  %v17226_v14 = vpack.c.bf16 %v1101_v13, %v1100_v12  ;;  %v17230_v21 = vpack.c.bf16 %v1103_v16, %v1102_v15  ;;  %v1104_v22 = vld [vmem:[#allocation8 + $0x20] sm:$0xff]  ;;  %v1105_v23 = vld [vmem:[#allocation8 + $0x28] sm:$0xff]  ;;  %v1106_v27 = vld [vmem:[#allocation8 + $0x30] sm:$0xff]  ;;  %s19889_s1 = sld [smem:[#allocation39_spill]]  ;;  %vm1590_vm5 = vcmask 326656   ;;  %vm1582_vm6 = vcmask 319488  }
 0x191   : > { %s16091_s21 = sshll.u32 %s785_s24, 6  ;;  %v17234_v26 = vpack.c.bf16 %v1105_v23, %v1104_v22  ;;  %v1107_v28 = vld [vmem:[#allocation8 + $0x38] sm:$0xff]  ;;  %v1108_v30 = vld [vmem:[#allocation8 + $0x40] sm:$0xff]  ;;  %v1109_v31 = vld [vmem:[#allocation8 + $0x48] sm:$0xff]  ;;  %s18391_s23 = smov 64  }
 0x192   : > { %17227 = vmatprep.subr.bf16.mxu1 %v17226_v14  ;;  %v17238_v29 = vpack.c.bf16 %v1107_v28, %v1106_v27  ;;  %v17242_v32 = vpack.c.bf16 %v1109_v31, %v1108_v30  ;;  %v1110_v33 = vld [vmem:[#allocation8 + $0x50] sm:$0xff]  ;;  %v1111_v34 = vld [vmem:[#allocation8 + $0x58] sm:$0xff]  ;;  %v1112_v36 = vld [vmem:[#allocation8 + $0x60] sm:$0xff]  ;;  %s19896_s28 = sld [smem:[#allocation44_spill]]  ;;  %s16087_s20 = sshll.u32 %s18510_s0, 4 }
 0x193   : > { %s18875_s3 = scalar_lea.vmem %s19887_s29, %s16091_s21  ;;  %v17246_v35 = vpack.c.bf16 %v1111_v34, %v1110_v33  ;;  %v1113_v37 = vld [vmem:[#allocation8 + $0x68] sm:$0xff]  ;;  %v1114_v39 = vld [vmem:[#allocation8 + $0x70] sm:$0xff]  ;;  %v1115_v40 = vld [vmem:[#allocation8 + $0x78] sm:$0xff]  ;;  %s19897_s2 = sld [smem:[#allocation51_spill]] }
 0x194   : > { %s18880_s18 = scalar_lea.vmem %s19888_s27, %s16091_s21  ;;  %v804_v2 = vld [vmem:[%s18875_s3] sm:$0xff]  ;;  %v805_v4 = vld [vmem:[%s18875_s3 + $0x8] sm:$0xff]  ;;  %v806_v6 = vld [vmem:[%s18875_s3 + $0x10] sm:$0xff]  ;;  %v17250_v38 = vpack.c.bf16 %v1113_v37, %v1112_v36  ;;  %v17254_v41 = vpack.c.bf16 %v1115_v40, %v1114_v39  ;;  %s18392_s17 = smov [#allocation25]  }
 0x195   : > { %v795_v3 = vld [vmem:[%s18880_s18] sm:$0xff]  ;;  %v796_v5 = vld [vmem:[%s18880_s18 + $0x8] sm:$0xff]  ;;  %16469 = vmatprep.mubr.msk.f32.mxu1 %vm813_vm1, %v804_v2  ;;  %v797_v7 = vld [vmem:[%s18880_s18 + $0x10] sm:$0xff]  ;;  %s18243_s29 = sshll.u32 %s18392_s17, 4  ;;  %s18244_s29 = int_to_ptr.vmem [resolvable:$false] %s18243_s29 }
 0x196   : > { %16483 = vmatprep.mubr.msk.f32.mxu0 %vm947_vm2, %v795_v3  ;;  %16470 = vmatmul.mubr.msk.f32.vlgmr.msra.gmra.mrb[0].mxu1 %vm813_vm1, %v805_v4  ;;  %v807_v8 = vld [vmem:[%s18875_s3 + $0x18] sm:$0xff]  ;;  %v808_v10 = vld [vmem:[%s18875_s3 + $0x20] sm:$0xff]  ;;  %v809_v17 = vld [vmem:[%s18875_s3 + $0x28] sm:$0xff]  ;;  %s18984_s22 = sand.u32 1, %s19889_s1  }
 0x197   : > { %16484 = vmatmul.mubr.msk.f32.vlgmr.msra.gmra.mrb[0].mxu0 %vm947_vm2, %v796_v5  ;;  %16472 = vmatprep.mubr.msk.f32.mxu1 %vm813_vm1, %v806_v6  ;;  %v798_v9 = vld [vmem:[%s18880_s18 + $0x18] sm:$0xff]  ;;  %v799_v11 = vld [vmem:[%s18880_s18 + $0x20] sm:$0xff]  ;;  %v800_v18 = vld [vmem:[%s18880_s18 + $0x28] sm:$0xff]  ;;  %s776_s27 = scalar_lea.vmem [#allocation25], %s18984_s22  ;;  %s14657_s21 = scalar_lea.sflag [#allocation4], %s18984_s22 }
 0x198   : > { %16486 = vmatprep.mubr.msk.f32.mxu0 %vm947_vm2, %v797_v7  ;;  %v810_v19 = vld [vmem:[%s18875_s3 + $0x30] sm:$0xff]  ;;  %17229 = vmatpush3.bf16.msra.mxu1 %v17226_v14  ;;  %v811_v24 = vld [vmem:[%s18875_s3 + $0x38] sm:$0xff]  ;;  %v1238_v44 = vld [vmem:[#allocation11 + $0x10] sm:$0xff]  ;;  %s14674_s26 = sshll.u32 %s776_s27, 4  ;;  %p19898_p9 = scmp.ne.s32.totalorder %s19896_s28, 0  ;;  %s14675_s26 = int_to_ptr.vmem [resolvable:$true] %s14674_s26 }
 0x199   : > { %v801_v20 = vld [vmem:[%s18880_s18 + $0x30] sm:$0xff]  ;;  %v802_v25 = vld [vmem:[%s18880_s18 + $0x38] sm:$0xff]  ;;  %17231 = vmatprep.subr.bf16.mxu1 %v17230_v21  ;;  %v1239_v46 = vld [vmem:[#allocation11 + $0x18] sm:$0xff]  ;;  %s17642_s18 = smul.u32 136, %s18984_s22  ;;  %s19734_s24 = scalar_lea.hbm %s19897_s2, %s16087_s20 }
 0x19a   : > { %16473 = vmatmul.mubr.msk.f32.gmra.mrb[2].mxu1 %vm813_vm1, %v807_v8  ;;  %v1236_v42 = vld [vmem:[#allocation11] sm:$0xff]  ;;  %v1237_v43 = vld [vmem:[#allocation11 + $0x8] sm:$0xff]  ;;  %v17262_v47 = vpack.c.bf16 %v1239_v46, %v1238_v44  ;;  %v1242_v51 = vld [vmem:[#allocation11 + $0x30] sm:$0xff]  ;;  %s18239_s19 = scalar_lea.vmem %s14675_s26, 16  ;;  %s18245_s3 = scalar_lea.vmem %s18244_s29, 32 }
 0x19b   : > { %16487 = vmatmul.mubr.msk.f32.gmra.mrb[2].mxu0 %vm947_vm2, %v798_v9  ;;  %16475 = vmatprep.mubr.msk.f32.mxu1 %vm813_vm1, %v808_v10  ;;  %v17258_v45 = vpack.c.bf16 %v1237_v43, %v1236_v42  ;;  %v1240_v48 = vld [vmem:[#allocation11 + $0x20] sm:$0xff]  ;;  %v1241_v49 = vld [vmem:[#allocation11 + $0x28] sm:$0xff]  ;;  %v1243_v52 = vld [vmem:[#allocation11 + $0x38] sm:$0xff]  ;;  %s19043_s30 = scalar_lea.vmem [#allocation26], %s17642_s18  ;;  %p18240_p5 = scmp.ne.s32.totalorder %s14675_s26, %s18239_s19 }
 0x19c   : > { %16489 = vmatprep.mubr.msk.f32.mxu0 %vm947_vm2, %v799_v11  ;;  %17233 = vmatpush3.bf16.msra.mxu1 %v17230_v21  ;;  %v17266_v50 = vpack.c.bf16 %v1241_v49, %v1240_v48  ;;  %v17270_v53 = vpack.c.bf16 %v1243_v52, %v1242_v51  ;;  %v1244_v54 = vld [vmem:[#allocation11 + $0x40] sm:$0xff]  ;;  %v1245_v55 = vld [vmem:[#allocation11 + $0x48] sm:$0xff]  ;;  %v1246_v57 = vld [vmem:[#allocation11 + $0x50] sm:$0xff]  ;;  %p18246_p2 = scmp.lt.s32.totalorder %s14675_s26, %s18244_s29  ;;  %p18247_p3 = scmp.lt.s32.totalorder %s18245_s3, %s18239_s19 }
 0x19d   : > { %17235 = vmatprep.subr.bf16.mxu1 %v17234_v26  ;;  %17259 = vmatprep.subr.bf16.mxu0 %v17258_v45  ;;  %v17274_v56 = vpack.c.bf16 %v1245_v55, %v1244_v54  ;;  %v1247_v58 = vld [vmem:[#allocation11 + $0x58] sm:$0xff]  ;;  %v1248_v60 = vld [vmem:[#allocation11 + $0x60] sm:$0xff]  ;;  %v1249_v61 = vld [vmem:[#allocation11 + $0x68] sm:$0xff]  ;;  %p18241_p12 = pnand %p18240_p5, %p19898_p9 }
 0x19e   : > { %16476 = vmatmul.mubr.msk.f32.gmra.mrb[4].mxu1 %vm813_vm1, %v809_v17  ;;  %17261 = vmatpush3.bf16.msra.mxu0 %v17258_v45  ;;  %v17278_v59 = vpack.c.bf16 %v1247_v58, %v1246_v57  ;;  %v17282_v62 = vpack.c.bf16 %v1249_v61, %v1248_v60  ;;  %v14976_v1 = vld [vmem:[#allocation7] ss:$0 sm:$0xff]  ;;  %v1250_v40 = vld [vmem:[#allocation11 + $0x70] sm:$0xff]  ;;  %v1374_v45 = vld [vmem:[%s19819_s9 + $0x10] sm:$0xff]  ;;  %p18248_p4 = por %p18247_p3, %p18246_p2 }
 0x19f   : > { %16490 = vmatmul.mubr.msk.f32.gmra.mrb[4].mxu0 %vm947_vm2, %v800_v18  ;;  %16478 = vmatprep.mubr.msk.f32.mxu1 %vm813_vm1, %v810_v19  ;;  %v1372_v43 = vld [vmem:[%s19819_s9] sm:$0xff]  ;;  %v1373_v44 = vld [vmem:[%s19819_s9 + $0x8] sm:$0xff]  ;;  %v1378_v52 = vld [vmem:[%s19819_s9 + $0x30] sm:$0xff]  ;;  %p18242_p10 = pneg %p18241_p12 }
 0x1a0   : > { %16492 = vmatprep.mubr.msk.f32.mxu0 %vm947_vm2, %v801_v20  ;;  %17237 = vmatpush3.bf16.msra.mxu1 %v17234_v26  ;;  %v17290_v46 = vpack.c.bf16 %v1373_v44, %v1372_v43  ;;  %v1376_v49 = vld [vmem:[%s19819_s9 + $0x20] sm:$0xff]  ;;  %v1382_v58 = vld [vmem:[%s19819_s9 + $0x50] sm:$0xff] }
 0x1a1   : > { %17239 = vmatprep.subr.bf16.mxu1 %v17238_v29  ;;  %17263 = vmatprep.subr.bf16.mxu0 %v17262_v47  ;;  %v1380_v55 = vld [vmem:[%s19819_s9 + $0x40] sm:$0xff]  ;;  %p18249_p7 = pnand %p18248_p4, %p18242_p10 }
 0x1a2   : > { %16479 = vmatmul.mubr.msk.f32.gmra.mrb[6].mxu1 %vm813_vm1, %v811_v24  ;;  %17265 = vmatpush3.bf16.msra.mxu0 %v17262_v47  ;;  %v1375_v47 = vld [vmem:[%s19819_s9 + $0x18] sm:$0xff]  ;;  %v1384_v61 = vld [vmem:[%s19819_s9 + $0x60] sm:$0xff] }
 0x1a3   : > { %16493 = vmatmul.mubr.msk.f32.gmra.mrb[6].mxu0 %vm947_vm2, %v802_v25  ;;  %17267 = vmatprep.subr.bf16.mxu0 %v17266_v50  ;;  %v17294_v48 = vpack.c.bf16 %v1375_v47, %v1374_v45 }
 0x1a4   : > { %17241 = vmatpush3.bf16.msra.mxu1 %v17238_v29 }
 0x1a5   : > { %17243 = vmatprep.subr.bf16.mxu1 %v17242_v32 }
 0x1a6   : > { %17269 = vmatpush3.bf16.msra.mxu0 %v17266_v50  ;;  %v1377_v50 = vld [vmem:[%s19819_s9 + $0x28] sm:$0xff] }
 0x1a7   : > { %17271 = vmatprep.subr.bf16.mxu0 %v17270_v53  ;;  %v17298_v51 = vpack.c.bf16 %v1377_v50, %v1376_v49 }
 0x1a8   : > { %17245 = vmatpush3.bf16.msra.mxu1 %v17242_v32 }
 0x1a9   : > { %17247 = vmatprep.subr.bf16.mxu1 %v17246_v35 }
 0x1aa   : > { %17273 = vmatpush3.bf16.msra.mxu0 %v17270_v53  ;;  %v1379_v53 = vld [vmem:[%s19819_s9 + $0x38] sm:$0xff] }
 0x1ab   : > { %17275 = vmatprep.subr.bf16.mxu0 %v17274_v56  ;;  %v17302_v54 = vpack.c.bf16 %v1379_v53, %v1378_v52  ;;  %v18385_v53 = vmov 0.0|0.0  }
 0x1ac   : > { %17249 = vmatpush3.bf16.msra.mxu1 %v17246_v35 }
 0x1ad   : > { %17251 = vmatprep.subr.bf16.mxu1 %v17250_v38 }
 0x1ae   : > { %17277 = vmatpush3.bf16.msra.mxu0 %v17274_v56  ;;  %v1381_v56 = vld [vmem:[%s19819_s9 + $0x48] sm:$0xff] }
 0x1af   : > { %17279 = vmatprep.subr.bf16.mxu0 %v17278_v59  ;;  %v17306_v57 = vpack.c.bf16 %v1381_v56, %v1380_v55  ;;  %v14979_v55 = vld [vmem:[#allocation14] ss:$0 sm:$0xff] }
 0x1b0   : > { %17253 = vmatpush3.bf16.msra.mxu1 %v17250_v38 }
 0x1b1   : > { %17255 = vmatprep.subr.bf16.mxu1 %v17254_v41 }
 0x1b2   : > { %17281 = vmatpush3.bf16.msra.mxu0 %v17278_v59  ;;  %v1383_v59 = vld [vmem:[%s19819_s9 + $0x58] sm:$0xff] }
 0x1b3   : > { %17283 = vmatprep.subr.bf16.mxu0 %v17282_v62  ;;  %v17310_v60 = vpack.c.bf16 %v1383_v59, %v1382_v58 }
 0x1b4   : > { %17257 = vmatpush3.bf16.msra.mxu1 %v17254_v41  ;;  %v1251_v41 = vld [vmem:[#allocation11 + $0x78] sm:$0xff] }
 0x1b5   : > { %v17286_v42 = vpack.c.bf16 %v1251_v41, %v1250_v40  ;;  %17291 = vmatprep.subr.bf16.mxu1 %v17290_v46 }
 0x1b6   : > { %17285 = vmatpush3.bf16.msra.mxu0 %v17282_v62  ;;  %v1385_v62 = vld [vmem:[%s19819_s9 + $0x68] sm:$0xff] }
 0x1b7   : > { %17287 = vmatprep.subr.bf16.mxu0 %v17286_v42 }
 0x1ba   : > { %17289 = vmatpush3.bf16.msra.mxu0 %v17286_v42 }
 0x1bb   : > { %17322 = vmatprep.subr.bf16.mxu0 %v18385_v53 }
 0x269   : > { %v16471_v63 = vpop.f32.mrb[0].mxu1 }
 0x26a   : > { %v16485_v0 = vpop.f32.mrb[0].mxu0  ;;  %v908_v3 = vpop.f32.mrb[1].mxu1 }
 0x26b   : > { %v1044_v2 = vadd.f32 %v16485_v0, %v16471_v63  ;;  %v1038_v4 = vpop.f32.mrb[1].mxu0  ;;  %v17314_v63 = vpack.c.bf16 %v1385_v62, %v1384_v61  ;;  %v14977_v0 = vld [vmem:[#allocation10] ss:$0 sm:$0xff] }
 0x26c   : > { %v1039_v5 = vadd.f32 %v1038_v4, %v908_v3 }
 0x26d   : > { %v1085_v6 = vadd.f32 %v14976_v1, %v1044_v2  ;;  %v16474_v8 = vpop.f32.mrb[2].mxu1 }
 0x26e   : > { %v1084_v7 = vadd.f32 %v14976_v1, %v1039_v5  ;;  %v16488_v9 = vpop.f32.mrb[2].mxu0  ;;  %v918_v11 = vpop.f32.mrb[3].mxu1 }
 0x26f   : > { %v1054_v10 = vadd.f32 %v16488_v9, %v16474_v8  ;;  %v1048_v12 = vpop.f32.mrb[3].mxu0  ;;  %v1093_v15 = vmax.f32 %v1085_v6, 0.0 }
 0x270   : > { %v1092_v13 = vmax.f32 %v1084_v7, 0.0  ;;  %v1049_v14 = vadd.f32 %v1048_v12, %v918_v11 }
 0x271   : > { %v1087_v16 = vadd.f32 %v14976_v1, %v1054_v10  ;;  %v16477_v18 = vpop.f32.mrb[4].mxu1 }
 0x272   : > { %v1086_v17 = vadd.f32 %v14976_v1, %v1049_v14  ;;  %v16491_v19 = vpop.f32.mrb[4].mxu0  ;;  %16527 = vmatprep.mubr.f32.mxu1 %v1092_v13  ;;  %v928_v21 = vpop.f32.mrb[5].mxu1 }
 0x273   : > { %v1064_v20 = vadd.f32 %v16491_v19, %v16477_v18  ;;  %v1058_v22 = vpop.f32.mrb[5].mxu0  ;;  %16528 = vmatmul.mubr.f32.vlgmr.msra.gmra.mrb[8].mxu1 %v1093_v15  ;;  %v1095_v25 = vmax.f32 %v1087_v16, 0.0 }
 0x274   : > { %v1094_v23 = vmax.f32 %v1086_v17, 0.0  ;;  %v1059_v24 = vadd.f32 %v1058_v22, %v928_v21  ;;  %17293 = vmatpush3.bf16.msra.mxu1 %v17290_v46 }
 0x275   : > { %v1089_v26 = vadd.f32 %v14976_v1, %v1064_v20  ;;  %v16480_v28 = vpop.f32.mrb[6].mxu1  ;;  %17295 = vmatprep.subr.bf16.mxu1 %v17294_v48 }
 0x276   : > { %v1088_v27 = vadd.f32 %v14976_v1, %v1059_v24  ;;  %v16494_v29 = vpop.f32.mrb[6].mxu0  ;;  %16530 = vmatprep.mubr.f32.mxu1 %v1094_v23  ;;  %v938_v31 = vpop.f32.mrb[7].mxu1 }
 0x277   : > { %v1074_v30 = vadd.f32 %v16494_v29, %v16480_v28  ;;  %v1068_v32 = vpop.f32.mrb[7].mxu0  ;;  %16531 = vmatmul.mubr.f32.gmra.mrb[10].mxu1 %v1095_v25  ;;  %v1097_v35 = vmax.f32 %v1089_v26, 0.0  ;;  %v1386_v25 = vld [vmem:[%s19819_s9 + $0x70] sm:$0xff]  ;;  %v1387_v26 = vld [vmem:[%s19819_s9 + $0x78] sm:$0xff] }
 0x278   : > { %v1096_v33 = vmax.f32 %v1088_v27, 0.0  ;;  %v1069_v34 = vadd.f32 %v1068_v32, %v938_v31  ;;  %17297 = vmatpush3.bf16.msra.mxu1 %v17294_v48  ;;  %v17318_v27 = vpack.c.bf16 %v1387_v26, %v1386_v25  ;;  %v14978_v28 = vld [vmem:[#allocation13] ss:$0 sm:$0xff]  ;;  %v18388_v25 = vmov 0.015625  }
 0x279   : > { %v1091_v36 = vadd.f32 %v14976_v1, %v1074_v30  ;;  %17299 = vmatprep.subr.bf16.mxu1 %v17298_v51 }
 0x27a   : > { %v1090_v37 = vadd.f32 %v14976_v1, %v1069_v34  ;;  %16533 = vmatprep.mubr.f32.mxu1 %v1096_v33 }
 0x27b   : > { %16534 = vmatmul.mubr.f32.gmra.mrb[12].mxu1 %v1097_v35  ;;  %v1099_v39 = vmax.f32 %v1091_v36, 0.0 }
 0x27c   : > { %v1098_v38 = vmax.f32 %v1090_v37, 0.0  ;;  %17301 = vmatpush3.bf16.msra.mxu1 %v17298_v51 }
 0x27d   : > { %17303 = vmatprep.subr.bf16.mxu1 %v17302_v54 }
 0x27e   : > { %16536 = vmatprep.mubr.f32.mxu1 %v1098_v38 }
 0x27f   : > { %16537 = vmatmul.mubr.f32.gmra.mrb[14].mxu1 %v1099_v39 }
 0x280   : > { %17305 = vmatpush3.bf16.msra.mxu1 %v17302_v54  ;;  %v18387_v54 = vmov 0.0  }
 0x281   : > { %17307 = vmatprep.subr.bf16.mxu1 %v17306_v57 }
 0x284   : > { %17309 = vmatpush3.bf16.msra.mxu1 %v17306_v57 }
 0x285   : > { %17311 = vmatprep.subr.bf16.mxu1 %v17310_v60 }
 0x288   : > { %17313 = vmatpush3.bf16.msra.mxu1 %v17310_v60 }
 0x289   : > { %17315 = vmatprep.subr.bf16.mxu1 %v17314_v63 }
 0x28c   : > { %17317 = vmatpush3.bf16.msra.mxu1 %v17314_v63 }
 0x28d   : > { %17319 = vmatprep.subr.bf16.mxu1 %v17318_v27 }
 0x290   : > { %17321 = vmatpush3.bf16.msra.mxu1 %v17318_v27  ;;  %v1588_v27 = vld [vmem:[#allocation16 + $0x20] sm:$0xff] }
 0x291   : > { %17340 = vmatprep.subr.bf16.mxu1 %v18385_v53 }
 0x346   : > { %v16529_v1 = vpop.f32.mrb[8].mxu1 }
 0x347   : > { %v1195_v2 = vadd.f32 %v16529_v1, %v14977_v0  ;;  %v1189_v3 = vpop.f32.mrb[9].mxu1 }
 0x348   : > { %v1190_v4 = vadd.f32 %v14977_v0, %v1189_v3 }
 0x349   : > { %v1229_v7 = vmax.f32 %v1195_v2, 0.0 }
 0x34a   : > { %v1228_v5 = vmax.f32 %v1190_v4, 0.0  ;;  %v16532_v6 = vpop.f32.mrb[10].mxu1 }
 0x34b   : > { %v1205_v8 = vadd.f32 %v16532_v6, %v14977_v0  ;;  %v1199_v9 = vpop.f32.mrb[11].mxu1 }
 0x34c   : > { %v1200_v10 = vadd.f32 %v14977_v0, %v1199_v9  ;;  %16571 = vmatprep.mubr.f32.mxu0 %v1228_v5 }
 0x34d   : > { %16572 = vmatmul.mubr.f32.vlgmr.msra.gmra.mrb[8].mxu0 %v1229_v7  ;;  %v1231_v13 = vmax.f32 %v1205_v8, 0.0 }
 0x34e   : > { %v1230_v11 = vmax.f32 %v1200_v10, 0.0  ;;  %v16535_v12 = vpop.f32.mrb[12].mxu1 }
 0x34f   : > { %v1215_v14 = vadd.f32 %v16535_v12, %v14977_v0  ;;  %v1209_v15 = vpop.f32.mrb[13].mxu1 }
 0x350   : > { %v1210_v16 = vadd.f32 %v14977_v0, %v1209_v15  ;;  %16574 = vmatprep.mubr.f32.mxu0 %v1230_v11 }
 0x351   : > { %16575 = vmatmul.mubr.f32.gmra.mrb[10].mxu0 %v1231_v13  ;;  %v1233_v19 = vmax.f32 %v1215_v14, 0.0 }
 0x352   : > { %v1232_v17 = vmax.f32 %v1210_v16, 0.0  ;;  %v16538_v18 = vpop.f32.mrb[14].mxu1 }
 0x353   : > { %v1225_v20 = vadd.f32 %v16538_v18, %v14977_v0  ;;  %v1219_v21 = vpop.f32.mrb[15].mxu1 }
 0x354   : > { %v1220_v22 = vadd.f32 %v14977_v0, %v1219_v21  ;;  %16577 = vmatprep.mubr.f32.mxu0 %v1232_v17 }
 0x355   : > { %16578 = vmatmul.mubr.f32.gmra.mrb[12].mxu0 %v1233_v19  ;;  %v1235_v24 = vmax.f32 %v1225_v20, 0.0  ;;  %v1584_v19 = vld [vmem:[#allocation16] sm:$0xff]  ;;  %v1585_v20 = vld [vmem:[#allocation16 + $0x8] sm:$0xff] }
 0x356   : > { %v1234_v23 = vmax.f32 %v1220_v22, 0.0  ;;  %v17335_v22 = vpack.c.bf16 %v1585_v20, %v1584_v19  ;;  %v1778_v20 = vld [vmem:[#allocation22 + $0x1980] sm:$0xff] }
 0x358   : > { %16580 = vmatprep.mubr.f32.mxu0 %v1234_v23  ;;  %v1586_v23 = vld [vmem:[#allocation16 + $0x10] sm:$0xff] }
 0x359   : > { %16581 = vmatmul.mubr.f32.gmra.mrb[14].mxu0 %v1235_v24  ;;  %v1587_v24 = vld [vmem:[#allocation16 + $0x18] sm:$0xff] }
 0x35a   : > { %16643 = vmatprep.mubr.msk.f32.mxu0 %vm18386_vm3, %v18387_v54  ;;  %v17338_v26 = vpack.c.bf16 %v1587_v24, %v1586_v23  ;;  %v1589_v24 = vld [vmem:[#allocation17] sm:$0x1] }
 0x420   : > { %v16573_v29 = vpop.f32.mrb[8].mxu0 }
 0x421   : > { %v1331_v30 = vadd.f32 %v16573_v29, %v14978_v28  ;;  %v1325_v31 = vpop.f32.mrb[9].mxu0  ;;  %v1666_v29 = vld [vmem:[#allocation19 + $0x8] sm:$0xff] }
 0x422   : > { %v1326_v32 = vadd.f32 %v14978_v28, %v1325_v31 }
 0x423   : > { %v1365_v35 = vmax.f32 %v1331_v30, 0.0  ;;  %v1667_v30 = vld [vmem:[#allocation19 + $0x10] sm:$0xff] }
 0x424   : > { %v1364_v33 = vmax.f32 %v1326_v32, 0.0  ;;  %v16576_v34 = vpop.f32.mrb[10].mxu0  ;;  %v1668_v32 = vld [vmem:[#allocation19 + $0x18] sm:$0xff] }
 0x425   : > { %v1341_v36 = vadd.f32 %v16576_v34, %v14978_v28  ;;  %v1335_v37 = vpop.f32.mrb[11].mxu0  ;;  %v1669_v34 = vld [vmem:[#allocation19 + $0x20] sm:$0xff] }
 0x426   : > { %v1336_v38 = vadd.f32 %v14978_v28, %v1335_v37  ;;  %16615 = vmatprep.mubr.f32.mxu1 %v1364_v33  ;;  %v17344_v33 = vpack.c.bf16 %v1668_v32, %v1667_v30  ;;  %v1671_v37 = vld [vmem:[#allocation19 + $0x30] sm:$0xff]  ;;  %v1763_v32 = vld [vmem:[#allocation22 + $0x888] sm:$0xff] }
 0x427   : > { %16616 = vmatmul.mubr.f32.vlgmr.msra.gmra.mrb[16].mxu1 %v1365_v35  ;;  %v1367_v41 = vmax.f32 %v1341_v36, 0.0  ;;  %v1670_v35 = vld [vmem:[#allocation19 + $0x28] sm:$0xff] }
 0x428   : > { %v1366_v39 = vmax.f32 %v1336_v38, 0.0  ;;  %v16579_v40 = vpop.f32.mrb[12].mxu0  ;;  %v17347_v36 = vpack.c.bf16 %v1670_v35, %v1669_v34  ;;  %v1672_v38 = vld [vmem:[#allocation19 + $0x38] sm:$0xff] }
 0x429   : > { %v1351_v42 = vadd.f32 %v16579_v40, %v14978_v28  ;;  %v1345_v43 = vpop.f32.mrb[13].mxu0  ;;  %v1673_v40 = vld [vmem:[#allocation19 + $0x40] sm:$0xff] }
 0x42a   : > { %v1346_v44 = vadd.f32 %v14978_v28, %v1345_v43  ;;  %16618 = vmatprep.mubr.f32.mxu1 %v1366_v39  ;;  %v17350_v39 = vpack.c.bf16 %v1672_v38, %v1671_v37  ;;  %v1675_v43 = vld [vmem:[#allocation19 + $0x50] sm:$0xff]  ;;  %v1769_v37 = vld [vmem:[#allocation22 + $0xee8] sm:$0xff] }
 0x42b   : > { %16619 = vmatmul.mubr.f32.gmra.mrb[18].mxu1 %v1367_v41  ;;  %v1369_v47 = vmax.f32 %v1351_v42, 0.0  ;;  %v1674_v41 = vld [vmem:[#allocation19 + $0x48] sm:$0xff] }
 0x42c   : > { %v1368_v45 = vmax.f32 %v1346_v44, 0.0  ;;  %v16582_v46 = vpop.f32.mrb[14].mxu0  ;;  %v17353_v42 = vpack.c.bf16 %v1674_v41, %v1673_v40  ;;  %v1676_v44 = vld [vmem:[#allocation19 + $0x58] sm:$0xff] }
 0x42d   : > { %v1361_v48 = vadd.f32 %v16582_v46, %v14978_v28  ;;  %v1355_v49 = vpop.f32.mrb[15].mxu0  ;;  %v1677_v46 = vld [vmem:[#allocation19 + $0x60] sm:$0xff]  ;;  %v1771_v40 = vld [vmem:[#allocation22 + $0x1108] sm:$0xff] }
 0x42e   : > { %v1356_v50 = vadd.f32 %v14978_v28, %v1355_v49  ;;  %16621 = vmatprep.mubr.f32.mxu1 %v1368_v45  ;;  %v1665_v28 = vld [vmem:[#allocation19] sm:$0xff]  ;;  %v17356_v45 = vpack.c.bf16 %v1676_v44, %v1675_v43  ;;  %v1773_v41 = vld [vmem:[#allocation22 + $0x1328] sm:$0xff] }
 0x42f   : > { %16622 = vmatmul.mubr.f32.gmra.mrb[20].mxu1 %v1369_v47  ;;  %v1371_v52 = vmax.f32 %v1361_v48, 0.0  ;;  %v17341_v31 = vpack.c.bf16 %v1666_v29, %v1665_v28  ;;  %v1678_v47 = vld [vmem:[#allocation19 + $0x68] sm:$0xff]  ;;  %v15001_v43 = vcombine.high %v1771_v40, %v1773_v41  ;;  %v1775_v44 = vld [vmem:[#allocation22 + $0x1548] sm:$0xff] }
 0x430   : > { %v1370_v51 = vmax.f32 %v1356_v50, 0.0  ;;  %v17359_v48 = vpack.c.bf16 %v1678_v47, %v1677_v46  ;;  %v15000_v46 = vcombine.low %v1771_v40, %v1773_v41  ;;  %v2255_v40 = vld [vmem:[#allocation22 + $0x450] sm:$0xf] }
 0x431   : > { %17342 = vmatpush3.bf16.msra.mxu1 %v17341_v31 }
 0x432   : > { %16624 = vmatprep.mubr.f32.mxu1 %v1370_v51  ;;  %17343 = vmatprep.subr.bf16.mxu1 %v18385_v53  ;;  %v1679_v51 = vld [vmem:[#allocation19 + $0x70] sm:$0xff] }
 0x433   : > { %16625 = vmatmul.mubr.f32.gmra.mrb[22].mxu1 %v1371_v52  ;;  %v1680_v52 = vld [vmem:[#allocation19 + $0x78] sm:$0xff] }
 0x434   : > { %16691 = vmatprep.mubr.msk.f32.mxu1 %vm18386_vm3, %v18387_v54 }
 0x435   : > { %17345 = vmatpush3.bf16.msra.mxu1 %v17344_v33  ;;  %v1765_v33 = vld [vmem:[#allocation22 + $0xaa8] sm:$0xff] }
 0x436   : > { %17346 = vmatprep.subr.bf16.mxu1 %v18385_v53  ;;  %v14993_v35 = vcombine.high %v1763_v32, %v1765_v33  ;;  %v14992_v38 = vcombine.low %v1763_v32, %v1765_v33  ;;  %v2176_v32 = vld [vmem:[#allocation19 + $0xe0] sm:$0xff]  ;;  %v2177_v33 = vld [vmem:[#allocation19 + $0xe8] sm:$0xff] }
 0x439   : > { %17348 = vmatpush3.bf16.msra.mxu1 %v17347_v36  ;;  %v1767_v36 = vld [vmem:[#allocation22 + $0xcc8] sm:$0xff] }
 0x43a   : > { %17349 = vmatprep.subr.bf16.mxu1 %v18385_v53 }
 0x43d   : > { %17351 = vmatpush3.bf16.msra.mxu1 %v17350_v39  ;;  %v14997_v39 = vcombine.high %v1767_v36, %v1769_v37 }
 0x43e   : > { %17352 = vmatprep.subr.bf16.mxu1 %v18385_v53 }
 0x441   : > { %17354 = vmatpush3.bf16.msra.mxu1 %v17353_v42  ;;  %v14996_v42 = vcombine.low %v1767_v36, %v1769_v37  ;;  %v2179_v36 = vld [vmem:[#allocation19 + $0xf8] sm:$0xff] }
 0x442   : > { %17355 = vmatprep.subr.bf16.mxu1 %v18385_v53 }
 0x445   : > { %17357 = vmatpush3.bf16.msra.mxu1 %v17356_v45  ;;  %v1777_v45 = vld [vmem:[#allocation22 + $0x1768] sm:$0xff] }
 0x446   : > { %17358 = vmatprep.subr.bf16.mxu1 %v18385_v53  ;;  %v15005_v47 = vcombine.high %v1775_v44, %v1777_v45 }
 0x449   : > { %17360 = vmatpush3.bf16.msra.mxu1 %v17359_v48  ;;  %v1779_v48 = vld [vmem:[#allocation22 + $0x1988] sm:$0xff] }
 0x44a   : > { %17361 = vmatprep.subr.bf16.mxu1 %v18385_v53 }
 0x4fa   : > { %v16617_v56 = vpop.f32.mrb[16].mxu1 }
 0x4fb   : > { %v1467_v57 = vadd.f32 %v16617_v56, %v14979_v55  ;;  %v1461_v58 = vpop.f32.mrb[17].mxu1  ;;  %v1754_v56 = vld [vmem:[#allocation22] sm:$0xff] }
 0x4fc   : > { %v1462_v59 = vadd.f32 %v14979_v55, %v1461_v58  ;;  %v1755_v58 = vld [vmem:[#allocation22 + $0x8] sm:$0xff] }
 0x4fd   : > { %v1501_v60 = vmax.f32 %v1467_v57, 0.0  ;;  %v1756_v57 = vld [vmem:[#allocation22 + $0x220] sm:$0xff] }
 0x4fe   : > { %v1500_v61 = vmax.f32 %v1462_v59, 0.0  ;;  %v16620_v62 = vpop.f32.mrb[18].mxu1  ;;  %v14982_v59 = vcombine.low %v1754_v56, %v1756_v57 }
 0x4ff   : > { %v1477_v63 = vadd.f32 %v16620_v62, %v14979_v55  ;;  %v1471_v0 = vpop.f32.mrb[19].mxu1  ;;  %v1758_v62 = vld [vmem:[#allocation22 + $0x440] sm:$0xff] }
 0x500   : > { %v17323_v1 = vpack.c.bf16 %v1501_v60, %v1500_v61  ;;  %v1472_v2 = vadd.f32 %v14979_v55, %v1471_v0  ;;  %v14983_v60 = vcombine.high %v1754_v56, %v1756_v57  ;;  %v1757_v61 = vld [vmem:[#allocation22 + $0x228] sm:$0xff]  ;;  %v1782_v56 = vld [vmem:[#allocation22 + $0x1dc0] sm:$0xff] }
 0x501   : > { %v1503_v3 = vmax.f32 %v1477_v63, 0.0  ;;  %v1760_v63 = vld [vmem:[#allocation22 + $0x660] sm:$0xff]  ;;  %v14984_v0 = vcombine.low %v1755_v58, %v1757_v61 }
 0x502   : > { %v1502_v4 = vmax.f32 %v1472_v2, 0.0  ;;  %v16623_v5 = vpop.f32.mrb[20].mxu1  ;;  %17324 = vmatpush3.bf16.msra.mxu0 %v17323_v1  ;;  %v14985_v1 = vcombine.high %v1755_v58, %v1757_v61  ;;  %v14987_v2 = vcombine.high %v1758_v62, %v1760_v63  ;;  %v1784_v57 = vld [vmem:[#allocation22 + $0x1fe0] sm:$0xff] }
 0x503   : > { %v1487_v6 = vadd.f32 %v16623_v5, %v14979_v55  ;;  %v1481_v7 = vpop.f32.mrb[21].mxu1  ;;  %17325 = vmatprep.subr.bf16.mxu0 %v18385_v53  ;;  %v1764_v5 = vld [vmem:[#allocation22 + $0xaa0] sm:$0xff]  ;;  %v15011_v58 = vcombine.high %v1782_v56, %v1784_v57  ;;  %v15010_v61 = vcombine.low %v1782_v56, %v1784_v57  ;;  %v2263_v56 = vld [vmem:[#allocation22 + $0x1550] sm:$0xf] }
 0x504   : > { %v17326_v8 = vpack.c.bf16 %v1503_v3, %v1502_v4  ;;  %v1482_v9 = vadd.f32 %v14979_v55, %v1481_v7  ;;  %v14986_v3 = vcombine.low %v1758_v62, %v1760_v63  ;;  %v1762_v4 = vld [vmem:[#allocation22 + $0x880] sm:$0xff]  ;;  %v2264_v57 = vld [vmem:[#allocation22 + $0x1770] sm:$0xf] }
 0x505   : > { %v1505_v10 = vmax.f32 %v1487_v6, 0.0  ;;  %v14991_v6 = vcombine.high %v1762_v4, %v1764_v5  ;;  %v14990_v7 = vcombine.low %v1762_v4, %v1764_v5  ;;  %v2086_v5 = vld [vmem:[#allocation16 + $0x28] sm:$0xff] }
 0x506   : > { %v1504_v11 = vmax.f32 %v1482_v9, 0.0  ;;  %v16626_v12 = vpop.f32.mrb[22].mxu1  ;;  %17327 = vmatpush3.bf16.msra.mxu0 %v17326_v8  ;;  %v1766_v8 = vld [vmem:[#allocation22 + $0xcc0] sm:$0xff] }
 0x507   : > { %v1497_v13 = vadd.f32 %v16626_v12, %v14979_v55  ;;  %v1491_v14 = vpop.f32.mrb[23].mxu1  ;;  %17328 = vmatprep.subr.bf16.mxu0 %v18385_v53  ;;  %v1768_v9 = vld [vmem:[#allocation22 + $0xee0] sm:$0xff] }
 0x508   : > { %v17329_v15 = vpack.c.bf16 %v1505_v10, %v1504_v11  ;;  %v1492_v16 = vadd.f32 %v14979_v55, %v1491_v14  ;;  %v17362_v55 = vpack.c.bf16 %v1680_v52, %v1679_v51  ;;  %v14995_v10 = vcombine.high %v1766_v8, %v1768_v9  ;;  %v1770_v12 = vld [vmem:[#allocation22 + $0x1100] sm:$0xff] }
 0x509   : > { %v1507_v17 = vmax.f32 %v1497_v13, 0.0  ;;  %v14994_v11 = vcombine.low %v1766_v8, %v1768_v9  ;;  %v1772_v13 = vld [vmem:[#allocation22 + $0x1320] sm:$0xff]  ;;  %v15004_v51 = vcombine.low %v1775_v44, %v1777_v45  ;;  %v2257_v44 = vld [vmem:[#allocation22 + $0x890] sm:$0xf] }
 0x50a   : > { %v1506_v18 = vmax.f32 %v1492_v16, 0.0  ;;  %17330 = vmatpush3.bf16.msra.mxu0 %v17329_v15  ;;  %17363 = vmatpush3.bf16.msra.mxu1 %v17362_v55  ;;  %v14999_v14 = vcombine.high %v1770_v12, %v1772_v13  ;;  %v14998_v15 = vcombine.low %v1770_v12, %v1772_v13  ;;  %v1774_v16 = vld [vmem:[#allocation22 + $0x1540] sm:$0xff]  ;;  %v2164_v13 = vld [vmem:[#allocation19 + $0x80] sm:$0xff] }
 0x50b   : > { %17331 = vmatprep.subr.bf16.mxu0 %v18385_v53  ;;  %2010 = vmatprep.subr.bf16.mxu1 %v14985_v1  ;;  %v1681_v1 = vld [vmem:[#allocation20] sm:$0x1] }
 0x50c   : > { %v17332_v21 = vpack.c.bf16 %v1507_v17, %v1506_v18  ;;  %v1776_v17 = vld [vmem:[#allocation22 + $0x1760] sm:$0xff]  ;;  %v2258_v45 = vld [vmem:[#allocation22 + $0xab0] sm:$0xf] }
 0x50d   : > { %v15003_v18 = vcombine.high %v1774_v16, %v1776_v17  ;;  %v15002_v19 = vcombine.low %v1774_v16, %v1776_v17  ;;  %v2166_v17 = vld [vmem:[#allocation19 + $0x90] sm:$0xff] }
 0x50e   : > { %17333 = vmatpush3.bf16.msra.mxu0 %v17332_v21  ;;  %v1780_v21 = vld [vmem:[#allocation22 + $0x1ba0] sm:$0xff] }
 0x50f   : > { %17334 = vmatprep.subr.bf16.mxu0 %v18385_v53  ;;  %v15006_v23 = vcombine.low %v1778_v20, %v1780_v21 }
 0x511   : > { %16644 = vmatmul.mubr.msk.f32.vlgmr.msra.gmra.mrb[16].mxu0 %vm1508_vm4, %v18388_v25 }
 0x512   : > { %17336 = vmatpush3.bf16.msra.mxu0 %v17335_v22  ;;  %16656 = vmatprep.mubr.msk.f32.mxu0 %vm18386_vm3, %v18387_v54  ;;  %v15007_v22 = vcombine.high %v1778_v20, %v1780_v21  ;;  %v2168_v20 = vld [vmem:[#allocation19 + $0xa0] sm:$0xff]  ;;  %v2169_v21 = vld [vmem:[#allocation19 + $0xa8] sm:$0xff] }
 0x513   : > { %17337 = vmatprep.subr.bf16.mxu0 %v18385_v53 }
 0x516   : > { %17339 = vmatpush3.bf16.msra.mxu0 %v17338_v26  ;;  %v1759_v26 = vld [vmem:[#allocation22 + $0x448] sm:$0xff] }
 0x517   : > { %16654 = vmatprep.subr.mxu0 %v18387_v54 }
 0x51a   : > { %16655 = vmatpush3.msra.mxu0 %v1588_v27  ;;  %v1761_v27 = vld [vmem:[#allocation22 + $0x668] sm:$0xff] }
 0x51b   : > { %1969 = vmatprep.subr.bf16.mxu0 %v14983_v60  ;;  %v14989_v31 = vcombine.high %v1759_v26, %v1761_v27  ;;  %v14988_v34 = vcombine.low %v1759_v26, %v1761_v27  ;;  %v1785_v60 = vld [vmem:[#allocation22 + $0x1fe8] sm:$0xff]  ;;  %v2172_v26 = vld [vmem:[#allocation19 + $0xc0] sm:$0xff]  ;;  %v2173_v27 = vld [vmem:[#allocation19 + $0xc8] sm:$0xff] }
 0x5e4   : > { %v18986_v49 = vpop.f32.mrb[16].mxu0 }
 0x5e5   : > { %v16645_v50 = vpop.f32.mrb[17].mxu0  ;;  %16657 = vmatmul.mubr.msk.f32.vlgmr.msra.gmra.mrb[18].mxu0 %vm1590_vm5, %v18986_v49  ;;  %1583 = vst.msk [vmem:[%s776_s27] sm:$0x1] %vm1582_vm6, %v18986_v49 }
 0x5e6   : > { %1970 = vmatpush1.bf16.msra.mxu0 %v14982_v59  ;;  %v1781_v50 = vld [vmem:[#allocation22 + $0x1ba8] sm:$0xff] }
 0x5e7   : > { %1971 = vmatprep.subr.bf16.mxu0 %v14987_v2  ;;  %v15009_v52 = vcombine.high %v1779_v48, %v1781_v50  ;;  %v15008_v55 = vcombine.low %v1779_v48, %v1781_v50  ;;  %v1783_v59 = vld [vmem:[#allocation22 + $0x1dc8] sm:$0xff]  ;;  %v2260_v48 = vld [vmem:[#allocation22 + $0xef0] sm:$0xf] }
 0x5e8   : > { %v15013_v62 = vcombine.high %v1783_v59, %v1785_v60  ;;  %v15012_v63 = vcombine.low %v1783_v59, %v1785_v60  ;;  %v1949_v59 = vlaneseq }
 0x5ea   : > { %1972 = vmatpush1.bf16.msra.mxu0 %v14986_v3  ;;  %v1950_v60 = vshrl.u32 %v1949_v59, 7  ;;  %vm2082_vm7 = vcmp.lt.s32.totalorder %v1949_v59, 512  ;;  %vm19066_vm8 = vcmp.lt.s32.totalorder %v1949_v59, 64  ;;  %vm19260_vm9 = vcmp.ge.s32.totalorder %v1949_v59, 64 }
 0x5eb   : > { %1973 = vmatprep.subr.bf16.mxu0 %v14991_v6  ;;  %v2087_v6 = vld [vmem:[#allocation16 + $0x30] sm:$0xff]  ;;  %vm19265_vm10 = vcmp.lt.s32.totalorder %v1949_v59, 128 }
 0x5ec   : > { %v17365_v8 = vpack.c.bf16 %v2087_v6, %v2086_v5  ;;  %v19030_v5 = vsub.s32 6, %v1950_v60  ;;  %vm5456_vm11 = vmand %vm19260_vm9, %vm19265_vm10 }
 0x5ee   : > { %1974 = vmatpush1.bf16.msra.mxu0 %v14990_v7 }
 0x5ef   : > { %1975 = vmatprep.subr.bf16.mxu0 %v14995_v10  ;;  %v2088_v10 = vld [vmem:[#allocation16 + $0x38] sm:$0xff] }
 0x5f2   : > { %1976 = vmatpush1.bf16.msra.mxu0 %v14994_v11  ;;  %v2089_v11 = vld [vmem:[#allocation16 + $0x40] sm:$0xff] }
 0x5f3   : > { %1977 = vmatprep.subr.bf16.mxu0 %v14999_v14  ;;  %v17368_v12 = vpack.c.bf16 %v2089_v11, %v2088_v10  ;;  %v2165_v14 = vld [vmem:[#allocation19 + $0x88] sm:$0xff] }
 0x5f4   : > { %v17371_v16 = vpack.c.bf16 %v2165_v14, %v2164_v13 }
 0x5f6   : > { %1978 = vmatpush1.bf16.msra.mxu0 %v14998_v15  ;;  %v2090_v15 = vld [vmem:[#allocation16 + $0x48] sm:$0xff] }
 0x5f7   : > { %1979 = vmatprep.subr.bf16.mxu0 %v15003_v18  ;;  %v2167_v18 = vld [vmem:[#allocation19 + $0x98] sm:$0xff] }
 0x5fa   : > { %1980 = vmatpush1.bf16.msra.mxu0 %v15002_v19  ;;  %v17374_v19 = vpack.c.bf16 %v2167_v18, %v2166_v17 }
 0x5fb   : > { %1981 = vmatprep.subr.bf16.mxu0 %v15007_v22  ;;  %v17377_v22 = vpack.c.bf16 %v2169_v21, %v2168_v20 }
 0x5fe   : > { %1982 = vmatpush1.bf16.msra.mxu0 %v15006_v23  ;;  %v2170_v23 = vld [vmem:[#allocation19 + $0xb0] sm:$0xff] }
 0x5ff   : > { %1983 = vmatprep.subr.bf16.mxu0 %v15011_v58  ;;  %v15020_v58 = vcombine.low %v2263_v56, %v2264_v57  ;;  %v2449_v57 = vld [vmem:[#allocation19 + $0x140] sm:$0xff] }
 0x602   : > { %1984 = vmatpush1.bf16.msra.mxu0 %v15010_v61  ;;  %v1786_v61 = vld [vmem:[#allocation23] sm:$0xf] }
 0x603   : > { %17364 = vmatprep.subr.bf16.mxu0 %v18385_v53 }
 0x6b8   : > { %v1660_v25 = vpop.f32.mrb[18].mxu0 }
 0x6b9   : > { %v1661_v28 = vadd.f32 %v1660_v25, %v1589_v24  ;;  %v16658_v29 = vpop.f32.mrb[19].mxu0  ;;  %v2171_v24 = vld [vmem:[#allocation19 + $0xb8] sm:$0xff] }
 0x6ba   : > { %v17380_v25 = vpack.c.bf16 %v2171_v24, %v2170_v23  ;;  %v2174_v29 = vld [vmem:[#allocation19 + $0xd0] sm:$0xff] }
 0x6bb   : > { %v1664_v30 = vmax.f32 %v1661_v28, 0.0  ;;  %v17383_v28 = vpack.c.bf16 %v2173_v27, %v2172_v26 }
 0x6bd   : > { %16692 = vmatmul.mubr.f32.vlgmr.msra.gmra.mrb[24].mxu1 %v1664_v30  ;;  %v2175_v30 = vld [vmem:[#allocation19 + $0xd8] sm:$0xff] }
 0x6be   : > { %2011 = vmatpush1.bf16.msra.mxu1 %v14984_v0  ;;  %v18389_v0 = vmov 0  }
 0x6bf   : > { %2012 = vmatprep.subr.bf16.mxu1 %v14989_v31  ;;  %2001 = vmatprep.mubr.bf16.mxu0 %v18389_v0  ;;  %v17386_v31 = vpack.c.bf16 %v2175_v30, %v2174_v29  ;;  %v2091_v29 = vld [vmem:[#allocation17 + $0x1] sm:$0x1] }
 0x6c0   : > { %2042 = vmatprep.mubr.bf16.mxu1 %v18389_v0  ;;  %v2363_v30 = vld [vmem:[#allocation16 + $0x50] sm:$0xff] }
 0x6c2   : > { %2013 = vmatpush1.bf16.msra.mxu1 %v14988_v34  ;;  %v17389_v34 = vpack.c.bf16 %v2177_v33, %v2176_v32 }
 0x6c3   : > { %2014 = vmatprep.subr.bf16.mxu1 %v14993_v35  ;;  %v2178_v35 = vld [vmem:[#allocation19 + $0xf0] sm:$0xff] }
 0x6c4   : > { %v17392_v37 = vpack.c.bf16 %v2179_v36, %v2178_v35 }
 0x6c6   : > { %2015 = vmatpush1.bf16.msra.mxu1 %v14992_v38  ;;  %v2253_v38 = vld [vmem:[#allocation22 + $0x10] sm:$0xf] }
 0x6c7   : > { %2016 = vmatprep.subr.bf16.mxu1 %v14997_v39  ;;  %v2254_v39 = vld [vmem:[#allocation22 + $0x230] sm:$0xf] }
 0x6c8   : > { %v15015_v41 = vcombine.low %v2253_v38, %v2254_v39  ;;  %v2365_v38 = vld [vmem:[#allocation16 + $0x60] sm:$0xff]  ;;  %v2366_v39 = vld [vmem:[#allocation16 + $0x68] sm:$0xff] }
 0x6ca   : > { %2017 = vmatpush1.bf16.msra.mxu1 %v14996_v42  ;;  %v2256_v42 = vld [vmem:[#allocation22 + $0x670] sm:$0xf] }
 0x6cb   : > { %2018 = vmatprep.subr.bf16.mxu1 %v15001_v43  ;;  %v15016_v43 = vcombine.low %v2255_v40, %v2256_v42  ;;  %v17398_v40 = vpack.c.bf16 %v2366_v39, %v2365_v38  ;;  %v2442_v42 = vld [vmem:[#allocation19 + $0x108] sm:$0xff]  ;;  %v2563_v39 = vld [vmem:[#allocation22 + $0x468] sm:$0xff] }
 0x6ce   : > { %2019 = vmatpush1.bf16.msra.mxu1 %v15000_v46  ;;  %v15017_v46 = vcombine.low %v2257_v44, %v2258_v45  ;;  %v2443_v45 = vld [vmem:[#allocation19 + $0x110] sm:$0xff] }
 0x6cf   : > { %2020 = vmatprep.subr.bf16.mxu1 %v15005_v47  ;;  %v2259_v47 = vld [vmem:[#allocation22 + $0xcd0] sm:$0xf] }
 0x6d0   : > { %v15018_v50 = vcombine.low %v2259_v47, %v2260_v48  ;;  %v2445_v48 = vld [vmem:[#allocation19 + $0x120] sm:$0xff] }
 0x6d2   : > { %2021 = vmatpush1.bf16.msra.mxu1 %v15004_v51  ;;  %v2261_v51 = vld [vmem:[#allocation22 + $0x1110] sm:$0xf] }
 0x6d3   : > { %2022 = vmatprep.subr.bf16.mxu1 %v15009_v52  ;;  %v2262_v52 = vld [vmem:[#allocation22 + $0x1330] sm:$0xf] }
 0x6d6   : > { %2023 = vmatpush1.bf16.msra.mxu1 %v15008_v55  ;;  %v15019_v55 = vcombine.low %v2261_v51, %v2262_v52  ;;  %v2447_v52 = vld [vmem:[#allocation19 + $0x130] sm:$0xff] }
 0x6d7   : > { %2024 = vmatprep.subr.bf16.mxu1 %v15013_v62  ;;  %v1787_v62 = vunpack.c.l.bf16 %v1786_v61  ;;  %v2265_v61 = vld [vmem:[#allocation22 + $0x1990] sm:$0xf] }
 0x6d9   : > { %v1964_v10 = vrot.slane %v1787_v62, %v19030_v5 }
 0x6da   : > { %2025 = vmatpush1.bf16.msra.mxu1 %v15012_v63  ;;  %v19024_v63 = vsub.s32 0, %v1950_v60 }
 0x6db   : > { %16742 = vmatprep.subr.bf16.mxu1 %v18387_v54 }
 0x6dc   : > { %v1952_v6 = vrot.slane %v1787_v62, %v19024_v63 }
 0x790   : > { %v1748_v2 = vpop.f32.mrb[24].mxu1 }
 0x791   : > { %v1749_v3 = vadd.f32 %v1748_v2, %v1681_v1  ;;  %v16693_v4 = vpop.f32.mrb[25].mxu1  ;;  %v19026_v1 = vsub.s32 4, %v1950_v60  ;;  %v19028_v2 = vsub.s32 2, %v1950_v60 }
 0x793   : > { %v1752_v7 = vmax.f32 %v1749_v3, 0.0  ;;  %v18390_v3 = vmov 1966171168  }
 0x794   : > { %v2058_v4 = vunpack.c.l.s4 %v18390_v3 }
 0x795   : > { %v1753_v9 = vpack.c.bf16 %v1752_v7, %v1752_v7  ;;  %v1960_v7 = vrot.slane %v1787_v62, %v19026_v1 }
 0x797   : > { %2002 = vmatmul.mubr.bf16.vlgmr.msra.gmra.mrb[20].mxu0 %v1753_v9  ;;  %2043 = vmatmul.mubr.bf16.vlgmr.msra.gmra.mrb[28].mxu1 %v1753_v9  ;;  %v2059_v9 = vunpack.c.0.s8 %v2058_v4  ;;  %v2451_v4 = vld [vmem:[#allocation19 + $0x150] sm:$0xff] }
 0x798   : > { %17366 = vmatpush3.bf16.msra.mxu0 %v17365_v8  ;;  %16704 = vmatprep.mubr.msk.f32.mxu0 %vm18386_vm3, %v18387_v54  ;;  %v1956_v8 = vrot.slane %v1787_v62, %v19028_v2  ;;  %v2266_v62 = vld [vmem:[#allocation22 + $0x1bb0] sm:$0xf] }
 0x799   : > { %17367 = vmatprep.subr.bf16.mxu0 %v18385_v53  ;;  %16758 = vmatprep.mubr.msk.bf16.mxu1 %vm18386_vm3, %v18387_v54  ;;  %v19036_v18 = vsub.s32 %v2059_v9, %v1950_v60  ;;  %v15021_v3 = vcombine.low %v2265_v61, %v2266_v62  ;;  %v2268_v9 = vld [vmem:[#allocation22 + $0x1ff0] sm:$0xf] }
 0x79a   : > { %16743 = vmatpush3.bf16.msra.mxu1 %v15015_v41  ;;  %v2441_v41 = vld [vmem:[#allocation19 + $0x100] sm:$0xff] }
 0x79b   : > { %16744 = vmatprep.subr.bf16.mxu1 %v18387_v54  ;;  %v17401_v44 = vpack.c.bf16 %v2442_v42, %v2441_v41  ;;  %v2579_v42 = vld [vmem:[#allocation22 + $0x688] sm:$0xff] }
 0x79c   : > { %17369 = vmatpush3.bf16.msra.mxu0 %v17368_v12 }
 0x79d   : > { %16702 = vmatprep.subr.mxu0 %v18387_v54 }
 0x79e   : > { %16745 = vmatpush3.bf16.msra.mxu1 %v15016_v43  ;;  %v2367_v43 = vld [vmem:[#allocation16 + $0x70] sm:$0xff] }
 0x79f   : > { %16746 = vmatprep.subr.bf16.mxu1 %v18387_v54 }
 0x7a0   : > { %16703 = vmatpush3.msra.mxu0 %v2090_v15 }
 0x7a1   : > { %16705 = vmatmul.mubr.msk.f32.vlgmr.msra.gmra.mrb[24].mxu0 %vm1590_vm5, %v18986_v49  ;;  %17370 = vmatprep.subr.bf16.mxu0 %v18385_v53 }
 0x7a2   : > { %17372 = vmatpush3.bf16.msra.mxu0 %v17371_v16  ;;  %16739 = vmatprep.mubr.msk.f32.mxu0 %vm18386_vm3, %v18387_v54 }
 0x7a3   : > { %17373 = vmatprep.subr.bf16.mxu0 %v18385_v53  ;;  %16747 = vmatpush3.bf16.msra.mxu1 %v15017_v46  ;;  %v2444_v46 = vld [vmem:[#allocation19 + $0x118] sm:$0xff] }
 0x7a4   : > { %16748 = vmatprep.subr.bf16.mxu1 %v18387_v54  ;;  %v17404_v47 = vpack.c.bf16 %v2444_v46, %v2443_v45 }
 0x7a6   : > { %17375 = vmatpush3.bf16.msra.mxu0 %v17374_v19 }
 0x7a7   : > { %17376 = vmatprep.subr.bf16.mxu0 %v18385_v53  ;;  %16749 = vmatpush3.bf16.msra.mxu1 %v15018_v50  ;;  %v2446_v50 = vld [vmem:[#allocation19 + $0x128] sm:$0xff] }
 0x7a8   : > { %16750 = vmatprep.subr.bf16.mxu1 %v18387_v54  ;;  %v17407_v51 = vpack.c.bf16 %v2446_v50, %v2445_v48  ;;  %v15059_v50 = vcombine.high %v2563_v39, %v2579_v42 }
 0x7aa   : > { %17378 = vmatpush3.bf16.msra.mxu0 %v17377_v22 }
 0x7ab   : > { %17379 = vmatprep.subr.bf16.mxu0 %v18385_v53  ;;  %16751 = vmatpush3.bf16.msra.mxu1 %v15019_v55  ;;  %v2448_v55 = vld [vmem:[#allocation19 + $0x138] sm:$0xff] }
 0x7ac   : > { %16752 = vmatprep.subr.bf16.mxu1 %v18387_v54  ;;  %v17410_v56 = vpack.c.bf16 %v2448_v55, %v2447_v52  ;;  %v2611_v55 = vld [vmem:[#allocation22 + $0xac8] sm:$0xff] }
 0x7ae   : > { %17381 = vmatpush3.bf16.msra.mxu0 %v17380_v25 }
 0x7af   : > { %17382 = vmatprep.subr.bf16.mxu0 %v18385_v53  ;;  %16753 = vmatpush3.bf16.msra.mxu1 %v15020_v58  ;;  %v2450_v58 = vld [vmem:[#allocation19 + $0x148] sm:$0xff] }
 0x7b0   : > { %16754 = vmatprep.subr.bf16.mxu1 %v18387_v54  ;;  %v17413_v60 = vpack.c.bf16 %v2450_v58, %v2449_v57  ;;  %v2674_v57 = vld [vmem:[#allocation22 + $0x1340] sm:$0xff]  ;;  %v15058_v58 = vcombine.low %v2563_v39, %v2579_v42  ;;  %v2532_v39 = vld [vmem:[#allocation22 + $0x30] sm:$0xff] }
 0x7b2   : > { %17384 = vmatpush3.bf16.msra.mxu0 %v17383_v28 }
 0x7b3   : > { %17385 = vmatprep.subr.bf16.mxu0 %v18385_v53  ;;  %16755 = vmatpush3.bf16.msra.mxu1 %v15021_v3  ;;  %v2627_v3 = vld [vmem:[#allocation22 + $0xce8] sm:$0xff] }
 0x7b4   : > { %16756 = vmatprep.subr.bf16.mxu1 %v18387_v54 }
 0x7b6   : > { %17387 = vmatpush3.bf16.msra.mxu0 %v17386_v31  ;;  %v2364_v31 = vld [vmem:[#allocation16 + $0x58] sm:$0xff] }
 0x7b7   : > { %17388 = vmatprep.subr.bf16.mxu0 %v18385_v53  ;;  %v17395_v36 = vpack.c.bf16 %v2364_v31, %v2363_v30  ;;  %v2562_v30 = vld [vmem:[#allocation22 + $0x460] sm:$0xff] }
 0x7b8   : > { %v2578_v31 = vld [vmem:[#allocation22 + $0x680] sm:$0xff] }
 0x7b9   : > { %v15056_v38 = vcombine.low %v2562_v30, %v2578_v31 }
 0x7ba   : > { %17390 = vmatpush3.bf16.msra.mxu0 %v17389_v34 }
 0x7bb   : > { %17391 = vmatprep.subr.bf16.mxu0 %v18385_v53 }
 0x7be   : > { %17393 = vmatpush3.bf16.msra.mxu0 %v17392_v37 }
 0x7bf   : > { %17394 = vmatprep.subr.bf16.mxu0 %v18385_v53 }
 0x86a   : > { %v2003_v11 = vpop.f32.mrb[20].mxu0  ;;  %v2044_v12 = vpop.f32.mrb[28].mxu1 }
 0x86b   : > { %v2004_v13 = vadd.f32 %v2003_v11, %v1952_v6  ;;  %v2045_v14 = vadd.f32 %v2044_v12, %v1960_v7  ;;  %v2005_v15 = vpop.f32.mrb[21].mxu0  ;;  %v2046_v16 = vpop.f32.mrb[29].mxu1  ;;  %v2452_v6 = vld [vmem:[#allocation19 + $0x158] sm:$0xff]  ;;  %v2453_v11 = vld [vmem:[#allocation19 + $0x160] sm:$0xff]  ;;  %v2454_v12 = vld [vmem:[#allocation19 + $0x168] sm:$0xff] }
 0x86c   : > { %v2006_v17 = vadd.f32 %v2005_v15, %v1956_v8  ;;  %v2047_v19 = vadd.f32 %v2046_v16, %v1964_v10  ;;  %v2007_v20 = vpop.f32.mrb[22].mxu0  ;;  %v2048_v21 = vpop.f32.mrb[30].mxu1  ;;  %v17416_v7 = vpack.c.bf16 %v2452_v6, %v2451_v4  ;;  %v2267_v8 = vld [vmem:[#allocation22 + $0x1dd0] sm:$0xf]  ;;  %v2456_v15 = vld [vmem:[#allocation19 + $0x178] sm:$0xff] }
 0x86d   : > { %v2008_v22 = vpop.f32.mrb[23].mxu0  ;;  %v2049_v23 = vpop.f32.mrb[31].mxu1  ;;  %v15022_v10 = vcombine.low %v2267_v8, %v2268_v9  ;;  %v2531_v20 = vld [vmem:[#allocation22 + $0x28] sm:$0xff] }
 0x86e   : > { %v2055_v24 = vcombine.low %v2004_v13, %v2006_v17  ;;  %v2056_v25 = vcombine.low %v2045_v14, %v2047_v19  ;;  %v17419_v13 = vpack.c.bf16 %v2454_v12, %v2453_v11  ;;  %v2455_v14 = vld [vmem:[#allocation19 + $0x170] sm:$0xff]  ;;  %v2547_v23 = vld [vmem:[#allocation22 + $0x248] sm:$0xff] }
 0x86f   : > { %16757 = vmatpush3.bf16.msra.mxu1 %v15022_v10  ;;  %v17422_v16 = vpack.c.bf16 %v2456_v15, %v2455_v14  ;;  %v2530_v17 = vld [vmem:[#allocation22 + $0x20] sm:$0xff]  ;;  %v2643_v4 = vld [vmem:[#allocation22 + $0xf08] sm:$0xff] }
 0x870   : > { %v2063_v26 = vrot.slane %v2055_v24, %v19036_v18  ;;  %v2070_v27 = vrot.slane %v2056_v25, %v19036_v18  ;;  %v2546_v19 = vld [vmem:[#allocation22 + $0x240] sm:$0xff]  ;;  %v15026_v24 = vcombine.low %v2531_v20, %v2547_v23  ;;  %v15027_v25 = vcombine.high %v2531_v20, %v2547_v23  ;;  %v2659_v9 = vld [vmem:[#allocation22 + $0x1128] sm:$0xff] }
 0x871   : > { %v15024_v21 = vcombine.low %v2530_v17, %v2546_v19  ;;  %v15025_v22 = vcombine.high %v2530_v17, %v2546_v19  ;;  %v15123_v8 = vcombine.high %v2627_v3, %v2643_v4  ;;  %v2675_v10 = vld [vmem:[#allocation22 + $0x1348] sm:$0xff]  ;;  %v15122_v11 = vcombine.low %v2627_v3, %v2643_v4  ;;  %v2690_v14 = vld [vmem:[#allocation22 + $0x1560] sm:$0xff]  ;;  %v2564_v3 = vld [vmem:[#allocation22 + $0x470] sm:$0xff] }
 0x872   : > { %v2071_v28 = vcombine.low %v2063_v26, %v2070_v27  ;;  %v2180_v26 = vld [vmem:[#allocation20 + $0x1] sm:$0x1]  ;;  %v15155_v12 = vcombine.high %v2659_v9, %v2675_v10  ;;  %v2706_v15 = vld [vmem:[#allocation22 + $0x1780] sm:$0xff]  ;;  %v2707_v19 = vld [vmem:[#allocation22 + $0x1788] sm:$0xff] }
 0x873   : > { %4246 = vmatprep.subr.bf16.mxu1 %v15025_v22  ;;  %v15185_v17 = vcombine.high %v2690_v14, %v2706_v15  ;;  %v15184_v20 = vcombine.low %v2690_v14, %v2706_v15  ;;  %v2722_v23 = vld [vmem:[#allocation22 + $0x19a0] sm:$0xff]  ;;  %v2580_v4 = vld [vmem:[#allocation22 + $0x690] sm:$0xff]  ;;  %v2597_v14 = vld [vmem:[#allocation22 + $0x8b8] sm:$0xff] }
 0x874   : > { %v2078_v32 = vrot.slane %v2071_v28, %v19036_v18  ;;  %v2158_v33 = vpop.f32.mrb[24].mxu0  ;;  %v2613_v15 = vld [vmem:[#allocation22 + $0xad8] sm:$0xff] }
 0x875   : > { %v2159_v34 = vadd.f32 %v2158_v33, %v2091_v29  ;;  %v16706_v35 = vpop.f32.mrb[25].mxu0 }
 0x876   : > { %2084 = vst.msk [vmem:[%s19043_s30] sm:$0xf] %vm2082_vm7, %v2078_v32  ;;  %v2594_v35 = vld [vmem:[#allocation22 + $0x8a0] sm:$0xff] }
 0x877   : > { %v2162_v37 = vmax.f32 %v2159_v34, 0.0  ;;  %v15057_v34 = vcombine.high %v2562_v30, %v2578_v31  ;;  %v2754_v31 = vld [vmem:[#allocation22 + $0x1de0] sm:$0xff] }
 0x879   : > { %16740 = vmatmul.mubr.f32.vlgmr.msra.gmra.mrb[26].mxu0 %v2162_v37  ;;  %v2368_v37 = vld [vmem:[#allocation17 + $0x2] sm:$0x1] }
 0x87a   : > { %17396 = vmatpush3.bf16.msra.mxu0 %v17395_v36  ;;  %16772 = vmatprep.mubr.msk.f32.mxu0 %vm18386_vm3, %v18387_v54  ;;  %v2610_v36 = vld [vmem:[#allocation22 + $0xac0] sm:$0xff] }
 0x87b   : > { %17397 = vmatprep.subr.bf16.mxu0 %v18385_v53 }
 0x87e   : > { %17399 = vmatpush3.bf16.msra.mxu0 %v17398_v40  ;;  %v15089_v40 = vcombine.high %v2594_v35, %v2610_v36 }
 0x87f   : > { %16770 = vmatprep.subr.mxu0 %v18387_v54 }
 0x882   : > { %16771 = vmatpush3.msra.mxu0 %v2367_v43  ;;  %v2626_v43 = vld [vmem:[#allocation22 + $0xce0] sm:$0xff] }
 0x883   : > { %16773 = vmatmul.mubr.msk.f32.vlgmr.msra.gmra.mrb[28].mxu0 %vm1590_vm5, %v18986_v49  ;;  %17400 = vmatprep.subr.bf16.mxu0 %v18385_v53 }
 0x884   : > { %17402 = vmatpush3.bf16.msra.mxu0 %v17401_v44  ;;  %16807 = vmatprep.mubr.msk.f32.mxu0 %vm18386_vm3, %v18387_v54  ;;  %v2642_v44 = vld [vmem:[#allocation22 + $0xf00] sm:$0xff] }
 0x885   : > { %17403 = vmatprep.subr.bf16.mxu0 %v18385_v53  ;;  %v15121_v52 = vcombine.high %v2626_v43, %v2642_v44 }
 0x888   : > { %17405 = vmatpush3.bf16.msra.mxu0 %v17404_v47  ;;  %v15088_v47 = vcombine.low %v2594_v35, %v2610_v36  ;;  %v2771_v35 = vld [vmem:[#allocation22 + $0x2008] sm:$0xff] }
 0x889   : > { %17406 = vmatprep.subr.bf16.mxu0 %v18385_v53 }
 0x88c   : > { %17408 = vmatpush3.bf16.msra.mxu0 %v17407_v51  ;;  %v2595_v51 = vld [vmem:[#allocation22 + $0x8a8] sm:$0xff] }
 0x88d   : > { %17409 = vmatprep.subr.bf16.mxu0 %v18385_v53  ;;  %v15091_v61 = vcombine.high %v2595_v51, %v2611_v55  ;;  %v15090_v6 = vcombine.low %v2595_v51, %v2611_v55 }
 0x890   : > { %17411 = vmatpush3.bf16.msra.mxu0 %v17410_v56  ;;  %v2658_v56 = vld [vmem:[#allocation22 + $0x1120] sm:$0xff] }
 0x891   : > { %17412 = vmatprep.subr.bf16.mxu0 %v18385_v53  ;;  %v15153_v62 = vcombine.high %v2658_v56, %v2674_v57 }
 0x894   : > { %17414 = vmatpush3.bf16.msra.mxu0 %v17413_v60  ;;  %v15120_v60 = vcombine.low %v2626_v43, %v2642_v44  ;;  %v2549_v43 = vld [vmem:[#allocation22 + $0x258] sm:$0xff] }
 0x895   : > { %17415 = vmatprep.subr.bf16.mxu0 %v18385_v53 }
 0x898   : > { %17417 = vmatpush3.bf16.msra.mxu0 %v17416_v7  ;;  %v15152_v7 = vcombine.low %v2658_v56, %v2674_v57 }
 0x899   : > { %17418 = vmatprep.subr.bf16.mxu0 %v18385_v53 }
 0x89c   : > { %17420 = vmatpush3.bf16.msra.mxu0 %v17419_v13  ;;  %v15154_v13 = vcombine.low %v2659_v9, %v2675_v10  ;;  %v15061_v10 = vcombine.high %v2564_v3, %v2580_v4 }
 0x89d   : > { %17421 = vmatprep.subr.bf16.mxu0 %v18385_v53 }
 0x8a0   : > { %17423 = vmatpush3.bf16.msra.mxu0 %v17422_v16  ;;  %v2691_v16 = vld [vmem:[#allocation22 + $0x1568] sm:$0xff] }
 0x8a1   : > { %4287 = vmatprep.subr.bf16.mxu0 %v15027_v25  ;;  %v15187_v22 = vcombine.high %v2691_v16, %v2707_v19  ;;  %v2723_v25 = vld [vmem:[#allocation22 + $0x19a8] sm:$0xff] }
 0x94c   : > { %v2247_v27 = vpop.f32.mrb[26].mxu0 }
 0x94d   : > { %v2248_v28 = vadd.f32 %v2247_v27, %v2180_v26  ;;  %v16741_v29 = vpop.f32.mrb[27].mxu0 }
 0x94f   : > { %v2251_v32 = vmax.f32 %v2248_v28, 0.0  ;;  %v2739_v28 = vld [vmem:[#allocation22 + $0x1bc8] sm:$0xff] }
 0x950   : > { %v15218_v29 = vcombine.low %v2723_v25, %v2739_v28  ;;  %v15219_v30 = vcombine.high %v2723_v25, %v2739_v28 }
 0x951   : > { %v2252_v33 = vpack.c.bf16 %v2251_v32, %v2251_v32  ;;  %v2770_v32 = vld [vmem:[#allocation22 + $0x2000] sm:$0xff] }
 0x952   : > { %v15248_v36 = vcombine.low %v2754_v31, %v2770_v32 }
 0x953   : > { %16759 = vmatmul.mubr.bf16.vlgmr.msra.gmra.mrb[32].mxu1 %v2252_v33  ;;  %v2755_v33 = vld [vmem:[#allocation22 + $0x1de8] sm:$0xff] }
 0x954   : > { %4247 = vmatpush1.bf16.msra.mxu1 %v15024_v21  ;;  %4278 = vmatprep.mubr.bf16.mxu1 %v18389_v0  ;;  %v15186_v21 = vcombine.low %v2691_v16, %v2707_v19  ;;  %v15060_v16 = vcombine.low %v2564_v3, %v2580_v4 }
 0x955   : > { %4248 = vmatprep.subr.bf16.mxu1 %v15057_v34  ;;  %v15249_v34 = vcombine.high %v2754_v31, %v2770_v32  ;;  %v2661_v31 = vld [vmem:[#allocation22 + $0x1138] sm:$0xff] }
 0x956   : > { %v2435_v41 = vpop.f32.mrb[28].mxu0  ;;  %v2677_v32 = vld [vmem:[#allocation22 + $0x1358] sm:$0xff] }
 0x957   : > { %v2436_v45 = vadd.f32 %v2435_v41, %v2368_v37  ;;  %v16774_v46 = vpop.f32.mrb[29].mxu0  ;;  %v15250_v37 = vcombine.low %v2755_v33, %v2771_v35  ;;  %v2533_v41 = vld [vmem:[#allocation22 + $0x38] sm:$0xff] }
 0x958   : > { %4249 = vmatpush1.bf16.msra.mxu1 %v15056_v38  ;;  %v15251_v38 = vcombine.high %v2755_v33, %v2771_v35  ;;  %v15031_v46 = vcombine.high %v2533_v41, %v2549_v43 }
 0x959   : > { %v2439_v48 = vmax.f32 %v2436_v45, 0.0  ;;  %4250 = vmatprep.subr.bf16.mxu1 %v15089_v40  ;;  %v2548_v40 = vld [vmem:[#allocation22 + $0x250] sm:$0xff]  ;;  %v15030_v45 = vcombine.low %v2533_v41, %v2549_v43 }
 0x95a   : > { %v15029_v42 = vcombine.high %v2532_v39, %v2548_v40  ;;  %v15028_v44 = vcombine.low %v2532_v39, %v2548_v40  ;;  %v2693_v39 = vld [vmem:[#allocation22 + $0x1578] sm:$0xff] }
 0x95b   : > { %16808 = vmatmul.mubr.f32.vlgmr.msra.gmra.mrb[30].mxu0 %v2439_v48  ;;  %v2709_v40 = vld [vmem:[#allocation22 + $0x1798] sm:$0xff] }
 0x95c   : > { %4288 = vmatpush1.bf16.msra.mxu0 %v15026_v24  ;;  %4251 = vmatpush1.bf16.msra.mxu1 %v15088_v47  ;;  %v2738_v24 = vld [vmem:[#allocation22 + $0x1bc0] sm:$0xff] }
 0x95d   : > { %4289 = vmatprep.subr.bf16.mxu0 %v15059_v50  ;;  %4252 = vmatprep.subr.bf16.mxu1 %v15121_v52  ;;  %v15216_v26 = vcombine.low %v2722_v23, %v2738_v24  ;;  %v15217_v27 = vcombine.high %v2722_v23, %v2738_v24  ;;  %v2269_v47 = vld [vmem:[#allocation23 + $0x4] sm:$0x1]  ;;  %v2629_v23 = vld [vmem:[#allocation22 + $0xcf8] sm:$0xff] }
 0x95e   : > { %4319 = vmatprep.mubr.bf16.mxu0 %v18389_v0  ;;  %v2270_v48 = vunpack.c.l.bf16 %v2269_v47  ;;  %v2645_v24 = vld [vmem:[#allocation22 + $0xf18] sm:$0xff] }
 0x95f   : > { %v15127_v28 = vcombine.high %v2629_v23, %v2645_v24  ;;  %v2725_v47 = vld [vmem:[#allocation22 + $0x19b8] sm:$0xff] }
 0x960   : > { %4290 = vmatpush1.bf16.msra.mxu0 %v15058_v58  ;;  %4253 = vmatpush1.bf16.msra.mxu1 %v15120_v60  ;;  %v2457_v58 = vld [vmem:[#allocation20 + $0x2] sm:$0x1] }
 0x961   : > { %4291 = vmatprep.subr.bf16.mxu0 %v15091_v61  ;;  %4254 = vmatprep.subr.bf16.mxu1 %v15153_v62 }
 0x964   : > { %4292 = vmatpush1.bf16.msra.mxu0 %v15090_v6  ;;  %4255 = vmatpush1.bf16.msra.mxu1 %v15152_v7  ;;  %v2565_v6 = vld [vmem:[#allocation22 + $0x478] sm:$0xff] }
 0x965   : > { %4293 = vmatprep.subr.bf16.mxu0 %v15123_v8  ;;  %4256 = vmatprep.subr.bf16.mxu1 %v15185_v17  ;;  %v2581_v7 = vld [vmem:[#allocation22 + $0x698] sm:$0xff] }
 0x966   : > { %v15062_v17 = vcombine.low %v2565_v6, %v2581_v7 }
 0x968   : > { %4294 = vmatpush1.bf16.msra.mxu0 %v15122_v11  ;;  %4257 = vmatpush1.bf16.msra.mxu1 %v15184_v20  ;;  %v15063_v11 = vcombine.high %v2565_v6, %v2581_v7  ;;  %v15095_v20 = vcombine.high %v2597_v14, %v2613_v15  ;;  %v2534_v7 = vld [vmem:[#allocation22 + $0x40] sm:$0xff] }
 0x969   : > { %4295 = vmatprep.subr.bf16.mxu0 %v15155_v12  ;;  %4258 = vmatprep.subr.bf16.mxu1 %v15217_v27  ;;  %v2596_v12 = vld [vmem:[#allocation22 + $0x8b0] sm:$0xff] }
 0x96c   : > { %4296 = vmatpush1.bf16.msra.mxu0 %v15154_v13  ;;  %4259 = vmatpush1.bf16.msra.mxu1 %v15216_v26  ;;  %v2612_v13 = vld [vmem:[#allocation22 + $0xad0] sm:$0xff]  ;;  %v15094_v26 = vcombine.low %v2597_v14, %v2613_v15 }
 0x96d   : > { %4297 = vmatprep.subr.bf16.mxu0 %v15187_v22  ;;  %4260 = vmatprep.subr.bf16.mxu1 %v15249_v34  ;;  %v15093_v19 = vcombine.high %v2596_v12, %v2612_v13  ;;  %v2644_v22 = vld [vmem:[#allocation22 + $0xf10] sm:$0xff]  ;;  %v15092_v25 = vcombine.low %v2596_v12, %v2612_v13  ;;  %v15126_v34 = vcombine.low %v2629_v23, %v2645_v24 }
 0x970   : > { %4298 = vmatpush1.bf16.msra.mxu0 %v15186_v21  ;;  %4261 = vmatpush1.bf16.msra.mxu1 %v15248_v36  ;;  %v2628_v21 = vld [vmem:[#allocation22 + $0xcf0] sm:$0xff]  ;;  %v15159_v36 = vcombine.high %v2661_v31, %v2677_v32 }
 0x971   : > { %4299 = vmatprep.subr.bf16.mxu0 %v15219_v30  ;;  %4328 = vmatprep.subr.bf16.mxu1 %v15029_v42  ;;  %v15125_v27 = vcombine.high %v2628_v21, %v2644_v22  ;;  %v2676_v30 = vld [vmem:[#allocation22 + $0x1350] sm:$0xff]  ;;  %v15124_v33 = vcombine.low %v2628_v21, %v2644_v22  ;;  %v15158_v42 = vcombine.low %v2661_v31, %v2677_v32 }
 0x974   : > { %4300 = vmatpush1.bf16.msra.mxu0 %v15218_v29  ;;  %v2660_v29 = vld [vmem:[#allocation22 + $0x1130] sm:$0xff] }
 0x975   : > { %4301 = vmatprep.subr.bf16.mxu0 %v15251_v38  ;;  %v15157_v35 = vcombine.high %v2660_v29, %v2676_v30  ;;  %v2708_v38 = vld [vmem:[#allocation22 + $0x1790] sm:$0xff]  ;;  %v15156_v41 = vcombine.low %v2660_v29, %v2676_v30 }
 0x978   : > { %4302 = vmatpush1.bf16.msra.mxu0 %v15250_v37  ;;  %v2692_v37 = vld [vmem:[#allocation22 + $0x1570] sm:$0xff] }
 0x979   : > { %4369 = vmatprep.subr.bf16.mxu0 %v15031_v46  ;;  %v15189_v43 = vcombine.high %v2692_v37, %v2708_v38  ;;  %v2740_v46 = vld [vmem:[#allocation22 + $0x1bd0] sm:$0xff] }
 0xa26   : > { %v2353_v50 = vpop.f32.mrb[32].mxu1 }
 0xa27   : > { %v2354_v52 = vadd.f32 %v2353_v50, %v2270_v48  ;;  %v16760_v55 = vpop.f32.mrb[33].mxu1  ;;  %v2741_v48 = vld [vmem:[#allocation22 + $0x1bd8] sm:$0xff]  ;;  %v15188_v50 = vcombine.low %v2692_v37, %v2708_v38 }
 0xa28   : > { %v2356_v56 = vpop.f32.mrb[34].mxu1  ;;  %v15222_v3 = vcombine.low %v2725_v47, %v2741_v48 }
 0xa29   : > { %2361 = vst.msk [vmem:[%s19043_s30 + $0x4] sm:$0x1] %vm19066_vm8, %v2354_v52  ;;  %v16761_v57 = vpop.f32.mrb[35].mxu1  ;;  %v15190_v52 = vcombine.low %v2693_v39, %v2709_v40  ;;  %v15223_v56 = vcombine.high %v2725_v47, %v2741_v48 }
 0xa2a   : > { %v2756_v57 = vld [vmem:[#allocation22 + $0x1df0] sm:$0xff] }
 0xa2e   : > { %v2524_v60 = vpop.f32.mrb[30].mxu0 }
 0xa2f   : > { %v2525_v61 = vadd.f32 %v2524_v60, %v2457_v58  ;;  %v16809_v62 = vpop.f32.mrb[31].mxu0  ;;  %v2772_v58 = vld [vmem:[#allocation22 + $0x2010] sm:$0xff]  ;;  %v2757_v60 = vld [vmem:[#allocation22 + $0x1df8] sm:$0xff] }
 0xa30   : > { %v15253_v4 = vcombine.high %v2756_v57, %v2772_v58  ;;  %v15252_v12 = vcombine.low %v2756_v57, %v2772_v58 }
 0xa31   : > { %v2528_v8 = vmax.f32 %v2525_v61, 0.0  ;;  %v2773_v61 = vld [vmem:[#allocation22 + $0x2018] sm:$0xff] }
 0xa32   : > { %v15255_v6 = vcombine.high %v2757_v60, %v2773_v61  ;;  %v15254_v13 = vcombine.low %v2757_v60, %v2773_v61 }
 0xa33   : > { %v19073_v9 = vpack.c.bf16 %v2528_v8, %v2528_v8  ;;  %v2550_v8 = vld [vmem:[#allocation22 + $0x260] sm:$0xff] }
 0xa34   : > { %v15033_v14 = vcombine.high %v2534_v7, %v2550_v8  ;;  %v15032_v21 = vcombine.low %v2534_v7, %v2550_v8 }
 0xa35   : > { %4279 = vmatmul.mubr.bf16.vlgmr.msra.gmra.mrb[36].mxu1 %v19073_v9  ;;  %4320 = vmatmul.mubr.bf16.vlgmr.msra.gmra.mrb[32].mxu0 %v19073_v9 }
 0xa36   : > { %4329 = vmatpush1.bf16.msra.mxu1 %v15028_v44  ;;  %4370 = vmatpush1.bf16.msra.mxu0 %v15030_v45  ;;  %v15191_v44 = vcombine.high %v2693_v39, %v2709_v40  ;;  %v2724_v45 = vld [vmem:[#allocation22 + $0x19b0] sm:$0xff] }
 0xa37   : > { %4330 = vmatprep.subr.bf16.mxu1 %v15061_v10  ;;  %4371 = vmatprep.subr.bf16.mxu0 %v15063_v11  ;;  %v15221_v55 = vcombine.high %v2724_v45, %v2740_v46  ;;  %v15220_v62 = vcombine.low %v2724_v45, %v2740_v46  ;;  %v2535_v10 = vld [vmem:[#allocation22 + $0x48] sm:$0xff] }
 0xa38   : > { %4360 = vmatprep.mubr.bf16.mxu1 %v18389_v0  ;;  %4401 = vmatprep.mubr.bf16.mxu0 %v18389_v0  ;;  %v2551_v11 = vld [vmem:[#allocation22 + $0x268] sm:$0xff] }
 0xa39   : > { %v15035_v15 = vcombine.high %v2535_v10, %v2551_v11  ;;  %v15034_v22 = vcombine.low %v2535_v10, %v2551_v11 }
 0xa3a   : > { %4331 = vmatpush1.bf16.msra.mxu1 %v15060_v16  ;;  %4372 = vmatpush1.bf16.msra.mxu0 %v15062_v17  ;;  %v2566_v16 = vld [vmem:[#allocation22 + $0x480] sm:$0xff] }
 0xa3b   : > { %4332 = vmatprep.subr.bf16.mxu1 %v15093_v19  ;;  %4373 = vmatprep.subr.bf16.mxu0 %v15095_v20  ;;  %v2582_v17 = vld [vmem:[#allocation22 + $0x6a0] sm:$0xff]  ;;  %v2567_v19 = vld [vmem:[#allocation22 + $0x488] sm:$0xff] }
 0xa3c   : > { %v2583_v20 = vld [vmem:[#allocation22 + $0x6a8] sm:$0xff]  ;;  %v15065_v23 = vcombine.high %v2566_v16, %v2582_v17  ;;  %v15064_v29 = vcombine.low %v2566_v16, %v2582_v17 }
 0xa3d   : > { %v15067_v24 = vcombine.high %v2567_v19, %v2583_v20  ;;  %v15066_v30 = vcombine.low %v2567_v19, %v2583_v20 }
 0xa3e   : > { %4333 = vmatpush1.bf16.msra.mxu1 %v15092_v25  ;;  %4374 = vmatpush1.bf16.msra.mxu0 %v15094_v26  ;;  %v2598_v25 = vld [vmem:[#allocation22 + $0x8c0] sm:$0xff] }
 0xa3f   : > { %4334 = vmatprep.subr.bf16.mxu1 %v15125_v27  ;;  %4375 = vmatprep.subr.bf16.mxu0 %v15127_v28  ;;  %v2614_v26 = vld [vmem:[#allocation22 + $0xae0] sm:$0xff]  ;;  %v2599_v27 = vld [vmem:[#allocation22 + $0x8c8] sm:$0xff] }
 0xa40   : > { %v2615_v28 = vld [vmem:[#allocation22 + $0xae8] sm:$0xff]  ;;  %v15097_v31 = vcombine.high %v2598_v25, %v2614_v26  ;;  %v15096_v37 = vcombine.low %v2598_v25, %v2614_v26 }
 0xa41   : > { %v15099_v32 = vcombine.high %v2599_v27, %v2615_v28  ;;  %v15098_v38 = vcombine.low %v2599_v27, %v2615_v28 }
 0xa42   : > { %4335 = vmatpush1.bf16.msra.mxu1 %v15124_v33  ;;  %4376 = vmatpush1.bf16.msra.mxu0 %v15126_v34  ;;  %v2630_v33 = vld [vmem:[#allocation22 + $0xd00] sm:$0xff] }
 0xa43   : > { %4336 = vmatprep.subr.bf16.mxu1 %v15157_v35  ;;  %4377 = vmatprep.subr.bf16.mxu0 %v15159_v36  ;;  %v2646_v34 = vld [vmem:[#allocation22 + $0xf20] sm:$0xff]  ;;  %v2631_v35 = vld [vmem:[#allocation22 + $0xd08] sm:$0xff] }
 0xa44   : > { %v2647_v36 = vld [vmem:[#allocation22 + $0xf28] sm:$0xff]  ;;  %v15129_v39 = vcombine.high %v2630_v33, %v2646_v34  ;;  %v15128_v45 = vcombine.low %v2630_v33, %v2646_v34 }
 0xa45   : > { %v15131_v40 = vcombine.high %v2631_v35, %v2647_v36  ;;  %v15130_v46 = vcombine.low %v2631_v35, %v2647_v36 }
 0xa46   : > { %4337 = vmatpush1.bf16.msra.mxu1 %v15156_v41  ;;  %4378 = vmatpush1.bf16.msra.mxu0 %v15158_v42  ;;  %v2662_v41 = vld [vmem:[#allocation22 + $0x1140] sm:$0xff] }
 0xa47   : > { %4338 = vmatprep.subr.bf16.mxu1 %v15189_v43  ;;  %4379 = vmatprep.subr.bf16.mxu0 %v15191_v44  ;;  %v2678_v42 = vld [vmem:[#allocation22 + $0x1360] sm:$0xff]  ;;  %v2663_v43 = vld [vmem:[#allocation22 + $0x1148] sm:$0xff] }
 0xa48   : > { %v2679_v44 = vld [vmem:[#allocation22 + $0x1368] sm:$0xff]  ;;  %v15161_v47 = vcombine.high %v2662_v41, %v2678_v42  ;;  %v15160_v57 = vcombine.low %v2662_v41, %v2678_v42 }
 0xa49   : > { %v15163_v48 = vcombine.high %v2663_v43, %v2679_v44  ;;  %v15162_v58 = vcombine.low %v2663_v43, %v2679_v44 }
 0xa4a   : > { %4339 = vmatpush1.bf16.msra.mxu1 %v15188_v50  ;;  %4380 = vmatpush1.bf16.msra.mxu0 %v15190_v52  ;;  %v2694_v50 = vld [vmem:[#allocation22 + $0x1580] sm:$0xff] }
 0xa4b   : > { %4340 = vmatprep.subr.bf16.mxu1 %v15221_v55  ;;  %4381 = vmatprep.subr.bf16.mxu0 %v15223_v56  ;;  %v2710_v52 = vld [vmem:[#allocation22 + $0x17a0] sm:$0xff]  ;;  %v2695_v55 = vld [vmem:[#allocation22 + $0x1588] sm:$0xff] }
 0xa4c   : > { %v2711_v56 = vld [vmem:[#allocation22 + $0x17a8] sm:$0xff]  ;;  %v15193_v60 = vcombine.high %v2694_v50, %v2710_v52  ;;  %v15192_v7 = vcombine.low %v2694_v50, %v2710_v52 }
 0xa4d   : > { %v15195_v61 = vcombine.high %v2695_v55, %v2711_v56  ;;  %v15194_v8 = vcombine.low %v2695_v55, %v2711_v56 }
 0xa4e   : > { %4341 = vmatpush1.bf16.msra.mxu1 %v15220_v62  ;;  %4382 = vmatpush1.bf16.msra.mxu0 %v15222_v3  ;;  %v2726_v62 = vld [vmem:[#allocation22 + $0x19c0] sm:$0xff] }
 0xa4f   : > { %4342 = vmatprep.subr.bf16.mxu1 %v15253_v4  ;;  %4383 = vmatprep.subr.bf16.mxu0 %v15255_v6  ;;  %v2742_v3 = vld [vmem:[#allocation22 + $0x1be0] sm:$0xff]  ;;  %v2727_v4 = vld [vmem:[#allocation22 + $0x19c8] sm:$0xff] }
 0xa50   : > { %v2743_v6 = vld [vmem:[#allocation22 + $0x1be8] sm:$0xff]  ;;  %v15225_v10 = vcombine.high %v2726_v62, %v2742_v3  ;;  %v15224_v16 = vcombine.low %v2726_v62, %v2742_v3 }
 0xa51   : > { %v15227_v11 = vcombine.high %v2727_v4, %v2743_v6  ;;  %v15226_v17 = vcombine.low %v2727_v4, %v2743_v6 }
 0xa52   : > { %4343 = vmatpush1.bf16.msra.mxu1 %v15252_v12  ;;  %4384 = vmatpush1.bf16.msra.mxu0 %v15254_v13  ;;  %v2758_v12 = vld [vmem:[#allocation22 + $0x1e00] sm:$0xff] }
 0xa53   : > { %4410 = vmatprep.subr.bf16.mxu1 %v15033_v14  ;;  %4451 = vmatprep.subr.bf16.mxu0 %v15035_v15  ;;  %v2774_v13 = vld [vmem:[#allocation22 + $0x2020] sm:$0xff]  ;;  %v2759_v14 = vld [vmem:[#allocation22 + $0x1e08] sm:$0xff] }
 0xa54   : > { %v2775_v15 = vld [vmem:[#allocation22 + $0x2028] sm:$0xff]  ;;  %v15257_v19 = vcombine.high %v2758_v12, %v2774_v13  ;;  %v15256_v25 = vcombine.low %v2758_v12, %v2774_v13 }
 0xa55   : > { %4361 = vmatmul.mubr.bf16.vlgmr.msra.gmra.mrb[40].mxu1 %v19073_v9  ;;  %4402 = vmatmul.mubr.bf16.vlgmr.msra.gmra.mrb[36].mxu0 %v19073_v9  ;;  %v15259_v20 = vcombine.high %v2759_v14, %v2775_v15  ;;  %v15258_v26 = vcombine.low %v2759_v14, %v2775_v15 }
 0xa56   : > { %4411 = vmatpush1.bf16.msra.mxu1 %v15032_v21  ;;  %4452 = vmatpush1.bf16.msra.mxu0 %v15034_v22  ;;  %v2536_v21 = vld [vmem:[#allocation22 + $0x50] sm:$0xff] }
 0xa57   : > { %4412 = vmatprep.subr.bf16.mxu1 %v15065_v23  ;;  %4453 = vmatprep.subr.bf16.mxu0 %v15067_v24  ;;  %v2552_v22 = vld [vmem:[#allocation22 + $0x270] sm:$0xff]  ;;  %v2537_v23 = vld [vmem:[#allocation22 + $0x58] sm:$0xff] }
 0xa58   : > { %4442 = vmatprep.mubr.bf16.mxu1 %v18389_v0  ;;  %4483 = vmatprep.mubr.bf16.mxu0 %v18389_v0  ;;  %v2553_v24 = vld [vmem:[#allocation22 + $0x278] sm:$0xff]  ;;  %v15037_v27 = vcombine.high %v2536_v21, %v2552_v22  ;;  %v15036_v33 = vcombine.low %v2536_v21, %v2552_v22 }
 0xa59   : > { %v15039_v28 = vcombine.high %v2537_v23, %v2553_v24  ;;  %v15038_v34 = vcombine.low %v2537_v23, %v2553_v24 }
 0xa5a   : > { %4413 = vmatpush1.bf16.msra.mxu1 %v15064_v29  ;;  %4454 = vmatpush1.bf16.msra.mxu0 %v15066_v30  ;;  %v2568_v29 = vld [vmem:[#allocation22 + $0x490] sm:$0xff] }
 0xa5b   : > { %4414 = vmatprep.subr.bf16.mxu1 %v15097_v31  ;;  %4455 = vmatprep.subr.bf16.mxu0 %v15099_v32  ;;  %v2584_v30 = vld [vmem:[#allocation22 + $0x6b0] sm:$0xff]  ;;  %v2569_v31 = vld [vmem:[#allocation22 + $0x498] sm:$0xff] }
 0xa5c   : > { %v2585_v32 = vld [vmem:[#allocation22 + $0x6b8] sm:$0xff]  ;;  %v15069_v35 = vcombine.high %v2568_v29, %v2584_v30  ;;  %v15068_v41 = vcombine.low %v2568_v29, %v2584_v30 }
 0xa5d   : > { %v15071_v36 = vcombine.high %v2569_v31, %v2585_v32  ;;  %v15070_v42 = vcombine.low %v2569_v31, %v2585_v32 }
 0xa5e   : > { %4415 = vmatpush1.bf16.msra.mxu1 %v15096_v37  ;;  %4456 = vmatpush1.bf16.msra.mxu0 %v15098_v38  ;;  %v2600_v37 = vld [vmem:[#allocation22 + $0x8d0] sm:$0xff] }
 0xa5f   : > { %4416 = vmatprep.subr.bf16.mxu1 %v15129_v39  ;;  %4457 = vmatprep.subr.bf16.mxu0 %v15131_v40  ;;  %v2616_v38 = vld [vmem:[#allocation22 + $0xaf0] sm:$0xff]  ;;  %v2601_v39 = vld [vmem:[#allocation22 + $0x8d8] sm:$0xff] }
 0xa60   : > { %v2617_v40 = vld [vmem:[#allocation22 + $0xaf8] sm:$0xff]  ;;  %v15101_v43 = vcombine.high %v2600_v37, %v2616_v38  ;;  %v15100_v50 = vcombine.low %v2600_v37, %v2616_v38 }
 0xa61   : > { %v15103_v44 = vcombine.high %v2601_v39, %v2617_v40  ;;  %v15102_v52 = vcombine.low %v2601_v39, %v2617_v40 }
 0xa62   : > { %4417 = vmatpush1.bf16.msra.mxu1 %v15128_v45  ;;  %4458 = vmatpush1.bf16.msra.mxu0 %v15130_v46  ;;  %v2632_v45 = vld [vmem:[#allocation22 + $0xd10] sm:$0xff] }
 0xa63   : > { %4418 = vmatprep.subr.bf16.mxu1 %v15161_v47  ;;  %4459 = vmatprep.subr.bf16.mxu0 %v15163_v48  ;;  %v2648_v46 = vld [vmem:[#allocation22 + $0xf30] sm:$0xff]  ;;  %v2633_v47 = vld [vmem:[#allocation22 + $0xd18] sm:$0xff] }
 0xa64   : > { %v2649_v48 = vld [vmem:[#allocation22 + $0xf38] sm:$0xff]  ;;  %v15133_v55 = vcombine.high %v2632_v45, %v2648_v46  ;;  %v15132_v62 = vcombine.low %v2632_v45, %v2648_v46 }
 0xa65   : > { %v15135_v56 = vcombine.high %v2633_v47, %v2649_v48  ;;  %v15134_v3 = vcombine.low %v2633_v47, %v2649_v48 }
 0xa66   : > { %4419 = vmatpush1.bf16.msra.mxu1 %v15160_v57  ;;  %4460 = vmatpush1.bf16.msra.mxu0 %v15162_v58  ;;  %v2664_v57 = vld [vmem:[#allocation22 + $0x1150] sm:$0xff] }
 0xa67   : > { %4420 = vmatprep.subr.bf16.mxu1 %v15193_v60  ;;  %4461 = vmatprep.subr.bf16.mxu0 %v15195_v61  ;;  %v2680_v58 = vld [vmem:[#allocation22 + $0x1370] sm:$0xff]  ;;  %v2665_v60 = vld [vmem:[#allocation22 + $0x1158] sm:$0xff] }
 0xa68   : > { %v2681_v61 = vld [vmem:[#allocation22 + $0x1378] sm:$0xff]  ;;  %v15165_v4 = vcombine.high %v2664_v57, %v2680_v58  ;;  %v15164_v12 = vcombine.low %v2664_v57, %v2680_v58 }
 0xa69   : > { %v15167_v6 = vcombine.high %v2665_v60, %v2681_v61  ;;  %v15166_v13 = vcombine.low %v2665_v60, %v2681_v61 }
 0xa6a   : > { %4421 = vmatpush1.bf16.msra.mxu1 %v15192_v7  ;;  %4462 = vmatpush1.bf16.msra.mxu0 %v15194_v8  ;;  %v2696_v7 = vld [vmem:[#allocation22 + $0x1590] sm:$0xff] }
 0xa6b   : > { %4422 = vmatprep.subr.bf16.mxu1 %v15225_v10  ;;  %4463 = vmatprep.subr.bf16.mxu0 %v15227_v11  ;;  %v2712_v8 = vld [vmem:[#allocation22 + $0x17b0] sm:$0xff]  ;;  %v2697_v10 = vld [vmem:[#allocation22 + $0x1598] sm:$0xff] }
 0xa6c   : > { %v2713_v11 = vld [vmem:[#allocation22 + $0x17b8] sm:$0xff]  ;;  %v15197_v14 = vcombine.high %v2696_v7, %v2712_v8  ;;  %v15196_v21 = vcombine.low %v2696_v7, %v2712_v8 }
 0xa6d   : > { %v15199_v15 = vcombine.high %v2697_v10, %v2713_v11  ;;  %v15198_v22 = vcombine.low %v2697_v10, %v2713_v11 }
 0xa6e   : > { %4423 = vmatpush1.bf16.msra.mxu1 %v15224_v16  ;;  %4464 = vmatpush1.bf16.msra.mxu0 %v15226_v17  ;;  %v2728_v16 = vld [vmem:[#allocation22 + $0x19d0] sm:$0xff] }
 0xa6f   : > { %4424 = vmatprep.subr.bf16.mxu1 %v15257_v19  ;;  %4465 = vmatprep.subr.bf16.mxu0 %v15259_v20  ;;  %v2744_v17 = vld [vmem:[#allocation22 + $0x1bf0] sm:$0xff]  ;;  %v2729_v19 = vld [vmem:[#allocation22 + $0x19d8] sm:$0xff] }
 0xa70   : > { %v2745_v20 = vld [vmem:[#allocation22 + $0x1bf8] sm:$0xff]  ;;  %v15229_v23 = vcombine.high %v2728_v16, %v2744_v17  ;;  %v15228_v29 = vcombine.low %v2728_v16, %v2744_v17 }
 0xa71   : > { %v15231_v24 = vcombine.high %v2729_v19, %v2745_v20  ;;  %v15230_v30 = vcombine.low %v2729_v19, %v2745_v20 }
 0xa72   : > { %4425 = vmatpush1.bf16.msra.mxu1 %v15256_v25  ;;  %4466 = vmatpush1.bf16.msra.mxu0 %v15258_v26  ;;  %v2760_v25 = vld [vmem:[#allocation22 + $0x1e10] sm:$0xff] }
 0xa73   : > { %4492 = vmatprep.subr.bf16.mxu1 %v15037_v27  ;;  %4533 = vmatprep.subr.bf16.mxu0 %v15039_v28  ;;  %v2776_v26 = vld [vmem:[#allocation22 + $0x2030] sm:$0xff]  ;;  %v2761_v27 = vld [vmem:[#allocation22 + $0x1e18] sm:$0xff] }
 0xa74   : > { %v2777_v28 = vld [vmem:[#allocation22 + $0x2038] sm:$0xff]  ;;  %v15261_v31 = vcombine.high %v2760_v25, %v2776_v26  ;;  %v15260_v37 = vcombine.low %v2760_v25, %v2776_v26 }
 0xa75   : > { %4443 = vmatmul.mubr.bf16.vlgmr.msra.gmra.mrb[44].mxu1 %v19073_v9  ;;  %4484 = vmatmul.mubr.bf16.vlgmr.msra.gmra.mrb[40].mxu0 %v19073_v9  ;;  %v15263_v32 = vcombine.high %v2761_v27, %v2777_v28  ;;  %v15262_v38 = vcombine.low %v2761_v27, %v2777_v28 }
 0xa76   : > { %4493 = vmatpush1.bf16.msra.mxu1 %v15036_v33  ;;  %4534 = vmatpush1.bf16.msra.mxu0 %v15038_v34  ;;  %v2538_v33 = vld [vmem:[#allocation22 + $0x60] sm:$0xff] }
 0xa77   : > { %4494 = vmatprep.subr.bf16.mxu1 %v15069_v35  ;;  %4535 = vmatprep.subr.bf16.mxu0 %v15071_v36  ;;  %v2554_v34 = vld [vmem:[#allocation22 + $0x280] sm:$0xff]  ;;  %v2539_v35 = vld [vmem:[#allocation22 + $0x68] sm:$0xff] }
 0xa78   : > { %4524 = vmatprep.mubr.bf16.mxu1 %v18389_v0  ;;  %4565 = vmatprep.mubr.bf16.mxu0 %v18389_v0  ;;  %v2555_v36 = vld [vmem:[#allocation22 + $0x288] sm:$0xff]  ;;  %v15041_v39 = vcombine.high %v2538_v33, %v2554_v34  ;;  %v15040_v45 = vcombine.low %v2538_v33, %v2554_v34 }
 0xa79   : > { %v15043_v40 = vcombine.high %v2539_v35, %v2555_v36  ;;  %v15042_v46 = vcombine.low %v2539_v35, %v2555_v36 }
 0xa7a   : > { %4495 = vmatpush1.bf16.msra.mxu1 %v15068_v41  ;;  %4536 = vmatpush1.bf16.msra.mxu0 %v15070_v42  ;;  %v2570_v41 = vld [vmem:[#allocation22 + $0x4a0] sm:$0xff] }
 0xa7b   : > { %4496 = vmatprep.subr.bf16.mxu1 %v15101_v43  ;;  %4537 = vmatprep.subr.bf16.mxu0 %v15103_v44  ;;  %v2586_v42 = vld [vmem:[#allocation22 + $0x6c0] sm:$0xff]  ;;  %v2571_v43 = vld [vmem:[#allocation22 + $0x4a8] sm:$0xff] }
 0xa7c   : > { %v2587_v44 = vld [vmem:[#allocation22 + $0x6c8] sm:$0xff]  ;;  %v15073_v47 = vcombine.high %v2570_v41, %v2586_v42  ;;  %v15072_v57 = vcombine.low %v2570_v41, %v2586_v42 }
 0xa7d   : > { %v15075_v48 = vcombine.high %v2571_v43, %v2587_v44  ;;  %v15074_v58 = vcombine.low %v2571_v43, %v2587_v44 }
 0xa7e   : > { %4497 = vmatpush1.bf16.msra.mxu1 %v15100_v50  ;;  %4538 = vmatpush1.bf16.msra.mxu0 %v15102_v52  ;;  %v2602_v50 = vld [vmem:[#allocation22 + $0x8e0] sm:$0xff] }
 0xa7f   : > { %4498 = vmatprep.subr.bf16.mxu1 %v15133_v55  ;;  %4539 = vmatprep.subr.bf16.mxu0 %v15135_v56  ;;  %v2618_v52 = vld [vmem:[#allocation22 + $0xb00] sm:$0xff]  ;;  %v2603_v55 = vld [vmem:[#allocation22 + $0x8e8] sm:$0xff] }
 0xa80   : > { %v2619_v56 = vld [vmem:[#allocation22 + $0xb08] sm:$0xff]  ;;  %v15105_v60 = vcombine.high %v2602_v50, %v2618_v52  ;;  %v15104_v7 = vcombine.low %v2602_v50, %v2618_v52 }
 0xa81   : > { %v15107_v61 = vcombine.high %v2603_v55, %v2619_v56  ;;  %v15106_v8 = vcombine.low %v2603_v55, %v2619_v56 }
 0xa82   : > { %4499 = vmatpush1.bf16.msra.mxu1 %v15132_v62  ;;  %4540 = vmatpush1.bf16.msra.mxu0 %v15134_v3  ;;  %v2634_v62 = vld [vmem:[#allocation22 + $0xd20] sm:$0xff] }
 0xa83   : > { %4500 = vmatprep.subr.bf16.mxu1 %v15165_v4  ;;  %4541 = vmatprep.subr.bf16.mxu0 %v15167_v6  ;;  %v2650_v3 = vld [vmem:[#allocation22 + $0xf40] sm:$0xff]  ;;  %v2635_v4 = vld [vmem:[#allocation22 + $0xd28] sm:$0xff] }
 0xa84   : > { %v2651_v6 = vld [vmem:[#allocation22 + $0xf48] sm:$0xff]  ;;  %v15137_v10 = vcombine.high %v2634_v62, %v2650_v3  ;;  %v15136_v16 = vcombine.low %v2634_v62, %v2650_v3 }
 0xa85   : > { %v15139_v11 = vcombine.high %v2635_v4, %v2651_v6  ;;  %v15138_v17 = vcombine.low %v2635_v4, %v2651_v6 }
 0xa86   : > { %4501 = vmatpush1.bf16.msra.mxu1 %v15164_v12  ;;  %4542 = vmatpush1.bf16.msra.mxu0 %v15166_v13  ;;  %v2666_v12 = vld [vmem:[#allocation22 + $0x1160] sm:$0xff] }
 0xa87   : > { %4502 = vmatprep.subr.bf16.mxu1 %v15197_v14  ;;  %4543 = vmatprep.subr.bf16.mxu0 %v15199_v15  ;;  %v2682_v13 = vld [vmem:[#allocation22 + $0x1380] sm:$0xff]  ;;  %v2667_v14 = vld [vmem:[#allocation22 + $0x1168] sm:$0xff] }
 0xa88   : > { %v2683_v15 = vld [vmem:[#allocation22 + $0x1388] sm:$0xff]  ;;  %v15169_v19 = vcombine.high %v2666_v12, %v2682_v13  ;;  %v15168_v25 = vcombine.low %v2666_v12, %v2682_v13 }
 0xa89   : > { %v15171_v20 = vcombine.high %v2667_v14, %v2683_v15  ;;  %v15170_v26 = vcombine.low %v2667_v14, %v2683_v15 }
 0xa8a   : > { %4503 = vmatpush1.bf16.msra.mxu1 %v15196_v21  ;;  %4544 = vmatpush1.bf16.msra.mxu0 %v15198_v22  ;;  %v2698_v21 = vld [vmem:[#allocation22 + $0x15a0] sm:$0xff] }
 0xa8b   : > { %4504 = vmatprep.subr.bf16.mxu1 %v15229_v23  ;;  %4545 = vmatprep.subr.bf16.mxu0 %v15231_v24  ;;  %v2714_v22 = vld [vmem:[#allocation22 + $0x17c0] sm:$0xff]  ;;  %v2699_v23 = vld [vmem:[#allocation22 + $0x15a8] sm:$0xff] }
 0xa8c   : > { %v2715_v24 = vld [vmem:[#allocation22 + $0x17c8] sm:$0xff]  ;;  %v15201_v27 = vcombine.high %v2698_v21, %v2714_v22  ;;  %v15200_v33 = vcombine.low %v2698_v21, %v2714_v22 }
 0xa8d   : > { %v15203_v28 = vcombine.high %v2699_v23, %v2715_v24  ;;  %v15202_v34 = vcombine.low %v2699_v23, %v2715_v24 }
 0xa8e   : > { %4505 = vmatpush1.bf16.msra.mxu1 %v15228_v29  ;;  %4546 = vmatpush1.bf16.msra.mxu0 %v15230_v30  ;;  %v2730_v29 = vld [vmem:[#allocation22 + $0x19e0] sm:$0xff] }
 0xa8f   : > { %4506 = vmatprep.subr.bf16.mxu1 %v15261_v31  ;;  %4547 = vmatprep.subr.bf16.mxu0 %v15263_v32  ;;  %v2746_v30 = vld [vmem:[#allocation22 + $0x1c00] sm:$0xff]  ;;  %v2731_v31 = vld [vmem:[#allocation22 + $0x19e8] sm:$0xff] }
 0xa90   : > { %v2747_v32 = vld [vmem:[#allocation22 + $0x1c08] sm:$0xff]  ;;  %v15233_v35 = vcombine.high %v2730_v29, %v2746_v30  ;;  %v15232_v41 = vcombine.low %v2730_v29, %v2746_v30 }
 0xa91   : > { %v15235_v36 = vcombine.high %v2731_v31, %v2747_v32  ;;  %v15234_v42 = vcombine.low %v2731_v31, %v2747_v32 }
 0xa92   : > { %4507 = vmatpush1.bf16.msra.mxu1 %v15260_v37  ;;  %4548 = vmatpush1.bf16.msra.mxu0 %v15262_v38  ;;  %v2762_v37 = vld [vmem:[#allocation22 + $0x1e20] sm:$0xff] }
 0xa93   : > { %4574 = vmatprep.subr.bf16.mxu1 %v15041_v39  ;;  %4615 = vmatprep.subr.bf16.mxu0 %v15043_v40  ;;  %v2778_v38 = vld [vmem:[#allocation22 + $0x2040] sm:$0xff]  ;;  %v2763_v39 = vld [vmem:[#allocation22 + $0x1e28] sm:$0xff] }
 0xa94   : > { %v2779_v40 = vld [vmem:[#allocation22 + $0x2048] sm:$0xff]  ;;  %v15265_v43 = vcombine.high %v2762_v37, %v2778_v38  ;;  %v15264_v50 = vcombine.low %v2762_v37, %v2778_v38 }
 0xa95   : > { %4525 = vmatmul.mubr.bf16.vlgmr.msra.gmra.mrb[48].mxu1 %v19073_v9  ;;  %4566 = vmatmul.mubr.bf16.vlgmr.msra.gmra.mrb[44].mxu0 %v19073_v9  ;;  %v15267_v44 = vcombine.high %v2763_v39, %v2779_v40  ;;  %v15266_v52 = vcombine.low %v2763_v39, %v2779_v40 }
 0xa96   : > { %4575 = vmatpush1.bf16.msra.mxu1 %v15040_v45  ;;  %4616 = vmatpush1.bf16.msra.mxu0 %v15042_v46  ;;  %v2540_v45 = vld [vmem:[#allocation22 + $0x70] sm:$0xff] }
 0xa97   : > { %4576 = vmatprep.subr.bf16.mxu1 %v15073_v47  ;;  %4617 = vmatprep.subr.bf16.mxu0 %v15075_v48  ;;  %v2556_v46 = vld [vmem:[#allocation22 + $0x290] sm:$0xff]  ;;  %v2541_v47 = vld [vmem:[#allocation22 + $0x78] sm:$0xff] }
 0xa98   : > { %4606 = vmatprep.mubr.bf16.mxu1 %v18389_v0  ;;  %4647 = vmatprep.mubr.bf16.mxu0 %v18389_v0  ;;  %v2557_v48 = vld [vmem:[#allocation22 + $0x298] sm:$0xff]  ;;  %v15045_v55 = vcombine.high %v2540_v45, %v2556_v46  ;;  %v15044_v62 = vcombine.low %v2540_v45, %v2556_v46 }
 0xa99   : > { %v15047_v56 = vcombine.high %v2541_v47, %v2557_v48  ;;  %v15046_v3 = vcombine.low %v2541_v47, %v2557_v48 }
 0xa9a   : > { %4577 = vmatpush1.bf16.msra.mxu1 %v15072_v57  ;;  %4618 = vmatpush1.bf16.msra.mxu0 %v15074_v58  ;;  %v2572_v57 = vld [vmem:[#allocation22 + $0x4b0] sm:$0xff] }
 0xa9b   : > { %4578 = vmatprep.subr.bf16.mxu1 %v15105_v60  ;;  %4619 = vmatprep.subr.bf16.mxu0 %v15107_v61  ;;  %v2588_v58 = vld [vmem:[#allocation22 + $0x6d0] sm:$0xff]  ;;  %v2573_v60 = vld [vmem:[#allocation22 + $0x4b8] sm:$0xff] }
 0xa9c   : > { %v2589_v61 = vld [vmem:[#allocation22 + $0x6d8] sm:$0xff]  ;;  %v15077_v4 = vcombine.high %v2572_v57, %v2588_v58  ;;  %v15076_v12 = vcombine.low %v2572_v57, %v2588_v58 }
 0xa9d   : > { %v15079_v6 = vcombine.high %v2573_v60, %v2589_v61  ;;  %v15078_v13 = vcombine.low %v2573_v60, %v2589_v61 }
 0xa9e   : > { %4579 = vmatpush1.bf16.msra.mxu1 %v15104_v7  ;;  %4620 = vmatpush1.bf16.msra.mxu0 %v15106_v8  ;;  %v2604_v7 = vld [vmem:[#allocation22 + $0x8f0] sm:$0xff] }
 0xa9f   : > { %4580 = vmatprep.subr.bf16.mxu1 %v15137_v10  ;;  %4621 = vmatprep.subr.bf16.mxu0 %v15139_v11  ;;  %v2620_v8 = vld [vmem:[#allocation22 + $0xb10] sm:$0xff]  ;;  %v2605_v10 = vld [vmem:[#allocation22 + $0x8f8] sm:$0xff] }
 0xaa0   : > { %v2621_v11 = vld [vmem:[#allocation22 + $0xb18] sm:$0xff]  ;;  %v15109_v14 = vcombine.high %v2604_v7, %v2620_v8  ;;  %v15108_v21 = vcombine.low %v2604_v7, %v2620_v8 }
 0xaa1   : > { %v15111_v15 = vcombine.high %v2605_v10, %v2621_v11  ;;  %v15110_v22 = vcombine.low %v2605_v10, %v2621_v11 }
 0xaa2   : > { %4581 = vmatpush1.bf16.msra.mxu1 %v15136_v16  ;;  %4622 = vmatpush1.bf16.msra.mxu0 %v15138_v17  ;;  %v2636_v16 = vld [vmem:[#allocation22 + $0xd30] sm:$0xff] }
 0xaa3   : > { %4582 = vmatprep.subr.bf16.mxu1 %v15169_v19  ;;  %4623 = vmatprep.subr.bf16.mxu0 %v15171_v20  ;;  %v2652_v17 = vld [vmem:[#allocation22 + $0xf50] sm:$0xff]  ;;  %v2637_v19 = vld [vmem:[#allocation22 + $0xd38] sm:$0xff] }
 0xaa4   : > { %v2653_v20 = vld [vmem:[#allocation22 + $0xf58] sm:$0xff]  ;;  %v15141_v23 = vcombine.high %v2636_v16, %v2652_v17  ;;  %v15140_v29 = vcombine.low %v2636_v16, %v2652_v17 }
 0xaa5   : > { %v15143_v24 = vcombine.high %v2637_v19, %v2653_v20  ;;  %v15142_v30 = vcombine.low %v2637_v19, %v2653_v20 }
 0xaa6   : > { %4583 = vmatpush1.bf16.msra.mxu1 %v15168_v25  ;;  %4624 = vmatpush1.bf16.msra.mxu0 %v15170_v26  ;;  %v2668_v25 = vld [vmem:[#allocation22 + $0x1170] sm:$0xff] }
 0xaa7   : > { %4584 = vmatprep.subr.bf16.mxu1 %v15201_v27  ;;  %4625 = vmatprep.subr.bf16.mxu0 %v15203_v28  ;;  %v2684_v26 = vld [vmem:[#allocation22 + $0x1390] sm:$0xff]  ;;  %v2669_v27 = vld [vmem:[#allocation22 + $0x1178] sm:$0xff] }
 0xaa8   : > { %v2685_v28 = vld [vmem:[#allocation22 + $0x1398] sm:$0xff]  ;;  %v15173_v31 = vcombine.high %v2668_v25, %v2684_v26  ;;  %v15172_v37 = vcombine.low %v2668_v25, %v2684_v26 }
 0xaa9   : > { %v15175_v32 = vcombine.high %v2669_v27, %v2685_v28  ;;  %v15174_v38 = vcombine.low %v2669_v27, %v2685_v28 }
 0xaaa   : > { %4585 = vmatpush1.bf16.msra.mxu1 %v15200_v33  ;;  %4626 = vmatpush1.bf16.msra.mxu0 %v15202_v34  ;;  %v2700_v33 = vld [vmem:[#allocation22 + $0x15b0] sm:$0xff] }
 0xaab   : > { %4586 = vmatprep.subr.bf16.mxu1 %v15233_v35  ;;  %4627 = vmatprep.subr.bf16.mxu0 %v15235_v36  ;;  %v2716_v34 = vld [vmem:[#allocation22 + $0x17d0] sm:$0xff]  ;;  %v2701_v35 = vld [vmem:[#allocation22 + $0x15b8] sm:$0xff] }
 0xaac   : > { %v2717_v36 = vld [vmem:[#allocation22 + $0x17d8] sm:$0xff]  ;;  %v15205_v39 = vcombine.high %v2700_v33, %v2716_v34  ;;  %v15204_v45 = vcombine.low %v2700_v33, %v2716_v34 }
 0xaad   : > { %v15207_v40 = vcombine.high %v2701_v35, %v2717_v36  ;;  %v15206_v46 = vcombine.low %v2701_v35, %v2717_v36 }
 0xaae   : > { %4587 = vmatpush1.bf16.msra.mxu1 %v15232_v41  ;;  %4628 = vmatpush1.bf16.msra.mxu0 %v15234_v42  ;;  %v2732_v41 = vld [vmem:[#allocation22 + $0x19f0] sm:$0xff] }
 0xaaf   : > { %4588 = vmatprep.subr.bf16.mxu1 %v15265_v43  ;;  %4629 = vmatprep.subr.bf16.mxu0 %v15267_v44  ;;  %v2748_v42 = vld [vmem:[#allocation22 + $0x1c10] sm:$0xff]  ;;  %v2733_v43 = vld [vmem:[#allocation22 + $0x19f8] sm:$0xff] }
 0xab0   : > { %v2749_v44 = vld [vmem:[#allocation22 + $0x1c18] sm:$0xff]  ;;  %v15237_v47 = vcombine.high %v2732_v41, %v2748_v42  ;;  %v15236_v57 = vcombine.low %v2732_v41, %v2748_v42 }
 0xab1   : > { %v15239_v48 = vcombine.high %v2733_v43, %v2749_v44  ;;  %v15238_v58 = vcombine.low %v2733_v43, %v2749_v44 }
 0xab2   : > { %4589 = vmatpush1.bf16.msra.mxu1 %v15264_v50  ;;  %4630 = vmatpush1.bf16.msra.mxu0 %v15266_v52  ;;  %v2764_v50 = vld [vmem:[#allocation22 + $0x1e30] sm:$0xff] }
 0xab3   : > { %4656 = vmatprep.subr.bf16.mxu1 %v15045_v55  ;;  %4697 = vmatprep.subr.bf16.mxu0 %v15047_v56  ;;  %v2780_v52 = vld [vmem:[#allocation22 + $0x2050] sm:$0xff]  ;;  %v2765_v55 = vld [vmem:[#allocation22 + $0x1e38] sm:$0xff] }
 0xab4   : > { %v2781_v56 = vld [vmem:[#allocation22 + $0x2058] sm:$0xff]  ;;  %v15269_v60 = vcombine.high %v2764_v50, %v2780_v52  ;;  %v15268_v7 = vcombine.low %v2764_v50, %v2780_v52 }
 0xab5   : > { %4607 = vmatmul.mubr.bf16.vlgmr.msra.gmra.mrb[52].mxu1 %v19073_v9  ;;  %4648 = vmatmul.mubr.bf16.vlgmr.msra.gmra.mrb[48].mxu0 %v19073_v9  ;;  %v15271_v61 = vcombine.high %v2765_v55, %v2781_v56  ;;  %v15270_v8 = vcombine.low %v2765_v55, %v2781_v56 }
 0xab6   : > { %4657 = vmatpush1.bf16.msra.mxu1 %v15044_v62  ;;  %4698 = vmatpush1.bf16.msra.mxu0 %v15046_v3  ;;  %v2542_v62 = vld [vmem:[#allocation22 + $0x80] sm:$0xff] }
 0xab7   : > { %4658 = vmatprep.subr.bf16.mxu1 %v15077_v4  ;;  %4699 = vmatprep.subr.bf16.mxu0 %v15079_v6  ;;  %v2558_v3 = vld [vmem:[#allocation22 + $0x2a0] sm:$0xff]  ;;  %v2543_v4 = vld [vmem:[#allocation22 + $0x88] sm:$0xff] }
 0xab8   : > { %4688 = vmatprep.mubr.bf16.mxu1 %v18389_v0  ;;  %4729 = vmatprep.mubr.bf16.mxu0 %v18389_v0  ;;  %v2559_v6 = vld [vmem:[#allocation22 + $0x2a8] sm:$0xff]  ;;  %v15049_v10 = vcombine.high %v2542_v62, %v2558_v3  ;;  %v15048_v16 = vcombine.low %v2542_v62, %v2558_v3 }
 0xab9   : > { %v15051_v11 = vcombine.high %v2543_v4, %v2559_v6  ;;  %v15050_v17 = vcombine.low %v2543_v4, %v2559_v6 }
 0xaba   : > { %4659 = vmatpush1.bf16.msra.mxu1 %v15076_v12  ;;  %4700 = vmatpush1.bf16.msra.mxu0 %v15078_v13  ;;  %v2574_v12 = vld [vmem:[#allocation22 + $0x4c0] sm:$0xff] }
 0xabb   : > { %4660 = vmatprep.subr.bf16.mxu1 %v15109_v14  ;;  %4701 = vmatprep.subr.bf16.mxu0 %v15111_v15  ;;  %v2590_v13 = vld [vmem:[#allocation22 + $0x6e0] sm:$0xff]  ;;  %v2575_v14 = vld [vmem:[#allocation22 + $0x4c8] sm:$0xff] }
 0xabc   : > { %v2591_v15 = vld [vmem:[#allocation22 + $0x6e8] sm:$0xff]  ;;  %v15081_v19 = vcombine.high %v2574_v12, %v2590_v13  ;;  %v15080_v25 = vcombine.low %v2574_v12, %v2590_v13 }
 0xabd   : > { %v15083_v20 = vcombine.high %v2575_v14, %v2591_v15  ;;  %v15082_v26 = vcombine.low %v2575_v14, %v2591_v15 }
 0xabe   : > { %4661 = vmatpush1.bf16.msra.mxu1 %v15108_v21  ;;  %4702 = vmatpush1.bf16.msra.mxu0 %v15110_v22  ;;  %v2606_v21 = vld [vmem:[#allocation22 + $0x900] sm:$0xff] }
 0xabf   : > { %4662 = vmatprep.subr.bf16.mxu1 %v15141_v23  ;;  %4703 = vmatprep.subr.bf16.mxu0 %v15143_v24  ;;  %v2622_v22 = vld [vmem:[#allocation22 + $0xb20] sm:$0xff]  ;;  %v2607_v23 = vld [vmem:[#allocation22 + $0x908] sm:$0xff] }
 0xac0   : > { %v2623_v24 = vld [vmem:[#allocation22 + $0xb28] sm:$0xff]  ;;  %v15113_v27 = vcombine.high %v2606_v21, %v2622_v22  ;;  %v15112_v33 = vcombine.low %v2606_v21, %v2622_v22 }
 0xac1   : > { %v15115_v28 = vcombine.high %v2607_v23, %v2623_v24  ;;  %v15114_v34 = vcombine.low %v2607_v23, %v2623_v24 }
 0xac2   : > { %4663 = vmatpush1.bf16.msra.mxu1 %v15140_v29  ;;  %4704 = vmatpush1.bf16.msra.mxu0 %v15142_v30  ;;  %v2638_v29 = vld [vmem:[#allocation22 + $0xd40] sm:$0xff] }
 0xac3   : > { %4664 = vmatprep.subr.bf16.mxu1 %v15173_v31  ;;  %4705 = vmatprep.subr.bf16.mxu0 %v15175_v32  ;;  %v2654_v30 = vld [vmem:[#allocation22 + $0xf60] sm:$0xff]  ;;  %v2639_v31 = vld [vmem:[#allocation22 + $0xd48] sm:$0xff] }
 0xac4   : > { %v2655_v32 = vld [vmem:[#allocation22 + $0xf68] sm:$0xff]  ;;  %v15145_v35 = vcombine.high %v2638_v29, %v2654_v30  ;;  %v15144_v41 = vcombine.low %v2638_v29, %v2654_v30 }
 0xac5   : > { %v15147_v36 = vcombine.high %v2639_v31, %v2655_v32  ;;  %v15146_v42 = vcombine.low %v2639_v31, %v2655_v32 }
 0xac6   : > { %4665 = vmatpush1.bf16.msra.mxu1 %v15172_v37  ;;  %4706 = vmatpush1.bf16.msra.mxu0 %v15174_v38  ;;  %v2670_v37 = vld [vmem:[#allocation22 + $0x1180] sm:$0xff] }
 0xac7   : > { %4666 = vmatprep.subr.bf16.mxu1 %v15205_v39  ;;  %4707 = vmatprep.subr.bf16.mxu0 %v15207_v40  ;;  %v2686_v38 = vld [vmem:[#allocation22 + $0x13a0] sm:$0xff]  ;;  %v2671_v39 = vld [vmem:[#allocation22 + $0x1188] sm:$0xff] }
 0xac8   : > { %v2687_v40 = vld [vmem:[#allocation22 + $0x13a8] sm:$0xff]  ;;  %v15177_v43 = vcombine.high %v2670_v37, %v2686_v38  ;;  %v15176_v50 = vcombine.low %v2670_v37, %v2686_v38 }
 0xac9   : > { %v15179_v44 = vcombine.high %v2671_v39, %v2687_v40  ;;  %v15178_v52 = vcombine.low %v2671_v39, %v2687_v40 }
 0xaca   : > { %4667 = vmatpush1.bf16.msra.mxu1 %v15204_v45  ;;  %4708 = vmatpush1.bf16.msra.mxu0 %v15206_v46  ;;  %v2702_v45 = vld [vmem:[#allocation22 + $0x15c0] sm:$0xff] }
 0xacb   : > { %4668 = vmatprep.subr.bf16.mxu1 %v15237_v47  ;;  %4709 = vmatprep.subr.bf16.mxu0 %v15239_v48  ;;  %v2718_v46 = vld [vmem:[#allocation22 + $0x17e0] sm:$0xff]  ;;  %v2703_v47 = vld [vmem:[#allocation22 + $0x15c8] sm:$0xff] }
 0xacc   : > { %v2719_v48 = vld [vmem:[#allocation22 + $0x17e8] sm:$0xff]  ;;  %v15209_v55 = vcombine.high %v2702_v45, %v2718_v46  ;;  %v15208_v62 = vcombine.low %v2702_v45, %v2718_v46 }
 0xacd   : > { %v15211_v56 = vcombine.high %v2703_v47, %v2719_v48  ;;  %v15210_v3 = vcombine.low %v2703_v47, %v2719_v48 }
 0xace   : > { %4669 = vmatpush1.bf16.msra.mxu1 %v15236_v57  ;;  %4710 = vmatpush1.bf16.msra.mxu0 %v15238_v58  ;;  %v2734_v57 = vld [vmem:[#allocation22 + $0x1a00] sm:$0xff] }
 0xacf   : > { %4670 = vmatprep.subr.bf16.mxu1 %v15269_v60  ;;  %4711 = vmatprep.subr.bf16.mxu0 %v15271_v61  ;;  %v2750_v58 = vld [vmem:[#allocation22 + $0x1c20] sm:$0xff]  ;;  %v2735_v60 = vld [vmem:[#allocation22 + $0x1a08] sm:$0xff] }
 0xad0   : > { %v2751_v61 = vld [vmem:[#allocation22 + $0x1c28] sm:$0xff]  ;;  %v15241_v4 = vcombine.high %v2734_v57, %v2750_v58  ;;  %v15240_v12 = vcombine.low %v2734_v57, %v2750_v58 }
 0xad1   : > { %v15243_v6 = vcombine.high %v2735_v60, %v2751_v61  ;;  %v15242_v13 = vcombine.low %v2735_v60, %v2751_v61  ;;  %v19103_v60 = vld [vmem:[#allocation23 + $0x8] sm:$0xff] }
 0xad2   : > { %4671 = vmatpush1.bf16.msra.mxu1 %v15268_v7  ;;  %4712 = vmatpush1.bf16.msra.mxu0 %v15270_v8  ;;  %v2766_v7 = vld [vmem:[#allocation22 + $0x1e40] sm:$0xff] }
 0xad3   : > { %4738 = vmatprep.subr.bf16.mxu1 %v15049_v10  ;;  %4779 = vmatprep.subr.bf16.mxu0 %v15051_v11  ;;  %v2782_v8 = vld [vmem:[#allocation22 + $0x2060] sm:$0xff]  ;;  %v2767_v10 = vld [vmem:[#allocation22 + $0x1e48] sm:$0xff] }
 0xad4   : > { %v2783_v11 = vld [vmem:[#allocation22 + $0x2068] sm:$0xff]  ;;  %v15273_v14 = vcombine.high %v2766_v7, %v2782_v8  ;;  %v15272_v21 = vcombine.low %v2766_v7, %v2782_v8  ;;  %v2721_v7 = vld [vmem:[#allocation22 + $0x17f8] sm:$0xff]  ;;  %v2790_v8 = vunpack.c.l.bf16 %v19103_v60 }
 0xad5   : > { %4689 = vmatmul.mubr.bf16.vlgmr.msra.gmra.mrb[56].mxu1 %v19073_v9  ;;  %4730 = vmatmul.mubr.bf16.vlgmr.msra.gmra.mrb[52].mxu0 %v19073_v9  ;;  %v15275_v15 = vcombine.high %v2767_v10, %v2783_v11  ;;  %v15274_v22 = vcombine.low %v2767_v10, %v2783_v11 }
 0xad6   : > { %4739 = vmatpush1.bf16.msra.mxu1 %v15048_v16  ;;  %4780 = vmatpush1.bf16.msra.mxu0 %v15050_v17  ;;  %v2544_v16 = vld [vmem:[#allocation22 + $0x90] sm:$0xff] }
 0xad7   : > { %4740 = vmatprep.subr.bf16.mxu1 %v15081_v19  ;;  %4781 = vmatprep.subr.bf16.mxu0 %v15083_v20  ;;  %v2560_v17 = vld [vmem:[#allocation22 + $0x2b0] sm:$0xff]  ;;  %v2545_v19 = vld [vmem:[#allocation22 + $0x98] sm:$0xff] }
 0xad8   : > { %4770 = vmatprep.mubr.bf16.mxu1 %v18389_v0  ;;  %4811 = vmatprep.mubr.bf16.mxu0 %v18389_v0  ;;  %v2561_v20 = vld [vmem:[#allocation22 + $0x2b8] sm:$0xff]  ;;  %v15053_v23 = vcombine.high %v2544_v16, %v2560_v17  ;;  %v15052_v29 = vcombine.low %v2544_v16, %v2560_v17 }
 0xad9   : > { %v15055_v24 = vcombine.high %v2545_v19, %v2561_v20  ;;  %v15054_v30 = vcombine.low %v2545_v19, %v2561_v20  ;;  %v2737_v16 = vld [vmem:[#allocation22 + $0x1a18] sm:$0xff]  ;;  %v4089_v19 = vrot.slane %v2790_v8, %v19024_v63  ;;  %v4097_v20 = vrot.slane %v2790_v8, %v19026_v1 }
 0xada   : > { %4741 = vmatpush1.bf16.msra.mxu1 %v15080_v25  ;;  %4782 = vmatpush1.bf16.msra.mxu0 %v15082_v26  ;;  %v2576_v25 = vld [vmem:[#allocation22 + $0x4d0] sm:$0xff]  ;;  %v2753_v17 = vld [vmem:[#allocation22 + $0x1c38] sm:$0xff] }
 0xadb   : > { %4742 = vmatprep.subr.bf16.mxu1 %v15113_v27  ;;  %4783 = vmatprep.subr.bf16.mxu0 %v15115_v28  ;;  %v2592_v26 = vld [vmem:[#allocation22 + $0x6f0] sm:$0xff]  ;;  %v2577_v27 = vld [vmem:[#allocation22 + $0x4d8] sm:$0xff] }
 0xadc   : > { %v2593_v28 = vld [vmem:[#allocation22 + $0x6f8] sm:$0xff]  ;;  %v15085_v31 = vcombine.high %v2576_v25, %v2592_v26  ;;  %v15084_v37 = vcombine.low %v2576_v25, %v2592_v26  ;;  %v15247_v26 = vcombine.high %v2737_v16, %v2753_v17 }
 0xadd   : > { %v15087_v32 = vcombine.high %v2577_v27, %v2593_v28  ;;  %v15086_v38 = vcombine.low %v2577_v27, %v2593_v28  ;;  %v2768_v27 = vld [vmem:[#allocation22 + $0x1e50] sm:$0xff] }
 0xade   : > { %4743 = vmatpush1.bf16.msra.mxu1 %v15112_v33  ;;  %4784 = vmatpush1.bf16.msra.mxu0 %v15114_v34  ;;  %v2608_v33 = vld [vmem:[#allocation22 + $0x910] sm:$0xff] }
 0xadf   : > { %4744 = vmatprep.subr.bf16.mxu1 %v15145_v35  ;;  %4785 = vmatprep.subr.bf16.mxu0 %v15147_v36  ;;  %v2624_v34 = vld [vmem:[#allocation22 + $0xb30] sm:$0xff]  ;;  %v2609_v35 = vld [vmem:[#allocation22 + $0x918] sm:$0xff] }
 0xae0   : > { %v2625_v36 = vld [vmem:[#allocation22 + $0xb38] sm:$0xff]  ;;  %v15117_v39 = vcombine.high %v2608_v33, %v2624_v34  ;;  %v15116_v45 = vcombine.low %v2608_v33, %v2624_v34 }
 0xae1   : > { %v15119_v40 = vcombine.high %v2609_v35, %v2625_v36  ;;  %v15118_v46 = vcombine.low %v2609_v35, %v2625_v36 }
 0xae2   : > { %4745 = vmatpush1.bf16.msra.mxu1 %v15144_v41  ;;  %4786 = vmatpush1.bf16.msra.mxu0 %v15146_v42  ;;  %v2640_v41 = vld [vmem:[#allocation22 + $0xd50] sm:$0xff] }
 0xae3   : > { %4746 = vmatprep.subr.bf16.mxu1 %v15177_v43  ;;  %4787 = vmatprep.subr.bf16.mxu0 %v15179_v44  ;;  %v2656_v42 = vld [vmem:[#allocation22 + $0xf70] sm:$0xff]  ;;  %v2641_v43 = vld [vmem:[#allocation22 + $0xd58] sm:$0xff] }
 0xae4   : > { %v2657_v44 = vld [vmem:[#allocation22 + $0xf78] sm:$0xff]  ;;  %v15149_v47 = vcombine.high %v2640_v41, %v2656_v42  ;;  %v15148_v57 = vcombine.low %v2640_v41, %v2656_v42  ;;  %v15246_v42 = vcombine.low %v2737_v16, %v2753_v17 }
 0xae5   : > { %v15151_v48 = vcombine.high %v2641_v43, %v2657_v44  ;;  %v15150_v58 = vcombine.low %v2641_v43, %v2657_v44 }
 0xae6   : > { %4747 = vmatpush1.bf16.msra.mxu1 %v15176_v50  ;;  %4788 = vmatpush1.bf16.msra.mxu0 %v15178_v52  ;;  %v2672_v50 = vld [vmem:[#allocation22 + $0x1190] sm:$0xff] }
 0xae7   : > { %4748 = vmatprep.subr.bf16.mxu1 %v15209_v55  ;;  %4789 = vmatprep.subr.bf16.mxu0 %v15211_v56  ;;  %v2688_v52 = vld [vmem:[#allocation22 + $0x13b0] sm:$0xff]  ;;  %v2673_v55 = vld [vmem:[#allocation22 + $0x1198] sm:$0xff] }
 0xae8   : > { %v2689_v56 = vld [vmem:[#allocation22 + $0x13b8] sm:$0xff]  ;;  %v15181_v61 = vcombine.high %v2672_v50, %v2688_v52  ;;  %v15180_v10 = vcombine.low %v2672_v50, %v2688_v52 }
 0xae9   : > { %v15182_v11 = vcombine.low %v2673_v55, %v2689_v56 }
 0xaea   : > { %4749 = vmatpush1.bf16.msra.mxu1 %v15208_v62  ;;  %4790 = vmatpush1.bf16.msra.mxu0 %v15210_v3  ;;  %v15183_v62 = vcombine.high %v2673_v55, %v2689_v56  ;;  %v2704_v3 = vld [vmem:[#allocation22 + $0x15d0] sm:$0xff] }
 0xaeb   : > { %4750 = vmatprep.subr.bf16.mxu1 %v15241_v4  ;;  %4791 = vmatprep.subr.bf16.mxu0 %v15243_v6  ;;  %v2720_v4 = vld [vmem:[#allocation22 + $0x17f0] sm:$0xff]  ;;  %v2705_v6 = vld [vmem:[#allocation22 + $0x15d8] sm:$0xff] }
 0xaee   : > { %4751 = vmatpush1.bf16.msra.mxu1 %v15240_v12  ;;  %4792 = vmatpush1.bf16.msra.mxu0 %v15242_v13  ;;  %v15213_v12 = vcombine.high %v2704_v3, %v2720_v4  ;;  %v15215_v13 = vcombine.high %v2705_v6, %v2721_v7 }
 0xaef   : > { %4752 = vmatprep.subr.bf16.mxu1 %v15273_v14  ;;  %4793 = vmatprep.subr.bf16.mxu0 %v15275_v15  ;;  %v2736_v14 = vld [vmem:[#allocation22 + $0x1a10] sm:$0xff] }
 0xaf0   : > { %v2752_v15 = vld [vmem:[#allocation22 + $0x1c30] sm:$0xff] }
 0xaf1   : > { %v15245_v25 = vcombine.high %v2736_v14, %v2752_v15 }
 0xaf2   : > { %4753 = vmatpush1.bf16.msra.mxu1 %v15272_v21  ;;  %4794 = vmatpush1.bf16.msra.mxu0 %v15274_v22  ;;  %v15212_v21 = vcombine.low %v2704_v3, %v2720_v4  ;;  %v15214_v22 = vcombine.low %v2705_v6, %v2721_v7  ;;  %v5141_v3 = vld [vmem:[#allocation16 + $0x88] sm:$0xff]  ;;  %v5142_v4 = vld [vmem:[#allocation16 + $0x90] sm:$0xff]  ;;  %v5143_v7 = vld [vmem:[#allocation16 + $0x98] sm:$0xff] }
 0xaf3   : > { %4820 = vmatprep.subr.bf16.mxu1 %v15053_v23  ;;  %4861 = vmatprep.subr.bf16.mxu0 %v15055_v24  ;;  %v4093_v23 = vrot.slane %v2790_v8, %v19028_v2  ;;  %v4101_v24 = vrot.slane %v2790_v8, %v19030_v5  ;;  %v17428_v6 = vpack.c.bf16 %v5142_v4, %v5141_v3  ;;  %v5218_v3 = vld [vmem:[#allocation19 + $0x188] sm:$0xff]  ;;  %v5219_v4 = vld [vmem:[#allocation19 + $0x190] sm:$0xff] }
 0xaf5   : > { %4771 = vmatmul.mubr.bf16.vlgmr.msra.gmra.mrb[60].mxu1 %v19073_v9  ;;  %4812 = vmatmul.mubr.bf16.vlgmr.msra.gmra.mrb[56].mxu0 %v19073_v9 }
 0xaf6   : > { %4821 = vmatpush1.bf16.msra.mxu1 %v15052_v29  ;;  %4862 = vmatpush1.bf16.msra.mxu0 %v15054_v30  ;;  %v2784_v30 = vld [vmem:[#allocation22 + $0x2070] sm:$0xff] }
 0xaf7   : > { %4822 = vmatprep.subr.bf16.mxu1 %v15085_v31  ;;  %4863 = vmatprep.subr.bf16.mxu0 %v15087_v32  ;;  %v2769_v31 = vld [vmem:[#allocation22 + $0x1e58] sm:$0xff]  ;;  %v15276_v50 = vcombine.low %v2768_v27, %v2784_v30 }
 0xaf8   : > { %4852 = vmatprep.mubr.bf16.mxu1 %v18389_v0  ;;  %4893 = vmatprep.mubr.bf16.mxu0 %v18389_v0  ;;  %v2785_v32 = vld [vmem:[#allocation22 + $0x2078] sm:$0xff] }
 0xaf9   : > { %v15278_v56 = vcombine.low %v2769_v31, %v2785_v32 }
 0xafa   : > { %4823 = vmatpush1.bf16.msra.mxu1 %v15084_v37  ;;  %4864 = vmatpush1.bf16.msra.mxu0 %v15086_v38  ;;  %v15244_v37 = vcombine.low %v2736_v14, %v2752_v15 }
 0xafb   : > { %4824 = vmatprep.subr.bf16.mxu1 %v15117_v39  ;;  %4865 = vmatprep.subr.bf16.mxu0 %v15119_v40 }
 0xafe   : > { %4825 = vmatpush1.bf16.msra.mxu1 %v15116_v45  ;;  %4866 = vmatpush1.bf16.msra.mxu0 %v15118_v46  ;;  %v15277_v45 = vcombine.high %v2768_v27, %v2784_v30  ;;  %v15279_v46 = vcombine.high %v2769_v31, %v2785_v32 }
 0xaff   : > { %4826 = vmatprep.subr.bf16.mxu1 %v15149_v47  ;;  %4867 = vmatprep.subr.bf16.mxu0 %v15151_v48 }
 0xb02   : > { %4827 = vmatpush1.bf16.msra.mxu1 %v15148_v57  ;;  %4868 = vmatpush1.bf16.msra.mxu0 %v15150_v58  ;;  %v5139_v57 = vld [vmem:[#allocation16 + $0x78] sm:$0xff]  ;;  %v5140_v58 = vld [vmem:[#allocation16 + $0x80] sm:$0xff] }
 0xb03   : > { %4828 = vmatprep.subr.bf16.mxu1 %v15181_v61  ;;  %4869 = vmatprep.subr.bf16.mxu0 %v15183_v62  ;;  %v17425_v62 = vpack.c.bf16 %v5140_v58, %v5139_v57 }
 0xb06   : > { %4829 = vmatpush1.bf16.msra.mxu1 %v15180_v10  ;;  %4870 = vmatpush1.bf16.msra.mxu0 %v15182_v11 }
 0xb07   : > { %4830 = vmatprep.subr.bf16.mxu1 %v15213_v12  ;;  %4871 = vmatprep.subr.bf16.mxu0 %v15215_v13 }
 0xb08   : > { %v4280_v28 = vpop.f32.mrb[36].mxu1  ;;  %v4321_v29 = vpop.f32.mrb[32].mxu0 }
 0xb09   : > { %v4281_v33 = vadd.f32 %v4280_v28, %v4089_v19  ;;  %v4322_v34 = vadd.f32 %v4321_v29, %v4097_v20  ;;  %v4282_v35 = vpop.f32.mrb[37].mxu1  ;;  %v4323_v36 = vpop.f32.mrb[33].mxu0 }
 0xb0a   : > { %v4283_v38 = vadd.f32 %v4282_v35, %v4093_v23  ;;  %v4324_v39 = vadd.f32 %v4323_v36, %v4101_v24  ;;  %4831 = vmatpush1.bf16.msra.mxu1 %v15212_v21  ;;  %4872 = vmatpush1.bf16.msra.mxu0 %v15214_v22  ;;  %v4284_v40 = vpop.f32.mrb[38].mxu1  ;;  %v4325_v41 = vpop.f32.mrb[34].mxu0 }
 0xb0b   : > { %v4285_v43 = vpop.f32.mrb[39].mxu1  ;;  %v4326_v44 = vpop.f32.mrb[35].mxu0  ;;  %4832 = vmatprep.subr.bf16.mxu1 %v15245_v25  ;;  %4873 = vmatprep.subr.bf16.mxu0 %v15247_v26 }
 0xb0c   : > { %v4934_v47 = vcombine.low %v4281_v33, %v4283_v38  ;;  %v4935_v48 = vcombine.low %v4322_v34, %v4324_v39  ;;  %v2787_v33 = vld [vmem:[#allocation23 + $0x10] sm:$0xff] }
 0xb0d   : > { %v2792_v34 = vunpack.c.l.bf16 %v2787_v33 }
 0xb0e   : > { %v4944_v52 = vrot.slane %v4934_v47, %v19036_v18  ;;  %v4951_v55 = vrot.slane %v4935_v48, %v19036_v18  ;;  %4833 = vmatpush1.bf16.msra.mxu1 %v15244_v37  ;;  %4874 = vmatpush1.bf16.msra.mxu0 %v15246_v42 }
 0xb0f   : > { %4834 = vmatprep.subr.bf16.mxu1 %v15277_v45  ;;  %4875 = vmatprep.subr.bf16.mxu0 %v15279_v46  ;;  %v4121_v35 = vrot.slane %v2792_v34, %v19024_v63  ;;  %v4129_v36 = vrot.slane %v2792_v34, %v19026_v1  ;;  %v4125_v37 = vrot.slane %v2792_v34, %v19028_v2 }
 0xb10   : > { %v4966_v61 = vcombine.low %v4944_v52, %v4951_v55  ;;  %v4133_v38 = vrot.slane %v2792_v34, %v19030_v5 }
 0xb12   : > { %4835 = vmatpush1.bf16.msra.mxu1 %v15276_v50  ;;  %4876 = vmatpush1.bf16.msra.mxu0 %v15278_v56  ;;  %v4974_v30 = vrot.slane %v4966_v61, %v19036_v18 }
 0xb13   : > { %17424 = vmatprep.subr.bf16.mxu0 %v18385_v53  ;;  %17430 = vmatprep.subr.bf16.mxu1 %v18385_v53 }
 0xb15   : > { %4853 = vmatmul.mubr.bf16.vlgmr.msra.gmra.mrb[64].mxu1 %v19073_v9  ;;  %4894 = vmatmul.mubr.bf16.vlgmr.msra.gmra.mrb[60].mxu0 %v19073_v9  ;;  %v2791_v9 = vunpack.c.h.bf16 %v19103_v60 }
 0xb16   : > { %17426 = vmatpush3.bf16.msra.mxu0 %v17425_v62  ;;  %16820 = vmatprep.mubr.msk.f32.mxu0 %vm18386_vm3, %v18387_v54  ;;  %v5217_v62 = vld [vmem:[#allocation19 + $0x180] sm:$0xff] }
 0xb17   : > { %17427 = vmatprep.subr.bf16.mxu0 %v18385_v53  ;;  %16855 = vmatprep.mubr.msk.f32.mxu1 %vm18386_vm3, %v18387_v54  ;;  %v4105_v8 = vrot.slane %v2791_v9, %v19024_v63  ;;  %v4113_v10 = vrot.slane %v2791_v9, %v19026_v1  ;;  %v4109_v11 = vrot.slane %v2791_v9, %v19028_v2 }
 0xb18   : > { %v4117_v12 = vrot.slane %v2791_v9, %v19030_v5 }
 0xb1a   : > { %17429 = vmatpush3.bf16.msra.mxu0 %v17428_v6  ;;  %v17431_v6 = vpack.c.bf16 %v5218_v3, %v5217_v62  ;;  %v5308_v62 = vld [vmem:[#allocation22 + $0x450] sm:$0xf] }
 0xb1b   : > { %16818 = vmatprep.subr.mxu0 %v18387_v54  ;;  %v5309_v3 = vld [vmem:[#allocation22 + $0x670] sm:$0xf] }
 0xb1c   : > { %17432 = vmatpush3.bf16.msra.mxu1 %v17431_v6  ;;  %v5311_v6 = vld [vmem:[#allocation22 + $0xab0] sm:$0xf] }
 0xb1d   : > { %17433 = vmatprep.subr.bf16.mxu1 %v18385_v53 }
 0xb1e   : > { %16819 = vmatpush3.msra.mxu0 %v5143_v7  ;;  %v5220_v7 = vld [vmem:[#allocation19 + $0x198] sm:$0xff] }
 0xb1f   : > { %16821 = vmatmul.mubr.msk.f32.vlgmr.msra.gmra.mrb[64].mxu0 %vm1590_vm5, %v18986_v49  ;;  %16858 = vmatprep.subr.bf16.mxu0 %v18387_v54  ;;  %v17434_v9 = vpack.c.bf16 %v5220_v7, %v5219_v4  ;;  %v5310_v4 = vld [vmem:[#allocation22 + $0x890] sm:$0xf] }
 0xb20   : > { %16874 = vmatprep.mubr.msk.bf16.mxu0 %vm18386_vm3, %v18387_v54  ;;  %v5312_v7 = vld [vmem:[#allocation22 + $0xcd0] sm:$0xf] }
 0xb21   : > { %17435 = vmatpush3.bf16.msra.mxu1 %v17434_v9  ;;  %v5313_v9 = vld [vmem:[#allocation22 + $0xef0] sm:$0xf] }
 0xb22   : > { %17436 = vmatprep.subr.bf16.mxu1 %v18385_v53 }
 0xb28   : > { %v4362_v13 = vpop.f32.mrb[40].mxu1  ;;  %v4403_v14 = vpop.f32.mrb[36].mxu0 }
 0xb29   : > { %v4363_v15 = vadd.f32 %v4362_v13, %v4105_v8  ;;  %v4404_v16 = vadd.f32 %v4403_v14, %v4113_v10  ;;  %v4364_v17 = vpop.f32.mrb[41].mxu1  ;;  %v4405_v19 = vpop.f32.mrb[37].mxu0  ;;  %v5221_v8 = vld [vmem:[#allocation19 + $0x1a0] sm:$0xff]  ;;  %v5222_v10 = vld [vmem:[#allocation19 + $0x1a8] sm:$0xff]  ;;  %v5224_v13 = vld [vmem:[#allocation19 + $0x1b8] sm:$0xff] }
 0xb2a   : > { %v4365_v20 = vadd.f32 %v4364_v17, %v4109_v11  ;;  %v4406_v21 = vadd.f32 %v4405_v19, %v4117_v12  ;;  %v4366_v22 = vpop.f32.mrb[42].mxu1  ;;  %v4407_v23 = vpop.f32.mrb[38].mxu0  ;;  %v17437_v11 = vpack.c.bf16 %v5222_v10, %v5221_v8  ;;  %v5223_v12 = vld [vmem:[#allocation19 + $0x1b0] sm:$0xff]  ;;  %v5225_v19 = vld [vmem:[#allocation19 + $0x1c0] sm:$0xff]  ;;  %v15283_v8 = vcombine.low %v5310_v4, %v5311_v6 }
 0xb2b   : > { %v4367_v60 = vpop.f32.mrb[43].mxu1  ;;  %v4408_v24 = vpop.f32.mrb[39].mxu0  ;;  %v17440_v14 = vpack.c.bf16 %v5224_v13, %v5223_v12  ;;  %v5314_v10 = vld [vmem:[#allocation22 + $0x1110] sm:$0xf]  ;;  %v15284_v12 = vcombine.low %v5312_v7, %v5313_v9 }
 0xb2c   : > { %v4936_v25 = vcombine.low %v4363_v15, %v4365_v20  ;;  %v4937_v26 = vcombine.low %v4404_v16, %v4406_v21  ;;  %17438 = vmatpush3.bf16.msra.mxu1 %v17437_v11  ;;  %v2793_v15 = vunpack.c.h.bf16 %v2787_v33  ;;  %v5226_v20 = vld [vmem:[#allocation19 + $0x1c8] sm:$0xff]  ;;  %v5315_v11 = vld [vmem:[#allocation22 + $0x1330] sm:$0xf]  ;;  %5368 = vrot.lane.b32.xlu1 %v15283_v8, %s18391_s23 }
 0xb2d   : > { %17439 = vmatprep.subr.bf16.mxu1 %v18385_v53  ;;  %v17443_v23 = vpack.c.bf16 %v5226_v20, %v5225_v19  ;;  %v5316_v13 = vld [vmem:[#allocation22 + $0x1550] sm:$0xf] }
 0xb2e   : > { %v4958_v27 = vrot.slane %v4936_v25, %v19036_v18  ;;  %v4965_v28 = vrot.slane %v4937_v26, %v19036_v18  ;;  %v4137_v16 = vrot.slane %v2793_v15, %v19024_v63  ;;  %v4145_v17 = vrot.slane %v2793_v15, %v19026_v1  ;;  %v5319_v19 = vld [vmem:[#allocation22 + $0x1bb0] sm:$0xf] }
 0xb2f   : > { %v4141_v21 = vrot.slane %v2793_v15, %v19028_v2  ;;  %v4149_v22 = vrot.slane %v2793_v15, %v19030_v5  ;;  %v2788_v15 = vld [vmem:[#allocation23 + $0x18] sm:$0xff] }
 0xb30   : > { %v4967_v29 = vcombine.low %v4958_v27, %v4965_v28  ;;  %17441 = vmatpush3.bf16.msra.mxu1 %v17440_v14  ;;  %v5317_v14 = vld [vmem:[#allocation22 + $0x1770] sm:$0xf]  ;;  %5370 = vrot.lane.b32.xlu1 %v15284_v12, %s18391_s23 }
 0xb31   : > { %17442 = vmatprep.subr.bf16.mxu1 %v18385_v53  ;;  %v15286_v20 = vcombine.low %v5316_v13, %v5317_v14 }
 0xb32   : > { %v4981_v31 = vrot.slane %v4967_v29, %v19036_v18  ;;  %v5227_v29 = vld [vmem:[#allocation19 + $0x1d0] sm:$0xff] }
 0xb34   : > { %v4982_v32 = vcombine.low %v4974_v30, %v4981_v31  ;;  %17444 = vmatpush3.bf16.msra.mxu1 %v17443_v23  ;;  %v5228_v30 = vld [vmem:[#allocation19 + $0x1d8] sm:$0xff]  ;;  %v5321_v23 = vld [vmem:[#allocation22 + $0x1ff0] sm:$0xf]  ;;  %5374 = vrot.lane.b32.xlu1 %v15286_v20, %s18391_s23 }
 0xb35   : > { %17445 = vmatprep.subr.bf16.mxu1 %v18385_v53 }
 0xb36   : > { %5134 = vst [vmem:[%s19043_s30 + $0x8] sm:$0xff] %v4982_v32 }
 0xb48   : > { %v4444_v39 = vpop.f32.mrb[44].mxu1  ;;  %v4485_v40 = vpop.f32.mrb[40].mxu0 }
 0xb49   : > { %v4445_v41 = vadd.f32 %v4444_v39, %v4121_v35  ;;  %v4486_v42 = vadd.f32 %v4485_v40, %v4129_v36  ;;  %v4446_v43 = vpop.f32.mrb[45].mxu1  ;;  %v4487_v44 = vpop.f32.mrb[41].mxu0  ;;  %v17446_v35 = vpack.c.bf16 %v5228_v30, %v5227_v29  ;;  %v5229_v40 = vld [vmem:[#allocation19 + $0x1e0] sm:$0xff] }
 0xb4a   : > { %v4447_v45 = vadd.f32 %v4446_v43, %v4125_v37  ;;  %v4488_v46 = vadd.f32 %v4487_v44, %v4133_v38  ;;  %v4448_v47 = vpop.f32.mrb[46].mxu1  ;;  %v4489_v48 = vpop.f32.mrb[42].mxu0 }
 0xb4b   : > { %v4449_v50 = vpop.f32.mrb[47].mxu1  ;;  %v4490_v52 = vpop.f32.mrb[43].mxu0  ;;  %17447 = vmatpush3.bf16.msra.mxu1 %v17446_v35  ;;  %v5232_v47 = vld [vmem:[#allocation19 + $0x1f8] sm:$0xff] }
 0xb4c   : > { %v4983_v55 = vcombine.low %v4445_v41, %v4447_v45  ;;  %v4984_v56 = vcombine.low %v4486_v42, %v4488_v46  ;;  %17448 = vmatprep.subr.bf16.mxu1 %v18385_v53  ;;  %v5230_v41 = vld [vmem:[#allocation19 + $0x1e8] sm:$0xff]  ;;  %v5231_v46 = vld [vmem:[#allocation19 + $0x1f0] sm:$0xff] }
 0xb4d   : > { %v17449_v44 = vpack.c.bf16 %v5230_v41, %v5229_v40  ;;  %v17452_v52 = vpack.c.bf16 %v5232_v47, %v5231_v46  ;;  %v2795_v46 = vunpack.c.h.bf16 %v2788_v15 }
 0xb4e   : > { %v19142_v57 = vrot.slane %v4983_v55, %v19036_v18  ;;  %v5000_v58 = vrot.slane %v4984_v56, %v19036_v18  ;;  %v5306_v56 = vld [vmem:[#allocation22 + $0x10] sm:$0xf] }
 0xb4f   : > { %17450 = vmatpush3.bf16.msra.mxu1 %v17449_v44  ;;  %v4169_v47 = vrot.slane %v2795_v46, %v19024_v63 }
 0xb50   : > { %v5015_v61 = vcombine.low %v19142_v57, %v5000_v58  ;;  %17451 = vmatprep.subr.bf16.mxu1 %v18385_v53  ;;  %v5307_v57 = vld [vmem:[#allocation22 + $0x230] sm:$0xf] }
 0xb51   : > { %v15281_v58 = vcombine.low %v5306_v56, %v5307_v57 }
 0xb52   : > { %v5023_v48 = vrot.slane %v5015_v61, %v19036_v18  ;;  %v15282_v61 = vcombine.low %v5308_v62, %v5309_v3 }
 0xb53   : > { %17453 = vmatpush3.bf16.msra.mxu1 %v17452_v52  ;;  %5364 = vrot.lane.b32.xlu0 %v15281_v58, %s18391_s23  ;;  %v4181_v52 = vrot.slane %v2795_v46, %v19030_v5 }
 0xb54   : > { %17460 = vmatprep.subr.bf16.mxu1 %v18385_v53 }
 0xb57   : > { %5366 = vrot.lane.b32.xlu0 %v15282_v61, %s18391_s23 }
 0xb68   : > { %v4526_v60 = vpop.f32.mrb[48].mxu1  ;;  %v4567_v24 = vpop.f32.mrb[44].mxu0 }
 0xb69   : > { %v4527_v25 = vadd.f32 %v4526_v60, %v4137_v16  ;;  %v4568_v26 = vadd.f32 %v4567_v24, %v4145_v17  ;;  %v4528_v27 = vpop.f32.mrb[49].mxu1  ;;  %v4569_v28 = vpop.f32.mrb[45].mxu0  ;;  %v15285_v16 = vcombine.low %v5314_v10, %v5315_v11  ;;  %v5318_v17 = vld [vmem:[#allocation22 + $0x1990] sm:$0xf] }
 0xb6a   : > { %v4529_v31 = vadd.f32 %v4528_v27, %v4141_v21  ;;  %v4570_v32 = vadd.f32 %v4569_v28, %v4149_v22  ;;  %v4530_v33 = vpop.f32.mrb[50].mxu1  ;;  %v4571_v34 = vpop.f32.mrb[46].mxu0  ;;  %v2794_v21 = vunpack.c.l.bf16 %v2788_v15  ;;  %v5320_v22 = vld [vmem:[#allocation22 + $0x1dd0] sm:$0xf]  ;;  %v15287_v60 = vcombine.low %v5318_v17, %v5319_v19  ;;  %v2789_v19 = vld [vmem:[#allocation23 + $0x20] sm:$0xff] }
 0xb6b   : > { %v4531_v36 = vpop.f32.mrb[51].mxu1  ;;  %v4572_v37 = vpop.f32.mrb[47].mxu0  ;;  %5372 = vrot.lane.b32.xlu0 %v15285_v16, %s18391_s23  ;;  %v15288_v24 = vcombine.low %v5320_v22, %v5321_v23  ;;  %v2796_v20 = vunpack.c.l.bf16 %v2789_v19 }
 0xb6c   : > { %v4985_v38 = vcombine.low %v4527_v25, %v4529_v31  ;;  %v4986_v39 = vcombine.low %v4568_v26, %v4570_v32  ;;  %v4153_v25 = vrot.slane %v2794_v21, %v19024_v63  ;;  %v4161_v26 = vrot.slane %v2794_v21, %v19026_v1 }
 0xb6d   : > { %v4157_v27 = vrot.slane %v2794_v21, %v19028_v2  ;;  %v4165_v28 = vrot.slane %v2794_v21, %v19030_v5  ;;  %5378 = vrot.lane.b32.xlu1 %v15288_v24, %s18391_s23  ;;  %v4185_v21 = vrot.slane %v2796_v20, %v19024_v63  ;;  %v4193_v22 = vrot.slane %v2796_v20, %v19026_v1 }
 0xb6e   : > { %v5007_v42 = vrot.slane %v4985_v38, %v19036_v18  ;;  %v5014_v43 = vrot.slane %v4986_v39, %v19036_v18  ;;  %v4189_v23 = vrot.slane %v2796_v20, %v19028_v2 }
 0xb6f   : > { %5376 = vrot.lane.b32.xlu0 %v15287_v60, %s18391_s23  ;;  %v4197_v60 = vrot.slane %v2796_v20, %v19030_v5 }
 0xb70   : > { %v5016_v45 = vcombine.low %v5007_v42, %v5014_v43 }
 0xb72   : > { %v5030_v50 = vrot.slane %v5016_v45, %v19036_v18 }
 0xb74   : > { %v5031_v55 = vcombine.low %v5023_v48, %v5030_v50  ;;  %v4177_v48 = vrot.slane %v2795_v46, %v19026_v1  ;;  %v4173_v50 = vrot.slane %v2795_v46, %v19028_v2 }
 0xb76   : > { %5135 = vst [vmem:[%s19043_s30 + $0x10] sm:$0xff] %v5031_v55 }
 0xb88   : > { %v4608_v29 = vpop.f32.mrb[52].mxu1  ;;  %v4649_v30 = vpop.f32.mrb[48].mxu0 }
 0xb89   : > { %v4609_v31 = vadd.f32 %v4608_v29, %v4153_v25  ;;  %v4650_v32 = vadd.f32 %v4649_v30, %v4161_v26  ;;  %v4610_v33 = vpop.f32.mrb[53].mxu1  ;;  %v4651_v34 = vpop.f32.mrb[49].mxu0 }
 0xb8a   : > { %v4611_v35 = vadd.f32 %v4610_v33, %v4157_v27  ;;  %v4652_v36 = vadd.f32 %v4651_v34, %v4165_v28  ;;  %v4612_v37 = vpop.f32.mrb[54].mxu1  ;;  %v4653_v38 = vpop.f32.mrb[50].mxu0 }
 0xb8b   : > { %v4613_v39 = vpop.f32.mrb[55].mxu1  ;;  %v4654_v40 = vpop.f32.mrb[51].mxu0 }
 0xb8c   : > { %v5032_v41 = vcombine.low %v4609_v31, %v4611_v35  ;;  %v5033_v42 = vcombine.low %v4650_v32, %v4652_v36 }
 0xb8e   : > { %v5042_v43 = vrot.slane %v5032_v41, %v19036_v18  ;;  %v5049_v44 = vrot.slane %v5033_v42, %v19036_v18  ;;  %v2797_v41 = vunpack.c.h.bf16 %v2789_v19 }
 0xb90   : > { %v5064_v45 = vcombine.low %v5042_v43, %v5049_v44  ;;  %v4201_v42 = vrot.slane %v2797_v41, %v19024_v63  ;;  %v4209_v43 = vrot.slane %v2797_v41, %v19026_v1  ;;  %v4205_v44 = vrot.slane %v2797_v41, %v19028_v2 }
 0xb92   : > { %v5072_v15 = vrot.slane %v5064_v45, %v19036_v18  ;;  %v4213_v45 = vrot.slane %v2797_v41, %v19030_v5  ;;  %v11455_v41 = vld [vmem:[#allocation22 + $0x454] sm:$0xf] }
 0xba8   : > { %v4690_v55 = vpop.f32.mrb[56].mxu1  ;;  %v4731_v56 = vpop.f32.mrb[52].mxu0 }
 0xba9   : > { %v4691_v57 = vadd.f32 %v4690_v55, %v4169_v47  ;;  %v4732_v58 = vadd.f32 %v4731_v56, %v4177_v48  ;;  %v4692_v62 = vpop.f32.mrb[57].mxu1  ;;  %v4733_v3 = vpop.f32.mrb[53].mxu0 }
 0xbaa   : > { %v4693_v4 = vadd.f32 %v4692_v62, %v4173_v50  ;;  %v4734_v6 = vadd.f32 %v4733_v3, %v4181_v52  ;;  %v4694_v7 = vpop.f32.mrb[58].mxu1  ;;  %v4735_v9 = vpop.f32.mrb[54].mxu0 }
 0xbab   : > { %v4695_v61 = vpop.f32.mrb[59].mxu1  ;;  %v4736_v8 = vpop.f32.mrb[55].mxu0 }
 0xbac   : > { %v5034_v10 = vcombine.low %v4691_v57, %v4693_v4  ;;  %v5035_v11 = vcombine.low %v4732_v58, %v4734_v6 }
 0xbae   : > { %v5056_v12 = vrot.slane %v5034_v10, %v19036_v18  ;;  %v5063_v13 = vrot.slane %v5035_v11, %v19036_v18  ;;  %v5144_v11 = vld [vmem:[#allocation17 + $0x3] sm:$0x1] }
 0xbb0   : > { %v5065_v14 = vcombine.low %v5056_v12, %v5063_v13  ;;  %v5369_v13 = vpop.permute.xlu1 %5368 }
 0xbb2   : > { %v5079_v16 = vrot.slane %v5065_v14, %v19036_v18 }
 0xbb4   : > { %v5080_v17 = vcombine.low %v5072_v15, %v5079_v16 }
 0xbb6   : > { %5136 = vst [vmem:[%s19043_s30 + $0x18] sm:$0xff] %v5080_v17 }
 0xbc5   : > { %v5365_v9 = vpop.permute.xlu0 %5364 }
 0xbc6   : > { %16859 = vmatpush3.bf16.msra.mxu0 %v5365_v9 }
 0xbc7   : > { %16860 = vmatprep.subr.bf16.mxu0 %v18387_v54 }
 0xbc8   : > { %v4772_v24 = vpop.f32.mrb[60].mxu1  ;;  %v4813_v25 = vpop.f32.mrb[56].mxu0 }
 0xbc9   : > { %v4773_v26 = vadd.f32 %v4772_v24, %v4185_v21  ;;  %v4814_v27 = vadd.f32 %v4813_v25, %v4193_v22  ;;  %v4774_v28 = vpop.f32.mrb[61].mxu1  ;;  %v4815_v29 = vpop.f32.mrb[57].mxu0 }
 0xbca   : > { %v4775_v30 = vadd.f32 %v4774_v28, %v4189_v23  ;;  %v4816_v31 = vadd.f32 %v4815_v29, %v4197_v60  ;;  %v4776_v32 = vpop.f32.mrb[62].mxu1  ;;  %v4817_v33 = vpop.f32.mrb[58].mxu0  ;;  %v11457_v28 = vld [vmem:[#allocation22 + $0x894] sm:$0xf] }
 0xbcb   : > { %v4777_v34 = vpop.f32.mrb[63].mxu1  ;;  %v4818_v35 = vpop.f32.mrb[59].mxu0  ;;  %v11462_v32 = vld [vmem:[#allocation22 + $0x1334] sm:$0xf]  ;;  %v5322_v33 = vld [vmem:[#allocation23 + $0x4] sm:$0x1] }
 0xbcc   : > { %v5081_v36 = vcombine.low %v4773_v26, %v4775_v30  ;;  %v5082_v37 = vcombine.low %v4814_v27, %v4816_v31  ;;  %v5367_v12 = vpop.permute.xlu0 %5366  ;;  %v5371_v22 = vpop.permute.xlu1 %5370  ;;  %v11453_v26 = vld [vmem:[#allocation22 + $0x14] sm:$0xf]  ;;  %v11469_v35 = vld [vmem:[#allocation23 + $0x5] sm:$0x1] }
 0xbcd   : > { %16861 = vmatpush3.bf16.msra.mxu0 %v5367_v12  ;;  %v11454_v27 = vld [vmem:[#allocation22 + $0x234] sm:$0xf] }
 0xbce   : > { %v5091_v38 = vrot.slane %v5081_v36, %v19036_v18  ;;  %v5098_v39 = vrot.slane %v5082_v37, %v19036_v18  ;;  %16862 = vmatprep.subr.bf16.mxu0 %v18387_v54  ;;  %v15813_v29 = vcombine.low %v11453_v26, %v11454_v27  ;;  %v11458_v30 = vld [vmem:[#allocation22 + $0xab4] sm:$0xf]  ;;  %v5538_v37 = vld [vmem:[#allocation19 + $0x208] sm:$0xff]  ;;  %v5462_v26 = vld [vmem:[#allocation16 + $0xb8] sm:$0xff] }
 0xbcf   : > { %v11461_v31 = vld [vmem:[#allocation22 + $0x1114] sm:$0xf]  ;;  %v15815_v34 = vcombine.low %v11457_v28, %v11458_v30 }
 0xbd0   : > { %v5113_v40 = vcombine.low %v5091_v38, %v5098_v39  ;;  %v5375_v60 = vpop.permute.xlu1 %5374  ;;  %11511 = vrot.lane.b32.xlu0 %v15813_v29, %s18391_s23  ;;  %v5537_v36 = vld [vmem:[#allocation19 + $0x200] sm:$0xff]  ;;  %v5539_v39 = vld [vmem:[#allocation19 + $0x210] sm:$0xff] }
 0xbd1   : > { %16863 = vmatpush3.bf16.msra.mxu0 %v5369_v13  ;;  %v17461_v38 = vpack.c.bf16 %v5538_v37, %v5537_v36  ;;  %v5545_v13 = vld [vmem:[#allocation19 + $0x240] sm:$0xff]  ;;  %v5550_v36 = vld [vmem:[#allocation19 + $0x268] sm:$0xff] }
 0xbd2   : > { %v5121_v14 = vrot.slane %v5113_v40, %v19036_v18  ;;  %16864 = vmatprep.subr.bf16.mxu0 %v18387_v54  ;;  %v5540_v40 = vld [vmem:[#allocation19 + $0x218] sm:$0xff]  ;;  %v5463_v28 = vld [vmem:[#allocation16 + $0xc0] sm:$0xff] }
 0xbd3   : > { %v11467_v29 = vld [vmem:[#allocation22 + $0x1dd4] sm:$0xf] }
 0xbd4   : > { %11515 = vrot.lane.b32.xlu0 %v15815_v34, %s18391_s23  ;;  %v11468_v30 = vld [vmem:[#allocation22 + $0x1ff4] sm:$0xf] }
 0xbd5   : > { %16865 = vmatpush3.bf16.msra.mxu0 %v5371_v22  ;;  %v5460_v22 = vld [vmem:[#allocation16 + $0xa8] sm:$0xff] }
 0xbd6   : > { %16866 = vmatprep.subr.bf16.mxu0 %v18387_v54 }
 0xbdd   : > { %v5373_v23 = vpop.permute.xlu0 %5372 }
 0xbde   : > { %16867 = vmatpush3.bf16.msra.mxu0 %v5373_v23 }
 0xbdf   : > { %16868 = vmatprep.subr.bf16.mxu0 %v18387_v54  ;;  %v5379_v25 = vpop.permute.xlu1 %5378 }
 0xbe1   : > { %v5377_v24 = vpop.permute.xlu0 %5376 }
 0xbe2   : > { %16869 = vmatpush3.bf16.msra.mxu0 %v5375_v60 }
 0xbe3   : > { %16870 = vmatprep.subr.bf16.mxu0 %v18387_v54 }
 0xbe6   : > { %16871 = vmatpush3.bf16.msra.mxu0 %v5377_v24 }
 0xbe7   : > { %16872 = vmatprep.subr.bf16.mxu0 %v18387_v54 }
 0xbe8   : > { %v4854_v46 = vpop.f32.mrb[64].mxu1  ;;  %v4895_v47 = vpop.f32.mrb[60].mxu0 }
 0xbe9   : > { %v4855_v48 = vadd.f32 %v4854_v46, %v4201_v42  ;;  %v4896_v50 = vadd.f32 %v4895_v47, %v4209_v43  ;;  %v4856_v52 = vpop.f32.mrb[65].mxu1  ;;  %v4897_v55 = vpop.f32.mrb[61].mxu0  ;;  %v11456_v42 = vld [vmem:[#allocation22 + $0x674] sm:$0xf]  ;;  %v17464_v43 = vpack.c.bf16 %v5540_v40, %v5539_v39  ;;  %v15817_v47 = vcombine.low %v11461_v31, %v11462_v32  ;;  %v5547_v31 = vld [vmem:[#allocation19 + $0x250] sm:$0xff]  ;;  %v5552_v39 = vld [vmem:[#allocation19 + $0x278] sm:$0xff] }
 0xbea   : > { %v4857_v56 = vadd.f32 %v4856_v52, %v4205_v44  ;;  %v4898_v57 = vadd.f32 %v4897_v55, %v4213_v45  ;;  %v4858_v58 = vpop.f32.mrb[66].mxu1  ;;  %v4899_v62 = vpop.f32.mrb[62].mxu0  ;;  %16873 = vmatpush3.bf16.msra.mxu0 %v5379_v25  ;;  %v15814_v44 = vcombine.low %v11455_v41, %v11456_v42  ;;  %v11459_v45 = vld [vmem:[#allocation22 + $0xcd4] sm:$0xf]  ;;  %v5542_v55 = vld [vmem:[#allocation19 + $0x228] sm:$0xff]  ;;  %v5461_v25 = vld [vmem:[#allocation16 + $0xb0] sm:$0xff]  ;;  %v15820_v32 = vcombine.low %v11467_v29, %v11468_v30 }
 0xbeb   : > { %v4859_v3 = vpop.f32.mrb[67].mxu1  ;;  %v4900_v4 = vpop.f32.mrb[63].mxu0  ;;  %17454 = vmatprep.subr.bf16.mxu0 %v18385_v53  ;;  %v11460_v46 = vld [vmem:[#allocation22 + $0xef4] sm:$0xf]  ;;  %11519 = vrot.lane.b32.xlu0 %v15817_v47, %s18391_s23  ;;  %v17458_v27 = vpack.c.bf16 %v5462_v26, %v5461_v25  ;;  %v5642_v47 = vld [vmem:[#allocation22 + $0x2c0] sm:$0xff]  ;;  %v5659_v26 = vld [vmem:[#allocation22 + $0x4e8] sm:$0xff] }
 0xbec   : > { %v5083_v6 = vcombine.low %v4855_v48, %v4857_v56  ;;  %v5084_v7 = vcombine.low %v4896_v50, %v4898_v57  ;;  %v5323_v48 = vunpack.c.l.bf16 %v5322_v33  ;;  %v11470_v50 = vunpack.c.l.bf16 %v11469_v35  ;;  %v5541_v52 = vld [vmem:[#allocation19 + $0x220] sm:$0xff]  ;;  %11513 = vrot.lane.b32.xlu1 %v15814_v44, %s18391_s23  ;;  %v5548_v33 = vld [vmem:[#allocation19 + $0x258] sm:$0xff] }
 0xbed   : > { %v11465_v56 = vld [vmem:[#allocation22 + $0x1994] sm:$0xf]  ;;  %v15816_v58 = vcombine.low %v11459_v45, %v11460_v46  ;;  %v17467_v4 = vpack.c.bf16 %v5542_v55, %v5541_v52  ;;  %v17476_v34 = vpack.c.bf16 %v5548_v33, %v5547_v31  ;;  %v5626_v46 = vld [vmem:[#allocation22 + $0xa0] sm:$0xff]  ;;  %v5643_v55 = vld [vmem:[#allocation22 + $0x2c8] sm:$0xff] }
 0xbee   : > { %v5105_v61 = vrot.slane %v5083_v6, %v19036_v18  ;;  %v5112_v8 = vrot.slane %v5084_v7, %v19036_v18  ;;  %v11466_v57 = vld [vmem:[#allocation22 + $0x1bb4] sm:$0xf]  ;;  %v5392_v7 = vrot.slane %v5323_v48, %v19024_v63  ;;  %v11539_v9 = vrot.slane %v11470_v50, %v19024_v63  ;;  %v5627_v48 = vld [vmem:[#allocation22 + $0xa8] sm:$0xff]  ;;  %v5818_v33 = vld [vmem:[#allocation22 + $0x1a20] sm:$0xff] }
 0xbef   : > { %v11463_v62 = vld [vmem:[#allocation22 + $0x1554] sm:$0xf]  ;;  %v15819_v6 = vcombine.low %v11465_v56, %v11466_v57  ;;  %v15290_v50 = vcombine.low %v5626_v46, %v5642_v47  ;;  %v15291_v52 = vcombine.high %v5626_v46, %v5642_v47  ;;  %v5658_v56 = vld [vmem:[#allocation22 + $0x4e0] sm:$0xff] }
 0xbf0   : > { %v5114_v10 = vcombine.low %v5105_v61, %v5112_v8  ;;  %v11464_v3 = vld [vmem:[#allocation22 + $0x1774] sm:$0xf]  ;;  %v5543_v61 = vld [vmem:[#allocation19 + $0x230] sm:$0xff]  ;;  %v5544_v8 = vld [vmem:[#allocation19 + $0x238] sm:$0xff]  ;;  %11517 = vrot.lane.b32.xlu1 %v15816_v58, %s18391_s23  ;;  %v17840_v12 = vpack.i.bf16 %v11539_v9, %v5392_v7  ;;  %v15293_v58 = vcombine.high %v5627_v48, %v5643_v55 }
 0xbf1   : > { %11523 = vrot.lane.b32.xlu0 %v15819_v6, %s18391_s23  ;;  %v5549_v35 = vld [vmem:[#allocation19 + $0x260] sm:$0xff]  ;;  %v5674_v57 = vld [vmem:[#allocation22 + $0x700] sm:$0xff] }
 0xbf2   : > { %v5128_v15 = vrot.slane %v5114_v10, %v19036_v18  ;;  %v5211_v16 = vpop.f32.mrb[64].mxu0  ;;  %v15818_v10 = vcombine.low %v11463_v62, %v11464_v3  ;;  %v17479_v37 = vpack.c.bf16 %v5550_v36, %v5549_v35  ;;  %v15323_v62 = vcombine.high %v5658_v56, %v5674_v57  ;;  %v5690_v3 = vld [vmem:[#allocation22 + $0x920] sm:$0xff] }
 0xbf3   : > { %v5212_v17 = vadd.f32 %v5211_v16, %v5144_v11  ;;  %v16822_v19 = vpop.f32.mrb[65].mxu0  ;;  %v17470_v11 = vpack.c.bf16 %v5544_v8, %v5543_v61  ;;  %v5233_v16 = vld [vmem:[#allocation20 + $0x3] sm:$0x1]  ;;  %v15322_v6 = vcombine.low %v5658_v56, %v5674_v57  ;;  %v5722_v61 = vld [vmem:[#allocation22 + $0xd60] sm:$0xff]  ;;  %v5755_v57 = vld [vmem:[#allocation22 + $0x11a8] sm:$0xff] }
 0xbf4   : > { %v5129_v20 = vcombine.low %v5121_v14, %v5128_v15  ;;  %v5546_v14 = vld [vmem:[#allocation19 + $0x248] sm:$0xff]  ;;  %11521 = vrot.lane.b32.xlu1 %v15818_v10, %s18391_s23  ;;  %v5738_v8 = vld [vmem:[#allocation22 + $0xf80] sm:$0xff] }
 0xbf5   : > { %v5215_v21 = vmax.f32 %v5212_v17, 0.0  ;;  %v17473_v15 = vpack.c.bf16 %v5546_v14, %v5545_v13  ;;  %17841 = vrot.lane.b32.xlu0 %v17840_v12, %s18391_s23 }
 0xbf6   : > { %5137 = vst [vmem:[%s19043_s30 + $0x20] sm:$0xff] %v5129_v20 }
 0xbf7   : > { %16856 = vmatmul.mubr.f32.vlgmr.msra.gmra.mrb[26].mxu1 %v5215_v21  ;;  %v5459_v21 = vld [vmem:[#allocation16 + $0xa0] sm:$0xff] }
 0xbf8   : > { %16923 = vmatprep.mubr.msk.f32.mxu1 %vm18386_vm3, %v18387_v54  ;;  %17462 = vmatpush3.bf16.msra.mxu1 %v17461_v38  ;;  %v17455_v60 = vpack.c.bf16 %v5460_v22, %v5459_v21  ;;  %v5551_v38 = vld [vmem:[#allocation19 + $0x270] sm:$0xff]  ;;  %v15386_v21 = vcombine.low %v5722_v61, %v5738_v8 }
 0xbf9   : > { %17463 = vmatprep.subr.bf16.mxu1 %v18385_v53  ;;  %11525 = vrot.lane.b32.xlu1 %v15820_v32, %s18391_s23  ;;  %v17482_v40 = vpack.c.bf16 %v5552_v39, %v5551_v38  ;;  %v15292_v32 = vcombine.low %v5627_v48, %v5643_v55  ;;  %v5707_v38 = vld [vmem:[#allocation22 + $0xb48] sm:$0xff] }
 0xbfc   : > { %17465 = vmatpush3.bf16.msra.mxu1 %v17464_v43 }
 0xbfd   : > { %17466 = vmatprep.subr.bf16.mxu1 %v18385_v53 }
 0xc00   : > { %17468 = vmatpush3.bf16.msra.mxu1 %v17467_v4  ;;  %v5706_v4 = vld [vmem:[#allocation22 + $0xb40] sm:$0xff] }
 0xc01   : > { %17469 = vmatprep.subr.bf16.mxu1 %v18385_v53  ;;  %v15355_v7 = vcombine.high %v5690_v3, %v5706_v4  ;;  %v15354_v13 = vcombine.low %v5690_v3, %v5706_v4  ;;  %v5787_v4 = vld [vmem:[#allocation22 + $0x15e8] sm:$0xff] }
 0xc04   : > { %17471 = vmatpush3.bf16.msra.mxu1 %v17470_v11 }
 0xc05   : > { %17472 = vmatprep.subr.bf16.mxu1 %v18385_v53 }
 0xc08   : > { %17474 = vmatpush3.bf16.msra.mxu1 %v17473_v15 }
 0xc09   : > { %17475 = vmatprep.subr.bf16.mxu1 %v18385_v53 }
 0xc0c   : > { %17477 = vmatpush3.bf16.msra.mxu1 %v17476_v34  ;;  %v5834_v34 = vld [vmem:[#allocation22 + $0x1c40] sm:$0xff] }
 0xc0d   : > { %17478 = vmatprep.subr.bf16.mxu1 %v18385_v53  ;;  %v15482_v48 = vcombine.low %v5818_v33, %v5834_v34 }
 0xc10   : > { %17480 = vmatpush3.bf16.msra.mxu1 %v17479_v37  ;;  %v5691_v37 = vld [vmem:[#allocation22 + $0x928] sm:$0xff] }
 0xc11   : > { %17481 = vmatprep.subr.bf16.mxu1 %v18385_v53  ;;  %v15357_v47 = vcombine.high %v5691_v37, %v5707_v38  ;;  %v15356_v55 = vcombine.low %v5691_v37, %v5707_v38 }
 0xc14   : > { %17483 = vmatpush3.bf16.msra.mxu1 %v17482_v40  ;;  %v15483_v40 = vcombine.high %v5818_v33, %v5834_v34 }
 0xc15   : > { %7383 = vmatprep.subr.bf16.mxu1 %v15293_v58  ;;  %v5771_v58 = vld [vmem:[#allocation22 + $0x13c8] sm:$0xff] }
 0xc16   : > { %v15421_v3 = vcombine.high %v5755_v57, %v5771_v58 }
 0xc42   : > { %v19236_v41 = vpop.permute.xlu0 %11511 }
 0xc46   : > { %v19238_v42 = vpop.permute.xlu0 %11515 }
 0xc5d   : > { %v19240_v43 = vpop.permute.xlu0 %11519 }
 0xc63   : > { %v19242_v44 = vpop.permute.xlu0 %11523 }
 0xc67   : > { %v19244_v45 = vpop.permute.xlu0 %17841 }
 0xcca   : > { %v5300_v17 = vpop.f32.mrb[26].mxu1 }
 0xccb   : > { %v5301_v19 = vadd.f32 %v5300_v17, %v5233_v16  ;;  %v16857_v20 = vpop.f32.mrb[27].mxu1  ;;  %v15387_v16 = vcombine.high %v5722_v61, %v5738_v8  ;;  %v5754_v17 = vld [vmem:[#allocation22 + $0x11a0] sm:$0xff]  ;;  %v5819_v61 = vld [vmem:[#allocation22 + $0x1a28] sm:$0xff] }
 0xccc   : > { %v5835_v8 = vld [vmem:[#allocation22 + $0x1c48] sm:$0xff] }
 0xccd   : > { %v5304_v23 = vmax.f32 %v5301_v19, 0.0  ;;  %v5770_v19 = vld [vmem:[#allocation22 + $0x13c0] sm:$0xff] }
 0xcce   : > { %v15419_v22 = vcombine.high %v5754_v17, %v5770_v19 }
 0xccf   : > { %v5305_v24 = vpack.c.bf16 %v5304_v23, %v5304_v23  ;;  %v5464_v23 = vld [vmem:[#allocation17 + $0x4] sm:$0x1] }
 0xcd1   : > { %16875 = vmatmul.mubr.bf16.vlgmr.msra.gmra.mrb[68].mxu0 %v5305_v24  ;;  %v5802_v24 = vld [vmem:[#allocation22 + $0x1800] sm:$0xff] }
 0xcd2   : > { %17456 = vmatpush3.bf16.msra.mxu0 %v17455_v60  ;;  %16888 = vmatprep.mubr.msk.f32.mxu0 %vm18386_vm3, %v18387_v54  ;;  %v5786_v60 = vld [vmem:[#allocation22 + $0x15e0] sm:$0xff] }
 0xcd3   : > { %17457 = vmatprep.subr.bf16.mxu0 %v18385_v53  ;;  %v15451_v31 = vcombine.high %v5786_v60, %v5802_v24  ;;  %v15450_v39 = vcombine.low %v5786_v60, %v5802_v24  ;;  %v5644_v60 = vld [vmem:[#allocation22 + $0x2d0] sm:$0xff]  ;;  %v5629_v24 = vld [vmem:[#allocation22 + $0xb8] sm:$0xff] }
 0xcd6   : > { %17459 = vmatpush3.bf16.msra.mxu0 %v17458_v27  ;;  %v5675_v27 = vld [vmem:[#allocation22 + $0x708] sm:$0xff] }
 0xcd7   : > { %16886 = vmatprep.subr.mxu0 %v18387_v54  ;;  %v15325_v36 = vcombine.high %v5659_v26, %v5675_v27  ;;  %v15324_v46 = vcombine.low %v5659_v26, %v5675_v27  ;;  %v5645_v26 = vld [vmem:[#allocation22 + $0x2d8] sm:$0xff] }
 0xcda   : > { %16887 = vmatpush3.msra.mxu0 %v5463_v28  ;;  %v15418_v28 = vcombine.low %v5754_v17, %v5770_v19  ;;  %v5867_v19 = vld [vmem:[#allocation22 + $0x2088] sm:$0xff] }
 0xcdb   : > { %16889 = vmatmul.mubr.msk.f32.vlgmr.msra.gmra.mrb[66].mxu0 %vm1590_vm5, %v18986_v49  ;;  %7342 = vmatprep.subr.bf16.mxu0 %v15291_v52  ;;  %v5739_v52 = vld [vmem:[#allocation22 + $0xf88] sm:$0xff] }
 0xcdc   : > { %7374 = vmatprep.mubr.bf16.mxu0 %v18389_v0  ;;  %7343 = vmatpush1.bf16.msra.mxu0 %v15290_v50  ;;  %v5723_v50 = vld [vmem:[#allocation22 + $0xd68] sm:$0xff] }
 0xcdd   : > { %7344 = vmatprep.subr.bf16.mxu0 %v15323_v62  ;;  %v15389_v56 = vcombine.high %v5723_v50, %v5739_v52  ;;  %v15388_v62 = vcombine.low %v5723_v50, %v5739_v52  ;;  %v5677_v50 = vld [vmem:[#allocation22 + $0x718] sm:$0xff] }
 0xce0   : > { %7345 = vmatpush1.bf16.msra.mxu0 %v15322_v6  ;;  %v5803_v6 = vld [vmem:[#allocation22 + $0x1808] sm:$0xff] }
 0xce1   : > { %7346 = vmatprep.subr.bf16.mxu0 %v15355_v7  ;;  %v15420_v7 = vcombine.low %v5755_v57, %v5771_v58  ;;  %v5692_v57 = vld [vmem:[#allocation22 + $0x930] sm:$0xff] }
 0xce2   : > { %v5708_v58 = vld [vmem:[#allocation22 + $0xb50] sm:$0xff] }
 0xce4   : > { %7347 = vmatpush1.bf16.msra.mxu0 %v15354_v13  ;;  %v19251_v13 = vpop.permute.xlu1 %11513 }
 0xce5   : > { %7348 = vmatprep.subr.bf16.mxu0 %v15387_v16  ;;  %v5851_v16 = vld [vmem:[#allocation22 + $0x1e68] sm:$0xff] }
 0xce8   : > { %7349 = vmatpush1.bf16.msra.mxu0 %v15386_v21  ;;  %v15516_v21 = vcombine.low %v5851_v16, %v5867_v19  ;;  %v19253_v27 = vpop.permute.xlu1 %11517 }
 0xce9   : > { %7350 = vmatprep.subr.bf16.mxu0 %v15419_v22  ;;  %v15517_v22 = vcombine.high %v5851_v16, %v5867_v19  ;;  %v5772_v19 = vld [vmem:[#allocation22 + $0x13d0] sm:$0xff] }
 0xcec   : > { %7351 = vmatpush1.bf16.msra.mxu0 %v15418_v28 }
 0xced   : > { %7352 = vmatprep.subr.bf16.mxu0 %v15451_v31  ;;  %v19255_v31 = vpop.permute.xlu1 %11521 }
 0xcf0   : > { %7353 = vmatpush1.bf16.msra.mxu0 %v15450_v39 }
 0xcf1   : > { %7354 = vmatprep.subr.bf16.mxu0 %v15483_v40  ;;  %v5660_v40 = vld [vmem:[#allocation22 + $0x4f0] sm:$0xff] }
 0xcf4   : > { %7355 = vmatpush1.bf16.msra.mxu0 %v15482_v48 }
 0xda4   : > { %v5430_v9 = vpop.f32.mrb[68].mxu0 }
 0xda5   : > { %v17845_v10 = vadd.low.f32.bf16 %v5430_v9, %v19244_v45  ;;  %v16876_v11 = vpop.f32.mrb[69].mxu0  ;;  %v15453_v9 = vcombine.high %v5787_v4, %v5803_v6 }
 0xda6   : > { %v5433_v12 = vpop.f32.mrb[70].mxu0  ;;  %v15485_v11 = vcombine.high %v5819_v61, %v5835_v8 }
 0xda7   : > { %v5443_v14 = vrot.slane %v17845_v10, %v19036_v18  ;;  %v16877_v15 = vpop.f32.mrb[71].mxu0  ;;  %v15452_v10 = vcombine.low %v5787_v4, %v5803_v6  ;;  %v15484_v12 = vcombine.low %v5819_v61, %v5835_v8  ;;  %v5724_v61 = vld [vmem:[#allocation22 + $0xd70] sm:$0xff] }
 0xda8   : > { %v5866_v15 = vld [vmem:[#allocation22 + $0x2080] sm:$0xff]  ;;  %v5740_v8 = vld [vmem:[#allocation22 + $0xf90] sm:$0xff] }
 0xda9   : > { %v5450_v20 = vrot.slane %v5443_v14, %v19036_v18  ;;  %v5850_v14 = vld [vmem:[#allocation22 + $0x1e60] sm:$0xff] }
 0xdaa   : > { %v15515_v17 = vcombine.high %v5850_v14, %v5866_v15 }
 0xdab   : > { %5451 = vrot.lane.b32.xlu1 %v5450_v20, %s18391_s23  ;;  %v15514_v20 = vcombine.low %v5850_v14, %v5866_v15  ;;  %v15391_v15 = vcombine.high %v5724_v61, %v5740_v8 }
 0xdac   : > { %7356 = vmatprep.subr.bf16.mxu0 %v15515_v17  ;;  %v5756_v17 = vld [vmem:[#allocation22 + $0x11b0] sm:$0xff] }
 0xdad   : > { %7357 = vmatpush1.bf16.msra.mxu0 %v15514_v20  ;;  %v5757_v20 = vld [vmem:[#allocation22 + $0x11b8] sm:$0xff] }
 0xdae   : > { %v5531_v25 = vpop.f32.mrb[66].mxu0 }
 0xdaf   : > { %v5532_v29 = vadd.f32 %v5531_v25, %v5464_v23  ;;  %v16890_v30 = vpop.f32.mrb[67].mxu0  ;;  %v5628_v23 = vld [vmem:[#allocation22 + $0xb0] sm:$0xff] }
 0xdb0   : > { %v15295_v25 = vcombine.high %v5628_v23, %v5644_v60  ;;  %v15294_v28 = vcombine.low %v5628_v23, %v5644_v60  ;;  %v15297_v30 = vcombine.high %v5629_v24, %v5645_v26  ;;  %v15423_v60 = vcombine.high %v5756_v17, %v5772_v19 }
 0xdb1   : > { %v5535_v35 = vmax.f32 %v5532_v29, 0.0  ;;  %v15296_v29 = vcombine.low %v5629_v24, %v5645_v26  ;;  %v5804_v26 = vld [vmem:[#allocation22 + $0x1810] sm:$0xff] }
 0xdb2   : > { %7424 = vmatprep.subr.bf16.mxu0 %v15295_v25  ;;  %v5788_v25 = vld [vmem:[#allocation22 + $0x15f0] sm:$0xff] }
 0xdb3   : > { %16924 = vmatmul.mubr.f32.vlgmr.msra.gmra.mrb[68].mxu1 %v5535_v35 }
 0xdb4   : > { %7384 = vmatpush1.bf16.msra.mxu1 %v15292_v32  ;;  %7415 = vmatprep.mubr.bf16.mxu1 %v18389_v0  ;;  %v19257_v32 = vpop.permute.xlu1 %11525 }
 0xdb5   : > { %7385 = vmatprep.subr.bf16.mxu1 %v15325_v36  ;;  %v5553_v36 = vld [vmem:[#allocation20 + $0x4] sm:$0x1] }
 0xdb8   : > { %7386 = vmatpush1.bf16.msra.mxu1 %v15324_v46  ;;  %v5676_v46 = vld [vmem:[#allocation22 + $0x710] sm:$0xff] }
 0xdb9   : > { %7387 = vmatprep.subr.bf16.mxu1 %v15357_v47  ;;  %v5661_v47 = vld [vmem:[#allocation22 + $0x4f8] sm:$0xff]  ;;  %v15326_v4 = vcombine.low %v5660_v40, %v5676_v46 }
 0xdba   : > { %v15328_v6 = vcombine.low %v5661_v47, %v5677_v50 }
 0xdbc   : > { %7388 = vmatpush1.bf16.msra.mxu1 %v15356_v55  ;;  %v15327_v55 = vcombine.high %v5660_v40, %v5676_v46  ;;  %v5821_v40 = vld [vmem:[#allocation22 + $0x1a38] sm:$0xff] }
 0xdbd   : > { %7389 = vmatprep.subr.bf16.mxu1 %v15389_v56  ;;  %v15329_v56 = vcombine.high %v5661_v47, %v5677_v50  ;;  %v5837_v46 = vld [vmem:[#allocation22 + $0x1c58] sm:$0xff]  ;;  %v15454_v47 = vcombine.low %v5788_v25, %v5804_v26 }
 0xdc0   : > { %7390 = vmatpush1.bf16.msra.mxu1 %v15388_v62  ;;  %v5693_v62 = vld [vmem:[#allocation22 + $0x938] sm:$0xff] }
 0xdc1   : > { %7391 = vmatprep.subr.bf16.mxu1 %v15421_v3  ;;  %v5709_v3 = vld [vmem:[#allocation22 + $0xb58] sm:$0xff] }
 0xdc2   : > { %v15360_v14 = vcombine.low %v5693_v62, %v5709_v3 }
 0xdc4   : > { %7392 = vmatpush1.bf16.msra.mxu1 %v15420_v7  ;;  %v15359_v7 = vcombine.high %v5692_v57, %v5708_v58 }
 0xdc5   : > { %7393 = vmatprep.subr.bf16.mxu1 %v15453_v9  ;;  %v15361_v9 = vcombine.high %v5693_v62, %v5709_v3  ;;  %v5869_v62 = vld [vmem:[#allocation22 + $0x2098] sm:$0xff] }
 0xdc8   : > { %7394 = vmatpush1.bf16.msra.mxu1 %v15452_v10  ;;  %v5725_v10 = vld [vmem:[#allocation22 + $0xd78] sm:$0xff] }
 0xdc9   : > { %7395 = vmatprep.subr.bf16.mxu1 %v15485_v11  ;;  %v5741_v11 = vld [vmem:[#allocation22 + $0xf98] sm:$0xff] }
 0xdca   : > { %v15393_v16 = vcombine.high %v5725_v10, %v5741_v11  ;;  %v15392_v23 = vcombine.low %v5725_v10, %v5741_v11  ;;  %v5647_v10 = vld [vmem:[#allocation22 + $0x2e8] sm:$0xff] }
 0xdcc   : > { %7396 = vmatpush1.bf16.msra.mxu1 %v15484_v12  ;;  %v15358_v12 = vcombine.low %v5692_v57, %v5708_v58  ;;  %v5868_v57 = vld [vmem:[#allocation22 + $0x2090] sm:$0xff]  ;;  %v5853_v58 = vld [vmem:[#allocation22 + $0x1e78] sm:$0xff] }
 0xdcd   : > { %7397 = vmatprep.subr.bf16.mxu1 %v15517_v22  ;;  %v15390_v22 = vcombine.low %v5724_v61, %v5740_v8  ;;  %v5646_v61 = vld [vmem:[#allocation22 + $0x2e0] sm:$0xff]  ;;  %v5631_v8 = vld [vmem:[#allocation22 + $0xc8] sm:$0xff] }
 0xdd0   : > { %7398 = vmatpush1.bf16.msra.mxu1 %v15516_v21  ;;  %v5773_v21 = vld [vmem:[#allocation22 + $0x13d8] sm:$0xff] }
 0xdd1   : > { %7465 = vmatprep.subr.bf16.mxu1 %v15297_v30  ;;  %v15425_v24 = vcombine.high %v5757_v20, %v5773_v21  ;;  %v15422_v30 = vcombine.low %v5756_v17, %v5772_v19  ;;  %v5678_v17 = vld [vmem:[#allocation22 + $0x720] sm:$0xff]  ;;  %v5663_v19 = vld [vmem:[#allocation22 + $0x508] sm:$0xff] }
 0xe1d   : > { %v5452_v35 = vpop.permute.xlu1 %5451 }
 0xe1e   : > { %5457 = vst.msk [vmem:[%s19043_s30 + $0x4] sm:$0x1] %vm5456_vm11, %v5452_v35  ;;  %v15424_v35 = vcombine.low %v5757_v20, %v5773_v21  ;;  %v5679_v20 = vld [vmem:[#allocation22 + $0x728] sm:$0xff] }
 0xe86   : > { %v5620_v37 = vpop.f32.mrb[68].mxu1 }
 0xe87   : > { %v5621_v38 = vadd.f32 %v5620_v37, %v5553_v36  ;;  %v16925_v39 = vpop.f32.mrb[69].mxu1  ;;  %v15455_v36 = vcombine.high %v5788_v25, %v5804_v26  ;;  %v5710_v25 = vld [vmem:[#allocation22 + $0xb60] sm:$0xff]  ;;  %v5695_v26 = vld [vmem:[#allocation22 + $0x948] sm:$0xff] }
 0xe88   : > { %v5836_v39 = vld [vmem:[#allocation22 + $0x1c50] sm:$0xff] }
 0xe89   : > { %v5624_v52 = vmax.f32 %v5621_v38, 0.0  ;;  %v5820_v38 = vld [vmem:[#allocation22 + $0x1a30] sm:$0xff] }
 0xe8a   : > { %v15486_v3 = vcombine.low %v5820_v38, %v5836_v39 }
 0xe8b   : > { %v19279_v48 = vpack.c.bf16 %v5624_v52, %v5624_v52  ;;  %v15487_v52 = vcombine.high %v5820_v38, %v5836_v39  ;;  %v5742_v38 = vld [vmem:[#allocation22 + $0xfa0] sm:$0xff]  ;;  %v5727_v39 = vld [vmem:[#allocation22 + $0xd88] sm:$0xff] }
 0xe8d   : > { %7375 = vmatmul.mubr.bf16.vlgmr.msra.gmra.mrb[72].mxu0 %v19279_v48  ;;  %7416 = vmatmul.mubr.bf16.vlgmr.msra.gmra.mrb[72].mxu1 %v19279_v48 }
 0xe8e   : > { %7425 = vmatpush1.bf16.msra.mxu0 %v15294_v28  ;;  %7466 = vmatpush1.bf16.msra.mxu1 %v15296_v29  ;;  %v5789_v28 = vld [vmem:[#allocation22 + $0x15f8] sm:$0xff] }
 0xe8f   : > { %7426 = vmatprep.subr.bf16.mxu0 %v15327_v55  ;;  %7467 = vmatprep.subr.bf16.mxu1 %v15329_v56  ;;  %v5805_v29 = vld [vmem:[#allocation22 + $0x1818] sm:$0xff]  ;;  %v15489_v55 = vcombine.high %v5821_v40, %v5837_v46  ;;  %v5852_v56 = vld [vmem:[#allocation22 + $0x1e70] sm:$0xff] }
 0xe90   : > { %7456 = vmatprep.mubr.bf16.mxu0 %v18389_v0  ;;  %7497 = vmatprep.mubr.bf16.mxu1 %v18389_v0  ;;  %v15457_v37 = vcombine.high %v5789_v28, %v5805_v29  ;;  %v15456_v50 = vcombine.low %v5789_v28, %v5805_v29  ;;  %v15518_v11 = vcombine.low %v5852_v56, %v5868_v57  ;;  %v5711_v28 = vld [vmem:[#allocation22 + $0xb68] sm:$0xff] }
 0xe92   : > { %7427 = vmatpush1.bf16.msra.mxu0 %v15326_v4  ;;  %7468 = vmatpush1.bf16.msra.mxu1 %v15328_v6  ;;  %v15488_v4 = vcombine.low %v5821_v40, %v5837_v46  ;;  %v15519_v6 = vcombine.high %v5852_v56, %v5868_v57  ;;  %v5743_v40 = vld [vmem:[#allocation22 + $0xfa8] sm:$0xff]  ;;  %v5774_v56 = vld [vmem:[#allocation22 + $0x13e0] sm:$0xff] }
 0xe93   : > { %7428 = vmatprep.subr.bf16.mxu0 %v15359_v7  ;;  %7469 = vmatprep.subr.bf16.mxu1 %v15361_v9  ;;  %v15521_v7 = vcombine.high %v5853_v58, %v5869_v62  ;;  %v5630_v9 = vld [vmem:[#allocation22 + $0xc0] sm:$0xff]  ;;  %v5759_v57 = vld [vmem:[#allocation22 + $0x11c8] sm:$0xff] }
 0xe94   : > { %v15298_v21 = vcombine.low %v5630_v9, %v5646_v61 }
 0xe96   : > { %7429 = vmatpush1.bf16.msra.mxu0 %v15358_v12  ;;  %7470 = vmatpush1.bf16.msra.mxu1 %v15360_v14  ;;  %v15520_v12 = vcombine.low %v5853_v58, %v5869_v62  ;;  %v15299_v14 = vcombine.high %v5630_v9, %v5646_v61  ;;  %v5775_v58 = vld [vmem:[#allocation22 + $0x13e8] sm:$0xff]  ;;  %v5806_v9 = vld [vmem:[#allocation22 + $0x1820] sm:$0xff] }
 0xe97   : > { %7430 = vmatprep.subr.bf16.mxu0 %v15391_v15  ;;  %7471 = vmatprep.subr.bf16.mxu1 %v15393_v16  ;;  %v15301_v15 = vcombine.high %v5631_v8, %v5647_v10  ;;  %v5662_v16 = vld [vmem:[#allocation22 + $0x500] sm:$0xff]  ;;  %v5791_v61 = vld [vmem:[#allocation22 + $0x1608] sm:$0xff] }
 0xe98   : > { %v15330_v29 = vcombine.low %v5662_v16, %v5678_v17 }
 0xe9a   : > { %7431 = vmatpush1.bf16.msra.mxu0 %v15390_v22  ;;  %7472 = vmatpush1.bf16.msra.mxu1 %v15392_v23  ;;  %v15300_v22 = vcombine.low %v5631_v8, %v5647_v10  ;;  %v15331_v23 = vcombine.high %v5662_v16, %v5678_v17  ;;  %v5807_v8 = vld [vmem:[#allocation22 + $0x1828] sm:$0xff]  ;;  %v5838_v16 = vld [vmem:[#allocation22 + $0x1c60] sm:$0xff] }
 0xe9b   : > { %7432 = vmatprep.subr.bf16.mxu0 %v15423_v60  ;;  %7473 = vmatprep.subr.bf16.mxu1 %v15425_v24  ;;  %v15333_v60 = vcombine.high %v5663_v19, %v5679_v20  ;;  %v5694_v24 = vld [vmem:[#allocation22 + $0x940] sm:$0xff]  ;;  %v5823_v17 = vld [vmem:[#allocation22 + $0x1a48] sm:$0xff] }
 0xe9c   : > { %v15362_v46 = vcombine.low %v5694_v24, %v5710_v25 }
 0xe9e   : > { %7433 = vmatpush1.bf16.msra.mxu0 %v15422_v30  ;;  %7474 = vmatpush1.bf16.msra.mxu1 %v15424_v35  ;;  %v15332_v30 = vcombine.low %v5663_v19, %v5679_v20  ;;  %v15363_v35 = vcombine.high %v5694_v24, %v5710_v25  ;;  %v5839_v19 = vld [vmem:[#allocation22 + $0x1c68] sm:$0xff]  ;;  %v5870_v24 = vld [vmem:[#allocation22 + $0x20a0] sm:$0xff] }
 0xe9f   : > { %7434 = vmatprep.subr.bf16.mxu0 %v15455_v36  ;;  %7475 = vmatprep.subr.bf16.mxu1 %v15457_v37  ;;  %v15365_v36 = vcombine.high %v5695_v26, %v5711_v28  ;;  %v5726_v37 = vld [vmem:[#allocation22 + $0xd80] sm:$0xff]  ;;  %v5855_v25 = vld [vmem:[#allocation22 + $0x1e88] sm:$0xff] }
 0xea0   : > { %v15394_v62 = vcombine.low %v5726_v37, %v5742_v38 }
 0xea2   : > { %7435 = vmatpush1.bf16.msra.mxu0 %v15454_v47  ;;  %7476 = vmatpush1.bf16.msra.mxu1 %v15456_v50  ;;  %v15364_v47 = vcombine.low %v5695_v26, %v5711_v28  ;;  %v15395_v50 = vcombine.high %v5726_v37, %v5742_v38  ;;  %v5871_v26 = vld [vmem:[#allocation22 + $0x20a8] sm:$0xff]  ;;  %v5648_v37 = vld [vmem:[#allocation22 + $0x2f0] sm:$0xff]  ;;  %v5633_v38 = vld [vmem:[#allocation22 + $0xd8] sm:$0xff] }
 0xea3   : > { %7436 = vmatprep.subr.bf16.mxu0 %v15487_v52  ;;  %7477 = vmatprep.subr.bf16.mxu1 %v15489_v55  ;;  %v15397_v52 = vcombine.high %v5727_v39, %v5743_v40  ;;  %v5758_v55 = vld [vmem:[#allocation22 + $0x11c0] sm:$0xff] }
 0xea4   : > { %v15426_v10 = vcombine.low %v5758_v55, %v5774_v56 }
 0xea6   : > { %7437 = vmatpush1.bf16.msra.mxu0 %v15486_v3  ;;  %7478 = vmatpush1.bf16.msra.mxu1 %v15488_v4  ;;  %v15396_v3 = vcombine.low %v5727_v39, %v5743_v40  ;;  %v15427_v4 = vcombine.high %v5758_v55, %v5774_v56  ;;  %v5649_v39 = vld [vmem:[#allocation22 + $0x2f8] sm:$0xff]  ;;  %v5680_v55 = vld [vmem:[#allocation22 + $0x730] sm:$0xff] }
 0xea7   : > { %7438 = vmatprep.subr.bf16.mxu0 %v15519_v6  ;;  %7479 = vmatprep.subr.bf16.mxu1 %v15521_v7  ;;  %v15429_v6 = vcombine.high %v5759_v57, %v5775_v58  ;;  %v5790_v7 = vld [vmem:[#allocation22 + $0x1600] sm:$0xff]  ;;  %v5665_v56 = vld [vmem:[#allocation22 + $0x518] sm:$0xff] }
 0xea8   : > { %v15458_v20 = vcombine.low %v5790_v7, %v5806_v9 }
 0xeaa   : > { %7439 = vmatpush1.bf16.msra.mxu0 %v15518_v11  ;;  %7480 = vmatpush1.bf16.msra.mxu1 %v15520_v12  ;;  %v15428_v11 = vcombine.low %v5759_v57, %v5775_v58  ;;  %v15459_v12 = vcombine.high %v5790_v7, %v5806_v9  ;;  %v5681_v57 = vld [vmem:[#allocation22 + $0x738] sm:$0xff]  ;;  %v5712_v7 = vld [vmem:[#allocation22 + $0xb70] sm:$0xff] }
 0xeab   : > { %7506 = vmatprep.subr.bf16.mxu0 %v15299_v14  ;;  %7547 = vmatprep.subr.bf16.mxu1 %v15301_v15  ;;  %v15461_v14 = vcombine.high %v5791_v61, %v5807_v8  ;;  %v5822_v15 = vld [vmem:[#allocation22 + $0x1a40] sm:$0xff]  ;;  %v5697_v9 = vld [vmem:[#allocation22 + $0x958] sm:$0xff] }
 0xeac   : > { %v15490_v28 = vcombine.low %v5822_v15, %v5838_v16 }
 0xead   : > { %7457 = vmatmul.mubr.bf16.vlgmr.msra.gmra.mrb[76].mxu0 %v19279_v48  ;;  %7498 = vmatmul.mubr.bf16.vlgmr.msra.gmra.mrb[76].mxu1 %v19279_v48 }
 0xeae   : > { %7507 = vmatpush1.bf16.msra.mxu0 %v15298_v21  ;;  %7548 = vmatpush1.bf16.msra.mxu1 %v15300_v22  ;;  %v15460_v21 = vcombine.low %v5791_v61, %v5807_v8  ;;  %v15491_v22 = vcombine.high %v5822_v15, %v5838_v16  ;;  %v5713_v61 = vld [vmem:[#allocation22 + $0xb78] sm:$0xff]  ;;  %v5744_v15 = vld [vmem:[#allocation22 + $0xfb0] sm:$0xff] }
 0xeaf   : > { %7508 = vmatprep.subr.bf16.mxu0 %v15331_v23  ;;  %7549 = vmatprep.subr.bf16.mxu1 %v15333_v60  ;;  %v15493_v23 = vcombine.high %v5823_v17, %v5839_v19  ;;  %v5854_v60 = vld [vmem:[#allocation22 + $0x1e80] sm:$0xff]  ;;  %v5729_v16 = vld [vmem:[#allocation22 + $0xd98] sm:$0xff] }
 0xeb0   : > { %7538 = vmatprep.mubr.bf16.mxu0 %v18389_v0  ;;  %7579 = vmatprep.mubr.bf16.mxu1 %v18389_v0  ;;  %v15522_v40 = vcombine.low %v5854_v60, %v5870_v24 }
 0xeb2   : > { %7509 = vmatpush1.bf16.msra.mxu0 %v15330_v29  ;;  %7550 = vmatpush1.bf16.msra.mxu1 %v15332_v30  ;;  %v15492_v29 = vcombine.low %v5823_v17, %v5839_v19  ;;  %v15523_v30 = vcombine.high %v5854_v60, %v5870_v24  ;;  %v5745_v17 = vld [vmem:[#allocation22 + $0xfb8] sm:$0xff]  ;;  %v5776_v60 = vld [vmem:[#allocation22 + $0x13f0] sm:$0xff] }
 0xeb3   : > { %7510 = vmatprep.subr.bf16.mxu0 %v15363_v35  ;;  %7551 = vmatprep.subr.bf16.mxu1 %v15365_v36  ;;  %v15525_v35 = vcombine.high %v5855_v25, %v5871_v26  ;;  %v5632_v36 = vld [vmem:[#allocation22 + $0xd0] sm:$0xff]  ;;  %v5761_v24 = vld [vmem:[#allocation22 + $0x11d8] sm:$0xff] }
 0xeb4   : > { %v15302_v58 = vcombine.low %v5632_v36, %v5648_v37 }
 0xeb6   : > { %7511 = vmatpush1.bf16.msra.mxu0 %v15362_v46  ;;  %7552 = vmatpush1.bf16.msra.mxu1 %v15364_v47  ;;  %v15524_v46 = vcombine.low %v5855_v25, %v5871_v26  ;;  %v15303_v47 = vcombine.high %v5632_v36, %v5648_v37  ;;  %v5777_v25 = vld [vmem:[#allocation22 + $0x13f8] sm:$0xff]  ;;  %v5808_v36 = vld [vmem:[#allocation22 + $0x1830] sm:$0xff] }
 0xeb7   : > { %7512 = vmatprep.subr.bf16.mxu0 %v15395_v50  ;;  %7553 = vmatprep.subr.bf16.mxu1 %v15397_v52  ;;  %v15305_v50 = vcombine.high %v5633_v38, %v5649_v39  ;;  %v5664_v52 = vld [vmem:[#allocation22 + $0x510] sm:$0xff]  ;;  %v5793_v37 = vld [vmem:[#allocation22 + $0x1618] sm:$0xff] }
 0xeb8   : > { %v15334_v8 = vcombine.low %v5664_v52, %v5680_v55 }
 0xeba   : > { %7513 = vmatpush1.bf16.msra.mxu0 %v15394_v62  ;;  %7554 = vmatpush1.bf16.msra.mxu1 %v15396_v3  ;;  %v15304_v62 = vcombine.low %v5633_v38, %v5649_v39  ;;  %v15335_v3 = vcombine.high %v5664_v52, %v5680_v55  ;;  %v5809_v38 = vld [vmem:[#allocation22 + $0x1838] sm:$0xff]  ;;  %v5840_v52 = vld [vmem:[#allocation22 + $0x1c70] sm:$0xff] }
 0xebb   : > { %7514 = vmatprep.subr.bf16.mxu0 %v15427_v4  ;;  %7555 = vmatprep.subr.bf16.mxu1 %v15429_v6  ;;  %v15337_v4 = vcombine.high %v5665_v56, %v5681_v57  ;;  %v5696_v6 = vld [vmem:[#allocation22 + $0x950] sm:$0xff]  ;;  %v5825_v55 = vld [vmem:[#allocation22 + $0x1a58] sm:$0xff] }
 0xebc   : > { %v15366_v19 = vcombine.low %v5696_v6, %v5712_v7 }
 0xebe   : > { %7515 = vmatpush1.bf16.msra.mxu0 %v15426_v10  ;;  %7556 = vmatpush1.bf16.msra.mxu1 %v15428_v11  ;;  %v15336_v10 = vcombine.low %v5665_v56, %v5681_v57  ;;  %v15367_v11 = vcombine.high %v5696_v6, %v5712_v7  ;;  %v5841_v56 = vld [vmem:[#allocation22 + $0x1c78] sm:$0xff]  ;;  %v5872_v6 = vld [vmem:[#allocation22 + $0x20b0] sm:$0xff] }
 0xebf   : > { %7516 = vmatprep.subr.bf16.mxu0 %v15459_v12  ;;  %7557 = vmatprep.subr.bf16.mxu1 %v15461_v14  ;;  %v15369_v12 = vcombine.high %v5697_v9, %v5713_v61  ;;  %v5728_v14 = vld [vmem:[#allocation22 + $0xd90] sm:$0xff]  ;;  %v5857_v7 = vld [vmem:[#allocation22 + $0x1e98] sm:$0xff] }
 0xec0   : > { %v15398_v26 = vcombine.low %v5728_v14, %v5744_v15 }
 0xec2   : > { %7517 = vmatpush1.bf16.msra.mxu0 %v15458_v20  ;;  %7558 = vmatpush1.bf16.msra.mxu1 %v15460_v21  ;;  %v15368_v20 = vcombine.low %v5697_v9, %v5713_v61  ;;  %v15399_v21 = vcombine.high %v5728_v14, %v5744_v15  ;;  %v5873_v9 = vld [vmem:[#allocation22 + $0x20b8] sm:$0xff]  ;;  %v5650_v14 = vld [vmem:[#allocation22 + $0x300] sm:$0xff]  ;;  %v5635_v15 = vld [vmem:[#allocation22 + $0xe8] sm:$0xff] }
 0xec3   : > { %7518 = vmatprep.subr.bf16.mxu0 %v15491_v22  ;;  %7559 = vmatprep.subr.bf16.mxu1 %v15493_v23  ;;  %v15401_v22 = vcombine.high %v5729_v16, %v5745_v17  ;;  %v5760_v23 = vld [vmem:[#allocation22 + $0x11d0] sm:$0xff] }
 0xec4   : > { %v15430_v39 = vcombine.low %v5760_v23, %v5776_v60 }
 0xec6   : > { %7519 = vmatpush1.bf16.msra.mxu0 %v15490_v28  ;;  %7560 = vmatpush1.bf16.msra.mxu1 %v15492_v29  ;;  %v15400_v28 = vcombine.low %v5729_v16, %v5745_v17  ;;  %v15431_v29 = vcombine.high %v5760_v23, %v5776_v60  ;;  %v5651_v16 = vld [vmem:[#allocation22 + $0x308] sm:$0xff]  ;;  %v5682_v23 = vld [vmem:[#allocation22 + $0x740] sm:$0xff] }
 0xec7   : > { %7520 = vmatprep.subr.bf16.mxu0 %v15523_v30  ;;  %7561 = vmatprep.subr.bf16.mxu1 %v15525_v35  ;;  %v15433_v30 = vcombine.high %v5761_v24, %v5777_v25  ;;  %v5792_v35 = vld [vmem:[#allocation22 + $0x1610] sm:$0xff]  ;;  %v5667_v60 = vld [vmem:[#allocation22 + $0x528] sm:$0xff] }
 0xec8   : > { %v15462_v57 = vcombine.low %v5792_v35, %v5808_v36 }
 0xeca   : > { %7521 = vmatpush1.bf16.msra.mxu0 %v15522_v40  ;;  %7562 = vmatpush1.bf16.msra.mxu1 %v15524_v46  ;;  %v15432_v40 = vcombine.low %v5761_v24, %v5777_v25  ;;  %v15463_v46 = vcombine.high %v5792_v35, %v5808_v36  ;;  %v5683_v24 = vld [vmem:[#allocation22 + $0x748] sm:$0xff]  ;;  %v5714_v35 = vld [vmem:[#allocation22 + $0xb80] sm:$0xff] }
 0xecb   : > { %7588 = vmatprep.subr.bf16.mxu0 %v15303_v47  ;;  %7629 = vmatprep.subr.bf16.mxu1 %v15305_v50  ;;  %v15465_v47 = vcombine.high %v5793_v37, %v5809_v38  ;;  %v5824_v50 = vld [vmem:[#allocation22 + $0x1a50] sm:$0xff]  ;;  %v5699_v36 = vld [vmem:[#allocation22 + $0x968] sm:$0xff] }
 0xecc   : > { %v15494_v61 = vcombine.low %v5824_v50, %v5840_v52 }
 0xecd   : > { %7539 = vmatmul.mubr.bf16.vlgmr.msra.gmra.mrb[80].mxu0 %v19279_v48  ;;  %7580 = vmatmul.mubr.bf16.vlgmr.msra.gmra.mrb[80].mxu1 %v19279_v48 }
 0xece   : > { %7589 = vmatpush1.bf16.msra.mxu0 %v15302_v58  ;;  %7630 = vmatpush1.bf16.msra.mxu1 %v15304_v62  ;;  %v15464_v58 = vcombine.low %v5793_v37, %v5809_v38  ;;  %v15495_v62 = vcombine.high %v5824_v50, %v5840_v52  ;;  %v5715_v37 = vld [vmem:[#allocation22 + $0xb88] sm:$0xff]  ;;  %v5746_v50 = vld [vmem:[#allocation22 + $0xfc0] sm:$0xff] }
 0xecf   : > { %7590 = vmatprep.subr.bf16.mxu0 %v15335_v3  ;;  %7631 = vmatprep.subr.bf16.mxu1 %v15337_v4  ;;  %v15497_v3 = vcombine.high %v5825_v55, %v5841_v56  ;;  %v5856_v4 = vld [vmem:[#allocation22 + $0x1e90] sm:$0xff]  ;;  %v5731_v52 = vld [vmem:[#allocation22 + $0xda8] sm:$0xff] }
 0xed0   : > { %7620 = vmatprep.mubr.bf16.mxu0 %v18389_v0  ;;  %7661 = vmatprep.mubr.bf16.mxu1 %v18389_v0  ;;  %v15526_v17 = vcombine.low %v5856_v4, %v5872_v6 }
 0xed2   : > { %7591 = vmatpush1.bf16.msra.mxu0 %v15334_v8  ;;  %7632 = vmatpush1.bf16.msra.mxu1 %v15336_v10  ;;  %v15496_v8 = vcombine.low %v5825_v55, %v5841_v56  ;;  %v15527_v10 = vcombine.high %v5856_v4, %v5872_v6  ;;  %v5747_v55 = vld [vmem:[#allocation22 + $0xfc8] sm:$0xff]  ;;  %v5778_v4 = vld [vmem:[#allocation22 + $0x1400] sm:$0xff] }
 0xed3   : > { %7592 = vmatprep.subr.bf16.mxu0 %v15367_v11  ;;  %7633 = vmatprep.subr.bf16.mxu1 %v15369_v12  ;;  %v15529_v11 = vcombine.high %v5857_v7, %v5873_v9  ;;  %v5634_v12 = vld [vmem:[#allocation22 + $0xe0] sm:$0xff]  ;;  %v5763_v6 = vld [vmem:[#allocation22 + $0x11e8] sm:$0xff] }
 0xed4   : > { %v15306_v25 = vcombine.low %v5634_v12, %v5650_v14 }
 0xed6   : > { %7593 = vmatpush1.bf16.msra.mxu0 %v15366_v19  ;;  %7634 = vmatpush1.bf16.msra.mxu1 %v15368_v20  ;;  %v15528_v19 = vcombine.low %v5857_v7, %v5873_v9  ;;  %v15307_v20 = vcombine.high %v5634_v12, %v5650_v14  ;;  %v5779_v7 = vld [vmem:[#allocation22 + $0x1408] sm:$0xff]  ;;  %v5810_v12 = vld [vmem:[#allocation22 + $0x1840] sm:$0xff] }
 0xed7   : > { %7594 = vmatprep.subr.bf16.mxu0 %v15399_v21  ;;  %7635 = vmatprep.subr.bf16.mxu1 %v15401_v22  ;;  %v15309_v21 = vcombine.high %v5635_v15, %v5651_v16  ;;  %v5666_v22 = vld [vmem:[#allocation22 + $0x520] sm:$0xff]  ;;  %v5795_v14 = vld [vmem:[#allocation22 + $0x1628] sm:$0xff] }
 0xed8   : > { %v15338_v38 = vcombine.low %v5666_v22, %v5682_v23 }
 0xeda   : > { %7595 = vmatpush1.bf16.msra.mxu0 %v15398_v26  ;;  %7636 = vmatpush1.bf16.msra.mxu1 %v15400_v28  ;;  %v15308_v26 = vcombine.low %v5635_v15, %v5651_v16  ;;  %v15339_v28 = vcombine.high %v5666_v22, %v5682_v23  ;;  %v5811_v15 = vld [vmem:[#allocation22 + $0x1848] sm:$0xff]  ;;  %v5842_v22 = vld [vmem:[#allocation22 + $0x1c80] sm:$0xff] }
 0xedb   : > { %7596 = vmatprep.subr.bf16.mxu0 %v15431_v29  ;;  %7637 = vmatprep.subr.bf16.mxu1 %v15433_v30  ;;  %v15341_v29 = vcombine.high %v5667_v60, %v5683_v24  ;;  %v5698_v30 = vld [vmem:[#allocation22 + $0x960] sm:$0xff]  ;;  %v5827_v23 = vld [vmem:[#allocation22 + $0x1a68] sm:$0xff] }
 0xedc   : > { %v15370_v56 = vcombine.low %v5698_v30, %v5714_v35 }
 0xede   : > { %7597 = vmatpush1.bf16.msra.mxu0 %v15430_v39  ;;  %7638 = vmatpush1.bf16.msra.mxu1 %v15432_v40  ;;  %v15340_v39 = vcombine.low %v5667_v60, %v5683_v24  ;;  %v15371_v40 = vcombine.high %v5698_v30, %v5714_v35  ;;  %v5843_v60 = vld [vmem:[#allocation22 + $0x1c88] sm:$0xff]  ;;  %v5874_v30 = vld [vmem:[#allocation22 + $0x20c0] sm:$0xff] }
 0xedf   : > { %7598 = vmatprep.subr.bf16.mxu0 %v15463_v46  ;;  %7639 = vmatprep.subr.bf16.mxu1 %v15465_v47  ;;  %v15373_v46 = vcombine.high %v5699_v36, %v5715_v37  ;;  %v5730_v47 = vld [vmem:[#allocation22 + $0xda0] sm:$0xff]  ;;  %v5859_v35 = vld [vmem:[#allocation22 + $0x1ea8] sm:$0xff] }
 0xee0   : > { %v15402_v9 = vcombine.low %v5730_v47, %v5746_v50 }
 0xee2   : > { %7599 = vmatpush1.bf16.msra.mxu0 %v15462_v57  ;;  %7640 = vmatpush1.bf16.msra.mxu1 %v15464_v58  ;;  %v15372_v57 = vcombine.low %v5699_v36, %v5715_v37  ;;  %v15403_v58 = vcombine.high %v5730_v47, %v5746_v50  ;;  %v5875_v36 = vld [vmem:[#allocation22 + $0x20c8] sm:$0xff]  ;;  %v5652_v47 = vld [vmem:[#allocation22 + $0x310] sm:$0xff]  ;;  %v5637_v50 = vld [vmem:[#allocation22 + $0xf8] sm:$0xff] }
 0xee3   : > { %7600 = vmatprep.subr.bf16.mxu0 %v15495_v62  ;;  %7641 = vmatprep.subr.bf16.mxu1 %v15497_v3  ;;  %v15405_v62 = vcombine.high %v5731_v52, %v5747_v55  ;;  %v5762_v3 = vld [vmem:[#allocation22 + $0x11e0] sm:$0xff] }
 0xee4   : > { %v15434_v16 = vcombine.low %v5762_v3, %v5778_v4 }
 0xee6   : > { %7601 = vmatpush1.bf16.msra.mxu0 %v15494_v61  ;;  %7642 = vmatpush1.bf16.msra.mxu1 %v15496_v8  ;;  %v15404_v61 = vcombine.low %v5731_v52, %v5747_v55  ;;  %v15435_v8 = vcombine.high %v5762_v3, %v5778_v4  ;;  %v5653_v52 = vld [vmem:[#allocation22 + $0x318] sm:$0xff]  ;;  %v5684_v3 = vld [vmem:[#allocation22 + $0x750] sm:$0xff] }
 0xee7   : > { %7602 = vmatprep.subr.bf16.mxu0 %v15527_v10  ;;  %7643 = vmatprep.subr.bf16.mxu1 %v15529_v11  ;;  %v15437_v10 = vcombine.high %v5763_v6, %v5779_v7  ;;  %v5794_v11 = vld [vmem:[#allocation22 + $0x1620] sm:$0xff]  ;;  %v5669_v4 = vld [vmem:[#allocation22 + $0x538] sm:$0xff] }
 0xee8   : > { %v15466_v24 = vcombine.low %v5794_v11, %v5810_v12 }
 0xeea   : > { %7603 = vmatpush1.bf16.msra.mxu0 %v15526_v17  ;;  %7644 = vmatpush1.bf16.msra.mxu1 %v15528_v19  ;;  %v15436_v17 = vcombine.low %v5763_v6, %v5779_v7  ;;  %v15467_v19 = vcombine.high %v5794_v11, %v5810_v12  ;;  %v5685_v6 = vld [vmem:[#allocation22 + $0x758] sm:$0xff]  ;;  %v5716_v11 = vld [vmem:[#allocation22 + $0xb90] sm:$0xff] }
 0xeeb   : > { %7670 = vmatprep.subr.bf16.mxu0 %v15307_v20  ;;  %7711 = vmatprep.subr.bf16.mxu1 %v15309_v21  ;;  %v15469_v20 = vcombine.high %v5795_v14, %v5811_v15  ;;  %v5826_v21 = vld [vmem:[#allocation22 + $0x1a60] sm:$0xff]  ;;  %v5701_v12 = vld [vmem:[#allocation22 + $0x978] sm:$0xff] }
 0xeec   : > { %v15498_v37 = vcombine.low %v5826_v21, %v5842_v22 }
 0xeed   : > { %7621 = vmatmul.mubr.bf16.vlgmr.msra.gmra.mrb[84].mxu0 %v19279_v48  ;;  %7662 = vmatmul.mubr.bf16.vlgmr.msra.gmra.mrb[84].mxu1 %v19279_v48 }
 0xeee   : > { %7671 = vmatpush1.bf16.msra.mxu0 %v15306_v25  ;;  %7712 = vmatpush1.bf16.msra.mxu1 %v15308_v26  ;;  %v15468_v25 = vcombine.low %v5795_v14, %v5811_v15  ;;  %v15499_v26 = vcombine.high %v5826_v21, %v5842_v22  ;;  %v5717_v14 = vld [vmem:[#allocation22 + $0xb98] sm:$0xff]  ;;  %v5748_v21 = vld [vmem:[#allocation22 + $0xfd0] sm:$0xff] }
 0xeef   : > { %7672 = vmatprep.subr.bf16.mxu0 %v15339_v28  ;;  %7713 = vmatprep.subr.bf16.mxu1 %v15341_v29  ;;  %v15501_v28 = vcombine.high %v5827_v23, %v5843_v60  ;;  %v5858_v29 = vld [vmem:[#allocation22 + $0x1ea0] sm:$0xff]  ;;  %v5733_v22 = vld [vmem:[#allocation22 + $0xdb8] sm:$0xff] }
 0xef0   : > { %7702 = vmatprep.mubr.bf16.mxu0 %v18389_v0  ;;  %7743 = vmatprep.mubr.bf16.mxu1 %v18389_v0  ;;  %v15530_v55 = vcombine.low %v5858_v29, %v5874_v30 }
 0xef2   : > { %7673 = vmatpush1.bf16.msra.mxu0 %v15338_v38  ;;  %7714 = vmatpush1.bf16.msra.mxu1 %v15340_v39  ;;  %v15500_v38 = vcombine.low %v5827_v23, %v5843_v60  ;;  %v15531_v39 = vcombine.high %v5858_v29, %v5874_v30  ;;  %v5749_v23 = vld [vmem:[#allocation22 + $0xfd8] sm:$0xff]  ;;  %v5780_v29 = vld [vmem:[#allocation22 + $0x1410] sm:$0xff] }
 0xef3   : > { %7674 = vmatprep.subr.bf16.mxu0 %v15371_v40  ;;  %7715 = vmatprep.subr.bf16.mxu1 %v15373_v46  ;;  %v15533_v40 = vcombine.high %v5859_v35, %v5875_v36  ;;  %v5636_v46 = vld [vmem:[#allocation22 + $0xf0] sm:$0xff]  ;;  %v5765_v30 = vld [vmem:[#allocation22 + $0x11f8] sm:$0xff] }
 0xef4   : > { %v15310_v7 = vcombine.low %v5636_v46, %v5652_v47 }
 0xef6   : > { %7675 = vmatpush1.bf16.msra.mxu0 %v15370_v56  ;;  %7716 = vmatpush1.bf16.msra.mxu1 %v15372_v57  ;;  %v15532_v56 = vcombine.low %v5859_v35, %v5875_v36  ;;  %v15311_v57 = vcombine.high %v5636_v46, %v5652_v47  ;;  %v5781_v35 = vld [vmem:[#allocation22 + $0x1418] sm:$0xff]  ;;  %v5812_v46 = vld [vmem:[#allocation22 + $0x1850] sm:$0xff] }
 0xef7   : > { %7676 = vmatprep.subr.bf16.mxu0 %v15403_v58  ;;  %7717 = vmatprep.subr.bf16.mxu1 %v15405_v62  ;;  %v15313_v58 = vcombine.high %v5637_v50, %v5653_v52  ;;  %v5668_v62 = vld [vmem:[#allocation22 + $0x530] sm:$0xff]  ;;  %v5797_v47 = vld [vmem:[#allocation22 + $0x1638] sm:$0xff] }
 0xef8   : > { %v15342_v15 = vcombine.low %v5668_v62, %v5684_v3 }
 0xefa   : > { %7677 = vmatpush1.bf16.msra.mxu0 %v15402_v9  ;;  %7718 = vmatpush1.bf16.msra.mxu1 %v15404_v61  ;;  %v15312_v9 = vcombine.low %v5637_v50, %v5653_v52  ;;  %v15343_v61 = vcombine.high %v5668_v62, %v5684_v3  ;;  %v5813_v50 = vld [vmem:[#allocation22 + $0x1858] sm:$0xff]  ;;  %v5844_v62 = vld [vmem:[#allocation22 + $0x1c90] sm:$0xff] }
 0xefb   : > { %7678 = vmatprep.subr.bf16.mxu0 %v15435_v8  ;;  %7719 = vmatprep.subr.bf16.mxu1 %v15437_v10  ;;  %v15345_v8 = vcombine.high %v5669_v4, %v5685_v6  ;;  %v5700_v10 = vld [vmem:[#allocation22 + $0x970] sm:$0xff]  ;;  %v5829_v3 = vld [vmem:[#allocation22 + $0x1a78] sm:$0xff] }
 0xefc   : > { %v15374_v60 = vcombine.low %v5700_v10, %v5716_v11 }
 0xefe   : > { %7679 = vmatpush1.bf16.msra.mxu0 %v15434_v16  ;;  %7720 = vmatpush1.bf16.msra.mxu1 %v15436_v17  ;;  %v15344_v16 = vcombine.low %v5669_v4, %v5685_v6  ;;  %v15375_v17 = vcombine.high %v5700_v10, %v5716_v11  ;;  %v5845_v4 = vld [vmem:[#allocation22 + $0x1c98] sm:$0xff]  ;;  %v5876_v10 = vld [vmem:[#allocation22 + $0x20d0] sm:$0xff] }
 0xeff   : > { %7680 = vmatprep.subr.bf16.mxu0 %v15467_v19  ;;  %7721 = vmatprep.subr.bf16.mxu1 %v15469_v20  ;;  %v15377_v19 = vcombine.high %v5701_v12, %v5717_v14  ;;  %v5732_v20 = vld [vmem:[#allocation22 + $0xdb0] sm:$0xff]  ;;  %v5861_v11 = vld [vmem:[#allocation22 + $0x1eb8] sm:$0xff] }
 0xf00   : > { %v15406_v36 = vcombine.low %v5732_v20, %v5748_v21 }
 0xf02   : > { %7681 = vmatpush1.bf16.msra.mxu0 %v15466_v24  ;;  %7722 = vmatpush1.bf16.msra.mxu1 %v15468_v25  ;;  %v15376_v24 = vcombine.low %v5701_v12, %v5717_v14  ;;  %v15407_v25 = vcombine.high %v5732_v20, %v5748_v21  ;;  %v5877_v12 = vld [vmem:[#allocation22 + $0x20d8] sm:$0xff]  ;;  %v5654_v20 = vld [vmem:[#allocation22 + $0x320] sm:$0xff]  ;;  %v5639_v21 = vld [vmem:[#allocation22 + $0x108] sm:$0xff] }
 0xf03   : > { %7682 = vmatprep.subr.bf16.mxu0 %v15499_v26  ;;  %7723 = vmatprep.subr.bf16.mxu1 %v15501_v28  ;;  %v15409_v26 = vcombine.high %v5733_v22, %v5749_v23  ;;  %v5764_v28 = vld [vmem:[#allocation22 + $0x11f0] sm:$0xff] }
 0xf04   : > { %v15438_v52 = vcombine.low %v5764_v28, %v5780_v29 }
 0xf06   : > { %7683 = vmatpush1.bf16.msra.mxu0 %v15498_v37  ;;  %7724 = vmatpush1.bf16.msra.mxu1 %v15500_v38  ;;  %v15408_v37 = vcombine.low %v5733_v22, %v5749_v23  ;;  %v15439_v38 = vcombine.high %v5764_v28, %v5780_v29  ;;  %v5655_v22 = vld [vmem:[#allocation22 + $0x328] sm:$0xff]  ;;  %v5686_v28 = vld [vmem:[#allocation22 + $0x760] sm:$0xff] }
 0xf07   : > { %7684 = vmatprep.subr.bf16.mxu0 %v15531_v39  ;;  %7725 = vmatprep.subr.bf16.mxu1 %v15533_v40  ;;  %v15441_v39 = vcombine.high %v5765_v30, %v5781_v35  ;;  %v5796_v40 = vld [vmem:[#allocation22 + $0x1630] sm:$0xff]  ;;  %v5671_v29 = vld [vmem:[#allocation22 + $0x548] sm:$0xff] }
 0xf08   : > { %v15470_v6 = vcombine.low %v5796_v40, %v5812_v46 }
 0xf0a   : > { %7685 = vmatpush1.bf16.msra.mxu0 %v15530_v55  ;;  %7726 = vmatpush1.bf16.msra.mxu1 %v15532_v56  ;;  %v15440_v55 = vcombine.low %v5765_v30, %v5781_v35  ;;  %v15471_v56 = vcombine.high %v5796_v40, %v5812_v46  ;;  %v5687_v30 = vld [vmem:[#allocation22 + $0x768] sm:$0xff]  ;;  %v5718_v40 = vld [vmem:[#allocation22 + $0xba0] sm:$0xff] }
 0xf0b   : > { %7752 = vmatprep.subr.bf16.mxu0 %v15311_v57  ;;  %7793 = vmatprep.subr.bf16.mxu1 %v15313_v58  ;;  %v15473_v57 = vcombine.high %v5797_v47, %v5813_v50  ;;  %v5828_v58 = vld [vmem:[#allocation22 + $0x1a70] sm:$0xff]  ;;  %v5703_v46 = vld [vmem:[#allocation22 + $0x988] sm:$0xff] }
 0xf0c   : > { %v15502_v14 = vcombine.low %v5828_v58, %v5844_v62 }
 0xf0d   : > { %7703 = vmatmul.mubr.bf16.vlgmr.msra.gmra.mrb[88].mxu0 %v19279_v48  ;;  %7744 = vmatmul.mubr.bf16.vlgmr.msra.gmra.mrb[88].mxu1 %v19279_v48 }
 0xf0e   : > { %7753 = vmatpush1.bf16.msra.mxu0 %v15310_v7  ;;  %7794 = vmatpush1.bf16.msra.mxu1 %v15312_v9  ;;  %v15472_v7 = vcombine.low %v5797_v47, %v5813_v50  ;;  %v15503_v9 = vcombine.high %v5828_v58, %v5844_v62  ;;  %v5719_v47 = vld [vmem:[#allocation22 + $0xba8] sm:$0xff]  ;;  %v5750_v58 = vld [vmem:[#allocation22 + $0xfe0] sm:$0xff] }
 0xf0f   : > { %7754 = vmatprep.subr.bf16.mxu0 %v15343_v61  ;;  %7795 = vmatprep.subr.bf16.mxu1 %v15345_v8  ;;  %v15505_v61 = vcombine.high %v5829_v3, %v5845_v4  ;;  %v5860_v8 = vld [vmem:[#allocation22 + $0x1eb0] sm:$0xff]  ;;  %v5735_v62 = vld [vmem:[#allocation22 + $0xdc8] sm:$0xff] }
 0xf10   : > { %7784 = vmatprep.mubr.bf16.mxu0 %v18389_v0  ;;  %7825 = vmatprep.mubr.bf16.mxu1 %v18389_v0  ;;  %v15534_v23 = vcombine.low %v5860_v8, %v5876_v10 }
 0xf12   : > { %7755 = vmatpush1.bf16.msra.mxu0 %v15342_v15  ;;  %7796 = vmatpush1.bf16.msra.mxu1 %v15344_v16  ;;  %v15504_v15 = vcombine.low %v5829_v3, %v5845_v4  ;;  %v15535_v16 = vcombine.high %v5860_v8, %v5876_v10  ;;  %v5751_v3 = vld [vmem:[#allocation22 + $0xfe8] sm:$0xff]  ;;  %v5782_v8 = vld [vmem:[#allocation22 + $0x1420] sm:$0xff] }
 0xf13   : > { %7756 = vmatprep.subr.bf16.mxu0 %v15375_v17  ;;  %7797 = vmatprep.subr.bf16.mxu1 %v15377_v19  ;;  %v15537_v17 = vcombine.high %v5861_v11, %v5877_v12  ;;  %v5638_v19 = vld [vmem:[#allocation22 + $0x100] sm:$0xff]  ;;  %v5767_v10 = vld [vmem:[#allocation22 + $0x1208] sm:$0xff] }
 0xf14   : > { %v15314_v35 = vcombine.low %v5638_v19, %v5654_v20 }
 0xf16   : > { %7757 = vmatpush1.bf16.msra.mxu0 %v15374_v60  ;;  %7798 = vmatpush1.bf16.msra.mxu1 %v15376_v24  ;;  %v15536_v60 = vcombine.low %v5861_v11, %v5877_v12  ;;  %v15315_v24 = vcombine.high %v5638_v19, %v5654_v20  ;;  %v5783_v11 = vld [vmem:[#allocation22 + $0x1428] sm:$0xff]  ;;  %v5814_v19 = vld [vmem:[#allocation22 + $0x1860] sm:$0xff] }
 0xf17   : > { %7758 = vmatprep.subr.bf16.mxu0 %v15407_v25  ;;  %7799 = vmatprep.subr.bf16.mxu1 %v15409_v26  ;;  %v15317_v25 = vcombine.high %v5639_v21, %v5655_v22  ;;  %v5670_v26 = vld [vmem:[#allocation22 + $0x540] sm:$0xff]  ;;  %v5799_v20 = vld [vmem:[#allocation22 + $0x1648] sm:$0xff] }
 0xf18   : > { %v15346_v50 = vcombine.low %v5670_v26, %v5686_v28 }
 0xf1a   : > { %7759 = vmatpush1.bf16.msra.mxu0 %v15406_v36  ;;  %7800 = vmatpush1.bf16.msra.mxu1 %v15408_v37  ;;  %v15316_v36 = vcombine.low %v5639_v21, %v5655_v22  ;;  %v15347_v37 = vcombine.high %v5670_v26, %v5686_v28  ;;  %v5815_v21 = vld [vmem:[#allocation22 + $0x1868] sm:$0xff]  ;;  %v5846_v26 = vld [vmem:[#allocation22 + $0x1ca0] sm:$0xff] }
 0xf1b   : > { %7760 = vmatprep.subr.bf16.mxu0 %v15439_v38  ;;  %7801 = vmatprep.subr.bf16.mxu1 %v15441_v39  ;;  %v15349_v38 = vcombine.high %v5671_v29, %v5687_v30  ;;  %v5702_v39 = vld [vmem:[#allocation22 + $0x980] sm:$0xff]  ;;  %v5831_v28 = vld [vmem:[#allocation22 + $0x1a88] sm:$0xff] }
 0xf1c   : > { %v15378_v4 = vcombine.low %v5702_v39, %v5718_v40 }
 0xf1e   : > { %7761 = vmatpush1.bf16.msra.mxu0 %v15438_v52  ;;  %7802 = vmatpush1.bf16.msra.mxu1 %v15440_v55  ;;  %v15348_v52 = vcombine.low %v5671_v29, %v5687_v30  ;;  %v15379_v55 = vcombine.high %v5702_v39, %v5718_v40  ;;  %v5847_v29 = vld [vmem:[#allocation22 + $0x1ca8] sm:$0xff]  ;;  %v5878_v39 = vld [vmem:[#allocation22 + $0x20e0] sm:$0xff] }
 0xf1f   : > { %7762 = vmatprep.subr.bf16.mxu0 %v15471_v56  ;;  %7803 = vmatprep.subr.bf16.mxu1 %v15473_v57  ;;  %v15381_v56 = vcombine.high %v5703_v46, %v5719_v47  ;;  %v5734_v57 = vld [vmem:[#allocation22 + $0xdc0] sm:$0xff]  ;;  %v5863_v40 = vld [vmem:[#allocation22 + $0x1ec8] sm:$0xff] }
 0xf20   : > { %v15410_v12 = vcombine.low %v5734_v57, %v5750_v58 }
 0xf22   : > { %7763 = vmatpush1.bf16.msra.mxu0 %v15470_v6  ;;  %7804 = vmatpush1.bf16.msra.mxu1 %v15472_v7  ;;  %v15380_v6 = vcombine.low %v5703_v46, %v5719_v47  ;;  %v15411_v7 = vcombine.high %v5734_v57, %v5750_v58  ;;  %v5879_v46 = vld [vmem:[#allocation22 + $0x20e8] sm:$0xff]  ;;  %v5656_v57 = vld [vmem:[#allocation22 + $0x330] sm:$0xff]  ;;  %v5641_v58 = vld [vmem:[#allocation22 + $0x118] sm:$0xff] }
 0xf23   : > { %7764 = vmatprep.subr.bf16.mxu0 %v15503_v9  ;;  %7805 = vmatprep.subr.bf16.mxu1 %v15505_v61  ;;  %v15413_v9 = vcombine.high %v5735_v62, %v5751_v3  ;;  %v5766_v61 = vld [vmem:[#allocation22 + $0x1200] sm:$0xff] }
 0xf24   : > { %v15442_v22 = vcombine.low %v5766_v61, %v5782_v8 }
 0xf26   : > { %7765 = vmatpush1.bf16.msra.mxu0 %v15502_v14  ;;  %7806 = vmatpush1.bf16.msra.mxu1 %v15504_v15  ;;  %v15412_v14 = vcombine.low %v5735_v62, %v5751_v3  ;;  %v15443_v15 = vcombine.high %v5766_v61, %v5782_v8  ;;  %v5657_v62 = vld [vmem:[#allocation22 + $0x338] sm:$0xff]  ;;  %v5688_v61 = vld [vmem:[#allocation22 + $0x770] sm:$0xff] }
 0xf27   : > { %7766 = vmatprep.subr.bf16.mxu0 %v15535_v16  ;;  %7807 = vmatprep.subr.bf16.mxu1 %v15537_v17  ;;  %v15445_v16 = vcombine.high %v5767_v10, %v5783_v11  ;;  %v5798_v17 = vld [vmem:[#allocation22 + $0x1640] sm:$0xff]  ;;  %v5673_v8 = vld [vmem:[#allocation22 + $0x558] sm:$0xff] }
 0xf28   : > { %v15474_v30 = vcombine.low %v5798_v17, %v5814_v19 }
 0xf2a   : > { %7767 = vmatpush1.bf16.msra.mxu0 %v15534_v23  ;;  %7808 = vmatpush1.bf16.msra.mxu1 %v15536_v60  ;;  %v15444_v23 = vcombine.low %v5767_v10, %v5783_v11  ;;  %v15475_v60 = vcombine.high %v5798_v17, %v5814_v19  ;;  %v5689_v10 = vld [vmem:[#allocation22 + $0x778] sm:$0xff]  ;;  %v5720_v17 = vld [vmem:[#allocation22 + $0xbb0] sm:$0xff] }
 0xf2b   : > { %7834 = vmatprep.subr.bf16.mxu0 %v15315_v24  ;;  %7875 = vmatprep.subr.bf16.mxu1 %v15317_v25  ;;  %v15477_v24 = vcombine.high %v5799_v20, %v5815_v21  ;;  %v5830_v25 = vld [vmem:[#allocation22 + $0x1a80] sm:$0xff]  ;;  %v5705_v19 = vld [vmem:[#allocation22 + $0x998] sm:$0xff] }
 0xf2c   : > { %v15506_v47 = vcombine.low %v5830_v25, %v5846_v26 }
 0xf2d   : > { %7785 = vmatmul.mubr.bf16.vlgmr.msra.gmra.mrb[92].mxu0 %v19279_v48  ;;  %7826 = vmatmul.mubr.bf16.vlgmr.msra.gmra.mrb[92].mxu1 %v19279_v48 }
 0xf2e   : > { %7835 = vmatpush1.bf16.msra.mxu0 %v15314_v35  ;;  %7876 = vmatpush1.bf16.msra.mxu1 %v15316_v36  ;;  %v15476_v35 = vcombine.low %v5799_v20, %v5815_v21  ;;  %v15507_v36 = vcombine.high %v5830_v25, %v5846_v26  ;;  %v5721_v20 = vld [vmem:[#allocation22 + $0xbb8] sm:$0xff]  ;;  %v5752_v25 = vld [vmem:[#allocation22 + $0xff0] sm:$0xff] }
 0xf2f   : > { %7836 = vmatprep.subr.bf16.mxu0 %v15347_v37  ;;  %7877 = vmatprep.subr.bf16.mxu1 %v15349_v38  ;;  %v15509_v37 = vcombine.high %v5831_v28, %v5847_v29  ;;  %v5862_v38 = vld [vmem:[#allocation22 + $0x1ec0] sm:$0xff]  ;;  %v5737_v26 = vld [vmem:[#allocation22 + $0xdd8] sm:$0xff] }
 0xf30   : > { %7866 = vmatprep.mubr.bf16.mxu0 %v18389_v0  ;;  %7907 = vmatprep.mubr.bf16.mxu1 %v18389_v0  ;;  %v15538_v3 = vcombine.low %v5862_v38, %v5878_v39 }
 0xf32   : > { %7837 = vmatpush1.bf16.msra.mxu0 %v15346_v50  ;;  %7878 = vmatpush1.bf16.msra.mxu1 %v15348_v52  ;;  %v15508_v50 = vcombine.low %v5831_v28, %v5847_v29  ;;  %v15539_v52 = vcombine.high %v5862_v38, %v5878_v39  ;;  %v5753_v28 = vld [vmem:[#allocation22 + $0xff8] sm:$0xff]  ;;  %v5784_v38 = vld [vmem:[#allocation22 + $0x1430] sm:$0xff] }
 0xf33   : > { %7838 = vmatprep.subr.bf16.mxu0 %v15379_v55  ;;  %7879 = vmatprep.subr.bf16.mxu1 %v15381_v56  ;;  %v15541_v55 = vcombine.high %v5863_v40, %v5879_v46  ;;  %v5640_v56 = vld [vmem:[#allocation22 + $0x110] sm:$0xff]  ;;  %v5769_v39 = vld [vmem:[#allocation22 + $0x1218] sm:$0xff] }
 0xf34   : > { %v15318_v11 = vcombine.low %v5640_v56, %v5656_v57 }
 0xf36   : > { %7839 = vmatpush1.bf16.msra.mxu0 %v15378_v4  ;;  %7880 = vmatpush1.bf16.msra.mxu1 %v15380_v6  ;;  %v15540_v4 = vcombine.low %v5863_v40, %v5879_v46  ;;  %v15319_v6 = vcombine.high %v5640_v56, %v5656_v57  ;;  %v5785_v40 = vld [vmem:[#allocation22 + $0x1438] sm:$0xff]  ;;  %v5800_v56 = vld [vmem:[#allocation22 + $0x1650] sm:$0xff] }
 0xf37   : > { %7840 = vmatprep.subr.bf16.mxu0 %v15411_v7  ;;  %7881 = vmatprep.subr.bf16.mxu1 %v15413_v9  ;;  %v15321_v7 = vcombine.high %v5641_v58, %v5657_v62  ;;  %v5672_v9 = vld [vmem:[#allocation22 + $0x550] sm:$0xff] }
 0xf38   : > { %v15350_v21 = vcombine.low %v5672_v9, %v5688_v61  ;;  %v5816_v57 = vld [vmem:[#allocation22 + $0x1870] sm:$0xff] }
 0xf3a   : > { %7841 = vmatpush1.bf16.msra.mxu0 %v15410_v12  ;;  %7882 = vmatpush1.bf16.msra.mxu1 %v15412_v14  ;;  %v15320_v12 = vcombine.low %v5641_v58, %v5657_v62  ;;  %v15351_v14 = vcombine.high %v5672_v9, %v5688_v61  ;;  %v5801_v58 = vld [vmem:[#allocation22 + $0x1658] sm:$0xff]  ;;  %v5832_v61 = vld [vmem:[#allocation22 + $0x1a90] sm:$0xff] }
 0xf3b   : > { %7842 = vmatprep.subr.bf16.mxu0 %v15443_v15  ;;  %7883 = vmatprep.subr.bf16.mxu1 %v15445_v16  ;;  %v15353_v15 = vcombine.high %v5673_v8, %v5689_v10  ;;  %v5704_v16 = vld [vmem:[#allocation22 + $0x990] sm:$0xff]  ;;  %v5817_v62 = vld [vmem:[#allocation22 + $0x1878] sm:$0xff] }
 0xf3c   : > { %v15382_v29 = vcombine.low %v5704_v16, %v5720_v17  ;;  %v15481_v9 = vcombine.high %v5801_v58, %v5817_v62 }
 0xf3e   : > { %7843 = vmatpush1.bf16.msra.mxu0 %v15442_v22  ;;  %7884 = vmatpush1.bf16.msra.mxu1 %v15444_v23  ;;  %v15352_v22 = vcombine.low %v5673_v8, %v5689_v10  ;;  %v15383_v23 = vcombine.high %v5704_v16, %v5720_v17  ;;  %v5848_v8 = vld [vmem:[#allocation22 + $0x1cb0] sm:$0xff]  ;;  %v5833_v10 = vld [vmem:[#allocation22 + $0x1a98] sm:$0xff]  ;;  %v15480_v16 = vcombine.low %v5801_v58, %v5817_v62 }
 0xf3f   : > { %7844 = vmatprep.subr.bf16.mxu0 %v15475_v60  ;;  %7885 = vmatprep.subr.bf16.mxu1 %v15477_v24  ;;  %v15385_v60 = vcombine.high %v5705_v19, %v5721_v20  ;;  %v5736_v24 = vld [vmem:[#allocation22 + $0xdd0] sm:$0xff] }
 0xf40   : > { %v15414_v46 = vcombine.low %v5736_v24, %v5752_v25 }
 0xf42   : > { %7845 = vmatpush1.bf16.msra.mxu0 %v15474_v30  ;;  %7886 = vmatpush1.bf16.msra.mxu1 %v15476_v35  ;;  %v15384_v30 = vcombine.low %v5705_v19, %v5721_v20  ;;  %v15415_v35 = vcombine.high %v5736_v24, %v5752_v25  ;;  %v15511_v20 = vcombine.high %v5832_v61, %v5848_v8  ;;  %v5880_v24 = vld [vmem:[#allocation22 + $0x20f0] sm:$0xff]  ;;  %v5865_v25 = vld [vmem:[#allocation22 + $0x1ed8] sm:$0xff] }
 0xf43   : > { %7846 = vmatprep.subr.bf16.mxu0 %v15507_v36  ;;  %7887 = vmatprep.subr.bf16.mxu1 %v15509_v37  ;;  %v15417_v36 = vcombine.high %v5737_v26, %v5753_v28  ;;  %v5768_v37 = vld [vmem:[#allocation22 + $0x1210] sm:$0xff] }
 0xf46   : > { %7847 = vmatpush1.bf16.msra.mxu0 %v15506_v47  ;;  %7888 = vmatpush1.bf16.msra.mxu1 %v15508_v50  ;;  %v15416_v47 = vcombine.low %v5737_v26, %v5753_v28  ;;  %v19309_v50 = vld [vmem:[#allocation23 + $0x28] sm:$0xff]  ;;  %v5881_v26 = vld [vmem:[#allocation22 + $0x20f8] sm:$0xff] }
 0xf47   : > { %7848 = vmatprep.subr.bf16.mxu0 %v15539_v52  ;;  %7889 = vmatprep.subr.bf16.mxu1 %v15541_v55  ;;  %v15447_v52 = vcombine.high %v5768_v37, %v5784_v38  ;;  %v15449_v55 = vcombine.high %v5769_v39, %v5785_v40 }
 0xf4a   : > { %7849 = vmatpush1.bf16.msra.mxu0 %v15538_v3  ;;  %7890 = vmatpush1.bf16.msra.mxu1 %v15540_v4  ;;  %v5886_v3 = vunpack.c.l.bf16 %v19309_v50  ;;  %v15446_v4 = vcombine.low %v5768_v37, %v5784_v38 }
 0xf4b   : > { %7916 = vmatprep.subr.bf16.mxu0 %v15319_v6  ;;  %7957 = vmatprep.subr.bf16.mxu1 %v15321_v7  ;;  %v15448_v6 = vcombine.low %v5769_v39, %v5785_v40  ;;  %v15479_v7 = vcombine.high %v5800_v56, %v5816_v57 }
 0xf4c   : > { %v7189_v17 = vrot.slane %v5886_v3, %v19028_v2  ;;  %v7197_v19 = vrot.slane %v5886_v3, %v19030_v5 }
 0xf4d   : > { %7867 = vmatmul.mubr.bf16.vlgmr.msra.gmra.mrb[96].mxu0 %v19279_v48  ;;  %7908 = vmatmul.mubr.bf16.vlgmr.msra.gmra.mrb[96].mxu1 %v19279_v48 }
 0xf4e   : > { %7917 = vmatpush1.bf16.msra.mxu0 %v15318_v11  ;;  %7958 = vmatpush1.bf16.msra.mxu1 %v15320_v12  ;;  %v5849_v11 = vld [vmem:[#allocation22 + $0x1cb8] sm:$0xff]  ;;  %v7185_v12 = vrot.slane %v5886_v3, %v19024_v63 }
 0xf4f   : > { %7918 = vmatprep.subr.bf16.mxu0 %v15351_v14  ;;  %7959 = vmatprep.subr.bf16.mxu1 %v15353_v15  ;;  %v7193_v14 = vrot.slane %v5886_v3, %v19026_v1  ;;  %v15478_v15 = vcombine.low %v5800_v56, %v5816_v57  ;;  %v15545_v56 = vcombine.high %v5865_v25, %v5881_v26 }
 0xf50   : > { %7948 = vmatprep.mubr.bf16.mxu0 %v18389_v0  ;;  %7989 = vmatprep.mubr.bf16.mxu1 %v18389_v0 }
 0xf52   : > { %7919 = vmatpush1.bf16.msra.mxu0 %v15350_v21  ;;  %7960 = vmatpush1.bf16.msra.mxu1 %v15352_v22  ;;  %v15513_v21 = vcombine.high %v5833_v10, %v5849_v11  ;;  %v5864_v22 = vld [vmem:[#allocation22 + $0x1ed0] sm:$0xff] }
 0xf53   : > { %7920 = vmatprep.subr.bf16.mxu0 %v15383_v23  ;;  %7961 = vmatprep.subr.bf16.mxu1 %v15385_v60  ;;  %v15542_v62 = vcombine.low %v5864_v22, %v5880_v24 }
 0xf56   : > { %7921 = vmatpush1.bf16.msra.mxu0 %v15382_v29  ;;  %7962 = vmatpush1.bf16.msra.mxu1 %v15384_v30 }
 0xf57   : > { %7922 = vmatprep.subr.bf16.mxu0 %v15415_v35  ;;  %7963 = vmatprep.subr.bf16.mxu1 %v15417_v36  ;;  %v15510_v36 = vcombine.low %v5832_v61, %v5848_v8 }
 0xf5a   : > { %7923 = vmatpush1.bf16.msra.mxu0 %v15414_v46  ;;  %7964 = vmatpush1.bf16.msra.mxu1 %v15416_v47  ;;  %v15512_v46 = vcombine.low %v5833_v10, %v5849_v11  ;;  %v8237_v10 = vld [vmem:[#allocation16 + $0xd8] sm:$0xff]  ;;  %v8238_v11 = vld [vmem:[#allocation16 + $0xe0] sm:$0xff] }
 0xf5b   : > { %7924 = vmatprep.subr.bf16.mxu0 %v15447_v52  ;;  %7965 = vmatprep.subr.bf16.mxu1 %v15449_v55  ;;  %v15543_v55 = vcombine.high %v5864_v22, %v5880_v24 }
 0xf5e   : > { %7925 = vmatpush1.bf16.msra.mxu0 %v15446_v4  ;;  %7966 = vmatpush1.bf16.msra.mxu1 %v15448_v6  ;;  %v15544_v6 = vcombine.low %v5865_v25, %v5881_v26 }
 0xf5f   : > { %7926 = vmatprep.subr.bf16.mxu0 %v15479_v7  ;;  %7967 = vmatprep.subr.bf16.mxu1 %v15481_v9  ;;  %v8235_v7 = vld [vmem:[#allocation16 + $0xc8] sm:$0xff]  ;;  %v8236_v9 = vld [vmem:[#allocation16 + $0xd0] sm:$0xff] }
 0xf60   : > { %v7376_v23 = vpop.f32.mrb[72].mxu0  ;;  %v7417_v60 = vpop.f32.mrb[72].mxu1  ;;  %v17485_v8 = vpack.c.bf16 %v8236_v9, %v8235_v7 }
 0xf61   : > { %v7377_v28 = vadd.f32 %v7376_v23, %v7185_v12  ;;  %v7418_v29 = vadd.f32 %v7417_v60, %v7193_v14  ;;  %v7378_v30 = vpop.f32.mrb[73].mxu0  ;;  %v7419_v35 = vpop.f32.mrb[73].mxu1  ;;  %v17488_v12 = vpack.c.bf16 %v8238_v11, %v8237_v10  ;;  %v8239_v14 = vld [vmem:[#allocation16 + $0xe8] sm:$0xff] }
 0xf62   : > { %v7379_v37 = vadd.f32 %v7378_v30, %v7189_v17  ;;  %v7420_v38 = vadd.f32 %v7419_v35, %v7197_v19  ;;  %7927 = vmatpush1.bf16.msra.mxu0 %v15478_v15  ;;  %7968 = vmatpush1.bf16.msra.mxu1 %v15480_v16  ;;  %v7380_v39 = vpop.f32.mrb[74].mxu0  ;;  %v7421_v40 = vpop.f32.mrb[74].mxu1 }
 0xf63   : > { %v7381_v47 = vpop.f32.mrb[75].mxu0  ;;  %v7422_v52 = vpop.f32.mrb[75].mxu1  ;;  %7928 = vmatprep.subr.bf16.mxu0 %v15511_v20  ;;  %7969 = vmatprep.subr.bf16.mxu1 %v15513_v21 }
 0xf64   : > { %v8030_v57 = vcombine.low %v7377_v28, %v7379_v37  ;;  %v8031_v58 = vcombine.low %v7418_v29, %v7420_v38  ;;  %v5883_v52 = vld [vmem:[#allocation23 + $0x30] sm:$0xff] }
 0xf66   : > { %v8040_v3 = vrot.slane %v8030_v57, %v19036_v18  ;;  %v8047_v4 = vrot.slane %v8031_v58, %v19036_v18  ;;  %7929 = vmatpush1.bf16.msra.mxu0 %v15510_v36  ;;  %7970 = vmatpush1.bf16.msra.mxu1 %v15512_v46 }
 0xf67   : > { %7930 = vmatprep.subr.bf16.mxu0 %v15543_v55  ;;  %7971 = vmatprep.subr.bf16.mxu1 %v15545_v56  ;;  %v5888_v55 = vunpack.c.l.bf16 %v5883_v52 }
 0xf68   : > { %v8062_v61 = vcombine.low %v8040_v3, %v8047_v4 }
 0xf69   : > { %v7217_v56 = vrot.slane %v5888_v55, %v19024_v63  ;;  %v7225_v57 = vrot.slane %v5888_v55, %v19026_v1  ;;  %v7221_v58 = vrot.slane %v5888_v55, %v19028_v2 }
 0xf6a   : > { %7931 = vmatpush1.bf16.msra.mxu0 %v15542_v62  ;;  %7972 = vmatpush1.bf16.msra.mxu1 %v15544_v6  ;;  %v8070_v40 = vrot.slane %v8062_v61, %v19036_v18  ;;  %v7229_v62 = vrot.slane %v5888_v55, %v19030_v5 }
 0xf6b   : > { %17484 = vmatprep.subr.bf16.mxu0 %v18385_v53  ;;  %16974 = vmatprep.subr.bf16.mxu1 %v18387_v54 }
 0xf6d   : > { %7949 = vmatmul.mubr.bf16.vlgmr.msra.gmra.mrb[100].mxu0 %v19279_v48  ;;  %7990 = vmatmul.mubr.bf16.vlgmr.msra.gmra.mrb[100].mxu1 %v19279_v48  ;;  %v5887_v48 = vunpack.c.h.bf16 %v19309_v50 }
 0xf6e   : > { %17486 = vmatpush3.bf16.msra.mxu0 %v17485_v8  ;;  %16936 = vmatprep.mubr.msk.f32.mxu0 %vm18386_vm3, %v18387_v54 }
 0xf6f   : > { %17487 = vmatprep.subr.bf16.mxu0 %v18385_v53  ;;  %16990 = vmatprep.mubr.msk.bf16.mxu1 %vm18386_vm3, %v18387_v54  ;;  %v7201_v15 = vrot.slane %v5887_v48, %v19024_v63  ;;  %v7209_v16 = vrot.slane %v5887_v48, %v19026_v1  ;;  %v7205_v17 = vrot.slane %v5887_v48, %v19028_v2 }
 0xf70   : > { %v7213_v19 = vrot.slane %v5887_v48, %v19030_v5 }
 0xf72   : > { %17489 = vmatpush3.bf16.msra.mxu0 %v17488_v12 }
 0xf73   : > { %16934 = vmatprep.subr.mxu0 %v18387_v54 }
 0xf76   : > { %16935 = vmatpush3.msra.mxu0 %v8239_v14 }
 0xf77   : > { %16937 = vmatmul.mubr.msk.f32.vlgmr.msra.gmra.mrb[104].mxu0 %vm1590_vm5, %v18986_v49  ;;  %17490 = vmatprep.subr.bf16.mxu0 %v18385_v53 }
 0xf78   : > { %16971 = vmatprep.mubr.msk.f32.mxu0 %vm18386_vm3, %v18387_v54 }
 0xf80   : > { %v7458_v20 = vpop.f32.mrb[76].mxu0  ;;  %v7499_v21 = vpop.f32.mrb[76].mxu1 }
 0xf81   : > { %v7459_v22 = vadd.f32 %v7458_v20, %v7201_v15  ;;  %v7500_v23 = vadd.f32 %v7499_v21, %v7209_v16  ;;  %v7460_v60 = vpop.f32.mrb[77].mxu0  ;;  %v7501_v24 = vpop.f32.mrb[77].mxu1  ;;  %v8313_v21 = vld [vmem:[#allocation19 + $0x280] sm:$0xff] }
 0xf82   : > { %v7461_v25 = vadd.f32 %v7460_v60, %v7205_v17  ;;  %v7502_v26 = vadd.f32 %v7501_v24, %v7213_v19  ;;  %v7462_v28 = vpop.f32.mrb[78].mxu0  ;;  %v7503_v29 = vpop.f32.mrb[78].mxu1  ;;  %v8316_v24 = vld [vmem:[#allocation19 + $0x298] sm:$0xff] }
 0xf83   : > { %v7463_v50 = vpop.f32.mrb[79].mxu0  ;;  %v7504_v30 = vpop.f32.mrb[79].mxu1  ;;  %v8318_v28 = vld [vmem:[#allocation19 + $0x2a8] sm:$0xff] }
 0xf84   : > { %v8032_v35 = vcombine.low %v7459_v22, %v7461_v25  ;;  %v8033_v36 = vcombine.low %v7500_v23, %v7502_v26  ;;  %v8314_v22 = vld [vmem:[#allocation19 + $0x288] sm:$0xff]  ;;  %v8315_v23 = vld [vmem:[#allocation19 + $0x290] sm:$0xff]  ;;  %v8317_v26 = vld [vmem:[#allocation19 + $0x2a0] sm:$0xff] }
 0xf85   : > { %v17491_v60 = vpack.c.bf16 %v8314_v22, %v8313_v21  ;;  %v17494_v25 = vpack.c.bf16 %v8316_v24, %v8315_v23  ;;  %v17497_v29 = vpack.c.bf16 %v8318_v28, %v8317_v26  ;;  %v8319_v50 = vld [vmem:[#allocation19 + $0x2b0] sm:$0xff]  ;;  %v8320_v30 = vld [vmem:[#allocation19 + $0x2b8] sm:$0xff] }
 0xf86   : > { %v8054_v37 = vrot.slane %v8032_v35, %v19036_v18  ;;  %v8061_v38 = vrot.slane %v8033_v36, %v19036_v18  ;;  %v17500_v35 = vpack.c.bf16 %v8320_v30, %v8319_v50  ;;  %v8321_v36 = vld [vmem:[#allocation19 + $0x2c0] sm:$0xff]  ;;  %v8327_v23 = vld [vmem:[#allocation19 + $0x2f0] sm:$0xff] }
 0xf87   : > { %17492 = vmatpush3.bf16.msra.mxu0 %v17491_v60  ;;  %v8328_v60 = vld [vmem:[#allocation19 + $0x2f8] sm:$0xff]  ;;  %v8402_v30 = vld [vmem:[#allocation22 + $0x14] sm:$0xf] }
 0xf88   : > { %v8063_v39 = vcombine.low %v8054_v37, %v8061_v38  ;;  %17493 = vmatprep.subr.bf16.mxu0 %v18385_v53  ;;  %v8322_v37 = vld [vmem:[#allocation19 + $0x2c8] sm:$0xff]  ;;  %v5889_v38 = vunpack.c.h.bf16 %v5883_v52  ;;  %v17512_v24 = vpack.c.bf16 %v8328_v60, %v8327_v23 }
 0xf8a   : > { %v8077_v46 = vrot.slane %v8063_v39, %v19036_v18  ;;  %v17503_v39 = vpack.c.bf16 %v8322_v37, %v8321_v36  ;;  %v7245_v55 = vrot.slane %v5889_v38, %v19030_v5  ;;  %v8404_v36 = vld [vmem:[#allocation22 + $0x454] sm:$0xf] }
 0xf8b   : > { %17495 = vmatpush3.bf16.msra.mxu0 %v17494_v25 }
 0xf8c   : > { %v8078_v47 = vcombine.low %v8070_v40, %v8077_v46  ;;  %17496 = vmatprep.subr.bf16.mxu0 %v18385_v53  ;;  %v7233_v40 = vrot.slane %v5889_v38, %v19024_v63  ;;  %v7241_v46 = vrot.slane %v5889_v38, %v19026_v1 }
 0xf8e   : > { %8230 = vst [vmem:[%s19043_s30 + $0x28] sm:$0xff] %v8078_v47  ;;  %v7237_v47 = vrot.slane %v5889_v38, %v19028_v2  ;;  %v8405_v38 = vld [vmem:[#allocation22 + $0x674] sm:$0xf] }
 0xf8f   : > { %17498 = vmatpush3.bf16.msra.mxu0 %v17497_v29  ;;  %v5884_v29 = vld [vmem:[#allocation23 + $0x38] sm:$0xff] }
 0xf90   : > { %17499 = vmatprep.subr.bf16.mxu0 %v18385_v53  ;;  %v5890_v50 = vunpack.c.l.bf16 %v5884_v29 }
 0xf93   : > { %17501 = vmatpush3.bf16.msra.mxu0 %v17500_v35  ;;  %v8403_v35 = vld [vmem:[#allocation22 + $0x234] sm:$0xf] }
 0xf94   : > { %17502 = vmatprep.subr.bf16.mxu0 %v18385_v53  ;;  %v15547_v37 = vcombine.low %v8402_v30, %v8403_v35 }
 0xf96   : > { %16975 = vmatpush3.bf16.msra.mxu1 %v15547_v37 }
 0xf97   : > { %17504 = vmatpush3.bf16.msra.mxu0 %v17503_v39  ;;  %v15548_v39 = vcombine.low %v8404_v36, %v8405_v38  ;;  %16976 = vmatprep.subr.bf16.mxu1 %v18387_v54 }
 0xf98   : > { %17505 = vmatprep.subr.bf16.mxu0 %v18385_v53 }
 0xf9a   : > { %16977 = vmatpush3.bf16.msra.mxu1 %v15548_v39 }
 0xf9b   : > { %16978 = vmatprep.subr.bf16.mxu1 %v18387_v54 }
 0xfa0   : > { %v7540_v3 = vpop.f32.mrb[80].mxu0  ;;  %v7581_v4 = vpop.f32.mrb[80].mxu1 }
 0xfa1   : > { %v7541_v6 = vadd.f32 %v7540_v3, %v7217_v56  ;;  %v7582_v7 = vadd.f32 %v7581_v4, %v7225_v57  ;;  %v7542_v9 = vpop.f32.mrb[81].mxu0  ;;  %v7583_v61 = vpop.f32.mrb[81].mxu1 }
 0xfa2   : > { %v7543_v8 = vadd.f32 %v7542_v9, %v7221_v58  ;;  %v7584_v10 = vadd.f32 %v7583_v61, %v7229_v62  ;;  %v7544_v11 = vpop.f32.mrb[82].mxu0  ;;  %v7585_v12 = vpop.f32.mrb[82].mxu1  ;;  %v8323_v58 = vld [vmem:[#allocation19 + $0x2d0] sm:$0xff]  ;;  %v8324_v62 = vld [vmem:[#allocation19 + $0x2d8] sm:$0xff] }
 0xfa3   : > { %v7545_v14 = vpop.f32.mrb[83].mxu0  ;;  %v7586_v48 = vpop.f32.mrb[83].mxu1 }
 0xfa4   : > { %v8079_v15 = vcombine.low %v7541_v6, %v7543_v8  ;;  %v8080_v16 = vcombine.low %v7582_v7, %v7584_v10  ;;  %v17506_v7 = vpack.c.bf16 %v8324_v62, %v8323_v58 }
 0xfa6   : > { %v19348_v17 = vrot.slane %v8079_v15, %v19036_v18  ;;  %v19351_v19 = vrot.slane %v8080_v16, %v19036_v18  ;;  %17507 = vmatpush3.bf16.msra.mxu0 %v17506_v7  ;;  %v8325_v15 = vld [vmem:[#allocation19 + $0x2e0] sm:$0xff]  ;;  %v8326_v16 = vld [vmem:[#allocation19 + $0x2e8] sm:$0xff] }
 0xfa7   : > { %17508 = vmatprep.subr.bf16.mxu0 %v18385_v53  ;;  %v8408_v7 = vld [vmem:[#allocation22 + $0xcd4] sm:$0xf] }
 0xfa8   : > { %v8111_v20 = vcombine.low %v19348_v17, %v19351_v19  ;;  %v17509_v17 = vpack.c.bf16 %v8326_v16, %v8325_v15 }
 0xfaa   : > { %17510 = vmatpush3.bf16.msra.mxu0 %v17509_v17  ;;  %v8119_v25 = vrot.slane %v8111_v20, %v19036_v18  ;;  %v7257_v20 = vrot.slane %v5890_v50, %v19026_v1  ;;  %v8410_v17 = vld [vmem:[#allocation22 + $0x1114] sm:$0xf] }
 0xfab   : > { %17511 = vmatprep.subr.bf16.mxu0 %v18385_v53 }
 0xfae   : > { %17513 = vmatpush3.bf16.msra.mxu0 %v17512_v24  ;;  %v8412_v24 = vld [vmem:[#allocation22 + $0x1554] sm:$0xf] }
 0xfaf   : > { %17514 = vmatprep.subr.bf16.mxu0 %v18385_v53 }
 0xfc0   : > { %v7622_v56 = vpop.f32.mrb[84].mxu0  ;;  %v7663_v57 = vpop.f32.mrb[84].mxu1 }
 0xfc1   : > { %v7623_v52 = vadd.f32 %v7622_v56, %v7233_v40  ;;  %v7664_v3 = vadd.f32 %v7663_v57, %v7241_v46  ;;  %v7624_v4 = vpop.f32.mrb[85].mxu0  ;;  %v7665_v6 = vpop.f32.mrb[85].mxu1  ;;  %v7249_v40 = vrot.slane %v5890_v50, %v19024_v63  ;;  %v8406_v46 = vld [vmem:[#allocation22 + $0x894] sm:$0xf]  ;;  %v7261_v56 = vrot.slane %v5890_v50, %v19030_v5 }
 0xfc2   : > { %v7625_v9 = vadd.f32 %v7624_v4, %v7237_v47  ;;  %v7666_v61 = vadd.f32 %v7665_v6, %v7245_v55  ;;  %v7626_v8 = vpop.f32.mrb[86].mxu0  ;;  %v7667_v10 = vpop.f32.mrb[86].mxu1  ;;  %v8407_v47 = vld [vmem:[#allocation22 + $0xab4] sm:$0xf]  ;;  %v7253_v55 = vrot.slane %v5890_v50, %v19028_v2 }
 0xfc3   : > { %v7627_v11 = vpop.f32.mrb[87].mxu0  ;;  %v7668_v12 = vpop.f32.mrb[87].mxu1  ;;  %v15549_v62 = vcombine.low %v8406_v46, %v8407_v47 }
 0xfc4   : > { %v8081_v14 = vcombine.low %v7623_v52, %v7625_v9  ;;  %v8082_v48 = vcombine.low %v7664_v3, %v7666_v61  ;;  %v8409_v9 = vld [vmem:[#allocation22 + $0xef4] sm:$0xf] }
 0xfc5   : > { %16979 = vmatpush3.bf16.msra.mxu1 %v15549_v62  ;;  %v15550_v16 = vcombine.low %v8408_v7, %v8409_v9 }
 0xfc6   : > { %v8103_v19 = vrot.slane %v8081_v14, %v19036_v18  ;;  %v8110_v21 = vrot.slane %v8082_v48, %v19036_v18  ;;  %16980 = vmatprep.subr.bf16.mxu1 %v18387_v54 }
 0xfc8   : > { %v8112_v22 = vcombine.low %v8103_v19, %v8110_v21  ;;  %v8411_v19 = vld [vmem:[#allocation22 + $0x1334] sm:$0xf] }
 0xfc9   : > { %16981 = vmatpush3.bf16.msra.mxu1 %v15550_v16  ;;  %v15551_v60 = vcombine.low %v8410_v17, %v8411_v19 }
 0xfca   : > { %v8126_v26 = vrot.slane %v8112_v22, %v19036_v18  ;;  %16982 = vmatprep.subr.bf16.mxu1 %v18387_v54 }
 0xfcc   : > { %v8127_v28 = vcombine.low %v8119_v25, %v8126_v26  ;;  %v8413_v25 = vld [vmem:[#allocation22 + $0x1774] sm:$0xf] }
 0xfcd   : > { %16983 = vmatpush3.bf16.msra.mxu1 %v15551_v60  ;;  %v15552_v26 = vcombine.low %v8412_v24, %v8413_v25 }
 0xfce   : > { %8231 = vst [vmem:[%s19043_s30 + $0x30] sm:$0xff] %v8127_v28  ;;  %16984 = vmatprep.subr.bf16.mxu1 %v18387_v54  ;;  %v5891_v28 = vunpack.c.h.bf16 %v5884_v29 }
 0xfd0   : > { %v7265_v50 = vrot.slane %v5891_v28, %v19024_v63  ;;  %v7273_v30 = vrot.slane %v5891_v28, %v19026_v1  ;;  %v7269_v35 = vrot.slane %v5891_v28, %v19028_v2  ;;  %v7277_v36 = vrot.slane %v5891_v28, %v19030_v5 }
 0xfd1   : > { %16985 = vmatpush3.bf16.msra.mxu1 %v15552_v26 }
 0xfd2   : > { %16986 = vmatprep.subr.bf16.mxu1 %v18387_v54 }
 0xfe0   : > { %v7704_v57 = vpop.f32.mrb[88].mxu0  ;;  %v7745_v58 = vpop.f32.mrb[88].mxu1 }
 0xfe1   : > { %v7705_v52 = vadd.f32 %v7704_v57, %v7249_v40  ;;  %v7746_v3 = vadd.f32 %v7745_v58, %v7257_v20  ;;  %v7706_v4 = vpop.f32.mrb[89].mxu0  ;;  %v7747_v6 = vpop.f32.mrb[89].mxu1 }
 0xfe2   : > { %v7707_v61 = vadd.f32 %v7706_v4, %v7253_v55  ;;  %v7748_v8 = vadd.f32 %v7747_v6, %v7261_v56  ;;  %v7708_v10 = vpop.f32.mrb[90].mxu0  ;;  %v7749_v11 = vpop.f32.mrb[90].mxu1 }
 0xfe3   : > { %v7709_v12 = vpop.f32.mrb[91].mxu0  ;;  %v7750_v14 = vpop.f32.mrb[91].mxu1 }
 0xfe4   : > { %v8128_v48 = vcombine.low %v7705_v52, %v7707_v61  ;;  %v8129_v15 = vcombine.low %v7746_v3, %v7748_v8  ;;  %v5885_v8 = vld [vmem:[#allocation23 + $0x40] sm:$0xff] }
 0xfe5   : > { %v5892_v10 = vunpack.c.l.bf16 %v5885_v8 }
 0xfe6   : > { %v8138_v21 = vrot.slane %v8128_v48, %v19036_v18  ;;  %v8145_v22 = vrot.slane %v8129_v15, %v19036_v18 }
 0xfe7   : > { %v7281_v11 = vrot.slane %v5892_v10, %v19024_v63  ;;  %v7289_v12 = vrot.slane %v5892_v10, %v19026_v1  ;;  %v7285_v14 = vrot.slane %v5892_v10, %v19028_v2  ;;  %v7293_v48 = vrot.slane %v5892_v10, %v19030_v5 }
 0xfe8   : > { %v8160_v23 = vcombine.low %v8138_v21, %v8145_v22 }
 0xfea   : > { %v8168_v7 = vrot.slane %v8160_v23, %v19036_v18 }
0x1000   : > { %v7786_v37 = vpop.f32.mrb[92].mxu0  ;;  %v7827_v38 = vpop.f32.mrb[92].mxu1 }
0x1001   : > { %v7787_v39 = vadd.f32 %v7786_v37, %v7265_v50  ;;  %v7828_v40 = vadd.f32 %v7827_v38, %v7273_v30  ;;  %v7788_v20 = vpop.f32.mrb[93].mxu0  ;;  %v7829_v46 = vpop.f32.mrb[93].mxu1  ;;  %v5893_v38 = vunpack.c.h.bf16 %v5885_v8 }
0x1002   : > { %v7789_v47 = vadd.f32 %v7788_v20, %v7269_v35  ;;  %v7830_v55 = vadd.f32 %v7829_v46, %v7277_v36  ;;  %v7790_v56 = vpop.f32.mrb[94].mxu0  ;;  %v7831_v57 = vpop.f32.mrb[94].mxu1 }
0x1003   : > { %v7791_v29 = vpop.f32.mrb[95].mxu0  ;;  %v7832_v58 = vpop.f32.mrb[95].mxu1  ;;  %v7301_v20 = vrot.slane %v5893_v38, %v19028_v2  ;;  %v7309_v46 = vrot.slane %v5893_v38, %v19030_v5 }
0x1004   : > { %v8130_v62 = vcombine.low %v7787_v39, %v7789_v47  ;;  %v8131_v52 = vcombine.low %v7828_v40, %v7830_v55  ;;  %v7297_v39 = vrot.slane %v5893_v38, %v19024_v63  ;;  %v7305_v40 = vrot.slane %v5893_v38, %v19026_v1 }
0x1006   : > { %v8152_v3 = vrot.slane %v8130_v62, %v19036_v18  ;;  %v8159_v4 = vrot.slane %v8131_v52, %v19036_v18 }
0x1008   : > { %v8161_v6 = vcombine.low %v8152_v3, %v8159_v4 }
0x100a   : > { %v8175_v9 = vrot.slane %v8161_v6, %v19036_v18 }
0x100c   : > { %v8176_v61 = vcombine.low %v8168_v7, %v8175_v9 }
0x100e   : > { %8232 = vst [vmem:[%s19043_s30 + $0x38] sm:$0xff] %v8176_v61 }
0x1020   : > { %v7868_v15 = vpop.f32.mrb[96].mxu0  ;;  %v7909_v16 = vpop.f32.mrb[96].mxu1 }
0x1021   : > { %v7869_v17 = vadd.f32 %v7868_v15, %v7281_v11  ;;  %v7910_v19 = vadd.f32 %v7909_v16, %v7289_v12  ;;  %v7870_v21 = vpop.f32.mrb[97].mxu0  ;;  %v7911_v22 = vpop.f32.mrb[97].mxu1  ;;  %v8240_v12 = vld [vmem:[#allocation17 + $0x5] sm:$0x1] }
0x1022   : > { %v7871_v23 = vadd.f32 %v7870_v21, %v7285_v14  ;;  %v7912_v60 = vadd.f32 %v7911_v22, %v7293_v48  ;;  %v7872_v24 = vpop.f32.mrb[98].mxu0  ;;  %v7913_v25 = vpop.f32.mrb[98].mxu1  ;;  %v8510_v14 = vld [vmem:[#allocation16 + $0xf0] sm:$0xff]  ;;  %v8511_v48 = vld [vmem:[#allocation16 + $0xf8] sm:$0xff] }
0x1023   : > { %v7873_v26 = vpop.f32.mrb[99].mxu0  ;;  %v7914_v28 = vpop.f32.mrb[99].mxu1  ;;  %v8512_v24 = vld [vmem:[#allocation16 + $0x100] sm:$0xff]  ;;  %v8513_v25 = vld [vmem:[#allocation16 + $0x108] sm:$0xff] }
0x1024   : > { %v8177_v50 = vcombine.low %v7869_v17, %v7871_v23  ;;  %v8178_v30 = vcombine.low %v7910_v19, %v7912_v60  ;;  %v17515_v23 = vpack.c.bf16 %v8511_v48, %v8510_v14  ;;  %v17518_v26 = vpack.c.bf16 %v8513_v25, %v8512_v24  ;;  %v8588_v28 = vld [vmem:[#allocation19 + $0x300] sm:$0xff]  ;;  %v8603_v14 = vld [vmem:[#allocation19 + $0x378] sm:$0xff] }
0x1025   : > { %v8329_v24 = vld [vmem:[#allocation20 + $0x5] sm:$0x1] }
0x1026   : > { %v8187_v35 = vrot.slane %v8177_v50, %v19036_v18  ;;  %v8194_v36 = vrot.slane %v8178_v30, %v19036_v18  ;;  %v8589_v50 = vld [vmem:[#allocation19 + $0x308] sm:$0xff]  ;;  %v8514_v30 = vld [vmem:[#allocation16 + $0x110] sm:$0xff] }
0x1028   : > { %v8209_v37 = vcombine.low %v8187_v35, %v8194_v36  ;;  %v17521_v35 = vpack.c.bf16 %v8589_v50, %v8588_v28  ;;  %v8590_v36 = vld [vmem:[#allocation19 + $0x310] sm:$0xff] }
0x1029   : > { %v8709_v50 = vld [vmem:[#allocation22 + $0x560] sm:$0xff] }
0x102a   : > { %v8217_v15 = vrot.slane %v8209_v37, %v19036_v18  ;;  %v8591_v37 = vld [vmem:[#allocation19 + $0x318] sm:$0xff] }
0x102b   : > { %v17524_v38 = vpack.c.bf16 %v8591_v37, %v8590_v36 }
0x1040   : > { %v7950_v47 = vpop.f32.mrb[100].mxu0  ;;  %v7991_v55 = vpop.f32.mrb[100].mxu1 }
0x1041   : > { %v7951_v56 = vadd.f32 %v7950_v47, %v7297_v39  ;;  %v7992_v57 = vadd.f32 %v7991_v55, %v7305_v40  ;;  %v7952_v29 = vpop.f32.mrb[101].mxu0  ;;  %v7993_v58 = vpop.f32.mrb[101].mxu1  ;;  %v8592_v39 = vld [vmem:[#allocation19 + $0x320] sm:$0xff]  ;;  %v8593_v40 = vld [vmem:[#allocation19 + $0x328] sm:$0xff]  ;;  %v8595_v47 = vld [vmem:[#allocation19 + $0x338] sm:$0xff] }
0x1042   : > { %v7953_v62 = vadd.f32 %v7952_v29, %v7301_v20  ;;  %v7994_v52 = vadd.f32 %v7993_v58, %v7309_v46  ;;  %v7954_v3 = vpop.f32.mrb[102].mxu0  ;;  %v7995_v4 = vpop.f32.mrb[102].mxu1  ;;  %v17527_v20 = vpack.c.bf16 %v8593_v40, %v8592_v39  ;;  %v8594_v46 = vld [vmem:[#allocation19 + $0x330] sm:$0xff]  ;;  %v8414_v58 = vld [vmem:[#allocation22 + $0x1994] sm:$0xf] }
0x1043   : > { %v7955_v6 = vpop.f32.mrb[103].mxu0  ;;  %v7996_v7 = vpop.f32.mrb[103].mxu1  ;;  %v17530_v55 = vpack.c.bf16 %v8595_v47, %v8594_v46  ;;  %v8598_v3 = vld [vmem:[#allocation19 + $0x350] sm:$0xff]  ;;  %v8599_v4 = vld [vmem:[#allocation19 + $0x358] sm:$0xff] }
0x1044   : > { %v8179_v9 = vcombine.low %v7951_v56, %v7953_v62  ;;  %v8180_v61 = vcombine.low %v7992_v57, %v7994_v52  ;;  %v8596_v56 = vld [vmem:[#allocation19 + $0x340] sm:$0xff]  ;;  %v8597_v57 = vld [vmem:[#allocation19 + $0x348] sm:$0xff]  ;;  %v17536_v6 = vpack.c.bf16 %v8599_v4, %v8598_v3  ;;  %v8757_v39 = vld [vmem:[#allocation22 + $0xbc0] sm:$0xff] }
0x1045   : > { %v17533_v29 = vpack.c.bf16 %v8597_v57, %v8596_v56  ;;  %v8415_v62 = vld [vmem:[#allocation22 + $0x1bb4] sm:$0xf]  ;;  %v8515_v40 = vld [vmem:[#allocation17 + $0x6] sm:$0x1]  ;;  %v8710_v46 = vld [vmem:[#allocation22 + $0x568] sm:$0xff] }
0x1046   : > { %v8201_v8 = vrot.slane %v8179_v9, %v19036_v18  ;;  %v8208_v10 = vrot.slane %v8180_v61, %v19036_v18  ;;  %v15553_v52 = vcombine.low %v8414_v58, %v8415_v62  ;;  %v8416_v7 = vld [vmem:[#allocation22 + $0x1dd4] sm:$0xf]  ;;  %v8726_v56 = vld [vmem:[#allocation22 + $0x788] sm:$0xff]  ;;  %v8773_v57 = vld [vmem:[#allocation22 + $0xde0] sm:$0xff] }
0x1047   : > { %v8417_v9 = vld [vmem:[#allocation22 + $0x1ff4] sm:$0xf]  ;;  %v15591_v4 = vcombine.high %v8710_v46, %v8726_v56 }
0x1048   : > { %v8210_v11 = vcombine.low %v8201_v8, %v8208_v10  ;;  %16987 = vmatpush3.bf16.msra.mxu1 %v15553_v52  ;;  %v15554_v61 = vcombine.low %v8416_v7, %v8417_v9  ;;  %v8600_v8 = vld [vmem:[#allocation19 + $0x360] sm:$0xff]  ;;  %v8601_v10 = vld [vmem:[#allocation19 + $0x368] sm:$0xff]  ;;  %v8758_v9 = vld [vmem:[#allocation22 + $0xbc8] sm:$0xff] }
0x1049   : > { %16988 = vmatprep.subr.bf16.mxu1 %v18387_v54 }
0x104a   : > { %v8224_v16 = vrot.slane %v8210_v11, %v19036_v18  ;;  %v8307_v17 = vpop.f32.mrb[104].mxu0  ;;  %v17539_v11 = vpack.c.bf16 %v8601_v10, %v8600_v8  ;;  %v8821_v8 = vld [vmem:[#allocation22 + $0x1440] sm:$0xff]  ;;  %v15590_v10 = vcombine.low %v8710_v46, %v8726_v56 }
0x104b   : > { %v8308_v19 = vadd.f32 %v8307_v17, %v8240_v12  ;;  %v16938_v21 = vpop.f32.mrb[105].mxu0  ;;  %v8602_v12 = vld [vmem:[#allocation19 + $0x370] sm:$0xff]  ;;  %v8678_v17 = vld [vmem:[#allocation22 + $0x128] sm:$0xff] }
0x104c   : > { %v8225_v22 = vcombine.low %v8217_v15, %v8224_v16  ;;  %16989 = vmatpush3.bf16.msra.mxu1 %v15554_v61  ;;  %v17542_v48 = vpack.c.bf16 %v8603_v14, %v8602_v12  ;;  %v8677_v15 = vld [vmem:[#allocation22 + $0x120] sm:$0xff] }
0x104d   : > { %v8311_v60 = vmax.f32 %v8308_v19, 0.0  ;;  %v8693_v16 = vld [vmem:[#allocation22 + $0x340] sm:$0xff] }
0x104e   : > { %8233 = vst [vmem:[%s19043_s30 + $0x40] sm:$0xff] %v8225_v22  ;;  %v15556_v19 = vcombine.low %v8677_v15, %v8693_v16  ;;  %v15557_v21 = vcombine.high %v8677_v15, %v8693_v16  ;;  %v8694_v22 = vld [vmem:[#allocation22 + $0x348] sm:$0xff]  ;;  %v8805_v61 = vld [vmem:[#allocation22 + $0x1220] sm:$0xff] }
0x104f   : > { %16972 = vmatmul.mubr.f32.vlgmr.msra.gmra.mrb[106].mxu0 %v8311_v60  ;;  %v15559_v60 = vcombine.high %v8678_v17, %v8694_v22  ;;  %v15685_v14 = vcombine.high %v8805_v61, %v8821_v8  ;;  %v8790_v15 = vld [vmem:[#allocation22 + $0x1008] sm:$0xff] }
0x1050   : > { %17516 = vmatpush3.bf16.msra.mxu0 %v17515_v23  ;;  %17004 = vmatprep.mubr.msk.f32.mxu0 %vm18386_vm3, %v18387_v54  ;;  %v15558_v23 = vcombine.low %v8678_v17, %v8694_v22  ;;  %v15684_v17 = vcombine.low %v8805_v61, %v8821_v8  ;;  %v8822_v22 = vld [vmem:[#allocation22 + $0x1448] sm:$0xff]  ;;  %v8680_v61 = vld [vmem:[#allocation22 + $0x138] sm:$0xff] }
0x1051   : > { %17517 = vmatprep.subr.bf16.mxu0 %v18385_v53  ;;  %10393 = vmatprep.subr.bf16.mxu1 %v15557_v21  ;;  %v8806_v21 = vld [vmem:[#allocation22 + $0x1228] sm:$0xff] }
0x1054   : > { %17519 = vmatpush3.bf16.msra.mxu0 %v17518_v26 }
0x1055   : > { %17002 = vmatprep.subr.mxu0 %v18387_v54 }
0x1058   : > { %17003 = vmatpush3.msra.mxu0 %v8514_v30  ;;  %v8725_v30 = vld [vmem:[#allocation22 + $0x780] sm:$0xff] }
0x1059   : > { %17005 = vmatmul.mubr.msk.f32.vlgmr.msra.gmra.mrb[108].mxu0 %vm1590_vm5, %v18986_v49  ;;  %17520 = vmatprep.subr.bf16.mxu0 %v18385_v53  ;;  %v15589_v37 = vcombine.high %v8709_v50, %v8725_v30 }
0x105a   : > { %17522 = vmatpush3.bf16.msra.mxu0 %v17521_v35  ;;  %17039 = vmatprep.mubr.msk.f32.mxu0 %vm18386_vm3, %v18387_v54 }
0x105b   : > { %17523 = vmatprep.subr.bf16.mxu0 %v18385_v53 }
0x105e   : > { %17525 = vmatpush3.bf16.msra.mxu0 %v17524_v38  ;;  %v8741_v38 = vld [vmem:[#allocation22 + $0x9a0] sm:$0xff] }
0x105f   : > { %17526 = vmatprep.subr.bf16.mxu0 %v18385_v53  ;;  %v15621_v47 = vcombine.high %v8741_v38, %v8757_v39  ;;  %v15620_v52 = vcombine.low %v8741_v38, %v8757_v39  ;;  %v8869_v38 = vld [vmem:[#allocation22 + $0x1aa0] sm:$0xff] }
0x1060   : > { %v8885_v39 = vld [vmem:[#allocation22 + $0x1cc0] sm:$0xff] }
0x1061   : > { %v15749_v46 = vcombine.high %v8869_v38, %v8885_v39 }
0x1062   : > { %17528 = vmatpush3.bf16.msra.mxu0 %v17527_v20  ;;  %v15588_v20 = vcombine.low %v8709_v50, %v8725_v30  ;;  %v8854_v30 = vld [vmem:[#allocation22 + $0x1888] sm:$0xff] }
0x1063   : > { %17529 = vmatprep.subr.bf16.mxu0 %v18385_v53 }
0x1066   : > { %17531 = vmatpush3.bf16.msra.mxu0 %v17530_v55 }
0x1067   : > { %17532 = vmatprep.subr.bf16.mxu0 %v18385_v53 }
0x106a   : > { %17534 = vmatpush3.bf16.msra.mxu0 %v17533_v29  ;;  %v8789_v29 = vld [vmem:[#allocation22 + $0x1000] sm:$0xff] }
0x106b   : > { %17535 = vmatprep.subr.bf16.mxu0 %v18385_v53  ;;  %v15653_v7 = vcombine.high %v8773_v57, %v8789_v29 }
0x106e   : > { %17537 = vmatpush3.bf16.msra.mxu0 %v17536_v6  ;;  %v8742_v6 = vld [vmem:[#allocation22 + $0x9a8] sm:$0xff] }
0x106f   : > { %17538 = vmatprep.subr.bf16.mxu0 %v18385_v53  ;;  %v15623_v12 = vcombine.high %v8742_v6, %v8758_v9  ;;  %v15622_v16 = vcombine.low %v8742_v6, %v8758_v9  ;;  %v8695_v9 = vld [vmem:[#allocation22 + $0x350] sm:$0xff] }
0x1072   : > { %17540 = vmatpush3.bf16.msra.mxu0 %v17539_v11  ;;  %v15652_v11 = vcombine.low %v8773_v57, %v8789_v29  ;;  %v8901_v57 = vld [vmem:[#allocation22 + $0x1ee0] sm:$0xff] }
0x1073   : > { %17541 = vmatprep.subr.bf16.mxu0 %v18385_v53  ;;  %v8917_v29 = vld [vmem:[#allocation22 + $0x2100] sm:$0xff] }
0x1076   : > { %17543 = vmatpush3.bf16.msra.mxu0 %v17542_v48  ;;  %v8774_v48 = vld [vmem:[#allocation22 + $0xde8] sm:$0xff] }
0x1077   : > { %10434 = vmatprep.subr.bf16.mxu0 %v15559_v60  ;;  %v15687_v60 = vcombine.high %v8806_v21, %v8822_v22 }
0x1122   : > { %v8396_v25 = vpop.f32.mrb[106].mxu0 }
0x1123   : > { %v8397_v26 = vadd.f32 %v8396_v25, %v8329_v24  ;;  %v16973_v28 = vpop.f32.mrb[107].mxu0  ;;  %v15686_v24 = vcombine.low %v8806_v21, %v8822_v22  ;;  %v8837_v25 = vld [vmem:[#allocation22 + $0x1660] sm:$0xff] }
0x1124   : > { %v8838_v28 = vld [vmem:[#allocation22 + $0x1668] sm:$0xff] }
0x1125   : > { %v8400_v35 = vmax.f32 %v8397_v26, 0.0  ;;  %v8853_v26 = vld [vmem:[#allocation22 + $0x1880] sm:$0xff] }
0x1126   : > { %v15717_v50 = vcombine.high %v8837_v25, %v8853_v26 }
0x1127   : > { %v8401_v36 = vpack.c.bf16 %v8400_v35, %v8400_v35  ;;  %v15716_v35 = vcombine.low %v8837_v25, %v8853_v26  ;;  %v8711_v26 = vld [vmem:[#allocation22 + $0x570] sm:$0xff] }
0x1129   : > { %16991 = vmatmul.mubr.bf16.vlgmr.msra.gmra.mrb[104].mxu1 %v8401_v36  ;;  %v15718_v36 = vcombine.low %v8838_v28, %v8854_v30 }
0x112a   : > { %10394 = vmatpush1.bf16.msra.mxu1 %v15556_v19  ;;  %10425 = vmatprep.mubr.bf16.mxu1 %v18389_v0  ;;  %v15655_v19 = vcombine.high %v8774_v48, %v8790_v15 }
0x112b   : > { %10395 = vmatprep.subr.bf16.mxu1 %v15589_v37  ;;  %v15719_v37 = vcombine.high %v8838_v28, %v8854_v30  ;;  %v8727_v28 = vld [vmem:[#allocation22 + $0x790] sm:$0xff]  ;;  %v8728_v30 = vld [vmem:[#allocation22 + $0x798] sm:$0xff] }
0x112c   : > { %v8582_v55 = vpop.f32.mrb[108].mxu0 }
0x112d   : > { %v8583_v58 = vadd.f32 %v8582_v55, %v8515_v40  ;;  %v17006_v62 = vpop.f32.mrb[109].mxu0  ;;  %v8870_v40 = vld [vmem:[#allocation22 + $0x1aa8] sm:$0xff] }
0x112e   : > { %10396 = vmatpush1.bf16.msra.mxu1 %v15588_v20  ;;  %v15748_v20 = vcombine.low %v8869_v38, %v8885_v39  ;;  %v15781_v62 = vcombine.high %v8901_v57, %v8917_v29  ;;  %v8743_v39 = vld [vmem:[#allocation22 + $0x9b0] sm:$0xff] }
0x112f   : > { %v8586_v3 = vmax.f32 %v8583_v58, 0.0  ;;  %10397 = vmatprep.subr.bf16.mxu1 %v15621_v47  ;;  %v8886_v47 = vld [vmem:[#allocation22 + $0x1cc8] sm:$0xff] }
0x1130   : > { %v15750_v55 = vcombine.low %v8870_v40, %v8886_v47  ;;  %v15751_v56 = vcombine.high %v8870_v40, %v8886_v47  ;;  %v8902_v58 = vld [vmem:[#allocation22 + $0x1ee8] sm:$0xff]  ;;  %v8759_v40 = vld [vmem:[#allocation22 + $0xbd0] sm:$0xff]  ;;  %v15592_v47 = vcombine.low %v8711_v26, %v8727_v28 }
0x1131   : > { %17040 = vmatmul.mubr.f32.vlgmr.msra.gmra.mrb[110].mxu0 %v8586_v3  ;;  %v15780_v3 = vcombine.low %v8901_v57, %v8917_v29  ;;  %v8775_v29 = vld [vmem:[#allocation22 + $0xdf0] sm:$0xff] }
0x1132   : > { %10435 = vmatpush1.bf16.msra.mxu0 %v15558_v23  ;;  %10398 = vmatpush1.bf16.msra.mxu1 %v15620_v52  ;;  %v15654_v23 = vcombine.low %v8774_v48, %v8790_v15  ;;  %v8918_v52 = vld [vmem:[#allocation22 + $0x2108] sm:$0xff]  ;;  %v8418_v48 = vld [vmem:[#allocation23 + $0x5] sm:$0x1] }
0x1133   : > { %10436 = vmatprep.subr.bf16.mxu0 %v15591_v4  ;;  %10399 = vmatprep.subr.bf16.mxu1 %v15653_v7  ;;  %v15782_v4 = vcombine.low %v8902_v58, %v8918_v52  ;;  %v15783_v6 = vcombine.high %v8902_v58, %v8918_v52  ;;  %v8679_v7 = vld [vmem:[#allocation22 + $0x130] sm:$0xff]  ;;  %v8419_v15 = vunpack.c.l.bf16 %v8418_v48  ;;  %v8792_v52 = vld [vmem:[#allocation22 + $0x1018] sm:$0xff] }
0x1134   : > { %10466 = vmatprep.mubr.bf16.mxu0 %v18389_v0  ;;  %v15561_v8 = vcombine.high %v8679_v7, %v8695_v9  ;;  %v8791_v58 = vld [vmem:[#allocation22 + $0x1010] sm:$0xff] }
0x1136   : > { %10437 = vmatpush1.bf16.msra.mxu0 %v15590_v10  ;;  %10400 = vmatpush1.bf16.msra.mxu1 %v15652_v11  ;;  %v8696_v10 = vld [vmem:[#allocation22 + $0x358] sm:$0xff]  ;;  %v15560_v11 = vcombine.low %v8679_v7, %v8695_v9  ;;  %v8807_v9 = vld [vmem:[#allocation22 + $0x1230] sm:$0xff] }
0x1137   : > { %10438 = vmatprep.subr.bf16.mxu0 %v15623_v12  ;;  %10401 = vmatprep.subr.bf16.mxu1 %v15685_v14  ;;  %v15562_v12 = vcombine.low %v8680_v61, %v8696_v10  ;;  %v15563_v14 = vcombine.high %v8680_v61, %v8696_v10  ;;  %v8823_v61 = vld [vmem:[#allocation22 + $0x1450] sm:$0xff]  ;;  %v8824_v10 = vld [vmem:[#allocation22 + $0x1458] sm:$0xff] }
0x113a   : > { %10439 = vmatpush1.bf16.msra.mxu0 %v15622_v16  ;;  %10402 = vmatpush1.bf16.msra.mxu1 %v15684_v17 }
0x113b   : > { %10440 = vmatprep.subr.bf16.mxu0 %v15655_v19  ;;  %10403 = vmatprep.subr.bf16.mxu1 %v15717_v50  ;;  %v8712_v50 = vld [vmem:[#allocation22 + $0x578] sm:$0xff] }
0x113c   : > { %v15595_v38 = vcombine.high %v8712_v50, %v8728_v30 }
0x113e   : > { %10441 = vmatpush1.bf16.msra.mxu0 %v15654_v23  ;;  %10404 = vmatpush1.bf16.msra.mxu1 %v15716_v35  ;;  %v8604_v23 = vld [vmem:[#allocation20 + $0x6] sm:$0x1] }
0x113f   : > { %10442 = vmatprep.subr.bf16.mxu0 %v15687_v60  ;;  %10405 = vmatprep.subr.bf16.mxu1 %v15749_v46  ;;  %v8760_v46 = vld [vmem:[#allocation22 + $0xbd8] sm:$0xff] }
0x1142   : > { %10443 = vmatpush1.bf16.msra.mxu0 %v15686_v24  ;;  %10406 = vmatpush1.bf16.msra.mxu1 %v15748_v20  ;;  %v8744_v20 = vld [vmem:[#allocation22 + $0x9b8] sm:$0xff] }
0x1143   : > { %10444 = vmatprep.subr.bf16.mxu0 %v15719_v37  ;;  %10407 = vmatprep.subr.bf16.mxu1 %v15781_v62  ;;  %v15593_v37 = vcombine.high %v8711_v26, %v8727_v28  ;;  %v15627_v57 = vcombine.high %v8744_v20, %v8760_v46  ;;  %v8776_v62 = vld [vmem:[#allocation22 + $0xdf8] sm:$0xff] }
0x1144   : > { %v15659_v7 = vcombine.high %v8776_v62, %v8792_v52  ;;  %v8872_v26 = vld [vmem:[#allocation22 + $0x1ab8] sm:$0xff] }
0x1145   : > { %v8888_v28 = vld [vmem:[#allocation22 + $0x1cd8] sm:$0xff] }
0x1146   : > { %10445 = vmatpush1.bf16.msra.mxu0 %v15718_v36  ;;  %10408 = vmatpush1.bf16.msra.mxu1 %v15780_v3  ;;  %v15624_v3 = vcombine.low %v8743_v39, %v8759_v40 }
0x1147   : > { %10446 = vmatprep.subr.bf16.mxu0 %v15751_v56  ;;  %10475 = vmatprep.subr.bf16.mxu1 %v15561_v8  ;;  %v15625_v56 = vcombine.high %v8743_v39, %v8759_v40  ;;  %v8808_v8 = vld [vmem:[#allocation22 + $0x1238] sm:$0xff]  ;;  %v8919_v39 = vld [vmem:[#allocation22 + $0x2110] sm:$0xff] }
0x1148   : > { %v15691_v48 = vcombine.high %v8808_v8, %v8824_v10  ;;  %v8904_v40 = vld [vmem:[#allocation22 + $0x1ef8] sm:$0xff] }
0x114a   : > { %10447 = vmatpush1.bf16.msra.mxu0 %v15750_v55  ;;  %v15594_v55 = vcombine.low %v8712_v50, %v8728_v30 }
0x114b   : > { %10448 = vmatprep.subr.bf16.mxu0 %v15783_v6  ;;  %v15657_v6 = vcombine.high %v8775_v29, %v8791_v58 }
0x114e   : > { %10449 = vmatpush1.bf16.msra.mxu0 %v15782_v4  ;;  %v15626_v4 = vcombine.low %v8744_v20, %v8760_v46  ;;  %v8920_v20 = vld [vmem:[#allocation22 + $0x2118] sm:$0xff] }
0x114f   : > { %10516 = vmatprep.subr.bf16.mxu0 %v15563_v14  ;;  %v15689_v14 = vcombine.high %v8807_v9, %v8823_v61 }
0x11fc   : > { %v8502_v16 = vpop.f32.mrb[104].mxu1 }
0x11fd   : > { %v8503_v17 = vadd.f32 %v8502_v16, %v8419_v15  ;;  %v16992_v19 = vpop.f32.mrb[105].mxu1  ;;  %v8839_v15 = vld [vmem:[#allocation22 + $0x1670] sm:$0xff] }
0x11fe   : > { %v8505_v21 = vpop.f32.mrb[106].mxu1  ;;  %v8855_v16 = vld [vmem:[#allocation22 + $0x1890] sm:$0xff]  ;;  %v8856_v19 = vld [vmem:[#allocation22 + $0x1898] sm:$0xff] }
0x11ff   : > { %8508 = vst.msk [vmem:[%s19043_s30 + $0x5] sm:$0x1] %vm19066_vm8, %v8503_v17  ;;  %v16993_v22 = vpop.f32.mrb[107].mxu1  ;;  %v8840_v17 = vld [vmem:[#allocation22 + $0x1678] sm:$0xff]  ;;  %v15688_v21 = vcombine.low %v8807_v9, %v8823_v61  ;;  %v15720_v50 = vcombine.low %v8839_v15, %v8855_v16  ;;  %v8729_v9 = vld [vmem:[#allocation22 + $0x7a0] sm:$0xff]  ;;  %v8714_v61 = vld [vmem:[#allocation22 + $0x588] sm:$0xff] }
0x1200   : > { %v15690_v22 = vcombine.low %v8808_v8, %v8824_v10  ;;  %v15722_v30 = vcombine.low %v8840_v17, %v8856_v19  ;;  %v8730_v8 = vld [vmem:[#allocation22 + $0x7a8] sm:$0xff] }
0x1204   : > { %v8671_v60 = vpop.f32.mrb[110].mxu0 }
0x1205   : > { %v8672_v24 = vadd.f32 %v8671_v60, %v8604_v23  ;;  %v17041_v25 = vpop.f32.mrb[111].mxu0  ;;  %v15721_v23 = vcombine.high %v8839_v15, %v8855_v16  ;;  %v15723_v60 = vcombine.high %v8840_v17, %v8856_v19  ;;  %v8761_v15 = vld [vmem:[#allocation22 + $0xbe0] sm:$0xff]  ;;  %v8746_v16 = vld [vmem:[#allocation22 + $0x9c8] sm:$0xff] }
0x1206   : > { %v8887_v25 = vld [vmem:[#allocation22 + $0x1cd0] sm:$0xff]  ;;  %v8762_v17 = vld [vmem:[#allocation22 + $0xbe8] sm:$0xff] }
0x1207   : > { %v8675_v35 = vmax.f32 %v8672_v24, 0.0  ;;  %v8871_v24 = vld [vmem:[#allocation22 + $0x1ab0] sm:$0xff] }
0x1208   : > { %v15752_v46 = vcombine.low %v8871_v24, %v8887_v25 }
0x1209   : > { %v19430_v36 = vpack.c.bf16 %v8675_v35, %v8675_v35  ;;  %v15753_v35 = vcombine.high %v8871_v24, %v8887_v25  ;;  %v8793_v24 = vld [vmem:[#allocation22 + $0x1020] sm:$0xff]  ;;  %v8778_v25 = vld [vmem:[#allocation22 + $0xe08] sm:$0xff] }
0x120b   : > { %10426 = vmatmul.mubr.bf16.vlgmr.msra.gmra.mrb[108].mxu1 %v19430_v36  ;;  %10467 = vmatmul.mubr.bf16.vlgmr.msra.gmra.mrb[112].mxu0 %v19430_v36 }
0x120c   : > { %10476 = vmatpush1.bf16.msra.mxu1 %v15560_v11  ;;  %10517 = vmatpush1.bf16.msra.mxu0 %v15562_v12  ;;  %v15656_v11 = vcombine.low %v8775_v29, %v8791_v58  ;;  %v15658_v12 = vcombine.low %v8776_v62, %v8792_v52  ;;  %v8697_v29 = vld [vmem:[#allocation22 + $0x360] sm:$0xff]  ;;  %v8682_v58 = vld [vmem:[#allocation22 + $0x148] sm:$0xff] }
0x120d   : > { %10477 = vmatprep.subr.bf16.mxu1 %v15593_v37  ;;  %10518 = vmatprep.subr.bf16.mxu0 %v15595_v38  ;;  %v15755_v37 = vcombine.high %v8872_v26, %v8888_v28  ;;  %v8903_v38 = vld [vmem:[#allocation22 + $0x1ef0] sm:$0xff]  ;;  %v8698_v62 = vld [vmem:[#allocation22 + $0x368] sm:$0xff] }
0x120e   : > { %10507 = vmatprep.mubr.bf16.mxu1 %v18389_v0  ;;  %10548 = vmatprep.mubr.bf16.mxu0 %v18389_v0  ;;  %v15784_v52 = vcombine.low %v8903_v38, %v8919_v39 }
0x1210   : > { %10478 = vmatpush1.bf16.msra.mxu1 %v15592_v47  ;;  %10519 = vmatpush1.bf16.msra.mxu0 %v15594_v55  ;;  %v15754_v47 = vcombine.low %v8872_v26, %v8888_v28  ;;  %v15785_v55 = vcombine.high %v8903_v38, %v8919_v39  ;;  %v8794_v26 = vld [vmem:[#allocation22 + $0x1028] sm:$0xff]  ;;  %v8825_v38 = vld [vmem:[#allocation22 + $0x1460] sm:$0xff] }
0x1211   : > { %10479 = vmatprep.subr.bf16.mxu1 %v15625_v56  ;;  %10520 = vmatprep.subr.bf16.mxu0 %v15627_v57  ;;  %v15787_v56 = vcombine.high %v8904_v40, %v8920_v20  ;;  %v8681_v57 = vld [vmem:[#allocation22 + $0x140] sm:$0xff]  ;;  %v8810_v39 = vld [vmem:[#allocation22 + $0x1248] sm:$0xff] }
0x1212   : > { %v15564_v10 = vcombine.low %v8681_v57, %v8697_v29 }
0x1214   : > { %10480 = vmatpush1.bf16.msra.mxu1 %v15624_v3  ;;  %10521 = vmatpush1.bf16.msra.mxu0 %v15626_v4  ;;  %v15786_v3 = vcombine.low %v8904_v40, %v8920_v20  ;;  %v15565_v4 = vcombine.high %v8681_v57, %v8697_v29  ;;  %v8826_v40 = vld [vmem:[#allocation22 + $0x1468] sm:$0xff]  ;;  %v8857_v57 = vld [vmem:[#allocation22 + $0x18a0] sm:$0xff] }
0x1215   : > { %10481 = vmatprep.subr.bf16.mxu1 %v15657_v6  ;;  %10522 = vmatprep.subr.bf16.mxu0 %v15659_v7  ;;  %v15567_v6 = vcombine.high %v8682_v58, %v8698_v62  ;;  %v8713_v7 = vld [vmem:[#allocation22 + $0x580] sm:$0xff]  ;;  %v8842_v29 = vld [vmem:[#allocation22 + $0x1688] sm:$0xff] }
0x1216   : > { %v15596_v19 = vcombine.low %v8713_v7, %v8729_v9 }
0x1218   : > { %10482 = vmatpush1.bf16.msra.mxu1 %v15656_v11  ;;  %10523 = vmatpush1.bf16.msra.mxu0 %v15658_v12  ;;  %v15566_v11 = vcombine.low %v8682_v58, %v8698_v62  ;;  %v15597_v12 = vcombine.high %v8713_v7, %v8729_v9  ;;  %v8858_v58 = vld [vmem:[#allocation22 + $0x18a8] sm:$0xff]  ;;  %v8889_v7 = vld [vmem:[#allocation22 + $0x1ce0] sm:$0xff] }
0x1219   : > { %10483 = vmatprep.subr.bf16.mxu1 %v15689_v14  ;;  %10524 = vmatprep.subr.bf16.mxu0 %v15691_v48  ;;  %v15599_v14 = vcombine.high %v8714_v61, %v8730_v8  ;;  %v8745_v48 = vld [vmem:[#allocation22 + $0x9c0] sm:$0xff]  ;;  %v8874_v9 = vld [vmem:[#allocation22 + $0x1ac8] sm:$0xff] }
0x121a   : > { %v15628_v28 = vcombine.low %v8745_v48, %v8761_v15 }
0x121c   : > { %10484 = vmatpush1.bf16.msra.mxu1 %v15688_v21  ;;  %10525 = vmatpush1.bf16.msra.mxu0 %v15690_v22  ;;  %v15598_v21 = vcombine.low %v8714_v61, %v8730_v8  ;;  %v15629_v22 = vcombine.high %v8745_v48, %v8761_v15  ;;  %v8890_v61 = vld [vmem:[#allocation22 + $0x1ce8] sm:$0xff]  ;;  %v8921_v48 = vld [vmem:[#allocation22 + $0x2120] sm:$0xff] }
0x121d   : > { %10485 = vmatprep.subr.bf16.mxu1 %v15721_v23  ;;  %10526 = vmatprep.subr.bf16.mxu0 %v15723_v60  ;;  %v15631_v23 = vcombine.high %v8746_v16, %v8762_v17  ;;  %v8777_v60 = vld [vmem:[#allocation22 + $0xe00] sm:$0xff]  ;;  %v8906_v15 = vld [vmem:[#allocation22 + $0x1f08] sm:$0xff] }
0x121e   : > { %v15660_v20 = vcombine.low %v8777_v60, %v8793_v24 }
0x1220   : > { %10486 = vmatpush1.bf16.msra.mxu1 %v15720_v50  ;;  %10527 = vmatpush1.bf16.msra.mxu0 %v15722_v30  ;;  %v15630_v50 = vcombine.low %v8746_v16, %v8762_v17  ;;  %v15661_v30 = vcombine.high %v8777_v60, %v8793_v24  ;;  %v8922_v16 = vld [vmem:[#allocation22 + $0x2128] sm:$0xff]  ;;  %v8699_v60 = vld [vmem:[#allocation22 + $0x370] sm:$0xff]  ;;  %v8684_v24 = vld [vmem:[#allocation22 + $0x158] sm:$0xff] }
0x1221   : > { %10487 = vmatprep.subr.bf16.mxu1 %v15753_v35  ;;  %10528 = vmatprep.subr.bf16.mxu0 %v15755_v37  ;;  %v15663_v35 = vcombine.high %v8778_v25, %v8794_v26  ;;  %v8809_v37 = vld [vmem:[#allocation22 + $0x1240] sm:$0xff] }
0x1222   : > { %v15692_v62 = vcombine.low %v8809_v37, %v8825_v38 }
0x1224   : > { %10488 = vmatpush1.bf16.msra.mxu1 %v15752_v46  ;;  %10529 = vmatpush1.bf16.msra.mxu0 %v15754_v47  ;;  %v15662_v46 = vcombine.low %v8778_v25, %v8794_v26  ;;  %v15693_v47 = vcombine.high %v8809_v37, %v8825_v38  ;;  %v8700_v25 = vld [vmem:[#allocation22 + $0x378] sm:$0xff]  ;;  %v8731_v37 = vld [vmem:[#allocation22 + $0x7b0] sm:$0xff] }
0x1225   : > { %10489 = vmatprep.subr.bf16.mxu1 %v15785_v55  ;;  %10530 = vmatprep.subr.bf16.mxu0 %v15787_v56  ;;  %v15695_v55 = vcombine.high %v8810_v39, %v8826_v40  ;;  %v8841_v56 = vld [vmem:[#allocation22 + $0x1680] sm:$0xff]  ;;  %v8716_v38 = vld [vmem:[#allocation22 + $0x598] sm:$0xff] }
0x1226   : > { %v15724_v8 = vcombine.low %v8841_v56, %v8857_v57 }
0x1228   : > { %10490 = vmatpush1.bf16.msra.mxu1 %v15784_v52  ;;  %10531 = vmatpush1.bf16.msra.mxu0 %v15786_v3  ;;  %v15694_v52 = vcombine.low %v8810_v39, %v8826_v40  ;;  %v15725_v3 = vcombine.high %v8841_v56, %v8857_v57  ;;  %v8732_v39 = vld [vmem:[#allocation22 + $0x7b8] sm:$0xff]  ;;  %v8763_v56 = vld [vmem:[#allocation22 + $0xbf0] sm:$0xff] }
0x1229   : > { %10557 = vmatprep.subr.bf16.mxu1 %v15565_v4  ;;  %10598 = vmatprep.subr.bf16.mxu0 %v15567_v6  ;;  %v15727_v4 = vcombine.high %v8842_v29, %v8858_v58  ;;  %v8873_v6 = vld [vmem:[#allocation22 + $0x1ac0] sm:$0xff]  ;;  %v8748_v57 = vld [vmem:[#allocation22 + $0x9d8] sm:$0xff] }
0x122a   : > { %v15756_v17 = vcombine.low %v8873_v6, %v8889_v7 }
0x122b   : > { %10508 = vmatmul.mubr.bf16.vlgmr.msra.gmra.mrb[112].mxu1 %v19430_v36  ;;  %10549 = vmatmul.mubr.bf16.vlgmr.msra.gmra.mrb[116].mxu0 %v19430_v36 }
0x122c   : > { %10558 = vmatpush1.bf16.msra.mxu1 %v15564_v10  ;;  %10599 = vmatpush1.bf16.msra.mxu0 %v15566_v11  ;;  %v15726_v10 = vcombine.low %v8842_v29, %v8858_v58  ;;  %v15757_v11 = vcombine.high %v8873_v6, %v8889_v7  ;;  %v8764_v29 = vld [vmem:[#allocation22 + $0xbf8] sm:$0xff]  ;;  %v8795_v6 = vld [vmem:[#allocation22 + $0x1030] sm:$0xff] }
0x122d   : > { %10559 = vmatprep.subr.bf16.mxu1 %v15597_v12  ;;  %10600 = vmatprep.subr.bf16.mxu0 %v15599_v14  ;;  %v15759_v12 = vcombine.high %v8874_v9, %v8890_v61  ;;  %v8905_v14 = vld [vmem:[#allocation22 + $0x1f00] sm:$0xff]  ;;  %v8780_v7 = vld [vmem:[#allocation22 + $0xe18] sm:$0xff] }
0x122e   : > { %10589 = vmatprep.mubr.bf16.mxu1 %v18389_v0  ;;  %10630 = vmatprep.mubr.bf16.mxu0 %v18389_v0  ;;  %v15788_v26 = vcombine.low %v8905_v14, %v8921_v48 }
0x1230   : > { %10560 = vmatpush1.bf16.msra.mxu1 %v15596_v19  ;;  %10601 = vmatpush1.bf16.msra.mxu0 %v15598_v21  ;;  %v15758_v19 = vcombine.low %v8874_v9, %v8890_v61  ;;  %v15789_v21 = vcombine.high %v8905_v14, %v8921_v48  ;;  %v8796_v9 = vld [vmem:[#allocation22 + $0x1038] sm:$0xff]  ;;  %v8827_v14 = vld [vmem:[#allocation22 + $0x1470] sm:$0xff] }
0x1231   : > { %10561 = vmatprep.subr.bf16.mxu1 %v15629_v22  ;;  %10602 = vmatprep.subr.bf16.mxu0 %v15631_v23  ;;  %v15791_v22 = vcombine.high %v8906_v15, %v8922_v16  ;;  %v8683_v23 = vld [vmem:[#allocation22 + $0x150] sm:$0xff]  ;;  %v8812_v48 = vld [vmem:[#allocation22 + $0x1258] sm:$0xff] }
0x1232   : > { %v15568_v40 = vcombine.low %v8683_v23, %v8699_v60 }
0x1234   : > { %10562 = vmatpush1.bf16.msra.mxu1 %v15628_v28  ;;  %10603 = vmatpush1.bf16.msra.mxu0 %v15630_v50  ;;  %v15790_v28 = vcombine.low %v8906_v15, %v8922_v16  ;;  %v15569_v50 = vcombine.high %v8683_v23, %v8699_v60  ;;  %v8828_v15 = vld [vmem:[#allocation22 + $0x1478] sm:$0xff]  ;;  %v8859_v23 = vld [vmem:[#allocation22 + $0x18b0] sm:$0xff] }
0x1235   : > { %10563 = vmatprep.subr.bf16.mxu1 %v15661_v30  ;;  %10604 = vmatprep.subr.bf16.mxu0 %v15663_v35  ;;  %v15571_v30 = vcombine.high %v8684_v24, %v8700_v25  ;;  %v8715_v35 = vld [vmem:[#allocation22 + $0x590] sm:$0xff]  ;;  %v8844_v60 = vld [vmem:[#allocation22 + $0x1698] sm:$0xff] }
0x1236   : > { %v15600_v58 = vcombine.low %v8715_v35, %v8731_v37 }
0x1238   : > { %10564 = vmatpush1.bf16.msra.mxu1 %v15660_v20  ;;  %10605 = vmatpush1.bf16.msra.mxu0 %v15662_v46  ;;  %v15570_v20 = vcombine.low %v8684_v24, %v8700_v25  ;;  %v15601_v46 = vcombine.high %v8715_v35, %v8731_v37  ;;  %v8860_v24 = vld [vmem:[#allocation22 + $0x18b8] sm:$0xff]  ;;  %v8891_v35 = vld [vmem:[#allocation22 + $0x1cf0] sm:$0xff] }
0x1239   : > { %10565 = vmatprep.subr.bf16.mxu1 %v15693_v47  ;;  %10606 = vmatprep.subr.bf16.mxu0 %v15695_v55  ;;  %v15603_v47 = vcombine.high %v8716_v38, %v8732_v39  ;;  %v8747_v55 = vld [vmem:[#allocation22 + $0x9d0] sm:$0xff]  ;;  %v8876_v37 = vld [vmem:[#allocation22 + $0x1ad8] sm:$0xff] }
0x123a   : > { %v15632_v61 = vcombine.low %v8747_v55, %v8763_v56 }
0x123c   : > { %10566 = vmatpush1.bf16.msra.mxu1 %v15692_v62  ;;  %10607 = vmatpush1.bf16.msra.mxu0 %v15694_v52  ;;  %v15602_v62 = vcombine.low %v8716_v38, %v8732_v39  ;;  %v15633_v52 = vcombine.high %v8747_v55, %v8763_v56  ;;  %v8892_v38 = vld [vmem:[#allocation22 + $0x1cf8] sm:$0xff]  ;;  %v8923_v55 = vld [vmem:[#allocation22 + $0x2130] sm:$0xff] }
0x123d   : > { %10567 = vmatprep.subr.bf16.mxu1 %v15725_v3  ;;  %10608 = vmatprep.subr.bf16.mxu0 %v15727_v4  ;;  %v15635_v3 = vcombine.high %v8748_v57, %v8764_v29  ;;  %v8779_v4 = vld [vmem:[#allocation22 + $0xe10] sm:$0xff]  ;;  %v8908_v56 = vld [vmem:[#allocation22 + $0x1f18] sm:$0xff] }
0x123e   : > { %v15664_v16 = vcombine.low %v8779_v4, %v8795_v6 }
0x1240   : > { %10568 = vmatpush1.bf16.msra.mxu1 %v15724_v8  ;;  %10609 = vmatpush1.bf16.msra.mxu0 %v15726_v10  ;;  %v15634_v8 = vcombine.low %v8748_v57, %v8764_v29  ;;  %v15665_v10 = vcombine.high %v8779_v4, %v8795_v6  ;;  %v8924_v57 = vld [vmem:[#allocation22 + $0x2138] sm:$0xff]  ;;  %v8701_v4 = vld [vmem:[#allocation22 + $0x380] sm:$0xff]  ;;  %v8686_v6 = vld [vmem:[#allocation22 + $0x168] sm:$0xff] }
0x1241   : > { %10569 = vmatprep.subr.bf16.mxu1 %v15757_v11  ;;  %10610 = vmatprep.subr.bf16.mxu0 %v15759_v12  ;;  %v15667_v11 = vcombine.high %v8780_v7, %v8796_v9  ;;  %v8811_v12 = vld [vmem:[#allocation22 + $0x1250] sm:$0xff] }
0x1242   : > { %v15696_v25 = vcombine.low %v8811_v12, %v8827_v14 }
0x1244   : > { %10570 = vmatpush1.bf16.msra.mxu1 %v15756_v17  ;;  %10611 = vmatpush1.bf16.msra.mxu0 %v15758_v19  ;;  %v15666_v17 = vcombine.low %v8780_v7, %v8796_v9  ;;  %v15697_v19 = vcombine.high %v8811_v12, %v8827_v14  ;;  %v8702_v7 = vld [vmem:[#allocation22 + $0x388] sm:$0xff]  ;;  %v8733_v12 = vld [vmem:[#allocation22 + $0x7c0] sm:$0xff] }
0x1245   : > { %10571 = vmatprep.subr.bf16.mxu1 %v15789_v21  ;;  %10612 = vmatprep.subr.bf16.mxu0 %v15791_v22  ;;  %v15699_v21 = vcombine.high %v8812_v48, %v8828_v15  ;;  %v8843_v22 = vld [vmem:[#allocation22 + $0x1690] sm:$0xff]  ;;  %v8718_v14 = vld [vmem:[#allocation22 + $0x5a8] sm:$0xff] }
0x1246   : > { %v15728_v39 = vcombine.low %v8843_v22, %v8859_v23 }
0x1248   : > { %10572 = vmatpush1.bf16.msra.mxu1 %v15788_v26  ;;  %10613 = vmatpush1.bf16.msra.mxu0 %v15790_v28  ;;  %v15698_v26 = vcombine.low %v8812_v48, %v8828_v15  ;;  %v15729_v28 = vcombine.high %v8843_v22, %v8859_v23  ;;  %v8734_v48 = vld [vmem:[#allocation22 + $0x7c8] sm:$0xff]  ;;  %v8765_v22 = vld [vmem:[#allocation22 + $0xc00] sm:$0xff] }
0x1249   : > { %10639 = vmatprep.subr.bf16.mxu1 %v15569_v50  ;;  %10680 = vmatprep.subr.bf16.mxu0 %v15571_v30  ;;  %v15731_v50 = vcombine.high %v8844_v60, %v8860_v24  ;;  %v8875_v30 = vld [vmem:[#allocation22 + $0x1ad0] sm:$0xff]  ;;  %v8750_v23 = vld [vmem:[#allocation22 + $0x9e8] sm:$0xff] }
0x124a   : > { %v15760_v29 = vcombine.low %v8875_v30, %v8891_v35 }
0x124b   : > { %10590 = vmatmul.mubr.bf16.vlgmr.msra.gmra.mrb[116].mxu1 %v19430_v36  ;;  %10631 = vmatmul.mubr.bf16.vlgmr.msra.gmra.mrb[120].mxu0 %v19430_v36 }
0x124c   : > { %10640 = vmatpush1.bf16.msra.mxu1 %v15568_v40  ;;  %10681 = vmatpush1.bf16.msra.mxu0 %v15570_v20  ;;  %v15730_v40 = vcombine.low %v8844_v60, %v8860_v24  ;;  %v15761_v20 = vcombine.high %v8875_v30, %v8891_v35  ;;  %v8766_v60 = vld [vmem:[#allocation22 + $0xc08] sm:$0xff]  ;;  %v8797_v30 = vld [vmem:[#allocation22 + $0x1040] sm:$0xff] }
0x124d   : > { %10641 = vmatprep.subr.bf16.mxu1 %v15601_v46  ;;  %10682 = vmatprep.subr.bf16.mxu0 %v15603_v47  ;;  %v15763_v46 = vcombine.high %v8876_v37, %v8892_v38  ;;  %v8907_v47 = vld [vmem:[#allocation22 + $0x1f10] sm:$0xff]  ;;  %v8782_v35 = vld [vmem:[#allocation22 + $0xe28] sm:$0xff] }
0x124e   : > { %10671 = vmatprep.mubr.bf16.mxu1 %v18389_v0  ;;  %10712 = vmatprep.mubr.bf16.mxu0 %v18389_v0  ;;  %v15792_v9 = vcombine.low %v8907_v47, %v8923_v55 }
0x1250   : > { %10642 = vmatpush1.bf16.msra.mxu1 %v15600_v58  ;;  %10683 = vmatpush1.bf16.msra.mxu0 %v15602_v62  ;;  %v15762_v58 = vcombine.low %v8876_v37, %v8892_v38  ;;  %v15793_v62 = vcombine.high %v8907_v47, %v8923_v55  ;;  %v8798_v37 = vld [vmem:[#allocation22 + $0x1048] sm:$0xff]  ;;  %v8829_v47 = vld [vmem:[#allocation22 + $0x1480] sm:$0xff] }
0x1251   : > { %10643 = vmatprep.subr.bf16.mxu1 %v15633_v52  ;;  %10684 = vmatprep.subr.bf16.mxu0 %v15635_v3  ;;  %v15795_v52 = vcombine.high %v8908_v56, %v8924_v57  ;;  %v8685_v3 = vld [vmem:[#allocation22 + $0x160] sm:$0xff]  ;;  %v8814_v55 = vld [vmem:[#allocation22 + $0x1268] sm:$0xff] }
0x1252   : > { %v15572_v15 = vcombine.low %v8685_v3, %v8701_v4 }
0x1254   : > { %10644 = vmatpush1.bf16.msra.mxu1 %v15632_v61  ;;  %10685 = vmatpush1.bf16.msra.mxu0 %v15634_v8  ;;  %v15794_v61 = vcombine.low %v8908_v56, %v8924_v57  ;;  %v15573_v8 = vcombine.high %v8685_v3, %v8701_v4  ;;  %v8830_v56 = vld [vmem:[#allocation22 + $0x1488] sm:$0xff]  ;;  %v8861_v3 = vld [vmem:[#allocation22 + $0x18c0] sm:$0xff] }
0x1255   : > { %10645 = vmatprep.subr.bf16.mxu1 %v15665_v10  ;;  %10686 = vmatprep.subr.bf16.mxu0 %v15667_v11  ;;  %v15575_v10 = vcombine.high %v8686_v6, %v8702_v7  ;;  %v8717_v11 = vld [vmem:[#allocation22 + $0x5a0] sm:$0xff]  ;;  %v8846_v4 = vld [vmem:[#allocation22 + $0x16a8] sm:$0xff] }
0x1256   : > { %v15604_v24 = vcombine.low %v8717_v11, %v8733_v12 }
0x1258   : > { %10646 = vmatpush1.bf16.msra.mxu1 %v15664_v16  ;;  %10687 = vmatpush1.bf16.msra.mxu0 %v15666_v17  ;;  %v15574_v16 = vcombine.low %v8686_v6, %v8702_v7  ;;  %v15605_v17 = vcombine.high %v8717_v11, %v8733_v12  ;;  %v8862_v6 = vld [vmem:[#allocation22 + $0x18c8] sm:$0xff]  ;;  %v8893_v11 = vld [vmem:[#allocation22 + $0x1d00] sm:$0xff] }
0x1259   : > { %10647 = vmatprep.subr.bf16.mxu1 %v15697_v19  ;;  %10688 = vmatprep.subr.bf16.mxu0 %v15699_v21  ;;  %v15607_v19 = vcombine.high %v8718_v14, %v8734_v48  ;;  %v8749_v21 = vld [vmem:[#allocation22 + $0x9e0] sm:$0xff]  ;;  %v8878_v12 = vld [vmem:[#allocation22 + $0x1ae8] sm:$0xff] }
0x125a   : > { %v15636_v38 = vcombine.low %v8749_v21, %v8765_v22 }
0x125c   : > { %10648 = vmatpush1.bf16.msra.mxu1 %v15696_v25  ;;  %10689 = vmatpush1.bf16.msra.mxu0 %v15698_v26  ;;  %v15606_v25 = vcombine.low %v8718_v14, %v8734_v48  ;;  %v15637_v26 = vcombine.high %v8749_v21, %v8765_v22  ;;  %v8894_v14 = vld [vmem:[#allocation22 + $0x1d08] sm:$0xff]  ;;  %v8925_v21 = vld [vmem:[#allocation22 + $0x2140] sm:$0xff] }
0x125d   : > { %10649 = vmatprep.subr.bf16.mxu1 %v15729_v28  ;;  %10690 = vmatprep.subr.bf16.mxu0 %v15731_v50  ;;  %v15639_v28 = vcombine.high %v8750_v23, %v8766_v60  ;;  %v8781_v50 = vld [vmem:[#allocation22 + $0xe20] sm:$0xff]  ;;  %v8910_v22 = vld [vmem:[#allocation22 + $0x1f28] sm:$0xff] }
0x125e   : > { %v15668_v57 = vcombine.low %v8781_v50, %v8797_v30 }
0x1260   : > { %10650 = vmatpush1.bf16.msra.mxu1 %v15728_v39  ;;  %10691 = vmatpush1.bf16.msra.mxu0 %v15730_v40  ;;  %v15638_v39 = vcombine.low %v8750_v23, %v8766_v60  ;;  %v15669_v40 = vcombine.high %v8781_v50, %v8797_v30  ;;  %v8926_v23 = vld [vmem:[#allocation22 + $0x2148] sm:$0xff]  ;;  %v8703_v50 = vld [vmem:[#allocation22 + $0x390] sm:$0xff]  ;;  %v8688_v30 = vld [vmem:[#allocation22 + $0x178] sm:$0xff] }
0x1261   : > { %10651 = vmatprep.subr.bf16.mxu1 %v15761_v20  ;;  %10692 = vmatprep.subr.bf16.mxu0 %v15763_v46  ;;  %v15671_v20 = vcombine.high %v8782_v35, %v8798_v37  ;;  %v8813_v46 = vld [vmem:[#allocation22 + $0x1260] sm:$0xff] }
0x1262   : > { %v15700_v7 = vcombine.low %v8813_v46, %v8829_v47 }
0x1264   : > { %10652 = vmatpush1.bf16.msra.mxu1 %v15760_v29  ;;  %10693 = vmatpush1.bf16.msra.mxu0 %v15762_v58  ;;  %v15670_v29 = vcombine.low %v8782_v35, %v8798_v37  ;;  %v15701_v58 = vcombine.high %v8813_v46, %v8829_v47  ;;  %v8704_v35 = vld [vmem:[#allocation22 + $0x398] sm:$0xff]  ;;  %v8735_v46 = vld [vmem:[#allocation22 + $0x7d0] sm:$0xff] }
0x1265   : > { %10653 = vmatprep.subr.bf16.mxu1 %v15793_v62  ;;  %10694 = vmatprep.subr.bf16.mxu0 %v15795_v52  ;;  %v15703_v62 = vcombine.high %v8814_v55, %v8830_v56  ;;  %v8845_v52 = vld [vmem:[#allocation22 + $0x16a0] sm:$0xff]  ;;  %v8720_v47 = vld [vmem:[#allocation22 + $0x5b8] sm:$0xff] }
0x1266   : > { %v15732_v48 = vcombine.low %v8845_v52, %v8861_v3 }
0x1268   : > { %10654 = vmatpush1.bf16.msra.mxu1 %v15792_v9  ;;  %10695 = vmatpush1.bf16.msra.mxu0 %v15794_v61  ;;  %v15702_v9 = vcombine.low %v8814_v55, %v8830_v56  ;;  %v15733_v61 = vcombine.high %v8845_v52, %v8861_v3  ;;  %v8736_v55 = vld [vmem:[#allocation22 + $0x7d8] sm:$0xff]  ;;  %v8767_v52 = vld [vmem:[#allocation22 + $0xc10] sm:$0xff] }
0x1269   : > { %10721 = vmatprep.subr.bf16.mxu1 %v15573_v8  ;;  %10762 = vmatprep.subr.bf16.mxu0 %v15575_v10  ;;  %v15735_v8 = vcombine.high %v8846_v4, %v8862_v6  ;;  %v8877_v10 = vld [vmem:[#allocation22 + $0x1ae0] sm:$0xff]  ;;  %v8752_v3 = vld [vmem:[#allocation22 + $0x9f8] sm:$0xff] }
0x126a   : > { %v15764_v60 = vcombine.low %v8877_v10, %v8893_v11 }
0x126b   : > { %10672 = vmatmul.mubr.bf16.vlgmr.msra.gmra.mrb[120].mxu1 %v19430_v36  ;;  %10713 = vmatmul.mubr.bf16.vlgmr.msra.gmra.mrb[124].mxu0 %v19430_v36 }
0x126c   : > { %10722 = vmatpush1.bf16.msra.mxu1 %v15572_v15  ;;  %10763 = vmatpush1.bf16.msra.mxu0 %v15574_v16  ;;  %v15734_v15 = vcombine.low %v8846_v4, %v8862_v6  ;;  %v15765_v16 = vcombine.high %v8877_v10, %v8893_v11  ;;  %v8768_v4 = vld [vmem:[#allocation22 + $0xc18] sm:$0xff]  ;;  %v8799_v10 = vld [vmem:[#allocation22 + $0x1050] sm:$0xff] }
0x126d   : > { %10723 = vmatprep.subr.bf16.mxu1 %v15605_v17  ;;  %10764 = vmatprep.subr.bf16.mxu0 %v15607_v19  ;;  %v15767_v17 = vcombine.high %v8878_v12, %v8894_v14  ;;  %v8909_v19 = vld [vmem:[#allocation22 + $0x1f20] sm:$0xff]  ;;  %v8784_v11 = vld [vmem:[#allocation22 + $0xe38] sm:$0xff] }
0x126e   : > { %10753 = vmatprep.mubr.bf16.mxu1 %v18389_v0  ;;  %10794 = vmatprep.mubr.bf16.mxu0 %v18389_v0  ;;  %v15796_v37 = vcombine.low %v8909_v19, %v8925_v21 }
0x1270   : > { %10724 = vmatpush1.bf16.msra.mxu1 %v15604_v24  ;;  %10765 = vmatpush1.bf16.msra.mxu0 %v15606_v25  ;;  %v15766_v24 = vcombine.low %v8878_v12, %v8894_v14  ;;  %v15797_v25 = vcombine.high %v8909_v19, %v8925_v21  ;;  %v8800_v12 = vld [vmem:[#allocation22 + $0x1058] sm:$0xff]  ;;  %v8831_v19 = vld [vmem:[#allocation22 + $0x1490] sm:$0xff] }
0x1271   : > { %10725 = vmatprep.subr.bf16.mxu1 %v15637_v26  ;;  %10766 = vmatprep.subr.bf16.mxu0 %v15639_v28  ;;  %v15799_v26 = vcombine.high %v8910_v22, %v8926_v23  ;;  %v8687_v28 = vld [vmem:[#allocation22 + $0x170] sm:$0xff]  ;;  %v8816_v21 = vld [vmem:[#allocation22 + $0x1278] sm:$0xff] }
0x1272   : > { %v15576_v56 = vcombine.low %v8687_v28, %v8703_v50 }
0x1274   : > { %10726 = vmatpush1.bf16.msra.mxu1 %v15636_v38  ;;  %10767 = vmatpush1.bf16.msra.mxu0 %v15638_v39  ;;  %v15798_v38 = vcombine.low %v8910_v22, %v8926_v23  ;;  %v15577_v39 = vcombine.high %v8687_v28, %v8703_v50  ;;  %v8832_v22 = vld [vmem:[#allocation22 + $0x1498] sm:$0xff]  ;;  %v8863_v28 = vld [vmem:[#allocation22 + $0x18d0] sm:$0xff] }
0x1275   : > { %10727 = vmatprep.subr.bf16.mxu1 %v15669_v40  ;;  %10768 = vmatprep.subr.bf16.mxu0 %v15671_v20  ;;  %v15579_v40 = vcombine.high %v8688_v30, %v8704_v35  ;;  %v8719_v20 = vld [vmem:[#allocation22 + $0x5b0] sm:$0xff]  ;;  %v8848_v50 = vld [vmem:[#allocation22 + $0x16b8] sm:$0xff] }
0x1276   : > { %v15608_v6 = vcombine.low %v8719_v20, %v8735_v46 }
0x1278   : > { %10728 = vmatpush1.bf16.msra.mxu1 %v15668_v57  ;;  %10769 = vmatpush1.bf16.msra.mxu0 %v15670_v29  ;;  %v15578_v57 = vcombine.low %v8688_v30, %v8704_v35  ;;  %v15609_v29 = vcombine.high %v8719_v20, %v8735_v46  ;;  %v8864_v30 = vld [vmem:[#allocation22 + $0x18d8] sm:$0xff]  ;;  %v8895_v20 = vld [vmem:[#allocation22 + $0x1d10] sm:$0xff] }
0x1279   : > { %10729 = vmatprep.subr.bf16.mxu1 %v15701_v58  ;;  %10770 = vmatprep.subr.bf16.mxu0 %v15703_v62  ;;  %v15611_v58 = vcombine.high %v8720_v47, %v8736_v55  ;;  %v8751_v62 = vld [vmem:[#allocation22 + $0x9f0] sm:$0xff]  ;;  %v8880_v46 = vld [vmem:[#allocation22 + $0x1af8] sm:$0xff] }
0x127a   : > { %v15640_v14 = vcombine.low %v8751_v62, %v8767_v52 }
0x127c   : > { %10730 = vmatpush1.bf16.msra.mxu1 %v15700_v7  ;;  %10771 = vmatpush1.bf16.msra.mxu0 %v15702_v9  ;;  %v15610_v7 = vcombine.low %v8720_v47, %v8736_v55  ;;  %v15641_v9 = vcombine.high %v8751_v62, %v8767_v52  ;;  %v8896_v47 = vld [vmem:[#allocation22 + $0x1d18] sm:$0xff]  ;;  %v8927_v62 = vld [vmem:[#allocation22 + $0x2150] sm:$0xff] }
0x127d   : > { %10731 = vmatprep.subr.bf16.mxu1 %v15733_v61  ;;  %10772 = vmatprep.subr.bf16.mxu0 %v15735_v8  ;;  %v15643_v61 = vcombine.high %v8752_v3, %v8768_v4  ;;  %v8783_v8 = vld [vmem:[#allocation22 + $0xe30] sm:$0xff]  ;;  %v8912_v52 = vld [vmem:[#allocation22 + $0x1f38] sm:$0xff] }
0x127e   : > { %v15672_v23 = vcombine.low %v8783_v8, %v8799_v10 }
0x1280   : > { %10732 = vmatpush1.bf16.msra.mxu1 %v15732_v48  ;;  %10773 = vmatpush1.bf16.msra.mxu0 %v15734_v15  ;;  %v15642_v48 = vcombine.low %v8752_v3, %v8768_v4  ;;  %v15673_v15 = vcombine.high %v8783_v8, %v8799_v10  ;;  %v8928_v3 = vld [vmem:[#allocation22 + $0x2158] sm:$0xff]  ;;  %v8705_v8 = vld [vmem:[#allocation22 + $0x3a0] sm:$0xff]  ;;  %v8690_v10 = vld [vmem:[#allocation22 + $0x188] sm:$0xff] }
0x1281   : > { %10733 = vmatprep.subr.bf16.mxu1 %v15765_v16  ;;  %10774 = vmatprep.subr.bf16.mxu0 %v15767_v17  ;;  %v15675_v16 = vcombine.high %v8784_v11, %v8800_v12  ;;  %v8815_v17 = vld [vmem:[#allocation22 + $0x1270] sm:$0xff] }
0x1282   : > { %v15704_v35 = vcombine.low %v8815_v17, %v8831_v19 }
0x1284   : > { %10734 = vmatpush1.bf16.msra.mxu1 %v15764_v60  ;;  %10775 = vmatpush1.bf16.msra.mxu0 %v15766_v24  ;;  %v15674_v60 = vcombine.low %v8784_v11, %v8800_v12  ;;  %v15705_v24 = vcombine.high %v8815_v17, %v8831_v19  ;;  %v8706_v11 = vld [vmem:[#allocation22 + $0x3a8] sm:$0xff]  ;;  %v8737_v17 = vld [vmem:[#allocation22 + $0x7e0] sm:$0xff] }
0x1285   : > { %10735 = vmatprep.subr.bf16.mxu1 %v15797_v25  ;;  %10776 = vmatprep.subr.bf16.mxu0 %v15799_v26  ;;  %v15707_v25 = vcombine.high %v8816_v21, %v8832_v22  ;;  %v8847_v26 = vld [vmem:[#allocation22 + $0x16b0] sm:$0xff]  ;;  %v8722_v19 = vld [vmem:[#allocation22 + $0x5c8] sm:$0xff] }
0x1286   : > { %v15736_v55 = vcombine.low %v8847_v26, %v8863_v28 }
0x1288   : > { %10736 = vmatpush1.bf16.msra.mxu1 %v15796_v37  ;;  %10777 = vmatpush1.bf16.msra.mxu0 %v15798_v38  ;;  %v15706_v37 = vcombine.low %v8816_v21, %v8832_v22  ;;  %v15737_v38 = vcombine.high %v8847_v26, %v8863_v28  ;;  %v8738_v21 = vld [vmem:[#allocation22 + $0x7e8] sm:$0xff]  ;;  %v8769_v26 = vld [vmem:[#allocation22 + $0xc20] sm:$0xff] }
0x1289   : > { %10803 = vmatprep.subr.bf16.mxu1 %v15577_v39  ;;  %10844 = vmatprep.subr.bf16.mxu0 %v15579_v40  ;;  %v15739_v39 = vcombine.high %v8848_v50, %v8864_v30  ;;  %v8879_v40 = vld [vmem:[#allocation22 + $0x1af0] sm:$0xff]  ;;  %v8754_v28 = vld [vmem:[#allocation22 + $0xa08] sm:$0xff] }
0x128a   : > { %v15768_v4 = vcombine.low %v8879_v40, %v8895_v20 }
0x128b   : > { %10754 = vmatmul.mubr.bf16.vlgmr.msra.gmra.mrb[124].mxu1 %v19430_v36  ;;  %10795 = vmatmul.mubr.bf16.vlgmr.msra.gmra.mrb[128].mxu0 %v19430_v36 }
0x128c   : > { %10804 = vmatpush1.bf16.msra.mxu1 %v15576_v56  ;;  %10845 = vmatpush1.bf16.msra.mxu0 %v15578_v57  ;;  %v15738_v56 = vcombine.low %v8848_v50, %v8864_v30  ;;  %v15769_v57 = vcombine.high %v8879_v40, %v8895_v20  ;;  %v8770_v50 = vld [vmem:[#allocation22 + $0xc28] sm:$0xff]  ;;  %v8801_v40 = vld [vmem:[#allocation22 + $0x1060] sm:$0xff] }
0x128d   : > { %10805 = vmatprep.subr.bf16.mxu1 %v15609_v29  ;;  %10846 = vmatprep.subr.bf16.mxu0 %v15611_v58  ;;  %v15771_v29 = vcombine.high %v8880_v46, %v8896_v47  ;;  %v8911_v58 = vld [vmem:[#allocation22 + $0x1f30] sm:$0xff]  ;;  %v8786_v20 = vld [vmem:[#allocation22 + $0xe48] sm:$0xff] }
0x128e   : > { %10835 = vmatprep.mubr.bf16.mxu1 %v18389_v0  ;;  %10876 = vmatprep.mubr.bf16.mxu0 %v18389_v0  ;;  %v15800_v12 = vcombine.low %v8911_v58, %v8927_v62 }
0x1290   : > { %10806 = vmatpush1.bf16.msra.mxu1 %v15608_v6  ;;  %10847 = vmatpush1.bf16.msra.mxu0 %v15610_v7  ;;  %v15770_v6 = vcombine.low %v8880_v46, %v8896_v47  ;;  %v15801_v7 = vcombine.high %v8911_v58, %v8927_v62  ;;  %v8802_v46 = vld [vmem:[#allocation22 + $0x1068] sm:$0xff]  ;;  %v8833_v58 = vld [vmem:[#allocation22 + $0x14a0] sm:$0xff] }
0x1291   : > { %10807 = vmatprep.subr.bf16.mxu1 %v15641_v9  ;;  %10848 = vmatprep.subr.bf16.mxu0 %v15643_v61  ;;  %v15803_v9 = vcombine.high %v8912_v52, %v8928_v3  ;;  %v8689_v61 = vld [vmem:[#allocation22 + $0x180] sm:$0xff]  ;;  %v8818_v62 = vld [vmem:[#allocation22 + $0x1288] sm:$0xff] }
0x1292   : > { %v15580_v22 = vcombine.low %v8689_v61, %v8705_v8 }
0x1294   : > { %10808 = vmatpush1.bf16.msra.mxu1 %v15640_v14  ;;  %10849 = vmatpush1.bf16.msra.mxu0 %v15642_v48  ;;  %v15802_v14 = vcombine.low %v8912_v52, %v8928_v3  ;;  %v15581_v48 = vcombine.high %v8689_v61, %v8705_v8  ;;  %v8834_v52 = vld [vmem:[#allocation22 + $0x14a8] sm:$0xff]  ;;  %v8865_v61 = vld [vmem:[#allocation22 + $0x18e0] sm:$0xff] }
0x1295   : > { %10809 = vmatprep.subr.bf16.mxu1 %v15673_v15  ;;  %10850 = vmatprep.subr.bf16.mxu0 %v15675_v16  ;;  %v15583_v15 = vcombine.high %v8690_v10, %v8706_v11  ;;  %v8721_v16 = vld [vmem:[#allocation22 + $0x5c0] sm:$0xff]  ;;  %v8850_v8 = vld [vmem:[#allocation22 + $0x16c8] sm:$0xff] }
0x1296   : > { %v15612_v30 = vcombine.low %v8721_v16, %v8737_v17 }
0x1298   : > { %10810 = vmatpush1.bf16.msra.mxu1 %v15672_v23  ;;  %10851 = vmatpush1.bf16.msra.mxu0 %v15674_v60  ;;  %v15582_v23 = vcombine.low %v8690_v10, %v8706_v11  ;;  %v15613_v60 = vcombine.high %v8721_v16, %v8737_v17  ;;  %v8866_v10 = vld [vmem:[#allocation22 + $0x18e8] sm:$0xff]  ;;  %v8897_v16 = vld [vmem:[#allocation22 + $0x1d20] sm:$0xff] }
0x1299   : > { %10811 = vmatprep.subr.bf16.mxu1 %v15705_v24  ;;  %10852 = vmatprep.subr.bf16.mxu0 %v15707_v25  ;;  %v15615_v24 = vcombine.high %v8722_v19, %v8738_v21  ;;  %v8753_v25 = vld [vmem:[#allocation22 + $0xa00] sm:$0xff]  ;;  %v8882_v17 = vld [vmem:[#allocation22 + $0x1b08] sm:$0xff] }
0x129a   : > { %v15644_v47 = vcombine.low %v8753_v25, %v8769_v26 }
0x129c   : > { %10812 = vmatpush1.bf16.msra.mxu1 %v15704_v35  ;;  %10853 = vmatpush1.bf16.msra.mxu0 %v15706_v37  ;;  %v15614_v35 = vcombine.low %v8722_v19, %v8738_v21  ;;  %v15645_v37 = vcombine.high %v8753_v25, %v8769_v26  ;;  %v8898_v19 = vld [vmem:[#allocation22 + $0x1d28] sm:$0xff]  ;;  %v8929_v25 = vld [vmem:[#allocation22 + $0x2160] sm:$0xff] }
0x129d   : > { %10813 = vmatprep.subr.bf16.mxu1 %v15737_v38  ;;  %10854 = vmatprep.subr.bf16.mxu0 %v15739_v39  ;;  %v15647_v38 = vcombine.high %v8754_v28, %v8770_v50  ;;  %v8785_v39 = vld [vmem:[#allocation22 + $0xe40] sm:$0xff]  ;;  %v8914_v26 = vld [vmem:[#allocation22 + $0x1f48] sm:$0xff] }
0x129e   : > { %v15676_v3 = vcombine.low %v8785_v39, %v8801_v40 }
0x12a0   : > { %10814 = vmatpush1.bf16.msra.mxu1 %v15736_v55  ;;  %10855 = vmatpush1.bf16.msra.mxu0 %v15738_v56  ;;  %v15646_v55 = vcombine.low %v8754_v28, %v8770_v50  ;;  %v15677_v56 = vcombine.high %v8785_v39, %v8801_v40  ;;  %v8930_v28 = vld [vmem:[#allocation22 + $0x2168] sm:$0xff]  ;;  %v8707_v39 = vld [vmem:[#allocation22 + $0x3b0] sm:$0xff]  ;;  %v8692_v40 = vld [vmem:[#allocation22 + $0x198] sm:$0xff] }
0x12a1   : > { %10815 = vmatprep.subr.bf16.mxu1 %v15769_v57  ;;  %10856 = vmatprep.subr.bf16.mxu0 %v15771_v29  ;;  %v15679_v57 = vcombine.high %v8786_v20, %v8802_v46  ;;  %v8817_v29 = vld [vmem:[#allocation22 + $0x1280] sm:$0xff] }
0x12a2   : > { %v15708_v11 = vcombine.low %v8817_v29, %v8833_v58 }
0x12a4   : > { %10816 = vmatpush1.bf16.msra.mxu1 %v15768_v4  ;;  %10857 = vmatpush1.bf16.msra.mxu0 %v15770_v6  ;;  %v15678_v4 = vcombine.low %v8786_v20, %v8802_v46  ;;  %v15709_v6 = vcombine.high %v8817_v29, %v8833_v58  ;;  %v8708_v20 = vld [vmem:[#allocation22 + $0x3b8] sm:$0xff]  ;;  %v8739_v29 = vld [vmem:[#allocation22 + $0x7f0] sm:$0xff] }
0x12a5   : > { %10817 = vmatprep.subr.bf16.mxu1 %v15801_v7  ;;  %10858 = vmatprep.subr.bf16.mxu0 %v15803_v9  ;;  %v15711_v7 = vcombine.high %v8818_v62, %v8834_v52  ;;  %v8849_v9 = vld [vmem:[#allocation22 + $0x16c0] sm:$0xff]  ;;  %v8724_v58 = vld [vmem:[#allocation22 + $0x5d8] sm:$0xff] }
0x12a6   : > { %v15740_v21 = vcombine.low %v8849_v9, %v8865_v61 }
0x12a8   : > { %10818 = vmatpush1.bf16.msra.mxu1 %v15800_v12  ;;  %10859 = vmatpush1.bf16.msra.mxu0 %v15802_v14  ;;  %v15710_v12 = vcombine.low %v8818_v62, %v8834_v52  ;;  %v15741_v14 = vcombine.high %v8849_v9, %v8865_v61  ;;  %v8740_v62 = vld [vmem:[#allocation22 + $0x7f8] sm:$0xff]  ;;  %v8771_v9 = vld [vmem:[#allocation22 + $0xc30] sm:$0xff] }
0x12a9   : > { %10885 = vmatprep.subr.bf16.mxu1 %v15581_v48  ;;  %10926 = vmatprep.subr.bf16.mxu0 %v15583_v15  ;;  %v15743_v48 = vcombine.high %v8850_v8, %v8866_v10  ;;  %v8881_v15 = vld [vmem:[#allocation22 + $0x1b00] sm:$0xff]  ;;  %v8756_v61 = vld [vmem:[#allocation22 + $0xa18] sm:$0xff] }
0x12aa   : > { %v15772_v50 = vcombine.low %v8881_v15, %v8897_v16 }
0x12ab   : > { %10836 = vmatmul.mubr.bf16.vlgmr.msra.gmra.mrb[128].mxu1 %v19430_v36  ;;  %10877 = vmatmul.mubr.bf16.vlgmr.msra.gmra.mrb[132].mxu0 %v19430_v36 }
0x12ac   : > { %10886 = vmatpush1.bf16.msra.mxu1 %v15580_v22  ;;  %10927 = vmatpush1.bf16.msra.mxu0 %v15582_v23  ;;  %v15742_v22 = vcombine.low %v8850_v8, %v8866_v10  ;;  %v15773_v23 = vcombine.high %v8881_v15, %v8897_v16  ;;  %v8772_v8 = vld [vmem:[#allocation22 + $0xc38] sm:$0xff]  ;;  %v8803_v15 = vld [vmem:[#allocation22 + $0x1070] sm:$0xff] }
0x12ad   : > { %10887 = vmatprep.subr.bf16.mxu1 %v15613_v60  ;;  %10928 = vmatprep.subr.bf16.mxu0 %v15615_v24  ;;  %v15775_v60 = vcombine.high %v8882_v17, %v8898_v19  ;;  %v8913_v24 = vld [vmem:[#allocation22 + $0x1f40] sm:$0xff]  ;;  %v8788_v16 = vld [vmem:[#allocation22 + $0xe58] sm:$0xff] }
0x12ae   : > { %10917 = vmatprep.mubr.bf16.mxu1 %v18389_v0  ;;  %10958 = vmatprep.mubr.bf16.mxu0 %v18389_v0  ;;  %v15804_v46 = vcombine.low %v8913_v24, %v8929_v25 }
0x12b0   : > { %10888 = vmatpush1.bf16.msra.mxu1 %v15612_v30  ;;  %10929 = vmatpush1.bf16.msra.mxu0 %v15614_v35  ;;  %v15774_v30 = vcombine.low %v8882_v17, %v8898_v19  ;;  %v15805_v35 = vcombine.high %v8913_v24, %v8929_v25  ;;  %v8804_v17 = vld [vmem:[#allocation22 + $0x1078] sm:$0xff]  ;;  %v8835_v24 = vld [vmem:[#allocation22 + $0x14b0] sm:$0xff] }
0x12b1   : > { %10889 = vmatprep.subr.bf16.mxu1 %v15645_v37  ;;  %10930 = vmatprep.subr.bf16.mxu0 %v15647_v38  ;;  %v15807_v37 = vcombine.high %v8914_v26, %v8930_v28  ;;  %v8691_v38 = vld [vmem:[#allocation22 + $0x190] sm:$0xff]  ;;  %v8820_v25 = vld [vmem:[#allocation22 + $0x1298] sm:$0xff] }
0x12b2   : > { %v15584_v52 = vcombine.low %v8691_v38, %v8707_v39 }
0x12b4   : > { %10890 = vmatpush1.bf16.msra.mxu1 %v15644_v47  ;;  %10931 = vmatpush1.bf16.msra.mxu0 %v15646_v55  ;;  %v15806_v47 = vcombine.low %v8914_v26, %v8930_v28  ;;  %v15585_v55 = vcombine.high %v8691_v38, %v8707_v39  ;;  %v8836_v26 = vld [vmem:[#allocation22 + $0x14b8] sm:$0xff]  ;;  %v8851_v38 = vld [vmem:[#allocation22 + $0x16d0] sm:$0xff] }
0x12b5   : > { %10891 = vmatprep.subr.bf16.mxu1 %v15677_v56  ;;  %10932 = vmatprep.subr.bf16.mxu0 %v15679_v57  ;;  %v15587_v56 = vcombine.high %v8692_v40, %v8708_v20  ;;  %v8723_v57 = vld [vmem:[#allocation22 + $0x5d0] sm:$0xff] }
0x12b6   : > { %v15616_v10 = vcombine.low %v8723_v57, %v8739_v29  ;;  %v8867_v39 = vld [vmem:[#allocation22 + $0x18f0] sm:$0xff] }
0x12b8   : > { %10892 = vmatpush1.bf16.msra.mxu1 %v15676_v3  ;;  %10933 = vmatpush1.bf16.msra.mxu0 %v15678_v4  ;;  %v15586_v3 = vcombine.low %v8692_v40, %v8708_v20  ;;  %v15617_v4 = vcombine.high %v8723_v57, %v8739_v29  ;;  %v8852_v40 = vld [vmem:[#allocation22 + $0x16d8] sm:$0xff]  ;;  %v8883_v29 = vld [vmem:[#allocation22 + $0x1b10] sm:$0xff] }
0x12b9   : > { %10893 = vmatprep.subr.bf16.mxu1 %v15709_v6  ;;  %10934 = vmatprep.subr.bf16.mxu0 %v15711_v7  ;;  %v15619_v6 = vcombine.high %v8724_v58, %v8740_v62  ;;  %v8755_v7 = vld [vmem:[#allocation22 + $0xa10] sm:$0xff]  ;;  %v8868_v20 = vld [vmem:[#allocation22 + $0x18f8] sm:$0xff] }
0x12ba   : > { %v15648_v19 = vcombine.low %v8755_v7, %v8771_v9  ;;  %v15747_v57 = vcombine.high %v8852_v40, %v8868_v20 }
0x12bc   : > { %10894 = vmatpush1.bf16.msra.mxu1 %v15708_v11  ;;  %10935 = vmatpush1.bf16.msra.mxu0 %v15710_v12  ;;  %v15618_v11 = vcombine.low %v8724_v58, %v8740_v62  ;;  %v15649_v12 = vcombine.high %v8755_v7, %v8771_v9  ;;  %v8899_v58 = vld [vmem:[#allocation22 + $0x1d30] sm:$0xff]  ;;  %v8884_v62 = vld [vmem:[#allocation22 + $0x1b18] sm:$0xff]  ;;  %v15746_v7 = vcombine.low %v8852_v40, %v8868_v20 }
0x12bd   : > { %10895 = vmatprep.subr.bf16.mxu1 %v15741_v14  ;;  %10936 = vmatprep.subr.bf16.mxu0 %v15743_v48  ;;  %v15651_v14 = vcombine.high %v8756_v61, %v8772_v8  ;;  %v8787_v48 = vld [vmem:[#allocation22 + $0xe50] sm:$0xff] }
0x12be   : > { %v15680_v28 = vcombine.low %v8787_v48, %v8803_v15 }
0x12c0   : > { %10896 = vmatpush1.bf16.msra.mxu1 %v15740_v21  ;;  %10937 = vmatpush1.bf16.msra.mxu0 %v15742_v22  ;;  %v15650_v21 = vcombine.low %v8756_v61, %v8772_v8  ;;  %v15681_v22 = vcombine.high %v8787_v48, %v8803_v15  ;;  %v15777_v8 = vcombine.high %v8883_v29, %v8899_v58  ;;  %v8931_v48 = vld [vmem:[#allocation22 + $0x2170] sm:$0xff]  ;;  %v8916_v15 = vld [vmem:[#allocation22 + $0x1f58] sm:$0xff] }
0x12c1   : > { %10897 = vmatprep.subr.bf16.mxu1 %v15773_v23  ;;  %10938 = vmatprep.subr.bf16.mxu0 %v15775_v60  ;;  %v15683_v23 = vcombine.high %v8788_v16, %v8804_v17  ;;  %v8819_v60 = vld [vmem:[#allocation22 + $0x1290] sm:$0xff] }
0x12c4   : > { %10898 = vmatpush1.bf16.msra.mxu1 %v15772_v50  ;;  %10939 = vmatpush1.bf16.msra.mxu0 %v15774_v30  ;;  %v15682_v50 = vcombine.low %v8788_v16, %v8804_v17  ;;  %v19460_v30 = vld [vmem:[#allocation23 + $0x48] sm:$0xff]  ;;  %v8932_v16 = vld [vmem:[#allocation22 + $0x2178] sm:$0xff] }
0x12c5   : > { %10899 = vmatprep.subr.bf16.mxu1 %v15805_v35  ;;  %10940 = vmatprep.subr.bf16.mxu0 %v15807_v37  ;;  %v15713_v35 = vcombine.high %v8819_v60, %v8835_v24  ;;  %v15715_v37 = vcombine.high %v8820_v25, %v8836_v26 }
0x12c8   : > { %10900 = vmatpush1.bf16.msra.mxu1 %v15804_v46  ;;  %10941 = vmatpush1.bf16.msra.mxu0 %v15806_v47  ;;  %v8937_v46 = vunpack.c.l.bf16 %v19460_v30  ;;  %v15712_v47 = vcombine.low %v8819_v60, %v8835_v24 }
0x12c9   : > { %10967 = vmatprep.subr.bf16.mxu1 %v15585_v55  ;;  %11008 = vmatprep.subr.bf16.mxu0 %v15587_v56  ;;  %v15714_v55 = vcombine.low %v8820_v25, %v8836_v26  ;;  %v15745_v56 = vcombine.high %v8851_v38, %v8867_v39 }
0x12ca   : > { %v10240_v9 = vrot.slane %v8937_v46, %v19028_v2  ;;  %v10248_v61 = vrot.slane %v8937_v46, %v19030_v5 }
0x12cb   : > { %10918 = vmatmul.mubr.bf16.vlgmr.msra.gmra.mrb[132].mxu1 %v19430_v36  ;;  %10959 = vmatmul.mubr.bf16.vlgmr.msra.gmra.mrb[136].mxu0 %v19430_v36 }
0x12cc   : > { %10968 = vmatpush1.bf16.msra.mxu1 %v15584_v52  ;;  %11009 = vmatpush1.bf16.msra.mxu0 %v15586_v3  ;;  %v8900_v52 = vld [vmem:[#allocation22 + $0x1d38] sm:$0xff]  ;;  %v10236_v3 = vrot.slane %v8937_v46, %v19024_v63 }
0x12cd   : > { %10969 = vmatprep.subr.bf16.mxu1 %v15617_v4  ;;  %11010 = vmatprep.subr.bf16.mxu0 %v15619_v6  ;;  %v10244_v4 = vrot.slane %v8937_v46, %v19026_v1  ;;  %v15744_v6 = vcombine.low %v8851_v38, %v8867_v39  ;;  %v15811_v38 = vcombine.high %v8916_v15, %v8932_v16 }
0x12ce   : > { %10999 = vmatprep.mubr.bf16.mxu1 %v18389_v0  ;;  %11040 = vmatprep.mubr.bf16.mxu0 %v18389_v0 }
0x12d0   : > { %10970 = vmatpush1.bf16.msra.mxu1 %v15616_v10  ;;  %11011 = vmatpush1.bf16.msra.mxu0 %v15618_v11  ;;  %v15779_v10 = vcombine.high %v8884_v62, %v8900_v52  ;;  %v8915_v11 = vld [vmem:[#allocation22 + $0x1f50] sm:$0xff] }
0x12d1   : > { %10971 = vmatprep.subr.bf16.mxu1 %v15649_v12  ;;  %11012 = vmatprep.subr.bf16.mxu0 %v15651_v14  ;;  %v15808_v20 = vcombine.low %v8915_v11, %v8931_v48 }
0x12d4   : > { %10972 = vmatpush1.bf16.msra.mxu1 %v15648_v19  ;;  %11013 = vmatpush1.bf16.msra.mxu0 %v15650_v21 }
0x12d5   : > { %10973 = vmatprep.subr.bf16.mxu1 %v15681_v22  ;;  %11014 = vmatprep.subr.bf16.mxu0 %v15683_v23  ;;  %v15776_v23 = vcombine.low %v8883_v29, %v8899_v58 }
0x12d8   : > { %10974 = vmatpush1.bf16.msra.mxu1 %v15680_v28  ;;  %11015 = vmatpush1.bf16.msra.mxu0 %v15682_v50  ;;  %v15778_v28 = vcombine.low %v8884_v62, %v8900_v52  ;;  %v11288_v62 = vld [vmem:[#allocation16 + $0x128] sm:$0xff]  ;;  %v11289_v52 = vld [vmem:[#allocation16 + $0x130] sm:$0xff] }
0x12d9   : > { %10975 = vmatprep.subr.bf16.mxu1 %v15713_v35  ;;  %11016 = vmatprep.subr.bf16.mxu0 %v15715_v37  ;;  %v15809_v37 = vcombine.high %v8915_v11, %v8931_v48 }
0x12dc   : > { %10976 = vmatpush1.bf16.msra.mxu1 %v15712_v47  ;;  %11017 = vmatpush1.bf16.msra.mxu0 %v15714_v55  ;;  %v15810_v55 = vcombine.low %v8916_v15, %v8932_v16 }
0x12dd   : > { %10977 = vmatprep.subr.bf16.mxu1 %v15745_v56  ;;  %11018 = vmatprep.subr.bf16.mxu0 %v15747_v57  ;;  %v11286_v56 = vld [vmem:[#allocation16 + $0x118] sm:$0xff]  ;;  %v11287_v57 = vld [vmem:[#allocation16 + $0x120] sm:$0xff] }
0x12de   : > { %v10427_v12 = vpop.f32.mrb[108].mxu1  ;;  %v10468_v14 = vpop.f32.mrb[112].mxu0  ;;  %v17545_v58 = vpack.c.bf16 %v11287_v57, %v11286_v56 }
0x12df   : > { %v10428_v17 = vadd.f32 %v10427_v12, %v10236_v3  ;;  %v10469_v19 = vadd.f32 %v10468_v14, %v10244_v4  ;;  %v10429_v21 = vpop.f32.mrb[109].mxu1  ;;  %v10470_v22 = vpop.f32.mrb[113].mxu0  ;;  %v17548_v3 = vpack.c.bf16 %v11289_v52, %v11288_v62  ;;  %v11290_v4 = vld [vmem:[#allocation16 + $0x138] sm:$0xff] }
0x12e0   : > { %v10430_v60 = vadd.f32 %v10429_v21, %v10240_v9  ;;  %v10471_v24 = vadd.f32 %v10470_v22, %v10248_v61  ;;  %10978 = vmatpush1.bf16.msra.mxu1 %v15744_v6  ;;  %11019 = vmatpush1.bf16.msra.mxu0 %v15746_v7  ;;  %v10431_v25 = vpop.f32.mrb[110].mxu1  ;;  %v10472_v26 = vpop.f32.mrb[114].mxu0 }
0x12e1   : > { %v10432_v50 = vpop.f32.mrb[111].mxu1  ;;  %v10473_v35 = vpop.f32.mrb[115].mxu0  ;;  %10979 = vmatprep.subr.bf16.mxu1 %v15777_v8  ;;  %11020 = vmatprep.subr.bf16.mxu0 %v15779_v10 }
0x12e2   : > { %v11081_v39 = vcombine.low %v10428_v17, %v10430_v60  ;;  %v11082_v40 = vcombine.low %v10469_v19, %v10471_v24 }
0x12e4   : > { %v19468_v46 = vrot.slane %v11081_v39, %v19036_v18  ;;  %v19471_v47 = vrot.slane %v11082_v40, %v19036_v18  ;;  %10980 = vmatpush1.bf16.msra.mxu1 %v15776_v23  ;;  %11021 = vmatpush1.bf16.msra.mxu0 %v15778_v28 }
0x12e5   : > { %10981 = vmatprep.subr.bf16.mxu1 %v15809_v37  ;;  %11022 = vmatprep.subr.bf16.mxu0 %v15811_v38 }
0x12e6   : > { %v11113_v29 = vcombine.low %v19468_v46, %v19471_v47 }
0x12e8   : > { %10982 = vmatpush1.bf16.msra.mxu1 %v15808_v20  ;;  %11023 = vmatpush1.bf16.msra.mxu0 %v15810_v55  ;;  %v11121_v22 = vrot.slane %v11113_v29, %v19036_v18 }
0x12e9   : > { %17544 = vmatprep.subr.bf16.mxu1 %v18385_v53  ;;  %17090 = vmatprep.subr.bf16.mxu0 %v18387_v54 }
0x12eb   : > { %11000 = vmatmul.mubr.bf16.vlgmr.msra.gmra.mrb[136].mxu1 %v19430_v36  ;;  %11041 = vmatmul.mubr.bf16.vlgmr.msra.gmra.mrb[140].mxu0 %v19430_v36 }
0x12ec   : > { %17546 = vmatpush3.bf16.msra.mxu1 %v17545_v58  ;;  %17052 = vmatprep.mubr.msk.f32.mxu1 %vm18386_vm3, %v18387_v54 }
0x12ed   : > { %17547 = vmatprep.subr.bf16.mxu1 %v18385_v53  ;;  %17091 = vmatpush3.bf16.msra.mxu0 %v19236_v41  ;;  %v8938_v41 = vunpack.c.h.bf16 %v19460_v30 }
0x12ee   : > { %17092 = vmatprep.subr.bf16.mxu0 %v18387_v54  ;;  %17106 = vmatprep.mubr.msk.bf16.mxu0 %vm18386_vm3, %v18387_v54 }
0x12ef   : > { %v10260_v36 = vrot.slane %v8938_v41, %v19026_v1  ;;  %v10256_v6 = vrot.slane %v8938_v41, %v19028_v2  ;;  %v10264_v7 = vrot.slane %v8938_v41, %v19030_v5 }
0x12f0   : > { %17549 = vmatpush3.bf16.msra.mxu1 %v17548_v3  ;;  %v11364_v3 = vld [vmem:[#allocation19 + $0x380] sm:$0xff] }
0x12f1   : > { %17050 = vmatprep.subr.mxu1 %v18387_v54  ;;  %17093 = vmatpush3.bf16.msra.mxu0 %v19251_v13  ;;  %v10252_v13 = vrot.slane %v8938_v41, %v19024_v63  ;;  %v11366_v41 = vld [vmem:[#allocation19 + $0x390] sm:$0xff] }
0x12f2   : > { %17094 = vmatprep.subr.bf16.mxu0 %v18387_v54 }
0x12f4   : > { %17051 = vmatpush3.msra.mxu1 %v11290_v4  ;;  %v11365_v4 = vld [vmem:[#allocation19 + $0x388] sm:$0xff] }
0x12f5   : > { %17053 = vmatmul.mubr.msk.f32.vlgmr.msra.gmra.mrb[70].mxu1 %vm1590_vm5, %v18986_v49  ;;  %17550 = vmatprep.subr.bf16.mxu1 %v18385_v53 }
0x12f6   : > { %17087 = vmatprep.mubr.msk.f32.mxu1 %vm18386_vm3, %v18387_v54  ;;  %17095 = vmatpush3.bf16.msra.mxu0 %v19238_v42 }
0x12f7   : > { %17096 = vmatprep.subr.bf16.mxu0 %v18387_v54 }
0x12fa   : > { %17097 = vmatpush3.bf16.msra.mxu0 %v19253_v27 }
0x12fb   : > { %17098 = vmatprep.subr.bf16.mxu0 %v18387_v54 }
0x12fe   : > { %v10509_v9 = vpop.f32.mrb[112].mxu1  ;;  %v10550_v61 = vpop.f32.mrb[116].mxu0  ;;  %17099 = vmatpush3.bf16.msra.mxu0 %v19240_v43 }
0x12ff   : > { %v10510_v42 = vadd.f32 %v10509_v9, %v10252_v13  ;;  %v10551_v30 = vadd.f32 %v10550_v61, %v10260_v36  ;;  %v10511_v8 = vpop.f32.mrb[113].mxu1  ;;  %v10552_v10 = vpop.f32.mrb[117].mxu0  ;;  %17100 = vmatprep.subr.bf16.mxu0 %v18387_v54  ;;  %v17551_v13 = vpack.c.bf16 %v11365_v4, %v11364_v3  ;;  %v11367_v36 = vld [vmem:[#allocation19 + $0x398] sm:$0xff]  ;;  %v11369_v9 = vld [vmem:[#allocation19 + $0x3a8] sm:$0xff] }
0x1300   : > { %v10512_v27 = vadd.f32 %v10511_v8, %v10256_v6  ;;  %v10553_v11 = vadd.f32 %v10552_v10, %v10264_v7  ;;  %v10513_v12 = vpop.f32.mrb[114].mxu1  ;;  %v10554_v14 = vpop.f32.mrb[118].mxu0  ;;  %v17554_v6 = vpack.c.bf16 %v11367_v36, %v11366_v41  ;;  %v11368_v7 = vld [vmem:[#allocation19 + $0x3a0] sm:$0xff]  ;;  %v8935_v3 = vld [vmem:[#allocation23 + $0x58] sm:$0xff] }
0x1301   : > { %v10514_v48 = vpop.f32.mrb[115].mxu1  ;;  %v10555_v15 = vpop.f32.mrb[119].mxu0  ;;  %17552 = vmatpush3.bf16.msra.mxu1 %v17551_v13  ;;  %v17557_v61 = vpack.c.bf16 %v11369_v9, %v11368_v7  ;;  %v11372_v10 = vld [vmem:[#allocation19 + $0x3c0] sm:$0xff]  ;;  %v8941_v4 = vunpack.c.l.bf16 %v8935_v3 }
0x1302   : > { %v11083_v16 = vcombine.low %v10510_v42, %v10512_v27  ;;  %v11084_v17 = vcombine.low %v10551_v30, %v10553_v11  ;;  %17101 = vmatpush3.bf16.msra.mxu0 %v19255_v31  ;;  %v8934_v31 = vld [vmem:[#allocation23 + $0x50] sm:$0xff]  ;;  %17553 = vmatprep.subr.bf16.mxu1 %v18385_v53  ;;  %v11370_v42 = vld [vmem:[#allocation19 + $0x3b0] sm:$0xff]  ;;  %v11371_v30 = vld [vmem:[#allocation19 + $0x3b8] sm:$0xff] }
0x1303   : > { %17102 = vmatprep.subr.bf16.mxu0 %v18387_v54  ;;  %v8939_v24 = vunpack.c.l.bf16 %v8934_v31  ;;  %v17560_v8 = vpack.c.bf16 %v11371_v30, %v11370_v42  ;;  %v11373_v27 = vld [vmem:[#allocation19 + $0x3c8] sm:$0xff]  ;;  %v8940_v11 = vunpack.c.h.bf16 %v8934_v31  ;;  %v10300_v41 = vrot.slane %v8941_v4, %v19024_v63 }
0x1304   : > { %v11105_v43 = vrot.slane %v11083_v16, %v19036_v18  ;;  %v11112_v19 = vrot.slane %v11084_v17, %v19036_v18  ;;  %v17563_v12 = vpack.c.bf16 %v11373_v27, %v11372_v10  ;;  %v10308_v13 = vrot.slane %v8941_v4, %v19026_v1 }
0x1305   : > { %v10268_v25 = vrot.slane %v8939_v24, %v19024_v63  ;;  %v10276_v26 = vrot.slane %v8939_v24, %v19026_v1  ;;  %v10272_v28 = vrot.slane %v8939_v24, %v19028_v2  ;;  %17555 = vmatpush3.bf16.msra.mxu1 %v17554_v6  ;;  %v10284_v14 = vrot.slane %v8940_v11, %v19024_v63 }
0x1306   : > { %v11114_v21 = vcombine.low %v11105_v43, %v11112_v19  ;;  %17103 = vmatpush3.bf16.msra.mxu0 %v19242_v44  ;;  %v10280_v44 = vrot.slane %v8939_v24, %v19030_v5  ;;  %17556 = vmatprep.subr.bf16.mxu1 %v18385_v53  ;;  %v10292_v48 = vrot.slane %v8940_v11, %v19026_v1  ;;  %v11374_v19 = vld [vmem:[#allocation19 + $0x3d0] sm:$0xff] }
0x1307   : > { %17104 = vmatprep.subr.bf16.mxu0 %v18387_v54  ;;  %v10288_v15 = vrot.slane %v8940_v11, %v19028_v2  ;;  %v10296_v16 = vrot.slane %v8940_v11, %v19030_v5  ;;  %v10304_v36 = vrot.slane %v8941_v4, %v19028_v2  ;;  %v10312_v6 = vrot.slane %v8941_v4, %v19030_v5 }
0x1308   : > { %v11128_v23 = vrot.slane %v11114_v21, %v19036_v18  ;;  %v11375_v21 = vld [vmem:[#allocation19 + $0x3d8] sm:$0xff] }
0x1309   : > { %17558 = vmatpush3.bf16.msra.mxu1 %v17557_v61  ;;  %v17566_v24 = vpack.c.bf16 %v11375_v21, %v11374_v19  ;;  %v8942_v19 = vunpack.c.h.bf16 %v8935_v3 }
0x130a   : > { %v11129_v60 = vcombine.low %v11121_v22, %v11128_v23  ;;  %17105 = vmatpush3.bf16.msra.mxu0 %v19257_v32  ;;  %17559 = vmatprep.subr.bf16.mxu1 %v18385_v53 }
0x130b   : > { %v10316_v21 = vrot.slane %v8942_v19, %v19024_v63 }
0x130c   : > { %11281 = vst [vmem:[%s19043_s30 + $0x48] sm:$0xff] %v11129_v60 }
0x130d   : > { %17561 = vmatpush3.bf16.msra.mxu1 %v17560_v8 }
0x130e   : > { %17562 = vmatprep.subr.bf16.mxu1 %v18385_v53 }
0x1311   : > { %17564 = vmatpush3.bf16.msra.mxu1 %v17563_v12 }
0x1312   : > { %17565 = vmatprep.subr.bf16.mxu1 %v18385_v53 }
0x1315   : > { %17567 = vmatpush3.bf16.msra.mxu1 %v17566_v24 }
0x1316   : > { %17568 = vmatprep.subr.bf16.mxu1 %v18385_v53 }
0x131e   : > { %v10591_v50 = vpop.f32.mrb[116].mxu1  ;;  %v10632_v35 = vpop.f32.mrb[120].mxu0 }
0x131f   : > { %v10592_v37 = vadd.f32 %v10591_v50, %v10268_v25  ;;  %v10633_v38 = vadd.f32 %v10632_v35, %v10276_v26  ;;  %v10593_v39 = vpop.f32.mrb[117].mxu1  ;;  %v10634_v40 = vpop.f32.mrb[121].mxu0 }
0x1320   : > { %v10594_v20 = vadd.f32 %v10593_v39, %v10272_v28  ;;  %v10635_v46 = vadd.f32 %v10634_v40, %v10280_v44  ;;  %v10595_v32 = vpop.f32.mrb[118].mxu1  ;;  %v10636_v47 = vpop.f32.mrb[122].mxu0  ;;  %v11376_v39 = vld [vmem:[#allocation19 + $0x3e0] sm:$0xff]  ;;  %v11377_v40 = vld [vmem:[#allocation19 + $0x3e8] sm:$0xff] }
0x1321   : > { %v10596_v55 = vpop.f32.mrb[119].mxu1  ;;  %v10637_v56 = vpop.f32.mrb[123].mxu0 }
0x1322   : > { %v11130_v57 = vcombine.low %v10592_v37, %v10594_v20  ;;  %v11131_v29 = vcombine.low %v10633_v38, %v10635_v46  ;;  %v17569_v20 = vpack.c.bf16 %v11377_v40, %v11376_v39  ;;  %v11378_v55 = vld [vmem:[#allocation19 + $0x3f0] sm:$0xff]  ;;  %v11379_v56 = vld [vmem:[#allocation19 + $0x3f8] sm:$0xff] }
0x1324   : > { %v19520_v58 = vrot.slane %v11130_v57, %v19036_v18  ;;  %v19523_v62 = vrot.slane %v11131_v29, %v19036_v18  ;;  %17570 = vmatpush3.bf16.msra.mxu1 %v17569_v20  ;;  %v17572_v57 = vpack.c.bf16 %v11379_v56, %v11378_v55 }
0x1325   : > { %17571 = vmatprep.subr.bf16.mxu1 %v18385_v53 }
0x1326   : > { %v11162_v52 = vcombine.low %v19520_v58, %v19523_v62 }
0x1328   : > { %v11170_v29 = vrot.slane %v11162_v52, %v19036_v18  ;;  %17573 = vmatpush3.bf16.msra.mxu1 %v17572_v57 }
0x1329   : > { %17574 = vmatprep.subr.bf16.mxu1 %v18385_v53 }
0x133e   : > { %v10673_v17 = vpop.f32.mrb[120].mxu1  ;;  %v10714_v43 = vpop.f32.mrb[124].mxu0 }
0x133f   : > { %v10674_v22 = vadd.f32 %v10673_v17, %v10284_v14  ;;  %v10715_v23 = vadd.f32 %v10714_v43, %v10292_v48  ;;  %v10675_v60 = vpop.f32.mrb[121].mxu1  ;;  %v10716_v31 = vpop.f32.mrb[125].mxu0 }
0x1340   : > { %v10676_v25 = vadd.f32 %v10675_v60, %v10288_v15  ;;  %v10717_v26 = vadd.f32 %v10716_v31, %v10296_v16  ;;  %v10677_v28 = vpop.f32.mrb[122].mxu1  ;;  %v10718_v44 = vpop.f32.mrb[126].mxu0  ;;  %v10328_v60 = vrot.slane %v8942_v19, %v19030_v5 }
0x1341   : > { %v10678_v50 = vpop.f32.mrb[123].mxu1  ;;  %v10719_v35 = vpop.f32.mrb[127].mxu0 }
0x1342   : > { %v11132_v37 = vcombine.low %v10674_v22, %v10676_v25  ;;  %v11133_v38 = vcombine.low %v10715_v23, %v10717_v26  ;;  %v10324_v22 = vrot.slane %v8942_v19, %v19026_v1  ;;  %v10320_v23 = vrot.slane %v8942_v19, %v19028_v2 }
0x1344   : > { %v11154_v46 = vrot.slane %v11132_v37, %v19036_v18  ;;  %v11161_v32 = vrot.slane %v11133_v38, %v19036_v18 }
0x1346   : > { %v11163_v47 = vcombine.low %v11154_v46, %v11161_v32 }
0x1348   : > { %v11177_v58 = vrot.slane %v11163_v47, %v19036_v18 }
0x134a   : > { %v11178_v62 = vcombine.low %v11170_v29, %v11177_v58  ;;  %v8936_v58 = vld [vmem:[#allocation23 + $0x60] sm:$0xff] }
0x134c   : > { %11282 = vst [vmem:[%s19043_s30 + $0x50] sm:$0xff] %v11178_v62  ;;  %v8943_v62 = vunpack.c.l.bf16 %v8936_v58 }
0x134e   : > { %v10332_v3 = vrot.slane %v8943_v62, %v19024_v63  ;;  %v10340_v4 = vrot.slane %v8943_v62, %v19026_v1 }
0x135e   : > { %v10755_v7 = vpop.f32.mrb[124].mxu1  ;;  %v10796_v9 = vpop.f32.mrb[128].mxu0 }
0x135f   : > { %v10756_v52 = vadd.f32 %v10755_v7, %v10300_v41  ;;  %v10797_v61 = vadd.f32 %v10796_v9, %v10308_v13  ;;  %v10757_v42 = vpop.f32.mrb[125].mxu1  ;;  %v10798_v30 = vpop.f32.mrb[129].mxu0  ;;  %v10336_v41 = vrot.slane %v8943_v62, %v19028_v2  ;;  %v10344_v13 = vrot.slane %v8943_v62, %v19030_v5 }
0x1360   : > { %v10758_v8 = vadd.f32 %v10757_v42, %v10304_v36  ;;  %v10799_v10 = vadd.f32 %v10798_v30, %v10312_v6  ;;  %v10759_v27 = vpop.f32.mrb[126].mxu1  ;;  %v10800_v11 = vpop.f32.mrb[130].mxu0 }
0x1361   : > { %v10760_v12 = vpop.f32.mrb[127].mxu1  ;;  %v10801_v14 = vpop.f32.mrb[131].mxu0 }
0x1362   : > { %v11179_v48 = vcombine.low %v10756_v52, %v10758_v8  ;;  %v11180_v15 = vcombine.low %v10797_v61, %v10799_v10 }
0x1364   : > { %v11189_v16 = vrot.slane %v11179_v48, %v19036_v18  ;;  %v11196_v17 = vrot.slane %v11180_v15, %v19036_v18 }
0x1366   : > { %v11211_v43 = vcombine.low %v11189_v16, %v11196_v17  ;;  %v8944_v17 = vunpack.c.h.bf16 %v8936_v58 }
0x1368   : > { %v11219_v56 = vrot.slane %v11211_v43, %v19036_v18  ;;  %v10348_v43 = vrot.slane %v8944_v17, %v19024_v63  ;;  %v10356_v19 = vrot.slane %v8944_v17, %v19026_v1 }
0x137e   : > { %v10837_v31 = vpop.f32.mrb[128].mxu1  ;;  %v10878_v24 = vpop.f32.mrb[132].mxu0 }
0x137f   : > { %v10838_v25 = vadd.f32 %v10837_v31, %v10316_v21  ;;  %v10879_v26 = vadd.f32 %v10878_v24, %v10324_v22  ;;  %v10839_v28 = vpop.f32.mrb[129].mxu1  ;;  %v10880_v44 = vpop.f32.mrb[133].mxu0  ;;  %v10352_v21 = vrot.slane %v8944_v17, %v19028_v2  ;;  %v10360_v22 = vrot.slane %v8944_v17, %v19030_v5  ;;  %v11690_v17 = vld [vmem:[#allocation19 + $0x448] sm:$0xff] }
0x1380   : > { %v10840_v50 = vadd.f32 %v10839_v28, %v10320_v23  ;;  %v10881_v35 = vadd.f32 %v10880_v44, %v10328_v60  ;;  %v10841_v37 = vpop.f32.mrb[130].mxu1  ;;  %v10882_v38 = vpop.f32.mrb[134].mxu0 }
0x1381   : > { %v10842_v39 = vpop.f32.mrb[131].mxu1  ;;  %v10883_v40 = vpop.f32.mrb[135].mxu0 }
0x1382   : > { %v11181_v20 = vcombine.low %v10838_v25, %v10840_v50  ;;  %v11182_v46 = vcombine.low %v10879_v26, %v10881_v35 }
0x1384   : > { %v11203_v32 = vrot.slane %v11181_v20, %v19036_v18  ;;  %v11210_v47 = vrot.slane %v11182_v46, %v19036_v18 }
0x1386   : > { %v11212_v55 = vcombine.low %v11203_v32, %v11210_v47  ;;  %v11291_v47 = vld [vmem:[#allocation17 + $0x7] sm:$0x1] }
0x1388   : > { %v11226_v57 = vrot.slane %v11212_v55, %v19036_v18  ;;  %v11603_v55 = vld [vmem:[#allocation16 + $0x140] sm:$0xff] }
0x138a   : > { %v11227_v29 = vcombine.low %v11219_v56, %v11226_v57  ;;  %v11604_v56 = vld [vmem:[#allocation16 + $0x148] sm:$0xff] }
0x138c   : > { %11283 = vst [vmem:[%s19043_s30 + $0x58] sm:$0xff] %v11227_v29 }
0x139e   : > { %v10919_v36 = vpop.f32.mrb[132].mxu1  ;;  %v10960_v6 = vpop.f32.mrb[136].mxu0 }
0x139f   : > { %v10920_v7 = vadd.f32 %v10919_v36, %v10332_v3  ;;  %v10961_v9 = vadd.f32 %v10960_v6, %v10340_v4  ;;  %v10921_v52 = vpop.f32.mrb[133].mxu1  ;;  %v10962_v61 = vpop.f32.mrb[137].mxu0  ;;  %v11605_v36 = vld [vmem:[#allocation16 + $0x150] sm:$0xff]  ;;  %v11606_v6 = vld [vmem:[#allocation16 + $0x158] sm:$0xff] }
0x13a0   : > { %v10922_v42 = vadd.f32 %v10921_v52, %v10336_v41  ;;  %v10963_v30 = vadd.f32 %v10962_v61, %v10344_v13  ;;  %v10923_v8 = vpop.f32.mrb[134].mxu1  ;;  %v10964_v10 = vpop.f32.mrb[138].mxu0  ;;  %v17575_v41 = vpack.c.bf16 %v11604_v56, %v11603_v55  ;;  %v11682_v52 = vld [vmem:[#allocation19 + $0x408] sm:$0xff]  ;;  %v11607_v61 = vld [vmem:[#allocation16 + $0x160] sm:$0xff]  ;;  %v11802_v55 = vld [vmem:[#allocation22 + $0x5e0] sm:$0xff] }
0x13a1   : > { %v10924_v27 = vpop.f32.mrb[135].mxu1  ;;  %v10965_v11 = vpop.f32.mrb[139].mxu0  ;;  %v11684_v8 = vld [vmem:[#allocation19 + $0x418] sm:$0xff]  ;;  %v11818_v56 = vld [vmem:[#allocation22 + $0x800] sm:$0xff] }
0x13a2   : > { %v11228_v12 = vcombine.low %v10920_v7, %v10922_v42  ;;  %v11229_v14 = vcombine.low %v10961_v9, %v10963_v30  ;;  %v17578_v7 = vpack.c.bf16 %v11606_v6, %v11605_v36  ;;  %v11681_v9 = vld [vmem:[#allocation19 + $0x400] sm:$0xff]  ;;  %v11683_v30 = vld [vmem:[#allocation19 + $0x410] sm:$0xff]  ;;  %v11686_v11 = vld [vmem:[#allocation19 + $0x428] sm:$0xff] }
0x13a3   : > { %v17581_v42 = vpack.c.bf16 %v11682_v52, %v11681_v9  ;;  %v17584_v10 = vpack.c.bf16 %v11684_v8, %v11683_v30  ;;  %v11685_v27 = vld [vmem:[#allocation19 + $0x420] sm:$0xff]  ;;  %v11866_v9 = vld [vmem:[#allocation22 + $0xe60] sm:$0xff] }
0x13a4   : > { %v11238_v48 = vrot.slane %v11228_v12, %v19036_v18  ;;  %v11245_v15 = vrot.slane %v11229_v14, %v19036_v18  ;;  %v17587_v12 = vpack.c.bf16 %v11686_v11, %v11685_v27  ;;  %v11687_v14 = vld [vmem:[#allocation19 + $0x430] sm:$0xff]  ;;  %v11835_v27 = vld [vmem:[#allocation22 + $0xa28] sm:$0xff] }
0x13a5   : > { %v11882_v52 = vld [vmem:[#allocation22 + $0x1080] sm:$0xff] }
0x13a6   : > { %v11260_v16 = vcombine.low %v11238_v48, %v11245_v15  ;;  %v11688_v48 = vld [vmem:[#allocation19 + $0x438] sm:$0xff]  ;;  %v15919_v11 = vcombine.high %v11866_v9, %v11882_v52 }
0x13a7   : > { %v17590_v15 = vpack.c.bf16 %v11688_v48, %v11687_v14  ;;  %v11898_v14 = vld [vmem:[#allocation22 + $0x12a0] sm:$0xff] }
0x13a8   : > { %v11268_v57 = vrot.slane %v11260_v16, %v19036_v18  ;;  %v11689_v16 = vld [vmem:[#allocation19 + $0x440] sm:$0xff]  ;;  %v11914_v48 = vld [vmem:[#allocation22 + $0x14c0] sm:$0xff] }
0x13be   : > { %v11001_v23 = vpop.f32.mrb[136].mxu1  ;;  %v11042_v60 = vpop.f32.mrb[140].mxu0 }
0x13bf   : > { %v11002_v31 = vadd.f32 %v11001_v23, %v10348_v43  ;;  %v11043_v24 = vadd.f32 %v11042_v60, %v10356_v19  ;;  %v11003_v25 = vpop.f32.mrb[137].mxu1  ;;  %v11044_v26 = vpop.f32.mrb[141].mxu0  ;;  %v17593_v43 = vpack.c.bf16 %v11690_v17, %v11689_v16  ;;  %v11691_v19 = vld [vmem:[#allocation19 + $0x450] sm:$0xff]  ;;  %v11693_v23 = vld [vmem:[#allocation19 + $0x460] sm:$0xff]  ;;  %v11694_v60 = vld [vmem:[#allocation19 + $0x468] sm:$0xff]  ;;  %v15918_v16 = vcombine.low %v11866_v9, %v11882_v52 }
0x13c0   : > { %v11004_v28 = vadd.f32 %v11003_v25, %v10352_v21  ;;  %v11045_v44 = vadd.f32 %v11044_v26, %v10360_v22  ;;  %v11005_v50 = vpop.f32.mrb[138].mxu1  ;;  %v11046_v35 = vpop.f32.mrb[142].mxu0  ;;  %v11692_v21 = vld [vmem:[#allocation19 + $0x458] sm:$0xff]  ;;  %v11772_v9 = vld [vmem:[#allocation22 + $0x1b0] sm:$0xff] }
0x13c1   : > { %v11006_v37 = vpop.f32.mrb[139].mxu1  ;;  %v11047_v38 = vpop.f32.mrb[143].mxu0  ;;  %v17596_v22 = vpack.c.bf16 %v11692_v21, %v11691_v19  ;;  %v11696_v25 = vld [vmem:[#allocation19 + $0x478] sm:$0xff]  ;;  %v11788_v52 = vld [vmem:[#allocation22 + $0x3d0] sm:$0xff] }
0x13c2   : > { %v11230_v39 = vcombine.low %v11002_v31, %v11004_v28  ;;  %v11231_v40 = vcombine.low %v11043_v24, %v11045_v44  ;;  %v17599_v31 = vpack.c.bf16 %v11694_v60, %v11693_v23  ;;  %v11695_v24 = vld [vmem:[#allocation19 + $0x470] sm:$0xff]  ;;  %v11771_v50 = vld [vmem:[#allocation22 + $0x1a8] sm:$0xff]  ;;  %v15950_v23 = vcombine.low %v11898_v14, %v11914_v48 }
0x13c3   : > { %v17602_v26 = vpack.c.bf16 %v11696_v25, %v11695_v24  ;;  %v11770_v28 = vld [vmem:[#allocation22 + $0x1a0] sm:$0xff]  ;;  %v11787_v38 = vld [vmem:[#allocation22 + $0x3c8] sm:$0xff] }
0x13c4   : > { %v11252_v20 = vrot.slane %v11230_v39, %v19036_v18  ;;  %v11259_v46 = vrot.slane %v11231_v40, %v19036_v18  ;;  %v11786_v44 = vld [vmem:[#allocation22 + $0x3c0] sm:$0xff]  ;;  %v15824_v39 = vcombine.low %v11771_v50, %v11787_v38  ;;  %v15825_v40 = vcombine.high %v11771_v50, %v11787_v38  ;;  %v11867_v19 = vld [vmem:[#allocation22 + $0xe68] sm:$0xff] }
0x13c5   : > { %v15822_v35 = vcombine.low %v11770_v28, %v11786_v44  ;;  %v15823_v37 = vcombine.high %v11770_v28, %v11786_v44  ;;  %v11883_v21 = vld [vmem:[#allocation22 + $0x1088] sm:$0xff]  ;;  %v11930_v44 = vld [vmem:[#allocation22 + $0x16e0] sm:$0xff] }
0x13c6   : > { %v11261_v32 = vcombine.low %v11252_v20, %v11259_v46  ;;  %v11380_v20 = vld [vmem:[#allocation20 + $0x7] sm:$0x1]  ;;  %v15921_v60 = vcombine.high %v11867_v19, %v11883_v21  ;;  %v11915_v24 = vld [vmem:[#allocation22 + $0x14c8] sm:$0xff]  ;;  %v15920_v25 = vcombine.low %v11867_v19, %v11883_v21  ;;  %v11946_v50 = vld [vmem:[#allocation22 + $0x1900] sm:$0xff] }
0x13c7   : > { %13486 = vmatprep.subr.bf16.mxu0 %v15823_v37  ;;  %v15983_v37 = vcombine.high %v11930_v44, %v11946_v50  ;;  %v11947_v38 = vld [vmem:[#allocation22 + $0x1908] sm:$0xff] }
0x13c8   : > { %v11275_v29 = vrot.slane %v11261_v32, %v19036_v18  ;;  %v11358_v58 = vpop.f32.mrb[70].mxu1 }
0x13c9   : > { %v11359_v62 = vadd.f32 %v11358_v58, %v11291_v47  ;;  %v17054_v3 = vpop.f32.mrb[71].mxu1  ;;  %v15855_v58 = vcombine.high %v11802_v55, %v11818_v56 }
0x13ca   : > { %v11276_v4 = vcombine.low %v11268_v57, %v11275_v29  ;;  %v11850_v3 = vld [vmem:[#allocation22 + $0xc40] sm:$0xff] }
0x13cb   : > { %v11362_v13 = vmax.f32 %v11359_v62, 0.0  ;;  %v11834_v62 = vld [vmem:[#allocation22 + $0xa20] sm:$0xff] }
0x13cc   : > { %11284 = vst [vmem:[%s19043_s30 + $0x60] sm:$0xff] %v11276_v4  ;;  %v11608_v4 = vld [vmem:[#allocation17 + $0x8] sm:$0x1]  ;;  %v15887_v36 = vcombine.high %v11834_v62, %v11850_v3  ;;  %v15886_v30 = vcombine.low %v11834_v62, %v11850_v3  ;;  %v11994_v62 = vld [vmem:[#allocation22 + $0x1f60] sm:$0xff] }
0x13cd   : > { %17088 = vmatmul.mubr.f32.vlgmr.msra.gmra.mrb[140].mxu1 %v11362_v13  ;;  %v11803_v13 = vld [vmem:[#allocation22 + $0x5e8] sm:$0xff]  ;;  %v12010_v3 = vld [vmem:[#allocation22 + $0x2180] sm:$0xff] }
0x13ce   : > { %17576 = vmatpush3.bf16.msra.mxu1 %v17575_v41  ;;  %17120 = vmatprep.mubr.msk.f32.mxu1 %vm18386_vm3, %v18387_v54  ;;  %v15854_v41 = vcombine.low %v11802_v55, %v11818_v56 }
0x13cf   : > { %17577 = vmatprep.subr.bf16.mxu1 %v18385_v53 }
0x13d2   : > { %17579 = vmatpush3.bf16.msra.mxu1 %v17578_v7  ;;  %v11819_v7 = vld [vmem:[#allocation22 + $0x808] sm:$0xff] }
0x13d3   : > { %17118 = vmatprep.subr.mxu1 %v18387_v54 }
0x13d6   : > { %17119 = vmatpush3.msra.mxu1 %v11607_v61 }
0x13d7   : > { %17121 = vmatmul.mubr.msk.f32.vlgmr.msra.gmra.mrb[142].mxu1 %vm1590_vm5, %v18986_v49  ;;  %17580 = vmatprep.subr.bf16.mxu1 %v18385_v53 }
0x13d8   : > { %17582 = vmatpush3.bf16.msra.mxu1 %v17581_v42  ;;  %17155 = vmatprep.mubr.msk.f32.mxu1 %vm18386_vm3, %v18387_v54 }
0x13d9   : > { %17583 = vmatprep.subr.bf16.mxu1 %v18385_v53 }
0x13dc   : > { %17585 = vmatpush3.bf16.msra.mxu1 %v17584_v10  ;;  %v15857_v10 = vcombine.high %v11803_v13, %v11819_v7 }
0x13dd   : > { %17586 = vmatprep.subr.bf16.mxu1 %v18385_v53 }
0x13e0   : > { %17588 = vmatpush3.bf16.msra.mxu1 %v17587_v12  ;;  %v11851_v12 = vld [vmem:[#allocation22 + $0xc48] sm:$0xff] }
0x13e1   : > { %17589 = vmatprep.subr.bf16.mxu1 %v18385_v53  ;;  %v15889_v17 = vcombine.high %v11835_v27, %v11851_v12 }
0x13e4   : > { %17591 = vmatpush3.bf16.msra.mxu1 %v17590_v15  ;;  %v15856_v15 = vcombine.low %v11803_v13, %v11819_v7  ;;  %v12011_v13 = vld [vmem:[#allocation22 + $0x2188] sm:$0xff] }
0x13e5   : > { %17592 = vmatprep.subr.bf16.mxu1 %v18385_v53 }
0x13e8   : > { %17594 = vmatpush3.bf16.msra.mxu1 %v17593_v43  ;;  %v15951_v43 = vcombine.high %v11898_v14, %v11914_v48 }
0x13e9   : > { %17595 = vmatprep.subr.bf16.mxu1 %v18385_v53 }
0x13ec   : > { %17597 = vmatpush3.bf16.msra.mxu1 %v17596_v22  ;;  %v15888_v22 = vcombine.low %v11835_v27, %v11851_v12 }
0x13ed   : > { %17598 = vmatprep.subr.bf16.mxu1 %v18385_v53 }
0x13f0   : > { %17600 = vmatpush3.bf16.msra.mxu1 %v17599_v31  ;;  %v11899_v31 = vld [vmem:[#allocation22 + $0x12a8] sm:$0xff] }
0x13f1   : > { %17601 = vmatprep.subr.bf16.mxu1 %v18385_v53  ;;  %v15952_v28 = vcombine.low %v11899_v31, %v11915_v24 }
0x13f4   : > { %17603 = vmatpush3.bf16.msra.mxu1 %v17602_v26  ;;  %v15953_v26 = vcombine.high %v11899_v31, %v11915_v24  ;;  %v11805_v31 = vld [vmem:[#allocation22 + $0x5f8] sm:$0xff] }
0x13f5   : > { %13527 = vmatprep.subr.bf16.mxu1 %v15825_v40  ;;  %v11821_v24 = vld [vmem:[#allocation22 + $0x818] sm:$0xff] }
0x14a0   : > { %v11447_v46 = vpop.f32.mrb[140].mxu1 }
0x14a1   : > { %v11448_v32 = vadd.f32 %v11447_v46, %v11380_v20  ;;  %v17089_v47 = vpop.f32.mrb[141].mxu1  ;;  %v11962_v46 = vld [vmem:[#allocation22 + $0x1b20] sm:$0xff] }
0x14a2   : > { %v11963_v47 = vld [vmem:[#allocation22 + $0x1b28] sm:$0xff] }
0x14a3   : > { %v11451_v57 = vmax.f32 %v11448_v32, 0.0  ;;  %v11978_v32 = vld [vmem:[#allocation22 + $0x1d40] sm:$0xff] }
0x14a4   : > { %v16014_v55 = vcombine.low %v11962_v46, %v11978_v32  ;;  %v16015_v56 = vcombine.high %v11962_v46, %v11978_v32  ;;  %v11868_v46 = vld [vmem:[#allocation22 + $0xe70] sm:$0xff] }
0x14a5   : > { %v11452_v29 = vpack.c.bf16 %v11451_v57, %v11451_v57  ;;  %v11979_v57 = vld [vmem:[#allocation22 + $0x1d48] sm:$0xff]  ;;  %v11884_v32 = vld [vmem:[#allocation22 + $0x1090] sm:$0xff] }
0x14a7   : > { %17107 = vmatmul.mubr.bf16.vlgmr.msra.gmra.mrb[144].mxu0 %v11452_v29  ;;  %v16016_v29 = vcombine.low %v11963_v47, %v11979_v57 }
0x14a8   : > { %13487 = vmatpush1.bf16.msra.mxu0 %v15822_v35  ;;  %13518 = vmatprep.mubr.bf16.mxu0 %v18389_v0  ;;  %v11931_v35 = vld [vmem:[#allocation22 + $0x16e8] sm:$0xff] }
0x14a9   : > { %13488 = vmatprep.subr.bf16.mxu0 %v15855_v58  ;;  %v15984_v40 = vcombine.low %v11931_v35, %v11947_v38  ;;  %v15985_v20 = vcombine.high %v11931_v35, %v11947_v38  ;;  %v16017_v58 = vcombine.high %v11963_v47, %v11979_v57  ;;  %v11837_v35 = vld [vmem:[#allocation22 + $0xa38] sm:$0xff] }
0x14aa   : > { %v11675_v6 = vpop.f32.mrb[142].mxu1  ;;  %v11869_v47 = vld [vmem:[#allocation22 + $0xe78] sm:$0xff] }
0x14ab   : > { %v11676_v61 = vadd.f32 %v11675_v6, %v11608_v4  ;;  %v17122_v42 = vpop.f32.mrb[143].mxu1  ;;  %v11995_v4 = vld [vmem:[#allocation22 + $0x1f68] sm:$0xff] }
0x14ac   : > { %13489 = vmatpush1.bf16.msra.mxu0 %v15854_v41  ;;  %v16047_v41 = vcombine.high %v11994_v62, %v12010_v3  ;;  %v16048_v6 = vcombine.low %v11995_v4, %v12011_v13  ;;  %v16049_v7 = vcombine.high %v11995_v4, %v12011_v13  ;;  %v15827_v42 = vcombine.high %v11772_v9, %v11788_v52  ;;  %v11901_v4 = vld [vmem:[#allocation22 + $0x12b8] sm:$0xff] }
0x14ad   : > { %v11679_v8 = vmax.f32 %v11676_v61, 0.0  ;;  %13490 = vmatprep.subr.bf16.mxu0 %v15887_v36  ;;  %v16046_v36 = vcombine.low %v11994_v62, %v12010_v3  ;;  %v11773_v61 = vld [vmem:[#allocation22 + $0x1b8] sm:$0xff]  ;;  %v11900_v62 = vld [vmem:[#allocation22 + $0x12b0] sm:$0xff]  ;;  %v15922_v13 = vcombine.low %v11868_v46, %v11884_v32 }
0x14ae   : > { %v11916_v3 = vld [vmem:[#allocation22 + $0x14d0] sm:$0xff] }
0x14af   : > { %17156 = vmatmul.mubr.f32.vlgmr.msra.gmra.mrb[144].mxu1 %v11679_v8  ;;  %v15826_v8 = vcombine.low %v11772_v9, %v11788_v52  ;;  %v11932_v9 = vld [vmem:[#allocation22 + $0x16f0] sm:$0xff] }
0x14b0   : > { %13528 = vmatpush1.bf16.msra.mxu1 %v15824_v39  ;;  %13491 = vmatpush1.bf16.msra.mxu0 %v15886_v30  ;;  %v15982_v39 = vcombine.low %v11930_v44, %v11946_v50  ;;  %v11789_v30 = vld [vmem:[#allocation22 + $0x3d8] sm:$0xff]  ;;  %v11836_v44 = vld [vmem:[#allocation22 + $0xa30] sm:$0xff] }
0x14b1   : > { %13529 = vmatprep.subr.bf16.mxu1 %v15857_v10  ;;  %13492 = vmatprep.subr.bf16.mxu0 %v15919_v11  ;;  %v15828_v10 = vcombine.low %v11773_v61, %v11789_v30  ;;  %v15829_v27 = vcombine.high %v11773_v61, %v11789_v30  ;;  %v11852_v50 = vld [vmem:[#allocation22 + $0xc50] sm:$0xff]  ;;  %v11933_v61 = vld [vmem:[#allocation22 + $0x16f8] sm:$0xff]  ;;  %v15954_v30 = vcombine.low %v11900_v62, %v11916_v3 }
0x14b2   : > { %13559 = vmatprep.mubr.bf16.mxu1 %v18389_v0  ;;  %v11948_v52 = vld [vmem:[#allocation22 + $0x1910] sm:$0xff] }
0x14b4   : > { %13530 = vmatpush1.bf16.msra.mxu1 %v15856_v15  ;;  %13493 = vmatpush1.bf16.msra.mxu0 %v15918_v16 }
0x14b5   : > { %13531 = vmatprep.subr.bf16.mxu1 %v15889_v17  ;;  %13494 = vmatprep.subr.bf16.mxu0 %v15951_v43  ;;  %v11697_v43 = vld [vmem:[#allocation20 + $0x8] sm:$0x1] }
0x14b8   : > { %13532 = vmatpush1.bf16.msra.mxu1 %v15888_v22  ;;  %13495 = vmatpush1.bf16.msra.mxu0 %v15950_v23  ;;  %v11804_v23 = vld [vmem:[#allocation22 + $0x5f0] sm:$0xff] }
0x14b9   : > { %13533 = vmatprep.subr.bf16.mxu1 %v15921_v60  ;;  %13496 = vmatprep.subr.bf16.mxu0 %v15983_v37  ;;  %v11820_v60 = vld [vmem:[#allocation22 + $0x810] sm:$0xff]  ;;  %v11853_v37 = vld [vmem:[#allocation22 + $0xc58] sm:$0xff] }
0x14ba   : > { %v15858_v38 = vcombine.low %v11804_v23, %v11820_v60  ;;  %v15892_v57 = vcombine.low %v11837_v35, %v11853_v37 }
0x14bc   : > { %13534 = vmatpush1.bf16.msra.mxu1 %v15920_v25  ;;  %13497 = vmatpush1.bf16.msra.mxu0 %v15982_v39  ;;  %v15860_v39 = vcombine.low %v11805_v31, %v11821_v24 }
0x14bd   : > { %13535 = vmatprep.subr.bf16.mxu1 %v15953_v26  ;;  %13498 = vmatprep.subr.bf16.mxu0 %v16015_v56  ;;  %v15890_v56 = vcombine.low %v11836_v44, %v11852_v50 }
0x14c0   : > { %13536 = vmatpush1.bf16.msra.mxu1 %v15952_v28  ;;  %13499 = vmatpush1.bf16.msra.mxu0 %v16014_v55  ;;  %v15861_v28 = vcombine.high %v11805_v31, %v11821_v24  ;;  %v11885_v55 = vld [vmem:[#allocation22 + $0x1098] sm:$0xff] }
0x14c1   : > { %13537 = vmatprep.subr.bf16.mxu1 %v15985_v20  ;;  %13500 = vmatprep.subr.bf16.mxu0 %v16047_v41  ;;  %v15893_v20 = vcombine.high %v11837_v35, %v11853_v37  ;;  %v11917_v41 = vld [vmem:[#allocation22 + $0x14d8] sm:$0xff] }
0x14c4   : > { %13538 = vmatpush1.bf16.msra.mxu1 %v15984_v40  ;;  %13501 = vmatpush1.bf16.msra.mxu0 %v16046_v36  ;;  %v15891_v40 = vcombine.high %v11836_v44, %v11852_v50  ;;  %v15924_v36 = vcombine.low %v11869_v47, %v11885_v55  ;;  %v11775_v44 = vld [vmem:[#allocation22 + $0x1c8] sm:$0xff] }
0x14c5   : > { %13539 = vmatprep.subr.bf16.mxu1 %v16017_v58  ;;  %13568 = vmatprep.subr.bf16.mxu0 %v15827_v42  ;;  %v15925_v58 = vcombine.high %v11869_v47, %v11885_v55  ;;  %v11949_v42 = vld [vmem:[#allocation22 + $0x1918] sm:$0xff]  ;;  %v11791_v50 = vld [vmem:[#allocation22 + $0x3e8] sm:$0xff] }
0x14c6   : > { %v15832_v55 = vcombine.low %v11775_v44, %v11791_v50 }
0x14c8   : > { %13540 = vmatpush1.bf16.msra.mxu1 %v16016_v29  ;;  %v15923_v29 = vcombine.high %v11868_v46, %v11884_v32  ;;  %v11807_v46 = vld [vmem:[#allocation22 + $0x608] sm:$0xff] }
0x14c9   : > { %13541 = vmatprep.subr.bf16.mxu1 %v16049_v7  ;;  %v15957_v7 = vcombine.high %v11901_v4, %v11917_v41  ;;  %v11823_v32 = vld [vmem:[#allocation22 + $0x828] sm:$0xff] }
0x14cc   : > { %13542 = vmatpush1.bf16.msra.mxu1 %v16048_v6  ;;  %v15955_v6 = vcombine.high %v11900_v62, %v11916_v3  ;;  %v11839_v62 = vld [vmem:[#allocation22 + $0xa48] sm:$0xff] }
0x14cd   : > { %13609 = vmatprep.subr.bf16.mxu1 %v15829_v27  ;;  %v15989_v27 = vcombine.high %v11933_v61, %v11949_v42  ;;  %v11855_v3 = vld [vmem:[#allocation22 + $0xc68] sm:$0xff] }
0x157a   : > { %v11577_v11 = vpop.f32.mrb[144].mxu0 }
0x157b   : > { %v17846_v12 = vadd.high.f32.bf16 %v11577_v11, %v19244_v45  ;;  %v17108_v14 = vpop.f32.mrb[145].mxu0  ;;  %v15859_v45 = vcombine.high %v11804_v23, %v11820_v60  ;;  %v11964_v11 = vld [vmem:[#allocation22 + $0x1b30] sm:$0xff]  ;;  %v12013_v23 = vld [vmem:[#allocation22 + $0x2198] sm:$0xff] }
0x157c   : > { %v11580_v48 = vpop.f32.mrb[146].mxu0  ;;  %v11965_v14 = vld [vmem:[#allocation22 + $0x1b38] sm:$0xff] }
0x157d   : > { %v11590_v15 = vrot.slane %v17846_v12, %v19036_v18  ;;  %v17109_v16 = vpop.f32.mrb[147].mxu0  ;;  %v11980_v12 = vld [vmem:[#allocation22 + $0x1d50] sm:$0xff]  ;;  %v11981_v48 = vld [vmem:[#allocation22 + $0x1d58] sm:$0xff] }
0x157e   : > { %v15988_v16 = vcombine.low %v11933_v61, %v11949_v42  ;;  %v16018_v60 = vcombine.low %v11964_v11, %v11980_v12  ;;  %v16020_v31 = vcombine.low %v11965_v14, %v11981_v48  ;;  %v15896_v42 = vcombine.low %v11839_v62, %v11855_v3 }
0x157f   : > { %v11597_v17 = vrot.slane %v11590_v15, %v19036_v18  ;;  %v15986_v15 = vcombine.low %v11932_v9, %v11948_v52 }
0x1581   : > { %11598 = vrot.lane.b32.xlu0 %v11597_v17, %s18391_s23  ;;  %v16019_v17 = vcombine.high %v11964_v11, %v11980_v12  ;;  %v11903_v11 = vld [vmem:[#allocation22 + $0x12c8] sm:$0xff] }
0x1582   : > { %v11764_v19 = vpop.f32.mrb[144].mxu1  ;;  %v11919_v12 = vld [vmem:[#allocation22 + $0x14e8] sm:$0xff] }
0x1583   : > { %v11765_v21 = vadd.f32 %v11764_v19, %v11697_v43  ;;  %v17157_v22 = vpop.f32.mrb[145].mxu1  ;;  %v16021_v43 = vcombine.high %v11965_v14, %v11981_v48  ;;  %v11996_v19 = vld [vmem:[#allocation22 + $0x1f70] sm:$0xff] }
0x1584   : > { %v11997_v22 = vld [vmem:[#allocation22 + $0x1f78] sm:$0xff] }
0x1585   : > { %v11768_v25 = vmax.f32 %v11765_v21, 0.0  ;;  %v12012_v21 = vld [vmem:[#allocation22 + $0x2190] sm:$0xff]  ;;  %v16052_v37 = vcombine.low %v11997_v22, %v12013_v23 }
0x1586   : > { %v16051_v24 = vcombine.high %v11996_v19, %v12012_v21  ;;  %v16050_v35 = vcombine.low %v11996_v19, %v12012_v21  ;;  %v11935_v19 = vld [vmem:[#allocation22 + $0x1708] sm:$0xff] }
0x1587   : > { %v19596_v26 = vpack.c.bf16 %v11768_v25, %v11768_v25  ;;  %v16053_v25 = vcombine.high %v11997_v22, %v12013_v23  ;;  %v11951_v21 = vld [vmem:[#allocation22 + $0x1928] sm:$0xff]  ;;  %v15960_v23 = vcombine.low %v11903_v11, %v11919_v12 }
0x1589   : > { %13519 = vmatmul.mubr.bf16.vlgmr.msra.gmra.mrb[148].mxu0 %v19596_v26  ;;  %13560 = vmatmul.mubr.bf16.vlgmr.msra.gmra.mrb[148].mxu1 %v19596_v26 }
0x158a   : > { %13569 = vmatpush1.bf16.msra.mxu0 %v15826_v8  ;;  %13610 = vmatpush1.bf16.msra.mxu1 %v15828_v10  ;;  %v15956_v8 = vcombine.low %v11901_v4, %v11917_v41  ;;  %v15987_v10 = vcombine.high %v11932_v9, %v11948_v52  ;;  %v15864_v41 = vcombine.low %v11807_v46, %v11823_v32  ;;  %v11871_v9 = vld [vmem:[#allocation22 + $0xe88] sm:$0xff] }
0x158b   : > { %13570 = vmatprep.subr.bf16.mxu0 %v15859_v45  ;;  %13611 = vmatprep.subr.bf16.mxu1 %v15861_v28  ;;  %v11774_v45 = vld [vmem:[#allocation22 + $0x1c0] sm:$0xff]  ;;  %v11887_v52 = vld [vmem:[#allocation22 + $0x10a8] sm:$0xff] }
0x158c   : > { %13600 = vmatprep.mubr.bf16.mxu0 %v18389_v0  ;;  %13641 = vmatprep.mubr.bf16.mxu1 %v18389_v0  ;;  %v11790_v28 = vld [vmem:[#allocation22 + $0x3e0] sm:$0xff]  ;;  %v15928_v48 = vcombine.low %v11871_v9, %v11887_v52 }
0x158d   : > { %v15830_v47 = vcombine.low %v11774_v45, %v11790_v28 }
0x158e   : > { %13571 = vmatpush1.bf16.msra.mxu0 %v15858_v38  ;;  %13612 = vmatpush1.bf16.msra.mxu1 %v15860_v39  ;;  %v15831_v38 = vcombine.high %v11774_v45, %v11790_v28  ;;  %v15833_v39 = vcombine.high %v11775_v44, %v11791_v50  ;;  %v11967_v45 = vld [vmem:[#allocation22 + $0x1b48] sm:$0xff]  ;;  %v15992_v50 = vcombine.low %v11935_v19, %v11951_v21 }
0x158f   : > { %13572 = vmatprep.subr.bf16.mxu0 %v15891_v40  ;;  %13613 = vmatprep.subr.bf16.mxu1 %v15893_v20  ;;  %v11806_v40 = vld [vmem:[#allocation22 + $0x600] sm:$0xff]  ;;  %v11983_v28 = vld [vmem:[#allocation22 + $0x1d68] sm:$0xff] }
0x1590   : > { %v11822_v20 = vld [vmem:[#allocation22 + $0x820] sm:$0xff] }
0x1591   : > { %v15862_v4 = vcombine.low %v11806_v40, %v11822_v20 }
0x1592   : > { %13573 = vmatpush1.bf16.msra.mxu0 %v15890_v56  ;;  %13614 = vmatpush1.bf16.msra.mxu1 %v15892_v57  ;;  %v15863_v56 = vcombine.high %v11806_v40, %v11822_v20  ;;  %v15865_v57 = vcombine.high %v11807_v46, %v11823_v32  ;;  %v11999_v40 = vld [vmem:[#allocation22 + $0x1f88] sm:$0xff]  ;;  %v16024_v32 = vcombine.low %v11967_v45, %v11983_v28 }
0x1593   : > { %13574 = vmatprep.subr.bf16.mxu0 %v15923_v29  ;;  %13615 = vmatprep.subr.bf16.mxu1 %v15925_v58  ;;  %v11838_v29 = vld [vmem:[#allocation22 + $0xa40] sm:$0xff]  ;;  %v12015_v20 = vld [vmem:[#allocation22 + $0x21a8] sm:$0xff] }
0x1594   : > { %v11854_v58 = vld [vmem:[#allocation22 + $0xc60] sm:$0xff] }
0x1595   : > { %v15894_v61 = vcombine.low %v11838_v29, %v11854_v58 }
0x1596   : > { %13575 = vmatpush1.bf16.msra.mxu0 %v15922_v13  ;;  %13616 = vmatpush1.bf16.msra.mxu1 %v15924_v36  ;;  %v15895_v13 = vcombine.high %v11838_v29, %v11854_v58  ;;  %v15897_v36 = vcombine.high %v11839_v62, %v11855_v3  ;;  %v11777_v29 = vld [vmem:[#allocation22 + $0x1d8] sm:$0xff]  ;;  %v16056_v3 = vcombine.low %v11999_v40, %v12015_v20 }
0x1597   : > { %13576 = vmatprep.subr.bf16.mxu0 %v15955_v6  ;;  %13617 = vmatprep.subr.bf16.mxu1 %v15957_v7  ;;  %v11870_v6 = vld [vmem:[#allocation22 + $0xe80] sm:$0xff]  ;;  %v11793_v58 = vld [vmem:[#allocation22 + $0x3f8] sm:$0xff] }
0x1598   : > { %v11886_v7 = vld [vmem:[#allocation22 + $0x10a0] sm:$0xff] }
0x1599   : > { %v15926_v14 = vcombine.low %v11870_v6, %v11886_v7 }
0x159a   : > { %13577 = vmatpush1.bf16.msra.mxu0 %v15954_v30  ;;  %13618 = vmatpush1.bf16.msra.mxu1 %v15956_v8  ;;  %v15927_v30 = vcombine.high %v11870_v6, %v11886_v7  ;;  %v15929_v8 = vcombine.high %v11871_v9, %v11887_v52  ;;  %v11809_v6 = vld [vmem:[#allocation22 + $0x618] sm:$0xff]  ;;  %v15836_v52 = vcombine.low %v11777_v29, %v11793_v58 }
0x159b   : > { %13578 = vmatprep.subr.bf16.mxu0 %v15987_v10  ;;  %13619 = vmatprep.subr.bf16.mxu1 %v15989_v27  ;;  %v11902_v10 = vld [vmem:[#allocation22 + $0x12c0] sm:$0xff]  ;;  %v11825_v7 = vld [vmem:[#allocation22 + $0x838] sm:$0xff] }
0x159c   : > { %v11918_v27 = vld [vmem:[#allocation22 + $0x14e0] sm:$0xff] }
0x159d   : > { %v15958_v22 = vcombine.low %v11902_v10, %v11918_v27 }
0x159e   : > { %13579 = vmatpush1.bf16.msra.mxu0 %v15986_v15  ;;  %13620 = vmatpush1.bf16.msra.mxu1 %v15988_v16  ;;  %v15959_v15 = vcombine.high %v11902_v10, %v11918_v27  ;;  %v15961_v16 = vcombine.high %v11903_v11, %v11919_v12  ;;  %v11841_v10 = vld [vmem:[#allocation22 + $0xa58] sm:$0xff]  ;;  %v15868_v12 = vcombine.low %v11809_v6, %v11825_v7 }
0x159f   : > { %13580 = vmatprep.subr.bf16.mxu0 %v16019_v17  ;;  %13621 = vmatprep.subr.bf16.mxu1 %v16021_v43  ;;  %v11934_v17 = vld [vmem:[#allocation22 + $0x1700] sm:$0xff]  ;;  %v11857_v27 = vld [vmem:[#allocation22 + $0xc78] sm:$0xff] }
0x15a0   : > { %v11950_v43 = vld [vmem:[#allocation22 + $0x1920] sm:$0xff] }
0x15a1   : > { %v15990_v44 = vcombine.low %v11934_v17, %v11950_v43 }
0x15a2   : > { %13581 = vmatpush1.bf16.msra.mxu0 %v16018_v60  ;;  %13622 = vmatpush1.bf16.msra.mxu1 %v16020_v31  ;;  %v15991_v60 = vcombine.high %v11934_v17, %v11950_v43  ;;  %v15993_v31 = vcombine.high %v11935_v19, %v11951_v21  ;;  %v11873_v17 = vld [vmem:[#allocation22 + $0xe98] sm:$0xff]  ;;  %v15900_v21 = vcombine.low %v11841_v10, %v11857_v27 }
0x15a3   : > { %13582 = vmatprep.subr.bf16.mxu0 %v16051_v24  ;;  %13623 = vmatprep.subr.bf16.mxu1 %v16053_v25  ;;  %v11966_v24 = vld [vmem:[#allocation22 + $0x1b40] sm:$0xff]  ;;  %v11889_v43 = vld [vmem:[#allocation22 + $0x10b8] sm:$0xff] }
0x15a4   : > { %v11982_v25 = vld [vmem:[#allocation22 + $0x1d60] sm:$0xff] }
0x15a5   : > { %v16022_v46 = vcombine.low %v11966_v24, %v11982_v25 }
0x15a6   : > { %13583 = vmatpush1.bf16.msra.mxu0 %v16050_v35  ;;  %13624 = vmatpush1.bf16.msra.mxu1 %v16052_v37  ;;  %v16023_v35 = vcombine.high %v11966_v24, %v11982_v25  ;;  %v16025_v37 = vcombine.high %v11967_v45, %v11983_v28  ;;  %v11905_v24 = vld [vmem:[#allocation22 + $0x12d8] sm:$0xff]  ;;  %v15932_v28 = vcombine.low %v11873_v17, %v11889_v43 }
0x15a7   : > { %13650 = vmatprep.subr.bf16.mxu0 %v15831_v38  ;;  %13691 = vmatprep.subr.bf16.mxu1 %v15833_v39  ;;  %v11998_v38 = vld [vmem:[#allocation22 + $0x1f80] sm:$0xff]  ;;  %v11921_v25 = vld [vmem:[#allocation22 + $0x14f8] sm:$0xff] }
0x15a8   : > { %v12014_v39 = vld [vmem:[#allocation22 + $0x21a0] sm:$0xff] }
0x15a9   : > { %13601 = vmatmul.mubr.bf16.vlgmr.msra.gmra.mrb[152].mxu0 %v19596_v26  ;;  %13642 = vmatmul.mubr.bf16.vlgmr.msra.gmra.mrb[152].mxu1 %v19596_v26  ;;  %v16054_v62 = vcombine.low %v11998_v38, %v12014_v39 }
0x15aa   : > { %13651 = vmatpush1.bf16.msra.mxu0 %v15830_v47  ;;  %13692 = vmatpush1.bf16.msra.mxu1 %v15832_v55  ;;  %v16055_v47 = vcombine.high %v11998_v38, %v12014_v39  ;;  %v16057_v55 = vcombine.high %v11999_v40, %v12015_v20  ;;  %v11937_v38 = vld [vmem:[#allocation22 + $0x1718] sm:$0xff]  ;;  %v15964_v20 = vcombine.low %v11905_v24, %v11921_v25 }
0x15ab   : > { %13652 = vmatprep.subr.bf16.mxu0 %v15863_v56  ;;  %13693 = vmatprep.subr.bf16.mxu1 %v15865_v57  ;;  %v11776_v56 = vld [vmem:[#allocation22 + $0x1d0] sm:$0xff]  ;;  %v11953_v39 = vld [vmem:[#allocation22 + $0x1938] sm:$0xff] }
0x15ac   : > { %13682 = vmatprep.mubr.bf16.mxu0 %v18389_v0  ;;  %13723 = vmatprep.mubr.bf16.mxu1 %v18389_v0  ;;  %v11792_v57 = vld [vmem:[#allocation22 + $0x3f0] sm:$0xff] }
0x15ad   : > { %v15834_v9 = vcombine.low %v11776_v56, %v11792_v57 }
0x15ae   : > { %13653 = vmatpush1.bf16.msra.mxu0 %v15862_v4  ;;  %13694 = vmatpush1.bf16.msra.mxu1 %v15864_v41  ;;  %v15835_v4 = vcombine.high %v11776_v56, %v11792_v57  ;;  %v15837_v41 = vcombine.high %v11777_v29, %v11793_v58  ;;  %v11969_v56 = vld [vmem:[#allocation22 + $0x1b58] sm:$0xff]  ;;  %v15996_v58 = vcombine.low %v11937_v38, %v11953_v39 }
0x15af   : > { %13654 = vmatprep.subr.bf16.mxu0 %v15895_v13  ;;  %13695 = vmatprep.subr.bf16.mxu1 %v15897_v36  ;;  %v11808_v13 = vld [vmem:[#allocation22 + $0x610] sm:$0xff]  ;;  %v11985_v57 = vld [vmem:[#allocation22 + $0x1d78] sm:$0xff] }
0x15b0   : > { %v11824_v36 = vld [vmem:[#allocation22 + $0x830] sm:$0xff] }
0x15b1   : > { %v15866_v11 = vcombine.low %v11808_v13, %v11824_v36 }
0x15b2   : > { %13655 = vmatpush1.bf16.msra.mxu0 %v15894_v61  ;;  %13696 = vmatpush1.bf16.msra.mxu1 %v15896_v42  ;;  %v15867_v61 = vcombine.high %v11808_v13, %v11824_v36  ;;  %v15869_v42 = vcombine.high %v11809_v6, %v11825_v7  ;;  %v12001_v13 = vld [vmem:[#allocation22 + $0x1f98] sm:$0xff]  ;;  %v16028_v7 = vcombine.low %v11969_v56, %v11985_v57 }
0x15b3   : > { %13656 = vmatprep.subr.bf16.mxu0 %v15927_v30  ;;  %13697 = vmatprep.subr.bf16.mxu1 %v15929_v8  ;;  %v11840_v30 = vld [vmem:[#allocation22 + $0xa50] sm:$0xff]  ;;  %v12017_v36 = vld [vmem:[#allocation22 + $0x21b8] sm:$0xff] }
0x15b4   : > { %v11856_v8 = vld [vmem:[#allocation22 + $0xc70] sm:$0xff] }
0x15b5   : > { %v15898_v19 = vcombine.low %v11840_v30, %v11856_v8 }
0x15b6   : > { %13657 = vmatpush1.bf16.msra.mxu0 %v15926_v14  ;;  %13698 = vmatpush1.bf16.msra.mxu1 %v15928_v48  ;;  %v15899_v14 = vcombine.high %v11840_v30, %v11856_v8  ;;  %v15901_v48 = vcombine.high %v11841_v10, %v11857_v27  ;;  %v11779_v30 = vld [vmem:[#allocation22 + $0x1e8] sm:$0xff]  ;;  %v16060_v27 = vcombine.low %v12001_v13, %v12017_v36 }
0x15b7   : > { %13658 = vmatprep.subr.bf16.mxu0 %v15959_v15  ;;  %13699 = vmatprep.subr.bf16.mxu1 %v15961_v16  ;;  %v11872_v15 = vld [vmem:[#allocation22 + $0xe90] sm:$0xff]  ;;  %v11795_v8 = vld [vmem:[#allocation22 + $0x408] sm:$0xff] }
0x15b8   : > { %v11888_v16 = vld [vmem:[#allocation22 + $0x10b0] sm:$0xff] }
0x15b9   : > { %v15930_v45 = vcombine.low %v11872_v15, %v11888_v16 }
0x15ba   : > { %13659 = vmatpush1.bf16.msra.mxu0 %v15958_v22  ;;  %13700 = vmatpush1.bf16.msra.mxu1 %v15960_v23  ;;  %v15931_v22 = vcombine.high %v11872_v15, %v11888_v16  ;;  %v15933_v23 = vcombine.high %v11873_v17, %v11889_v43  ;;  %v11811_v15 = vld [vmem:[#allocation22 + $0x628] sm:$0xff]  ;;  %v15840_v43 = vcombine.low %v11779_v30, %v11795_v8 }
0x15bb   : > { %13660 = vmatprep.subr.bf16.mxu0 %v15991_v60  ;;  %13701 = vmatprep.subr.bf16.mxu1 %v15993_v31  ;;  %v11904_v60 = vld [vmem:[#allocation22 + $0x12d0] sm:$0xff]  ;;  %v11827_v16 = vld [vmem:[#allocation22 + $0x848] sm:$0xff] }
0x15bc   : > { %v11920_v31 = vld [vmem:[#allocation22 + $0x14f0] sm:$0xff] }
0x15bd   : > { %v15962_v40 = vcombine.low %v11904_v60, %v11920_v31 }
0x15be   : > { %13661 = vmatpush1.bf16.msra.mxu0 %v15990_v44  ;;  %13702 = vmatpush1.bf16.msra.mxu1 %v15992_v50  ;;  %v15963_v44 = vcombine.high %v11904_v60, %v11920_v31  ;;  %v15965_v50 = vcombine.high %v11905_v24, %v11921_v25  ;;  %v11843_v60 = vld [vmem:[#allocation22 + $0xa68] sm:$0xff]  ;;  %v15872_v25 = vcombine.low %v11811_v15, %v11827_v16 }
0x15bf   : > { %13662 = vmatprep.subr.bf16.mxu0 %v16023_v35  ;;  %13703 = vmatprep.subr.bf16.mxu1 %v16025_v37  ;;  %v11936_v35 = vld [vmem:[#allocation22 + $0x1710] sm:$0xff]  ;;  %v11859_v31 = vld [vmem:[#allocation22 + $0xc88] sm:$0xff] }
0x15c0   : > { %v11952_v37 = vld [vmem:[#allocation22 + $0x1930] sm:$0xff] }
0x15c1   : > { %v15994_v29 = vcombine.low %v11936_v35, %v11952_v37 }
0x15c2   : > { %13663 = vmatpush1.bf16.msra.mxu0 %v16022_v46  ;;  %13704 = vmatpush1.bf16.msra.mxu1 %v16024_v32  ;;  %v15995_v46 = vcombine.high %v11936_v35, %v11952_v37  ;;  %v15997_v32 = vcombine.high %v11937_v38, %v11953_v39  ;;  %v11875_v35 = vld [vmem:[#allocation22 + $0xea8] sm:$0xff]  ;;  %v15904_v39 = vcombine.low %v11843_v60, %v11859_v31 }
0x15c3   : > { %13664 = vmatprep.subr.bf16.mxu0 %v16055_v47  ;;  %13705 = vmatprep.subr.bf16.mxu1 %v16057_v55  ;;  %v11968_v47 = vld [vmem:[#allocation22 + $0x1b50] sm:$0xff]  ;;  %v11891_v37 = vld [vmem:[#allocation22 + $0x10c8] sm:$0xff] }
0x15c4   : > { %v11984_v55 = vld [vmem:[#allocation22 + $0x1d70] sm:$0xff] }
0x15c5   : > { %v16026_v6 = vcombine.low %v11968_v47, %v11984_v55 }
0x15c6   : > { %13665 = vmatpush1.bf16.msra.mxu0 %v16054_v62  ;;  %13706 = vmatpush1.bf16.msra.mxu1 %v16056_v3  ;;  %v16027_v62 = vcombine.high %v11968_v47, %v11984_v55  ;;  %v16029_v3 = vcombine.high %v11969_v56, %v11985_v57  ;;  %v11907_v47 = vld [vmem:[#allocation22 + $0x12e8] sm:$0xff]  ;;  %v15936_v57 = vcombine.low %v11875_v35, %v11891_v37 }
0x15c7   : > { %13732 = vmatprep.subr.bf16.mxu0 %v15835_v4  ;;  %13773 = vmatprep.subr.bf16.mxu1 %v15837_v41  ;;  %v12000_v4 = vld [vmem:[#allocation22 + $0x1f90] sm:$0xff]  ;;  %v11923_v55 = vld [vmem:[#allocation22 + $0x1508] sm:$0xff] }
0x15c8   : > { %v12016_v41 = vld [vmem:[#allocation22 + $0x21b0] sm:$0xff] }
0x15c9   : > { %13683 = vmatmul.mubr.bf16.vlgmr.msra.gmra.mrb[156].mxu0 %v19596_v26  ;;  %13724 = vmatmul.mubr.bf16.vlgmr.msra.gmra.mrb[156].mxu1 %v19596_v26  ;;  %v16058_v10 = vcombine.low %v12000_v4, %v12016_v41 }
0x15ca   : > { %13733 = vmatpush1.bf16.msra.mxu0 %v15834_v9  ;;  %13774 = vmatpush1.bf16.msra.mxu1 %v15836_v52  ;;  %v16059_v9 = vcombine.high %v12000_v4, %v12016_v41  ;;  %v16061_v52 = vcombine.high %v12001_v13, %v12017_v36  ;;  %v11954_v4 = vld [vmem:[#allocation22 + $0x1940] sm:$0xff]  ;;  %v11939_v41 = vld [vmem:[#allocation22 + $0x1728] sm:$0xff] }
0x15cb   : > { %13734 = vmatprep.subr.bf16.mxu0 %v15867_v61  ;;  %13775 = vmatprep.subr.bf16.mxu1 %v15869_v42  ;;  %v11778_v61 = vld [vmem:[#allocation22 + $0x1e0] sm:$0xff]  ;;  %v11955_v13 = vld [vmem:[#allocation22 + $0x1948] sm:$0xff] }
0x15cc   : > { %13764 = vmatprep.mubr.bf16.mxu0 %v18389_v0  ;;  %13805 = vmatprep.mubr.bf16.mxu1 %v18389_v0  ;;  %v11794_v42 = vld [vmem:[#allocation22 + $0x400] sm:$0xff] }
0x15cd   : > { %v15838_v17 = vcombine.low %v11778_v61, %v11794_v42 }
0x15ce   : > { %13735 = vmatpush1.bf16.msra.mxu0 %v15866_v11  ;;  %13776 = vmatpush1.bf16.msra.mxu1 %v15868_v12  ;;  %v15839_v11 = vcombine.high %v11778_v61, %v11794_v42  ;;  %v15841_v12 = vcombine.high %v11779_v30, %v11795_v8  ;;  %v11986_v61 = vld [vmem:[#allocation22 + $0x1d80] sm:$0xff]  ;;  %v11971_v42 = vld [vmem:[#allocation22 + $0x1b68] sm:$0xff]  ;;  %v16000_v8 = vcombine.low %v11939_v41, %v11955_v13 }
0x15cf   : > { %13736 = vmatprep.subr.bf16.mxu0 %v15899_v14  ;;  %13777 = vmatprep.subr.bf16.mxu1 %v15901_v48  ;;  %v11810_v14 = vld [vmem:[#allocation22 + $0x620] sm:$0xff]  ;;  %v11987_v30 = vld [vmem:[#allocation22 + $0x1d88] sm:$0xff] }
0x15d0   : > { %v11826_v48 = vld [vmem:[#allocation22 + $0x840] sm:$0xff] }
0x15d1   : > { %v15870_v24 = vcombine.low %v11810_v14, %v11826_v48 }
0x15d2   : > { %13737 = vmatpush1.bf16.msra.mxu0 %v15898_v19  ;;  %13778 = vmatpush1.bf16.msra.mxu1 %v15900_v21  ;;  %v15871_v19 = vcombine.high %v11810_v14, %v11826_v48  ;;  %v15873_v21 = vcombine.high %v11811_v15, %v11827_v16  ;;  %v12003_v14 = vld [vmem:[#allocation22 + $0x1fa8] sm:$0xff]  ;;  %v16032_v16 = vcombine.low %v11971_v42, %v11987_v30 }
0x15d3   : > { %13738 = vmatprep.subr.bf16.mxu0 %v15931_v22  ;;  %13779 = vmatprep.subr.bf16.mxu1 %v15933_v23  ;;  %v11842_v22 = vld [vmem:[#allocation22 + $0xa60] sm:$0xff]  ;;  %v12019_v48 = vld [vmem:[#allocation22 + $0x21c8] sm:$0xff] }
0x15d4   : > { %v11858_v23 = vld [vmem:[#allocation22 + $0xc80] sm:$0xff] }
0x15d5   : > { %v15902_v38 = vcombine.low %v11842_v22, %v11858_v23 }
0x15d6   : > { %13739 = vmatpush1.bf16.msra.mxu0 %v15930_v45  ;;  %13780 = vmatpush1.bf16.msra.mxu1 %v15932_v28  ;;  %v15903_v45 = vcombine.high %v11842_v22, %v11858_v23  ;;  %v15905_v28 = vcombine.high %v11843_v60, %v11859_v31  ;;  %v11781_v22 = vld [vmem:[#allocation22 + $0x1f8] sm:$0xff]  ;;  %v16064_v31 = vcombine.low %v12003_v14, %v12019_v48 }
0x15d7   : > { %13740 = vmatprep.subr.bf16.mxu0 %v15963_v44  ;;  %13781 = vmatprep.subr.bf16.mxu1 %v15965_v50  ;;  %v11874_v44 = vld [vmem:[#allocation22 + $0xea0] sm:$0xff]  ;;  %v11797_v23 = vld [vmem:[#allocation22 + $0x418] sm:$0xff] }
0x15d8   : > { %v11890_v50 = vld [vmem:[#allocation22 + $0x10c0] sm:$0xff] }
0x15d9   : > { %v15934_v56 = vcombine.low %v11874_v44, %v11890_v50 }
0x15da   : > { %13741 = vmatpush1.bf16.msra.mxu0 %v15962_v40  ;;  %13782 = vmatpush1.bf16.msra.mxu1 %v15964_v20  ;;  %v15935_v40 = vcombine.high %v11874_v44, %v11890_v50  ;;  %v15937_v20 = vcombine.high %v11875_v35, %v11891_v37  ;;  %v11813_v44 = vld [vmem:[#allocation22 + $0x638] sm:$0xff]  ;;  %v15844_v37 = vcombine.low %v11781_v22, %v11797_v23 }
0x15db   : > { %13742 = vmatprep.subr.bf16.mxu0 %v15995_v46  ;;  %13783 = vmatprep.subr.bf16.mxu1 %v15997_v32  ;;  %v11906_v46 = vld [vmem:[#allocation22 + $0x12e0] sm:$0xff]  ;;  %v11829_v50 = vld [vmem:[#allocation22 + $0x858] sm:$0xff] }
0x15dc   : > { %v11922_v32 = vld [vmem:[#allocation22 + $0x1500] sm:$0xff] }
0x15dd   : > { %v15966_v36 = vcombine.low %v11906_v46, %v11922_v32 }
0x15de   : > { %13743 = vmatpush1.bf16.msra.mxu0 %v15994_v29  ;;  %13784 = vmatpush1.bf16.msra.mxu1 %v15996_v58  ;;  %v15967_v58 = vcombine.high %v11906_v46, %v11922_v32  ;;  %v11845_v46 = vld [vmem:[#allocation22 + $0xa78] sm:$0xff] }
0x15df   : > { %13744 = vmatprep.subr.bf16.mxu0 %v16027_v62  ;;  %13785 = vmatprep.subr.bf16.mxu1 %v16029_v3  ;;  %v15969_v62 = vcombine.high %v11907_v47, %v11923_v55  ;;  %v11938_v3 = vld [vmem:[#allocation22 + $0x1720] sm:$0xff]  ;;  %v11861_v32 = vld [vmem:[#allocation22 + $0xc98] sm:$0xff] }
0x15e0   : > { %v15998_v34 = vcombine.low %v11938_v3, %v11954_v4 }
0x15e2   : > { %13745 = vmatpush1.bf16.msra.mxu0 %v16026_v6  ;;  %13786 = vmatpush1.bf16.msra.mxu1 %v16028_v7  ;;  %v15968_v6 = vcombine.low %v11907_v47, %v11923_v55  ;;  %v15999_v7 = vcombine.high %v11938_v3, %v11954_v4  ;;  %v15876_v55 = vcombine.low %v11813_v44, %v11829_v50  ;;  %v11893_v3 = vld [vmem:[#allocation22 + $0x10d8] sm:$0xff] }
0x15e3   : > { %13746 = vmatprep.subr.bf16.mxu0 %v16059_v9  ;;  %13787 = vmatprep.subr.bf16.mxu1 %v16061_v52  ;;  %v16001_v9 = vcombine.high %v11939_v41, %v11955_v13  ;;  %v11970_v52 = vld [vmem:[#allocation22 + $0x1b60] sm:$0xff]  ;;  %v15908_v41 = vcombine.low %v11845_v46, %v11861_v32 }
0x15e4   : > { %v16030_v15 = vcombine.low %v11970_v52, %v11986_v61 }
0x15e6   : > { %13747 = vmatpush1.bf16.msra.mxu0 %v16058_v10  ;;  %13788 = vmatpush1.bf16.msra.mxu1 %v16060_v27  ;;  %v16031_v10 = vcombine.high %v11970_v52, %v11986_v61  ;;  %v16033_v27 = vcombine.high %v11971_v42, %v11987_v30  ;;  %v11925_v52 = vld [vmem:[#allocation22 + $0x1518] sm:$0xff] }
0x15e7   : > { %13814 = vmatprep.subr.bf16.mxu0 %v15839_v11  ;;  %13855 = vmatprep.subr.bf16.mxu1 %v15841_v12  ;;  %v12002_v11 = vld [vmem:[#allocation22 + $0x1fa0] sm:$0xff] }
0x15e8   : > { %v12018_v12 = vld [vmem:[#allocation22 + $0x21c0] sm:$0xff] }
0x15e9   : > { %13765 = vmatmul.mubr.bf16.vlgmr.msra.gmra.mrb[160].mxu0 %v19596_v26  ;;  %13806 = vmatmul.mubr.bf16.vlgmr.msra.gmra.mrb[160].mxu1 %v19596_v26  ;;  %v16062_v60 = vcombine.low %v12002_v11, %v12018_v12 }
0x15ea   : > { %13815 = vmatpush1.bf16.msra.mxu0 %v15838_v17  ;;  %13856 = vmatpush1.bf16.msra.mxu1 %v15840_v43  ;;  %v16063_v17 = vcombine.high %v12002_v11, %v12018_v12  ;;  %v16065_v43 = vcombine.high %v12003_v14, %v12019_v48  ;;  %v11957_v11 = vld [vmem:[#allocation22 + $0x1958] sm:$0xff] }
0x15eb   : > { %13816 = vmatprep.subr.bf16.mxu0 %v15871_v19  ;;  %13857 = vmatprep.subr.bf16.mxu1 %v15873_v21  ;;  %v11780_v19 = vld [vmem:[#allocation22 + $0x1f0] sm:$0xff] }
0x15ec   : > { %13846 = vmatprep.mubr.bf16.mxu0 %v18389_v0  ;;  %13887 = vmatprep.mubr.bf16.mxu1 %v18389_v0  ;;  %v11796_v21 = vld [vmem:[#allocation22 + $0x410] sm:$0xff] }
0x15ed   : > { %v15842_v35 = vcombine.low %v11780_v19, %v11796_v21 }
0x15ee   : > { %13817 = vmatpush1.bf16.msra.mxu0 %v15870_v24  ;;  %13858 = vmatpush1.bf16.msra.mxu1 %v15872_v25  ;;  %v15843_v24 = vcombine.high %v11780_v19, %v11796_v21  ;;  %v15845_v25 = vcombine.high %v11781_v22, %v11797_v23  ;;  %v11989_v19 = vld [vmem:[#allocation22 + $0x1d98] sm:$0xff] }
0x15ef   : > { %13818 = vmatprep.subr.bf16.mxu0 %v15903_v45  ;;  %13859 = vmatprep.subr.bf16.mxu1 %v15905_v28  ;;  %v11812_v45 = vld [vmem:[#allocation22 + $0x630] sm:$0xff] }
0x15f0   : > { %v11828_v28 = vld [vmem:[#allocation22 + $0x850] sm:$0xff] }
0x15f1   : > { %v15874_v47 = vcombine.low %v11812_v45, %v11828_v28 }
0x15f2   : > { %13819 = vmatpush1.bf16.msra.mxu0 %v15902_v38  ;;  %13860 = vmatpush1.bf16.msra.mxu1 %v15904_v39  ;;  %v15875_v38 = vcombine.high %v11812_v45, %v11828_v28  ;;  %v15877_v39 = vcombine.high %v11813_v44, %v11829_v50  ;;  %v12021_v45 = vld [vmem:[#allocation22 + $0x21d8] sm:$0xff] }
0x15f3   : > { %13820 = vmatprep.subr.bf16.mxu0 %v15935_v40  ;;  %13861 = vmatprep.subr.bf16.mxu1 %v15937_v20  ;;  %v11599_v29 = vpop.permute.xlu0 %11598  ;;  %v11844_v40 = vld [vmem:[#allocation22 + $0xa70] sm:$0xff] }
0x15f4   : > { %11601 = vst.msk [vmem:[%s19043_s30 + $0x5] sm:$0x1] %vm5456_vm11, %v11599_v29  ;;  %v11860_v20 = vld [vmem:[#allocation22 + $0xc90] sm:$0xff] }
0x15f5   : > { %v11876_v29 = vld [vmem:[#allocation22 + $0xeb0] sm:$0xff]  ;;  %v15906_v4 = vcombine.low %v11844_v40, %v11860_v20 }
0x15f6   : > { %13821 = vmatpush1.bf16.msra.mxu0 %v15934_v56  ;;  %13862 = vmatpush1.bf16.msra.mxu1 %v15936_v57  ;;  %v15907_v56 = vcombine.high %v11844_v40, %v11860_v20  ;;  %v15909_v57 = vcombine.high %v11845_v46, %v11861_v32  ;;  %v11799_v40 = vld [vmem:[#allocation22 + $0x428] sm:$0xff] }
0x15f7   : > { %13822 = vmatprep.subr.bf16.mxu0 %v15967_v58  ;;  %13863 = vmatprep.subr.bf16.mxu1 %v15969_v62  ;;  %v11892_v58 = vld [vmem:[#allocation22 + $0x10d0] sm:$0xff]  ;;  %v11877_v62 = vld [vmem:[#allocation22 + $0xeb8] sm:$0xff] }
0x15f8   : > { %v15939_v13 = vcombine.high %v11876_v29, %v11892_v58  ;;  %v15938_v61 = vcombine.low %v11876_v29, %v11892_v58  ;;  %v15940_v42 = vcombine.low %v11877_v62, %v11893_v3  ;;  %v11831_v29 = vld [vmem:[#allocation22 + $0x868] sm:$0xff] }
0x15fa   : > { %13823 = vmatpush1.bf16.msra.mxu0 %v15966_v36  ;;  %13864 = vmatpush1.bf16.msra.mxu1 %v15968_v6  ;;  %v15941_v36 = vcombine.high %v11877_v62, %v11893_v3  ;;  %v11908_v6 = vld [vmem:[#allocation22 + $0x12f0] sm:$0xff] }
0x15fb   : > { %13824 = vmatprep.subr.bf16.mxu0 %v15999_v7  ;;  %13865 = vmatprep.subr.bf16.mxu1 %v16001_v9  ;;  %v11924_v7 = vld [vmem:[#allocation22 + $0x1510] sm:$0xff]  ;;  %v11909_v9 = vld [vmem:[#allocation22 + $0x12f8] sm:$0xff] }
0x15fc   : > { %v15971_v30 = vcombine.high %v11908_v6, %v11924_v7  ;;  %v15970_v12 = vcombine.low %v11908_v6, %v11924_v7  ;;  %v15972_v14 = vcombine.low %v11909_v9, %v11925_v52  ;;  %v11863_v6 = vld [vmem:[#allocation22 + $0xca8] sm:$0xff] }
0x15fe   : > { %13825 = vmatpush1.bf16.msra.mxu0 %v15998_v34  ;;  %13866 = vmatpush1.bf16.msra.mxu1 %v16000_v8  ;;  %v15973_v34 = vcombine.high %v11909_v9, %v11925_v52  ;;  %v11940_v8 = vld [vmem:[#allocation22 + $0x1730] sm:$0xff] }
0x15ff   : > { %13826 = vmatprep.subr.bf16.mxu0 %v16031_v10  ;;  %13867 = vmatprep.subr.bf16.mxu1 %v16033_v27  ;;  %v11956_v10 = vld [vmem:[#allocation22 + $0x1950] sm:$0xff]  ;;  %v11941_v27 = vld [vmem:[#allocation22 + $0x1738] sm:$0xff] }
0x1600   : > { %v16003_v48 = vcombine.high %v11940_v8, %v11956_v10  ;;  %v16002_v21 = vcombine.low %v11940_v8, %v11956_v10  ;;  %v16004_v22 = vcombine.low %v11941_v27, %v11957_v11  ;;  %v11895_v8 = vld [vmem:[#allocation22 + $0x10e8] sm:$0xff] }
0x1602   : > { %13827 = vmatpush1.bf16.msra.mxu0 %v16030_v15  ;;  %13868 = vmatpush1.bf16.msra.mxu1 %v16032_v16  ;;  %v16005_v15 = vcombine.high %v11941_v27, %v11957_v11  ;;  %v11972_v16 = vld [vmem:[#allocation22 + $0x1b70] sm:$0xff] }
0x1603   : > { %13828 = vmatprep.subr.bf16.mxu0 %v16063_v17  ;;  %13869 = vmatprep.subr.bf16.mxu1 %v16065_v43  ;;  %v11988_v17 = vld [vmem:[#allocation22 + $0x1d90] sm:$0xff]  ;;  %v11973_v43 = vld [vmem:[#allocation22 + $0x1b78] sm:$0xff] }
0x1604   : > { %v16035_v23 = vcombine.high %v11972_v16, %v11988_v17  ;;  %v16034_v28 = vcombine.low %v11972_v16, %v11988_v17  ;;  %v16036_v44 = vcombine.low %v11973_v43, %v11989_v19  ;;  %v11927_v16 = vld [vmem:[#allocation22 + $0x1528] sm:$0xff] }
0x1606   : > { %13829 = vmatpush1.bf16.msra.mxu0 %v16062_v60  ;;  %13870 = vmatpush1.bf16.msra.mxu1 %v16064_v31  ;;  %v16037_v60 = vcombine.high %v11973_v43, %v11989_v19  ;;  %v12004_v31 = vld [vmem:[#allocation22 + $0x1fb0] sm:$0xff] }
0x1607   : > { %13896 = vmatprep.subr.bf16.mxu0 %v15843_v24  ;;  %13937 = vmatprep.subr.bf16.mxu1 %v15845_v25  ;;  %v12020_v24 = vld [vmem:[#allocation22 + $0x21d0] sm:$0xff]  ;;  %v12005_v25 = vld [vmem:[#allocation22 + $0x1fb8] sm:$0xff] }
0x1608   : > { %v16067_v50 = vcombine.high %v12004_v31, %v12020_v24  ;;  %v16066_v20 = vcombine.low %v12004_v31, %v12020_v24  ;;  %v16068_v46 = vcombine.low %v12005_v25, %v12021_v45  ;;  %v11959_v31 = vld [vmem:[#allocation22 + $0x1968] sm:$0xff] }
0x1609   : > { %13847 = vmatmul.mubr.bf16.vlgmr.msra.gmra.mrb[164].mxu0 %v19596_v26  ;;  %13888 = vmatmul.mubr.bf16.vlgmr.msra.gmra.mrb[164].mxu1 %v19596_v26 }
0x160a   : > { %13897 = vmatpush1.bf16.msra.mxu0 %v15842_v35  ;;  %13938 = vmatpush1.bf16.msra.mxu1 %v15844_v37  ;;  %v16069_v35 = vcombine.high %v12005_v25, %v12021_v45  ;;  %v11782_v37 = vld [vmem:[#allocation22 + $0x200] sm:$0xff] }
0x160b   : > { %13898 = vmatprep.subr.bf16.mxu0 %v15875_v38  ;;  %13939 = vmatprep.subr.bf16.mxu1 %v15877_v39  ;;  %v11798_v38 = vld [vmem:[#allocation22 + $0x420] sm:$0xff]  ;;  %v11783_v39 = vld [vmem:[#allocation22 + $0x208] sm:$0xff] }
0x160c   : > { %13928 = vmatprep.mubr.bf16.mxu0 %v18389_v0  ;;  %13969 = vmatprep.mubr.bf16.mxu1 %v18389_v0  ;;  %v15847_v32 = vcombine.high %v11782_v37, %v11798_v38  ;;  %v15846_v58 = vcombine.low %v11782_v37, %v11798_v38  ;;  %v15848_v62 = vcombine.low %v11783_v39, %v11799_v40  ;;  %v11991_v37 = vld [vmem:[#allocation22 + $0x1da8] sm:$0xff] }
0x160e   : > { %13899 = vmatpush1.bf16.msra.mxu0 %v15874_v47  ;;  %13940 = vmatpush1.bf16.msra.mxu1 %v15876_v55  ;;  %v15849_v47 = vcombine.high %v11783_v39, %v11799_v40  ;;  %v11814_v55 = vld [vmem:[#allocation22 + $0x640] sm:$0xff] }
0x160f   : > { %13900 = vmatprep.subr.bf16.mxu0 %v15907_v56  ;;  %13941 = vmatprep.subr.bf16.mxu1 %v15909_v57  ;;  %v11830_v56 = vld [vmem:[#allocation22 + $0x860] sm:$0xff]  ;;  %v11815_v57 = vld [vmem:[#allocation22 + $0x648] sm:$0xff] }
0x1610   : > { %v15879_v3 = vcombine.high %v11814_v55, %v11830_v56  ;;  %v15878_v7 = vcombine.low %v11814_v55, %v11830_v56  ;;  %v15880_v9 = vcombine.low %v11815_v57, %v11831_v29  ;;  %v12023_v55 = vld [vmem:[#allocation22 + $0x21e8] sm:$0xff] }
0x1612   : > { %13901 = vmatpush1.bf16.msra.mxu0 %v15906_v4  ;;  %13942 = vmatpush1.bf16.msra.mxu1 %v15908_v41  ;;  %v15881_v4 = vcombine.high %v11815_v57, %v11831_v29  ;;  %v11846_v41 = vld [vmem:[#allocation22 + $0xa80] sm:$0xff] }
0x1613   : > { %13902 = vmatprep.subr.bf16.mxu0 %v15939_v13  ;;  %13943 = vmatprep.subr.bf16.mxu1 %v15941_v36  ;;  %v11862_v13 = vld [vmem:[#allocation22 + $0xca0] sm:$0xff]  ;;  %v11847_v36 = vld [vmem:[#allocation22 + $0xa88] sm:$0xff] }
0x1614   : > { %v15911_v52 = vcombine.high %v11846_v41, %v11862_v13  ;;  %v15910_v10 = vcombine.low %v11846_v41, %v11862_v13  ;;  %v15912_v27 = vcombine.low %v11847_v36, %v11863_v6  ;;  %v11801_v41 = vld [vmem:[#allocation22 + $0x438] sm:$0xff] }
0x1616   : > { %13903 = vmatpush1.bf16.msra.mxu0 %v15938_v61  ;;  %13944 = vmatpush1.bf16.msra.mxu1 %v15940_v42  ;;  %v15913_v61 = vcombine.high %v11847_v36, %v11863_v6  ;;  %v11878_v42 = vld [vmem:[#allocation22 + $0xec0] sm:$0xff] }
0x1617   : > { %13904 = vmatprep.subr.bf16.mxu0 %v15971_v30  ;;  %13945 = vmatprep.subr.bf16.mxu1 %v15973_v34  ;;  %v11894_v30 = vld [vmem:[#allocation22 + $0x10e0] sm:$0xff]  ;;  %v11879_v34 = vld [vmem:[#allocation22 + $0xec8] sm:$0xff] }
0x1618   : > { %v15943_v11 = vcombine.high %v11878_v42, %v11894_v30  ;;  %v15942_v17 = vcombine.low %v11878_v42, %v11894_v30  ;;  %v15944_v43 = vcombine.low %v11879_v34, %v11895_v8  ;;  %v11833_v42 = vld [vmem:[#allocation22 + $0x878] sm:$0xff] }
0x161a   : > { %13905 = vmatpush1.bf16.msra.mxu0 %v15970_v12  ;;  %13946 = vmatpush1.bf16.msra.mxu1 %v15972_v14  ;;  %v15945_v12 = vcombine.high %v11879_v34, %v11895_v8  ;;  %v11910_v14 = vld [vmem:[#allocation22 + $0x1300] sm:$0xff] }
0x161b   : > { %13906 = vmatprep.subr.bf16.mxu0 %v16003_v48  ;;  %13947 = vmatprep.subr.bf16.mxu1 %v16005_v15  ;;  %v11926_v48 = vld [vmem:[#allocation22 + $0x1520] sm:$0xff]  ;;  %v11911_v15 = vld [vmem:[#allocation22 + $0x1308] sm:$0xff] }
0x161c   : > { %v15975_v19 = vcombine.high %v11910_v14, %v11926_v48  ;;  %v15974_v24 = vcombine.low %v11910_v14, %v11926_v48  ;;  %v15976_v25 = vcombine.low %v11911_v15, %v11927_v16  ;;  %v11865_v14 = vld [vmem:[#allocation22 + $0xcb8] sm:$0xff] }
0x161e   : > { %13907 = vmatpush1.bf16.msra.mxu0 %v16002_v21  ;;  %13948 = vmatpush1.bf16.msra.mxu1 %v16004_v22  ;;  %v15977_v21 = vcombine.high %v11911_v15, %v11927_v16  ;;  %v11942_v22 = vld [vmem:[#allocation22 + $0x1740] sm:$0xff] }
0x161f   : > { %13908 = vmatprep.subr.bf16.mxu0 %v16035_v23  ;;  %13949 = vmatprep.subr.bf16.mxu1 %v16037_v60  ;;  %v11958_v23 = vld [vmem:[#allocation22 + $0x1960] sm:$0xff]  ;;  %v11943_v60 = vld [vmem:[#allocation22 + $0x1748] sm:$0xff] }
0x1620   : > { %v16007_v45 = vcombine.high %v11942_v22, %v11958_v23  ;;  %v16006_v38 = vcombine.low %v11942_v22, %v11958_v23  ;;  %v16008_v39 = vcombine.low %v11943_v60, %v11959_v31  ;;  %v11897_v22 = vld [vmem:[#allocation22 + $0x10f8] sm:$0xff] }
0x1622   : > { %13909 = vmatpush1.bf16.msra.mxu0 %v16034_v28  ;;  %13950 = vmatpush1.bf16.msra.mxu1 %v16036_v44  ;;  %v16009_v28 = vcombine.high %v11943_v60, %v11959_v31  ;;  %v11974_v44 = vld [vmem:[#allocation22 + $0x1b80] sm:$0xff] }
0x1623   : > { %13910 = vmatprep.subr.bf16.mxu0 %v16067_v50  ;;  %13951 = vmatprep.subr.bf16.mxu1 %v16069_v35  ;;  %v11990_v50 = vld [vmem:[#allocation22 + $0x1da0] sm:$0xff]  ;;  %v11975_v35 = vld [vmem:[#allocation22 + $0x1b88] sm:$0xff] }
0x1624   : > { %v16039_v40 = vcombine.high %v11974_v44, %v11990_v50  ;;  %v16038_v56 = vcombine.low %v11974_v44, %v11990_v50  ;;  %v16040_v57 = vcombine.low %v11975_v35, %v11991_v37  ;;  %v11929_v44 = vld [vmem:[#allocation22 + $0x1538] sm:$0xff] }
0x1626   : > { %13911 = vmatpush1.bf16.msra.mxu0 %v16066_v20  ;;  %13952 = vmatpush1.bf16.msra.mxu1 %v16068_v46  ;;  %v16041_v20 = vcombine.high %v11975_v35, %v11991_v37  ;;  %v12006_v46 = vld [vmem:[#allocation22 + $0x1fc0] sm:$0xff]  ;;  %v19632_v37 = vld [vmem:[#allocation23 + $0x68] sm:$0xff] }
0x1627   : > { %13978 = vmatprep.subr.bf16.mxu0 %v15847_v32  ;;  %14019 = vmatprep.subr.bf16.mxu1 %v15849_v47  ;;  %v12022_v32 = vld [vmem:[#allocation22 + $0x21e0] sm:$0xff]  ;;  %v12007_v47 = vld [vmem:[#allocation22 + $0x1fc8] sm:$0xff] }
0x1628   : > { %v16071_v29 = vcombine.high %v12006_v46, %v12022_v32  ;;  %v16070_v13 = vcombine.low %v12006_v46, %v12022_v32  ;;  %v16072_v36 = vcombine.low %v12007_v47, %v12023_v55  ;;  %v11961_v46 = vld [vmem:[#allocation22 + $0x1978] sm:$0xff]  ;;  %v12030_v32 = vunpack.c.l.bf16 %v19632_v37 }
0x1629   : > { %13929 = vmatmul.mubr.bf16.vlgmr.msra.gmra.mrb[168].mxu0 %v19596_v26  ;;  %13970 = vmatmul.mubr.bf16.vlgmr.msra.gmra.mrb[168].mxu1 %v19596_v26 }
0x162a   : > { %13979 = vmatpush1.bf16.msra.mxu0 %v15846_v58  ;;  %14020 = vmatpush1.bf16.msra.mxu1 %v15848_v62  ;;  %v16073_v58 = vcombine.high %v12007_v47, %v12023_v55  ;;  %v11784_v62 = vld [vmem:[#allocation22 + $0x210] sm:$0xff] }
0x162b   : > { %13980 = vmatprep.subr.bf16.mxu0 %v15879_v3  ;;  %14021 = vmatprep.subr.bf16.mxu1 %v15881_v4  ;;  %v11800_v3 = vld [vmem:[#allocation22 + $0x430] sm:$0xff]  ;;  %v11785_v4 = vld [vmem:[#allocation22 + $0x218] sm:$0xff] }
0x162c   : > { %14010 = vmatprep.mubr.bf16.mxu0 %v18389_v0  ;;  %14051 = vmatprep.mubr.bf16.mxu1 %v18389_v0  ;;  %v15851_v6 = vcombine.high %v11784_v62, %v11800_v3  ;;  %v15850_v30 = vcombine.low %v11784_v62, %v11800_v3  ;;  %v15852_v34 = vcombine.low %v11785_v4, %v11801_v41  ;;  %v11977_v62 = vld [vmem:[#allocation22 + $0x1b98] sm:$0xff] }
0x162d   : > { %v11993_v3 = vld [vmem:[#allocation22 + $0x1db8] sm:$0xff] }
0x162e   : > { %13981 = vmatpush1.bf16.msra.mxu0 %v15878_v7  ;;  %14022 = vmatpush1.bf16.msra.mxu1 %v15880_v9  ;;  %v15853_v7 = vcombine.high %v11785_v4, %v11801_v41  ;;  %v11816_v9 = vld [vmem:[#allocation22 + $0x650] sm:$0xff]  ;;  %v13329_v4 = vrot.slane %v12030_v32, %v19024_v63  ;;  %v13337_v41 = vrot.slane %v12030_v32, %v19026_v1 }
0x162f   : > { %13982 = vmatprep.subr.bf16.mxu0 %v15911_v52  ;;  %14023 = vmatprep.subr.bf16.mxu1 %v15913_v61  ;;  %v11832_v52 = vld [vmem:[#allocation22 + $0x870] sm:$0xff]  ;;  %v11817_v61 = vld [vmem:[#allocation22 + $0x658] sm:$0xff] }
0x1630   : > { %v15883_v8 = vcombine.high %v11816_v9, %v11832_v52  ;;  %v15882_v48 = vcombine.low %v11816_v9, %v11832_v52  ;;  %v15884_v15 = vcombine.low %v11817_v61, %v11833_v42  ;;  %v16045_v52 = vcombine.high %v11977_v62, %v11993_v3 }
0x1632   : > { %13983 = vmatpush1.bf16.msra.mxu0 %v15910_v10  ;;  %14024 = vmatpush1.bf16.msra.mxu1 %v15912_v27  ;;  %v15885_v10 = vcombine.high %v11817_v61, %v11833_v42  ;;  %v11848_v27 = vld [vmem:[#allocation22 + $0xa90] sm:$0xff] }
0x1633   : > { %13984 = vmatprep.subr.bf16.mxu0 %v15943_v11  ;;  %14025 = vmatprep.subr.bf16.mxu1 %v15945_v12  ;;  %v11864_v11 = vld [vmem:[#allocation22 + $0xcb0] sm:$0xff]  ;;  %v11849_v12 = vld [vmem:[#allocation22 + $0xa98] sm:$0xff] }
0x1634   : > { %v15915_v16 = vcombine.high %v11848_v27, %v11864_v11  ;;  %v15914_v23 = vcombine.low %v11848_v27, %v11864_v11  ;;  %v15916_v60 = vcombine.low %v11849_v12, %v11865_v14  ;;  %v12008_v61 = vld [vmem:[#allocation22 + $0x1fd0] sm:$0xff] }
0x1636   : > { %13985 = vmatpush1.bf16.msra.mxu0 %v15942_v17  ;;  %14026 = vmatpush1.bf16.msra.mxu1 %v15944_v43  ;;  %v15917_v17 = vcombine.high %v11849_v12, %v11865_v14  ;;  %v11880_v43 = vld [vmem:[#allocation22 + $0xed0] sm:$0xff] }
0x1637   : > { %13986 = vmatprep.subr.bf16.mxu0 %v15975_v19  ;;  %14027 = vmatprep.subr.bf16.mxu1 %v15977_v21  ;;  %v11896_v19 = vld [vmem:[#allocation22 + $0x10f0] sm:$0xff]  ;;  %v11881_v21 = vld [vmem:[#allocation22 + $0xed8] sm:$0xff] }
0x1638   : > { %v15947_v31 = vcombine.high %v11880_v43, %v11896_v19  ;;  %v15946_v50 = vcombine.low %v11880_v43, %v11896_v19  ;;  %v15948_v35 = vcombine.low %v11881_v21, %v11897_v22  ;;  %v16044_v19 = vcombine.low %v11977_v62, %v11993_v3 }
0x163a   : > { %13987 = vmatpush1.bf16.msra.mxu0 %v15974_v24  ;;  %14028 = vmatpush1.bf16.msra.mxu1 %v15976_v25  ;;  %v15949_v24 = vcombine.high %v11881_v21, %v11897_v22  ;;  %v11912_v25 = vld [vmem:[#allocation22 + $0x1310] sm:$0xff] }
0x163b   : > { %13988 = vmatprep.subr.bf16.mxu0 %v16007_v45  ;;  %14029 = vmatprep.subr.bf16.mxu1 %v16009_v28  ;;  %v11928_v45 = vld [vmem:[#allocation22 + $0x1530] sm:$0xff]  ;;  %v11913_v28 = vld [vmem:[#allocation22 + $0x1318] sm:$0xff] }
0x163c   : > { %v15978_v47 = vcombine.low %v11912_v25, %v11928_v45  ;;  %v15980_v55 = vcombine.low %v11913_v28, %v11929_v44 }
0x163e   : > { %13989 = vmatpush1.bf16.msra.mxu0 %v16006_v38  ;;  %14030 = vmatpush1.bf16.msra.mxu1 %v16008_v39  ;;  %v15981_v38 = vcombine.high %v11913_v28, %v11929_v44  ;;  %v11944_v39 = vld [vmem:[#allocation22 + $0x1750] sm:$0xff] }
0x163f   : > { %13990 = vmatprep.subr.bf16.mxu0 %v16039_v40  ;;  %14031 = vmatprep.subr.bf16.mxu1 %v16041_v20  ;;  %v11960_v40 = vld [vmem:[#allocation22 + $0x1970] sm:$0xff]  ;;  %v11945_v20 = vld [vmem:[#allocation22 + $0x1758] sm:$0xff] }
0x1642   : > { %13991 = vmatpush1.bf16.msra.mxu0 %v16038_v56  ;;  %14032 = vmatpush1.bf16.msra.mxu1 %v16040_v57  ;;  %v16011_v56 = vcombine.high %v11944_v39, %v11960_v40  ;;  %v16013_v57 = vcombine.high %v11945_v20, %v11961_v46 }
0x1643   : > { %13992 = vmatprep.subr.bf16.mxu0 %v16071_v29  ;;  %14033 = vmatprep.subr.bf16.mxu1 %v16073_v58  ;;  %v11976_v29 = vld [vmem:[#allocation22 + $0x1b90] sm:$0xff] }
0x1644   : > { %v11992_v58 = vld [vmem:[#allocation22 + $0x1db0] sm:$0xff] }
0x1645   : > { %v16043_v9 = vcombine.high %v11976_v29, %v11992_v58 }
0x1646   : > { %13993 = vmatpush1.bf16.msra.mxu0 %v16070_v13  ;;  %14034 = vmatpush1.bf16.msra.mxu1 %v16072_v36  ;;  %v16010_v13 = vcombine.low %v11944_v39, %v11960_v40  ;;  %v16012_v36 = vcombine.low %v11945_v20, %v11961_v46  ;;  %v14381_v39 = vld [vmem:[#allocation16 + $0x178] sm:$0xff]  ;;  %v14382_v40 = vld [vmem:[#allocation16 + $0x180] sm:$0xff]  ;;  %v14383_v46 = vld [vmem:[#allocation16 + $0x188] sm:$0xff] }
0x1647   : > { %14060 = vmatprep.subr.bf16.mxu0 %v15851_v6  ;;  %14101 = vmatprep.subr.bf16.mxu1 %v15853_v7  ;;  %v13333_v6 = vrot.slane %v12030_v32, %v19028_v2  ;;  %v13341_v7 = vrot.slane %v12030_v32, %v19030_v5  ;;  %v17608_v20 = vpack.c.bf16 %v14382_v40, %v14381_v39  ;;  %v14459_v39 = vld [vmem:[#allocation19 + $0x490] sm:$0xff] }
0x1649   : > { %14011 = vmatmul.mubr.bf16.vlgmr.msra.gmra.mrb[172].mxu0 %v19596_v26  ;;  %14052 = vmatmul.mubr.bf16.vlgmr.msra.gmra.mrb[172].mxu1 %v19596_v26 }
0x164a   : > { %14061 = vmatpush1.bf16.msra.mxu0 %v15850_v30  ;;  %14102 = vmatpush1.bf16.msra.mxu1 %v15852_v34  ;;  %v12024_v34 = vld [vmem:[#allocation22 + $0x21f0] sm:$0xff] }
0x164b   : > { %14062 = vmatprep.subr.bf16.mxu0 %v15883_v8  ;;  %14103 = vmatprep.subr.bf16.mxu1 %v15885_v10  ;;  %v12009_v8 = vld [vmem:[#allocation22 + $0x1fd8] sm:$0xff] }
0x164c   : > { %14092 = vmatprep.mubr.bf16.mxu0 %v18389_v0  ;;  %14133 = vmatprep.mubr.bf16.mxu1 %v18389_v0  ;;  %v15979_v0 = vcombine.high %v11912_v25, %v11928_v45  ;;  %v12025_v10 = vld [vmem:[#allocation22 + $0x21f8] sm:$0xff]  ;;  %v16074_v25 = vcombine.low %v12008_v61, %v12024_v34 }
0x164d   : > { %v16076_v44 = vcombine.low %v12009_v8, %v12025_v10 }
0x164e   : > { %14063 = vmatpush1.bf16.msra.mxu0 %v15882_v48  ;;  %14104 = vmatpush1.bf16.msra.mxu1 %v15884_v15  ;;  %v16042_v48 = vcombine.low %v11976_v29, %v11992_v58 }
0x164f   : > { %14064 = vmatprep.subr.bf16.mxu0 %v15915_v16  ;;  %14105 = vmatprep.subr.bf16.mxu1 %v15917_v17 }
0x1652   : > { %14065 = vmatpush1.bf16.msra.mxu0 %v15914_v23  ;;  %14106 = vmatpush1.bf16.msra.mxu1 %v15916_v60  ;;  %v16075_v23 = vcombine.high %v12008_v61, %v12024_v34  ;;  %v16077_v60 = vcombine.high %v12009_v8, %v12025_v10  ;;  %v12027_v10 = vld [vmem:[#allocation23 + $0x70] sm:$0xff] }
0x1653   : > { %14066 = vmatprep.subr.bf16.mxu0 %v15947_v31  ;;  %14107 = vmatprep.subr.bf16.mxu1 %v15949_v24 }
0x1656   : > { %14067 = vmatpush1.bf16.msra.mxu0 %v15946_v50  ;;  %14108 = vmatpush1.bf16.msra.mxu1 %v15948_v35  ;;  %v14379_v50 = vld [vmem:[#allocation16 + $0x168] sm:$0xff]  ;;  %v14380_v35 = vld [vmem:[#allocation16 + $0x170] sm:$0xff] }
0x1657   : > { %14068 = vmatprep.subr.bf16.mxu0 %v15979_v0  ;;  %14109 = vmatprep.subr.bf16.mxu1 %v15981_v38  ;;  %v17605_v38 = vpack.c.bf16 %v14380_v35, %v14379_v50 }
0x165a   : > { %14069 = vmatpush1.bf16.msra.mxu0 %v15978_v47  ;;  %14110 = vmatpush1.bf16.msra.mxu1 %v15980_v55 }
0x165b   : > { %14070 = vmatprep.subr.bf16.mxu0 %v16011_v56  ;;  %14111 = vmatprep.subr.bf16.mxu1 %v16013_v57 }
0x165c   : > { %v13520_v42 = vpop.f32.mrb[148].mxu0  ;;  %v13561_v30 = vpop.f32.mrb[148].mxu1 }
0x165d   : > { %v13521_v27 = vadd.f32 %v13520_v42, %v13329_v4  ;;  %v13562_v11 = vadd.f32 %v13561_v30, %v13337_v41  ;;  %v13522_v12 = vpop.f32.mrb[149].mxu0  ;;  %v13563_v14 = vpop.f32.mrb[149].mxu1 }
0x165e   : > { %v13523_v15 = vadd.f32 %v13522_v12, %v13333_v6  ;;  %v13564_v16 = vadd.f32 %v13563_v14, %v13341_v7  ;;  %14071 = vmatpush1.bf16.msra.mxu0 %v16010_v13  ;;  %14112 = vmatpush1.bf16.msra.mxu1 %v16012_v36  ;;  %v13524_v17 = vpop.f32.mrb[150].mxu0  ;;  %v13565_v43 = vpop.f32.mrb[150].mxu1 }
0x165f   : > { %v13525_v21 = vpop.f32.mrb[151].mxu0  ;;  %v13566_v22 = vpop.f32.mrb[151].mxu1  ;;  %14072 = vmatprep.subr.bf16.mxu0 %v16043_v9  ;;  %14113 = vmatprep.subr.bf16.mxu1 %v16045_v52 }
0x1660   : > { %v14174_v31 = vcombine.low %v13521_v27, %v13523_v15  ;;  %v14175_v24 = vcombine.low %v13562_v11, %v13564_v16  ;;  %v12032_v27 = vunpack.c.l.bf16 %v12027_v10 }
0x1662   : > { %v14184_v45 = vrot.slane %v14174_v31, %v19036_v18  ;;  %v14191_v28 = vrot.slane %v14175_v24, %v19036_v18  ;;  %14073 = vmatpush1.bf16.msra.mxu0 %v16042_v48  ;;  %14114 = vmatpush1.bf16.msra.mxu1 %v16044_v19  ;;  %v13361_v11 = vrot.slane %v12032_v27, %v19024_v63 }
0x1663   : > { %14074 = vmatprep.subr.bf16.mxu0 %v16075_v23  ;;  %14115 = vmatprep.subr.bf16.mxu1 %v16077_v60  ;;  %v13369_v12 = vrot.slane %v12032_v27, %v19026_v1  ;;  %v13365_v14 = vrot.slane %v12032_v27, %v19028_v2  ;;  %v13373_v48 = vrot.slane %v12032_v27, %v19030_v5 }
0x1664   : > { %v14206_v0 = vcombine.low %v14184_v45, %v14191_v28 }
0x1666   : > { %14075 = vmatpush1.bf16.msra.mxu0 %v16074_v25  ;;  %14116 = vmatpush1.bf16.msra.mxu1 %v16076_v44  ;;  %v14214_v30 = vrot.slane %v14206_v0, %v19036_v18  ;;  %v14457_v0 = vld [vmem:[#allocation19 + $0x480] sm:$0xff] }
0x1667   : > { %17604 = vmatprep.subr.bf16.mxu0 %v18385_v53  ;;  %17206 = vmatprep.subr.bf16.mxu1 %v18387_v54 }
0x1669   : > { %14093 = vmatmul.mubr.bf16.vlgmr.msra.gmra.mrb[176].mxu0 %v19596_v26  ;;  %14134 = vmatmul.mubr.bf16.vlgmr.msra.gmra.mrb[176].mxu1 %v19596_v26  ;;  %v12031_v26 = vunpack.c.h.bf16 %v19632_v37 }
0x166a   : > { %17606 = vmatpush3.bf16.msra.mxu0 %v17605_v38  ;;  %17168 = vmatprep.mubr.msk.f32.mxu0 %vm18386_vm3, %v18387_v54  ;;  %v14458_v38 = vld [vmem:[#allocation19 + $0x488] sm:$0xff] }
0x166b   : > { %17607 = vmatprep.subr.bf16.mxu0 %v18385_v53  ;;  %17222 = vmatprep.mubr.msk.bf16.mxu1 %vm18386_vm3, %v18387_v54  ;;  %v13345_v32 = vrot.slane %v12031_v26, %v19024_v63  ;;  %v13353_v47 = vrot.slane %v12031_v26, %v19026_v1  ;;  %v13349_v55 = vrot.slane %v12031_v26, %v19028_v2 }
0x166c   : > { %v13357_v56 = vrot.slane %v12031_v26, %v19030_v5  ;;  %v17611_v40 = vpack.c.bf16 %v14458_v38, %v14457_v0  ;;  %v14461_v26 = vld [vmem:[#allocation19 + $0x4a0] sm:$0xff]  ;;  %v14549_v0 = vld [vmem:[#allocation22 + $0x678] sm:$0xf] }
0x166e   : > { %17609 = vmatpush3.bf16.msra.mxu0 %v17608_v20  ;;  %v14460_v20 = vld [vmem:[#allocation19 + $0x498] sm:$0xff] }
0x166f   : > { %17166 = vmatprep.subr.mxu0 %v18387_v54 }
0x1672   : > { %17167 = vmatpush3.msra.mxu0 %v14383_v46  ;;  %v17614_v46 = vpack.c.bf16 %v14460_v20, %v14459_v39  ;;  %v14551_v39 = vld [vmem:[#allocation22 + $0xab8] sm:$0xf] }
0x1673   : > { %17169 = vmatmul.mubr.msk.f32.vlgmr.msra.gmra.mrb[180].mxu0 %vm1590_vm5, %v18986_v49  ;;  %17610 = vmatprep.subr.bf16.mxu0 %v18385_v53  ;;  %v14552_v20 = vld [vmem:[#allocation22 + $0xcd8] sm:$0xf] }
0x1674   : > { %17203 = vmatprep.mubr.msk.f32.mxu0 %vm18386_vm3, %v18387_v54  ;;  %17612 = vmatpush3.bf16.msra.mxu0 %v17611_v40  ;;  %v12028_v40 = vld [vmem:[#allocation23 + $0x78] sm:$0xff] }
0x1675   : > { %17613 = vmatprep.subr.bf16.mxu0 %v18385_v53 }
0x1678   : > { %17615 = vmatpush3.bf16.msra.mxu0 %v17614_v46  ;;  %v14553_v46 = vld [vmem:[#allocation22 + $0xef8] sm:$0xf] }
0x1679   : > { %17616 = vmatprep.subr.bf16.mxu0 %v18385_v53 }
0x167c   : > { %v13602_v57 = vpop.f32.mrb[152].mxu0  ;;  %v13643_v29 = vpop.f32.mrb[152].mxu1 }
0x167d   : > { %v13603_v58 = vadd.f32 %v13602_v57, %v13345_v32  ;;  %v13644_v62 = vadd.f32 %v13643_v29, %v13353_v47  ;;  %v13604_v49 = vpop.f32.mrb[153].mxu0  ;;  %v13645_v3 = vpop.f32.mrb[153].mxu1  ;;  %v14462_v32 = vld [vmem:[#allocation19 + $0x4a8] sm:$0xff]  ;;  %v12033_v29 = vunpack.c.h.bf16 %v12027_v10 }
0x167e   : > { %v13605_v4 = vadd.f32 %v13604_v49, %v13349_v55  ;;  %v13646_v41 = vadd.f32 %v13645_v3, %v13357_v56  ;;  %v13606_v13 = vpop.f32.mrb[154].mxu0  ;;  %v13647_v36 = vpop.f32.mrb[154].mxu1  ;;  %v17617_v47 = vpack.c.bf16 %v14462_v32, %v14461_v26  ;;  %v14463_v55 = vld [vmem:[#allocation19 + $0x4b0] sm:$0xff]  ;;  %v14464_v56 = vld [vmem:[#allocation19 + $0x4b8] sm:$0xff]  ;;  %v14465_v49 = vld [vmem:[#allocation19 + $0x4c0] sm:$0xff]  ;;  %v12034_v26 = vunpack.c.l.bf16 %v12028_v40 }
0x167f   : > { %v13607_v37 = vpop.f32.mrb[155].mxu0  ;;  %v13648_v6 = vpop.f32.mrb[155].mxu1  ;;  %v17620_v57 = vpack.c.bf16 %v14464_v56, %v14463_v55  ;;  %v14466_v3 = vld [vmem:[#allocation19 + $0x4c8] sm:$0xff]  ;;  %v16082_v32 = vcombine.low %v14552_v20, %v14553_v46  ;;  %v12029_v46 = vld [vmem:[#allocation23 + $0x80] sm:$0xff] }
0x1680   : > { %v14176_v7 = vcombine.low %v13603_v58, %v13605_v4  ;;  %v14177_v9 = vcombine.low %v13644_v62, %v13646_v41  ;;  %17618 = vmatpush3.bf16.msra.mxu0 %v17617_v47  ;;  %v13377_v58 = vrot.slane %v12033_v29, %v19024_v63  ;;  %v13385_v62 = vrot.slane %v12033_v29, %v19026_v1  ;;  %v14554_v47 = vld [vmem:[#allocation22 + $0x1118] sm:$0xf] }
0x1681   : > { %17619 = vmatprep.subr.bf16.mxu0 %v18385_v53  ;;  %v13381_v4 = vrot.slane %v12033_v29, %v19028_v2  ;;  %v13389_v41 = vrot.slane %v12033_v29, %v19030_v5  ;;  %v17623_v13 = vpack.c.bf16 %v14466_v3, %v14465_v49  ;;  %v14555_v55 = vld [vmem:[#allocation22 + $0x1338] sm:$0xf]  ;;  %v13393_v56 = vrot.slane %v12034_v26, %v19024_v63 }
0x1682   : > { %v14198_v52 = vrot.slane %v14176_v7, %v19036_v18  ;;  %v14205_v61 = vrot.slane %v14177_v9, %v19036_v18  ;;  %v13397_v29 = vrot.slane %v12034_v26, %v19028_v2  ;;  %v14556_v49 = vld [vmem:[#allocation22 + $0x1558] sm:$0xf] }
0x1683   : > { %v14557_v3 = vld [vmem:[#allocation22 + $0x1778] sm:$0xf] }
0x1684   : > { %v14207_v42 = vcombine.low %v14198_v52, %v14205_v61  ;;  %17621 = vmatpush3.bf16.msra.mxu0 %v17620_v57  ;;  %v14467_v61 = vld [vmem:[#allocation19 + $0x4d0] sm:$0xff]  ;;  %v13401_v57 = vrot.slane %v12034_v26, %v19026_v1 }
0x1685   : > { %17622 = vmatprep.subr.bf16.mxu0 %v18385_v53 }
0x1686   : > { %v14221_v34 = vrot.slane %v14207_v42, %v19036_v18  ;;  %v14468_v42 = vld [vmem:[#allocation19 + $0x4d8] sm:$0xff] }
0x1687   : > { %v17626_v27 = vpack.c.bf16 %v14468_v42, %v14467_v61  ;;  %v16084_v42 = vcombine.low %v14556_v49, %v14557_v3 }
0x1688   : > { %v14222_v8 = vcombine.low %v14214_v30, %v14221_v34  ;;  %17624 = vmatpush3.bf16.msra.mxu0 %v17623_v13 }
0x1689   : > { %17625 = vmatprep.subr.bf16.mxu0 %v18385_v53 }
0x168a   : > { %14374 = vst [vmem:[%s19043_s30 + $0x68] sm:$0xff] %v14222_v8 }
0x168c   : > { %17627 = vmatpush3.bf16.msra.mxu0 %v17626_v27 }
0x168d   : > { %17628 = vmatprep.subr.bf16.mxu0 %v18385_v53 }
0x169c   : > { %v13684_v15 = vpop.f32.mrb[156].mxu0  ;;  %v13725_v16 = vpop.f32.mrb[156].mxu1 }
0x169d   : > { %v13685_v17 = vadd.f32 %v13684_v15, %v13361_v11  ;;  %v13726_v43 = vadd.f32 %v13725_v16, %v13369_v12  ;;  %v13686_v19 = vpop.f32.mrb[157].mxu0  ;;  %v13727_v21 = vpop.f32.mrb[157].mxu1  ;;  %v14469_v15 = vld [vmem:[#allocation19 + $0x4e0] sm:$0xff]  ;;  %v14470_v16 = vld [vmem:[#allocation19 + $0x4e8] sm:$0xff] }
0x169e   : > { %v13687_v22 = vadd.f32 %v13686_v19, %v13365_v14  ;;  %v13728_v23 = vadd.f32 %v13727_v21, %v13373_v48  ;;  %v13688_v60 = vpop.f32.mrb[158].mxu0  ;;  %v13729_v31 = vpop.f32.mrb[158].mxu1  ;;  %v17629_v19 = vpack.c.bf16 %v14470_v16, %v14469_v15 }
0x169f   : > { %v13689_v24 = vpop.f32.mrb[159].mxu0  ;;  %v13730_v25 = vpop.f32.mrb[159].mxu1 }
0x16a0   : > { %v14223_v45 = vcombine.low %v13685_v17, %v13687_v22  ;;  %v14224_v28 = vcombine.low %v13726_v43, %v13728_v23  ;;  %17630 = vmatpush3.bf16.msra.mxu0 %v17629_v19  ;;  %v14471_v22 = vld [vmem:[#allocation19 + $0x4f0] sm:$0xff]  ;;  %v14472_v23 = vld [vmem:[#allocation19 + $0x4f8] sm:$0xff] }
0x16a1   : > { %17631 = vmatprep.subr.bf16.mxu0 %v18385_v53  ;;  %v17632_v24 = vpack.c.bf16 %v14472_v23, %v14471_v22  ;;  %v14550_v53 = vld [vmem:[#allocation22 + $0x898] sm:$0xf] }
0x16a2   : > { %v19671_v44 = vrot.slane %v14223_v45, %v19036_v18  ;;  %v14240_v50 = vrot.slane %v14224_v28, %v19036_v18  ;;  %v14546_v45 = vld [vmem:[#allocation22 + $0x18] sm:$0xf] }
0x16a3   : > { %v14547_v28 = vld [vmem:[#allocation22 + $0x238] sm:$0xf] }
0x16a4   : > { %v14255_v35 = vcombine.low %v19671_v44, %v14240_v50  ;;  %17633 = vmatpush3.bf16.msra.mxu0 %v17632_v24  ;;  %v14548_v44 = vld [vmem:[#allocation22 + $0x458] sm:$0xf]  ;;  %v16079_v50 = vcombine.low %v14546_v45, %v14547_v28 }
0x16a5   : > { %v16080_v38 = vcombine.low %v14548_v44, %v14549_v0 }
0x16a6   : > { %v14263_v60 = vrot.slane %v14255_v35, %v19036_v18  ;;  %17207 = vmatpush3.bf16.msra.mxu1 %v16079_v50  ;;  %v16081_v35 = vcombine.low %v14550_v53, %v14551_v39 }
0x16a7   : > { %17208 = vmatprep.subr.bf16.mxu1 %v18387_v54 }
0x16aa   : > { %17209 = vmatpush3.bf16.msra.mxu1 %v16080_v38 }
0x16ab   : > { %17210 = vmatprep.subr.bf16.mxu1 %v18387_v54 }
0x16ae   : > { %17211 = vmatpush3.bf16.msra.mxu1 %v16081_v35 }
0x16af   : > { %17212 = vmatprep.subr.bf16.mxu1 %v18387_v54 }
0x16b2   : > { %17213 = vmatpush3.bf16.msra.mxu1 %v16082_v32 }
0x16b3   : > { %17214 = vmatprep.subr.bf16.mxu1 %v18387_v54 }
0x16bc   : > { %v13766_v36 = vpop.f32.mrb[160].mxu0  ;;  %v13807_v37 = vpop.f32.mrb[160].mxu1 }
0x16bd   : > { %v13767_v6 = vadd.f32 %v13766_v36, %v13377_v58  ;;  %v13808_v7 = vadd.f32 %v13807_v37, %v13385_v62  ;;  %v13768_v9 = vpop.f32.mrb[161].mxu0  ;;  %v13809_v52 = vpop.f32.mrb[161].mxu1  ;;  %v13405_v58 = vrot.slane %v12034_v26, %v19030_v5  ;;  %v16083_v62 = vcombine.low %v14554_v47, %v14555_v55 }
0x16be   : > { %v13769_v30 = vadd.f32 %v13768_v9, %v13381_v4  ;;  %v13810_v34 = vadd.f32 %v13809_v52, %v13389_v41  ;;  %v13770_v8 = vpop.f32.mrb[162].mxu0  ;;  %v13811_v10 = vpop.f32.mrb[162].mxu1  ;;  %v12036_v26 = vunpack.c.l.bf16 %v12029_v46 }
0x16bf   : > { %v13771_v11 = vpop.f32.mrb[163].mxu0  ;;  %v13812_v12 = vpop.f32.mrb[163].mxu1  ;;  %17215 = vmatpush3.bf16.msra.mxu1 %v16083_v62 }
0x16c0   : > { %v14225_v14 = vcombine.low %v13767_v6, %v13769_v30  ;;  %v14226_v48 = vcombine.low %v13808_v7, %v13810_v34  ;;  %17216 = vmatprep.subr.bf16.mxu1 %v18387_v54  ;;  %v13425_v32 = vrot.slane %v12036_v26, %v19024_v63  ;;  %v13433_v47 = vrot.slane %v12036_v26, %v19026_v1 }
0x16c1   : > { %v13429_v55 = vrot.slane %v12036_v26, %v19028_v2 }
0x16c2   : > { %v14247_v17 = vrot.slane %v14225_v14, %v19036_v18  ;;  %v14254_v43 = vrot.slane %v14226_v48, %v19036_v18  ;;  %v12035_v14 = vunpack.c.h.bf16 %v12028_v40 }
0x16c3   : > { %17217 = vmatpush3.bf16.msra.mxu1 %v16084_v42 }
0x16c4   : > { %v14256_v21 = vcombine.low %v14247_v17, %v14254_v43  ;;  %17218 = vmatprep.subr.bf16.mxu1 %v18387_v54  ;;  %v13409_v48 = vrot.slane %v12035_v14, %v19024_v63  ;;  %v13417_v15 = vrot.slane %v12035_v14, %v19026_v1  ;;  %v13413_v16 = vrot.slane %v12035_v14, %v19028_v2 }
0x16c5   : > { %v13421_v17 = vrot.slane %v12035_v14, %v19030_v5 }
0x16c6   : > { %v14270_v31 = vrot.slane %v14256_v21, %v19036_v18 }
0x16c8   : > { %v14271_v25 = vcombine.low %v14263_v60, %v14270_v31 }
0x16ca   : > { %14375 = vst [vmem:[%s19043_s30 + $0x70] sm:$0xff] %v14271_v25 }
0x16dc   : > { %v13848_v4 = vpop.f32.mrb[164].mxu0  ;;  %v13889_v41 = vpop.f32.mrb[164].mxu1 }
0x16dd   : > { %v13849_v13 = vadd.f32 %v13848_v4, %v13393_v56  ;;  %v13890_v36 = vadd.f32 %v13889_v41, %v13401_v57  ;;  %v13850_v37 = vpop.f32.mrb[165].mxu0  ;;  %v13891_v6 = vpop.f32.mrb[165].mxu1  ;;  %v13437_v56 = vrot.slane %v12036_v26, %v19030_v5 }
0x16de   : > { %v13851_v7 = vadd.f32 %v13850_v37, %v13397_v29  ;;  %v13892_v9 = vadd.f32 %v13891_v6, %v13405_v58  ;;  %v13852_v52 = vpop.f32.mrb[166].mxu0  ;;  %v13893_v61 = vpop.f32.mrb[166].mxu1 }
0x16df   : > { %v13853_v30 = vpop.f32.mrb[167].mxu0  ;;  %v13894_v34 = vpop.f32.mrb[167].mxu1 }
0x16e0   : > { %v14272_v8 = vcombine.low %v13849_v13, %v13851_v7  ;;  %v14273_v10 = vcombine.low %v13890_v36, %v13892_v9  ;;  %v12037_v30 = vunpack.c.h.bf16 %v12029_v46 }
0x16e2   : > { %v14282_v27 = vrot.slane %v14272_v8, %v19036_v18  ;;  %v14289_v11 = vrot.slane %v14273_v10, %v19036_v18  ;;  %v13441_v34 = vrot.slane %v12037_v30, %v19024_v63  ;;  %v13449_v8 = vrot.slane %v12037_v30, %v19026_v1 }
0x16e3   : > { %v13445_v10 = vrot.slane %v12037_v30, %v19028_v2 }
0x16e4   : > { %v14304_v12 = vcombine.low %v14282_v27, %v14289_v11  ;;  %v13453_v27 = vrot.slane %v12037_v30, %v19030_v5 }
0x16e6   : > { %v14312_v40 = vrot.slane %v14304_v12, %v19036_v18 }
0x16fc   : > { %v13930_v43 = vpop.f32.mrb[168].mxu0  ;;  %v13971_v19 = vpop.f32.mrb[168].mxu1 }
0x16fd   : > { %v13931_v21 = vadd.f32 %v13930_v43, %v13409_v48  ;;  %v13972_v22 = vadd.f32 %v13971_v19, %v13417_v15  ;;  %v13932_v23 = vpop.f32.mrb[169].mxu0  ;;  %v13973_v60 = vpop.f32.mrb[169].mxu1 }
0x16fe   : > { %v13933_v31 = vadd.f32 %v13932_v23, %v13413_v16  ;;  %v13974_v24 = vadd.f32 %v13973_v60, %v13421_v17  ;;  %v13934_v25 = vpop.f32.mrb[170].mxu0  ;;  %v13975_v45 = vpop.f32.mrb[170].mxu1 }
0x16ff   : > { %v13935_v28 = vpop.f32.mrb[171].mxu0  ;;  %v13976_v44 = vpop.f32.mrb[171].mxu1 }
0x1700   : > { %v14274_v50 = vcombine.low %v13931_v21, %v13933_v31  ;;  %v14275_v0 = vcombine.low %v13972_v22, %v13974_v24  ;;  %v14384_v31 = vld [vmem:[#allocation17 + $0x9] sm:$0x1] }
0x1702   : > { %v14296_v38 = vrot.slane %v14274_v50, %v19036_v18  ;;  %v14303_v53 = vrot.slane %v14275_v0, %v19036_v18 }
0x1704   : > { %v14305_v39 = vcombine.low %v14296_v38, %v14303_v53  ;;  %v14558_v38 = vld [vmem:[#allocation22 + $0x1998] sm:$0xf] }
0x1705   : > { %v14559_v53 = vld [vmem:[#allocation22 + $0x1bb8] sm:$0xf] }
0x1706   : > { %v14319_v35 = vrot.slane %v14305_v39, %v19036_v18  ;;  %v16085_v39 = vcombine.low %v14558_v38, %v14559_v53 }
0x1708   : > { %v14320_v20 = vcombine.low %v14312_v40, %v14319_v35  ;;  %17219 = vmatpush3.bf16.msra.mxu1 %v16085_v39  ;;  %v14560_v40 = vld [vmem:[#allocation22 + $0x1dd8] sm:$0xf] }
0x1709   : > { %17220 = vmatprep.subr.bf16.mxu1 %v18387_v54  ;;  %v14561_v35 = vld [vmem:[#allocation22 + $0x1ff8] sm:$0xf] }
0x170a   : > { %14376 = vst [vmem:[%s19043_s30 + $0x78] sm:$0xff] %v14320_v20  ;;  %v16086_v20 = vcombine.low %v14560_v40, %v14561_v35 }
0x170c   : > { %17221 = vmatpush3.bf16.msra.mxu1 %v16086_v20 }
0x171c   : > { %v14012_v57 = vpop.f32.mrb[172].mxu0  ;;  %v14053_v29 = vpop.f32.mrb[172].mxu1 }
0x171d   : > { %v14013_v58 = vadd.f32 %v14012_v57, %v13425_v32  ;;  %v14054_v62 = vadd.f32 %v14053_v29, %v13433_v47  ;;  %v14014_v49 = vpop.f32.mrb[173].mxu0  ;;  %v14055_v3 = vpop.f32.mrb[173].mxu1 }
0x171e   : > { %v14015_v4 = vadd.f32 %v14014_v49, %v13429_v55  ;;  %v14056_v41 = vadd.f32 %v14055_v3, %v13437_v56  ;;  %v14016_v13 = vpop.f32.mrb[174].mxu0  ;;  %v14057_v36 = vpop.f32.mrb[174].mxu1 }
0x171f   : > { %v14017_v37 = vpop.f32.mrb[175].mxu0  ;;  %v14058_v6 = vpop.f32.mrb[175].mxu1 }
0x1720   : > { %v14321_v7 = vcombine.low %v14013_v58, %v14015_v4  ;;  %v14322_v9 = vcombine.low %v14054_v62, %v14056_v41 }
0x1722   : > { %v14331_v52 = vrot.slane %v14321_v7, %v19036_v18  ;;  %v14338_v61 = vrot.slane %v14322_v9, %v19036_v18 }
0x1724   : > { %v14353_v42 = vcombine.low %v14331_v52, %v14338_v61 }
0x1726   : > { %v14361_v24 = vrot.slane %v14353_v42, %v19036_v18 }
0x173c   : > { %v14094_v11 = vpop.f32.mrb[176].mxu0  ;;  %v14135_v12 = vpop.f32.mrb[176].mxu1 }
0x173d   : > { %v14095_v14 = vadd.f32 %v14094_v11, %v13441_v34  ;;  %v14136_v48 = vadd.f32 %v14135_v12, %v13449_v8  ;;  %v14096_v15 = vpop.f32.mrb[177].mxu0  ;;  %v14137_v16 = vpop.f32.mrb[177].mxu1 }
0x173e   : > { %v14097_v17 = vadd.f32 %v14096_v15, %v13445_v10  ;;  %v14138_v43 = vadd.f32 %v14137_v16, %v13453_v27  ;;  %v14098_v19 = vpop.f32.mrb[178].mxu0  ;;  %v14139_v21 = vpop.f32.mrb[178].mxu1 }
0x173f   : > { %v14099_v22 = vpop.f32.mrb[179].mxu0  ;;  %v14140_v23 = vpop.f32.mrb[179].mxu1 }
0x1740   : > { %v14323_v63 = vcombine.low %v14095_v14, %v14097_v17  ;;  %v14324_v60 = vcombine.low %v14136_v48, %v14138_v43 }
0x1742   : > { %v14345_v1 = vrot.slane %v14323_v63, %v19036_v18  ;;  %v14352_v2 = vrot.slane %v14324_v60, %v19036_v18 }
0x1744   : > { %v14354_v5 = vcombine.low %v14345_v1, %v14352_v2 }
0x1746   : > { %v14368_v25 = vrot.slane %v14354_v5, %v19036_v18  ;;  %v14451_v45 = vpop.f32.mrb[180].mxu0  ;;  %v14473_v18 = vld [vmem:[#allocation20 + $0x9] sm:$0x1] }
0x1747   : > { %v14452_v28 = vadd.f32 %v14451_v45, %v14384_v31  ;;  %v17170_v44 = vpop.f32.mrb[181].mxu0 }
0x1748   : > { %v14369_v50 = vcombine.low %v14361_v24, %v14368_v25 }
0x1749   : > { %v14455_v0 = vmax.f32 %v14452_v28, 0.0 }
0x174a   : > { %14377 = vst [vmem:[%s19043_s30 + $0x80] sm:$0xff] %v14369_v50 }
0x174b   : > { %17204 = vmatmul.mubr.f32.vlgmr.msra.gmra.mrb[182].mxu0 %v14455_v0 }
0x181e   : > { %v14540_v46 = vpop.f32.mrb[182].mxu0 }
0x181f   : > { %v14541_v26 = vadd.f32 %v14540_v46, %v14473_v18  ;;  %v17205_v32 = vpop.f32.mrb[183].mxu0 }
0x1821   : > { %v14544_v47 = vmax.f32 %v14541_v26, 0.0 }
0x1823   : > { %v14545_v55 = vpack.c.bf16 %v14544_v47, %v14544_v47 }
0x1825   : > { %17223 = vmatmul.mubr.bf16.vlgmr.msra.gmra.mrb[180].mxu1 %v14545_v55 }
0x1826   : > { %18252 = shalt.err (!%p18249_p7)
}
0x1827   : > { %s18253_s1 = scalar_lea.hbm %s19734_s24, 16  ;;  %s18257_s23 = scalar_lea.hbm %s19897_s2, 32 }
0x1828   : > { %p18254_p8 = scmp.ne.s32.totalorder %s19734_s24, %s18253_s1  ;;  %p18258_p1 = scmp.lt.u32.totalorder %s19734_s24, %s19897_s2 }
0x1829   : > { %p18259_p0 = scmp.lt.u32.totalorder %s18257_s23, %s18253_s1  ;;  %p18261_p5 = scmp.lt.u32.totalorder %s18253_s1, %s19734_s24 }
0x182a   : > { %p18255_p11 = pnand %p18254_p8, %p19898_p9 }
0x182b   : > { %p18260_p6 = por %p18259_p0, %p18258_p1 }
0x182c   : > { %p18256_p13 = pneg %p18255_p11 }
0x182d   : > { %p18262_p12 = por %p18261_p5, %p18260_p6 }
0x182f   : > { %p18263_p10 = pnand %p18262_p12, %p18256_p13 }
0x1831   : > { %18266 = shalt.err (!%p18263_p10)
}
0x1832   : > { %17700 = dma.vmem_to_hbm [thread:$0]  (%p19898_p9), %s14675_s26, 16, %s19734_s24, %s14657_s21   ;;  %v14562_v56 = vld [vmem:[#allocation23 + $0x6] sm:$0x1]  ;;  %vm14653_vm12 = vcmp.lt.s32.totalorder %v1949_v59, 256 }
0x1833   : > { %v14563_v57 = vunpack.c.l.bf16 %v14562_v56  ;;  %s17643_s5 = smul.u32 2176, %s18510_s0  ;;  %s14688_s19 = sshll.u32 %s19043_s30, 4  ;;  %vm14654_vm13 = vmand %vm19260_vm9, %vm14653_vm12  ;;  %s19764_s19 = int_to_ptr.vmem [resolvable:$true] %s14688_s19 }
0x1834   : > { %s19899_s3 = sld [smem:[#allocation52_spill]]  ;;  %s14661_s0 = scalar_lea.sflag [#allocation27], %s18984_s22 }
0x1835   : > { %s18267_s26 = scalar_lea.vmem %s19764_s19, 2176  ;;  %s18393_s24 = smov [#allocation26]  }
0x1836   : > { %p18268_p2 = scmp.ne.s32.totalorder %s19764_s19, %s18267_s26  ;;  %s18271_s21 = sshll.u32 %s18393_s24, 4  ;;  %s18272_s21 = int_to_ptr.vmem [resolvable:$false] %s18271_s21 }
0x1837   : > { %s18273_s27 = scalar_lea.vmem %s18272_s21, 4352  ;;  %p18274_p7 = scmp.lt.s32.totalorder %s19764_s19, %s18272_s21 }
0x1838   : > { %p18269_p3 = pnand %p18268_p2, %p19898_p9  ;;  %p18275_p8 = scmp.lt.s32.totalorder %s18273_s27, %s18267_s26 }
0x183a   : > { %s19762_s1 = scalar_lea.hbm %s19899_s3, %s17643_s5  ;;  %p18270_p4 = pneg %p18269_p3 }
0x183b   : > { %p18276_p11 = por %p18275_p8, %p18274_p7 }
0x183d   : > { %p18277_p13 = pnand %p18276_p11, %p18270_p4 }
0x18f8   : > { %v14646_v29 = vpop.f32.mrb[180].mxu1 }
0x18f9   : > { %v14647_v58 = vadd.f32 %v14646_v29, %v14563_v57  ;;  %v17224_v62 = vpop.f32.mrb[181].mxu1 }
0x18fa   : > { %v14649_v49 = vpop.f32.mrb[182].mxu1 }
0x18fb   : > { %14652 = vst.msk [vmem:[%s19043_s30 + $0x6] sm:$0x1] %vm19066_vm8, %v14647_v58  ;;  %v17225_v59 = vpop.f32.mrb[183].mxu1 }
0x18fc   : > { %14655 = vst.msk [vmem:[%s19043_s30 + $0x6] sm:$0x3] %vm14654_vm13, %v18387_v54 }
0x18fd   : > { %18280 = shalt.err (!%p18277_p13)
}
0x18fe   : > { %s18281_s22 = scalar_lea.hbm %s19762_s1, 2176  ;;  %s18285_s23 = scalar_lea.hbm %s19899_s3, 4352 }
0x18ff   : > { %p18282_p1 = scmp.ne.s32.totalorder %s19762_s1, %s18281_s22  ;;  %p18286_p5 = scmp.lt.u32.totalorder %s19762_s1, %s19899_s3 }
0x1900   : > { %p18287_p12 = scmp.lt.u32.totalorder %s18285_s23, %s18281_s22  ;;  %p18289_p2 = scmp.lt.u32.totalorder %s18281_s22, %s19762_s1 }
0x1901   : > { %p18283_p0 = pnand %p18282_p1, %p19898_p9 }
0x1902   : > { %p18288_p10 = por %p18287_p12, %p18286_p5 }
0x1903   : > { %p18284_p6 = pneg %p18283_p0 }
0x1904   : > { %p18290_p3 = por %p18289_p2, %p18288_p10 }
0x1906   : > { %p18291_p4 = pnand %p18290_p3, %p18284_p6 }
0x1908   : > { %18294 = shalt.err (!%p18291_p4)
}
0x1909   : > { %17701 = dma.vmem_to_hbm [thread:$0]  (%p19898_p9), %s19764_s19, 2176, %s19762_s1, %s14661_s0  }
0x190a PF: > { %s19900_s5 = sld [smem:[#allocation41_spill]]  ;;  %s19901_s17 = sld [smem:[#allocation38_spill]] }
0x190b   : > { %s19902_s29 = sld [smem:[#allocation45_spill]] }
0x1910   : > { %p17782_p7 = scmp.ge.s32.totalorder %s19900_s5, 2  ;;  %s14700_s26 = sand.u32 1, %s19901_s17  }
0x1911   : > { %p19903_p8 = scmp.ne.s32.totalorder %s19902_s29, 0  ;;  %s14701_s24 = scalar_lea.sflag [#allocation4], %s14700_s26 }
0x1913   : > { %p17748_p11 = pnand %p17782_p7, %p19903_p8 }
0x1915   : > { %18344 = dma.done.wait (!%p17748_p11), %s14701_s24, 16  }
0x1916   : > { %18346 = vsyncadd (!%p17748_p11), %s14701_s24, 4294967280  ;;  %s14709_s21 = scalar_lea.sflag [#allocation27], %s14700_s26 }
0x1917   : > { %18348 = dma.done.wait (!%p17748_p11), %s14709_s21, 2176  }
0x1918   : > { %18350 = vsyncadd (!%p17748_p11), %s14709_s21, 4294965120  ;;  %s19904_s30 = sld [smem:[#allocation42_spill]]  ;;  %s19905_s27 = sld [smem:[#allocation39_spill]] }
0x1919   : > { %s19906_s28 = sld [smem:[#allocation40_spill]]  ;;  %s19907_s29 = sld [smem:[#allocation43_spill]] }
0x191e   : > { %p40_p9 = scmp.ge.s32.totalorder %s19904_s30, 4  }
0x1920   :  { %42 = sbr.rel (!%p40_p9) target bundleno = 21 (0x15), region = 218 }
0x1927   :  { %14714 = vsyncpa [#allocation3], 1 }
0x1928   :  { %14716 = vsyncpa [#allocation3 + $0x1], 1 }
0x1929   :  { %14717 = vsyncpa [#allocation6], 1 }
0x192a   :  { %14718 = vsyncpa [#allocation9], 1 }
0x192b   :  { %14719 = vsyncpa [#allocation12], 1 }
0x192c   :  { %14720 = vsyncpa [#allocation15], 1 }
0x192d   :  { %14721 = vsyncpa [#allocation18], 1 }
0x192e   :  { %14722 = vsyncpa [#allocation21], 1 }
0x192f   :  { %14723 = vsyncpa [#allocation24], 1 }
0x1930   :  { %14724 = vsyncpa [#allocation4], 1 }
0x1931   :  { %14726 = vsyncpa [#allocation4 + $0x1], 1 }
0x1932   :  { %14727 = vsyncpa [#allocation27], 1 }
0x1933   :  { %14729 = vsyncpa [#allocation27 + $0x1], 1 }

</bundles_post_ra>
